<compile_context>
chip_gen: v7x
topology: tpu7x:2x2x1
jax: 0.10.0
libtpu: 0.0.40
codegen_flags: <defaults>
</compile_context>

<pallas_src>
import jax
import jax.numpy as jnp
from jax.experimental import pallas as pl
from jax.experimental.pallas import tpu as pltpu


def classifier2_kernel(x_ref, w_ref, b_ref, o_ref, *, inv_hw):
    # x_ref: (TB, C, HW) f32, native NCHW-flattened layout (HW on lanes)
    # w_ref: (C, 3) f32;  b_ref: (1, 3) f32;  o_ref: (TB, 3) f32
    pooled = jnp.sum(x_ref[...], axis=-1) * inv_hw                # (TB, C) mean-pool
    logits = jnp.dot(pooled, w_ref[...],
                     preferred_element_type=jnp.float32) + b_ref[...]   # (TB, 3) MXU
    # numerically-stable softmax over the class axis (dim=1 in PyTorch)
    m = jnp.max(logits, axis=-1, keepdims=True)
    e = jnp.exp(logits - m)
    denom = jnp.sum(e, axis=-1, keepdims=True)
    o_ref[...] = e / denom                                        # exact divide


def _pick_tile_b(B, C, HW, budget_bytes=8 << 20):
    """Batch tile sized from VMEM residency (with lane/sublane padding)."""
    hw_pad = pl.cdiv(HW, 128) * 128          # last dim occupies full 128 lanes
    c_pad = pl.cdiv(C, 8) * 8                # sublane padding
    row_bytes = c_pad * hw_pad * 4           # resident bytes per batch row
    cap = max(1, budget_bytes // row_bytes)  # rows per ~8 MiB input buffer

    # Multiple-of-8 divisors of B (satisfy the (8,128) rule on the output tile
    # and avoid any jnp.pad of the large input).
    cands = [t for t in range(8, min(B, cap) + 1, 8) if B % t == 0]
    if cands:
        multi = [t for t in cands if B // t >= 2]   # prefer >=2 grid steps
        return max(multi) if multi else max(cands)
    # No suitable divisor: a single full-batch block is legal (block dim ==
    # full array dim); take it if it fits comfortably in VMEM.
    if B <= 2 * cap:
        return B
    # Last resort (large ragged B): pad up to a multiple of 8 in the wrapper.
    return max(8, (cap // 8) * 8)


def classifier2_forward(x, w, b, *, tile_b=None):
    """x: (B, C, H, W) f32 (NCHW like PyTorch); w: (3, C) f32; b: (3,) f32."""
    B, C, H, W = x.shape
    HW = H * W

    # Native layout, free flatten (no HBM transpose).
    x_l = x.reshape(B, C, HW)
    w_t = jnp.asarray(w, jnp.float32).T                           # (C, 3)
    b2 = jnp.asarray(b, jnp.float32).reshape(1, 3)

    if tile_b is None:
        tile_b = _pick_tile_b(B, C, HW)
    grid_b = pl.cdiv(B, tile_b)
    Bp = grid_b * tile_b
    if Bp != B:
        # Rare ragged-batch fallback; padded rows compute softmax(bias) and
        # are sliced off below.
        x_l = jnp.pad(x_l, ((0, Bp - B), (0, 0), (0, 0)))

    bytes_accessed = Bp * C * HW * 4 + C * 3 * 4 + 3 * 4 + Bp * 3 * 4
    flops = Bp * C * HW + Bp * C + 2 * Bp * C * 3 + 12 * Bp

    kernel = lambda x_ref, w_ref, b_ref, o_ref: classifier2_kernel(
        x_ref, w_ref, b_ref, o_ref, inv_hw=1.0 / float(HW))

    out = pl.pallas_call(
        kernel,
        out_shape=jax.ShapeDtypeStruct((Bp, 3), jnp.float32),
        grid=(grid_b,),
        in_specs=[
            pl.BlockSpec((tile_b, C, HW), lambda i: (i, 0, 0)),   # batch-tiled
            pl.BlockSpec((C, 3), lambda i: (0, 0)),               # full weight
            pl.BlockSpec((1, 3), lambda i: (0, 0)),               # full bias
        ],
        out_specs=pl.BlockSpec((tile_b, 3), lambda i: (i, 0)),
        compiler_params=pltpu.CompilerParams(
            # Independent batch steps: shards across v7x's 2 TensorCores,
            # harmless on single-TC v5e/v6e.
            dimension_semantics=("parallel",),
            # Explicit limit so v5e's 16 MiB scoped default doesn't shrink
            # the ~16 MiB double-buffered input block.
            vmem_limit_bytes=32 << 20),
        cost_estimate=pl.CostEstimate(
            flops=flops, transcendentals=Bp * 3,
            bytes_accessed=bytes_accessed),
    )(x_l, w_t, b2)
    return out[:B]


if __name__ == "__main__":
    key = jax.random.PRNGKey(0)
    kx, kw, kb = jax.random.split(key, 3)

    B, C, H, W = 16, 1024, 8, 8                 # fc expects 1024 input features
    x = jax.random.normal(kx, (B, C, H, W), dtype=jnp.float32)

    # Deterministic nn.Linear(1024, 3)-style init: U(-1/sqrt(C), 1/sqrt(C))
    bound = 1.0 / (C ** 0.5)
    w = jax.random.uniform(kw, (3, C), jnp.float32, -bound, bound)
    b = jax.random.uniform(kb, (3,), jnp.float32, -bound, bound)

    out = classifier2_forward(x, w, b)          # tile_b=8 -> grid=(2,), pipelined
    out = jax.block_until_ready(out)

    # Pure-JAX reference check
    ref = jax.nn.softmax(x.mean(axis=(2, 3)) @ w.T + b, axis=1)
    assert out.shape == (B, 3)
    err = float(jnp.max(jnp.abs(out - ref)))
    assert jnp.allclose(out, ref, atol=1e-5, rtol=1e-5), err
    assert jnp.allclose(jnp.sum(out, axis=1), 1.0, atol=1e-6)

    print("KERNEL_OK")
</pallas_src>

<mosaic_0001>
module attributes {stable_mosaic.version = 11 : i64} {
  func.func @_lambda_(%arg0: i32, %arg1: memref<8x1024x64xf32, #tpu.memory_space<vmem>>, %arg2: memref<1024x3xf32, #tpu.memory_space<vmem>>, %arg3: memref<1x3xf32, #tpu.memory_space<vmem>>, %arg4: memref<8x3xf32, #tpu.memory_space<vmem>>) attributes {dimension_semantics = [#tpu.dimension_semantics<parallel>], iteration_bounds = array<i64: 2>, scalar_prefetch = 0 : i64, scratch_operands = 0 : i64, tpu.core_type = #tpu.core_type<tc>, window_params = [{transform_indices = @transform_0, window_bounds = array<i64: 8, 1024, 64>}, {pipeline_mode = #tpu.pipeline_mode<synchronous>, transform_indices = @transform_1, window_bounds = array<i64: 1024, 3>}, {pipeline_mode = #tpu.pipeline_mode<synchronous>, transform_indices = @transform_2, window_bounds = array<i64: 1, 3>}, {transform_indices = @transform_3, window_bounds = array<i64: 8, 3>}]} {
    %c0 = arith.constant 0 : index
    %c0_0 = arith.constant 0 : index
    %c0_1 = arith.constant 0 : index
    %0 = vector.load %arg1[%c0, %c0_0, %c0_1] : memref<8x1024x64xf32, #tpu.memory_space<vmem>>, vector<8x1024x64xf32>
    %cst = arith.constant dense<0.000000e+00> : vector<8x1024xf32>
    %1 = vector.multi_reduction <add>, %0, %cst [2] : vector<8x1024x64xf32> to vector<8x1024xf32>
    %cst_2 = arith.constant 1.562500e-02 : f32
    %2 = vector.broadcast %cst_2 : f32 to vector<8x1024xf32>
    %3 = arith.mulf %1, %2 : vector<8x1024xf32>
    %c0_3 = arith.constant 0 : index
    %c0_4 = arith.constant 0 : index
    %4 = vector.load %arg2[%c0_3, %c0_4] : memref<1024x3xf32, #tpu.memory_space<vmem>>, vector<1024x3xf32>
    %cst_5 = arith.constant dense<0.000000e+00> : vector<8x3xf32>
    %5 = tpu.matmul %3, %4, %cst_5 {dimension_numbers = #tpu.dot_dimension_numbers<[1], [0], [0], [1], [0, 0, 1, 1], [], []>} : vector<8x1024xf32>, vector<1024x3xf32>, vector<8x3xf32> -> vector<8x3xf32>
    %c0_6 = arith.constant 0 : index
    %c0_7 = arith.constant 0 : index
    %6 = vector.load %arg3[%c0_6, %c0_7] : memref<1x3xf32, #tpu.memory_space<vmem>>, vector<1x3xf32>
    %7 = vector.broadcast %6 : vector<1x3xf32> to vector<8x3xf32>
    %8 = arith.addf %5, %7 : vector<8x3xf32>
    %cst_8 = arith.constant dense<0xFF800000> : vector<8xf32>
    %9 = vector.multi_reduction <maximumf>, %8, %cst_8 [1] : vector<8x3xf32> to vector<8xf32>
    %10 = vector.shape_cast %9 : vector<8xf32> to vector<8x1xf32>
    %11 = vector.broadcast %10 : vector<8x1xf32> to vector<8x3xf32>
    %12 = arith.subf %8, %11 : vector<8x3xf32>
    %13 = math.exp %12 : vector<8x3xf32>
    %cst_9 = arith.constant dense<0.000000e+00> : vector<8xf32>
    %14 = vector.multi_reduction <add>, %13, %cst_9 [1] : vector<8x3xf32> to vector<8xf32>
    %15 = vector.shape_cast %14 : vector<8xf32> to vector<8x1xf32>
    %16 = vector.broadcast %15 : vector<8x1xf32> to vector<8x3xf32>
    %17 = arith.divf %13, %16 : vector<8x3xf32>
    %c0_10 = arith.constant 0 : index
    %c0_11 = arith.constant 0 : index
    %18 = vector.load %arg4[%c0_10, %c0_11] : memref<8x3xf32, #tpu.memory_space<vmem>>, vector<8x3xf32>
    tpu.vector_store %arg4[%c0_10, %c0_11], %17 {strides = array<i32>} : memref<8x3xf32, #tpu.memory_space<vmem>>, vector<8x3xf32>,
    return
  }
  func.func @transform_0(%arg0: i32) -> (i32, i32, i32) {
    %c0_i32 = arith.constant 0 : i32
    %c0_i32_0 = arith.constant 0 : i32
    %c0_i32_1 = arith.constant 0 : i32
    return %arg0, %c0_i32, %c0_i32_0 : i32, i32, i32
  }
  func.func @transform_1(%arg0: i32) -> (i32, i32) {
    %c0_i32 = arith.constant 0 : i32
    %c0_i32_0 = arith.constant 0 : i32
    %c0_i32_1 = arith.constant 0 : i32
    return %c0_i32, %c0_i32_0 : i32, i32
  }
  func.func @transform_2(%arg0: i32) -> (i32, i32) {
    %c0_i32 = arith.constant 0 : i32
    %c0_i32_0 = arith.constant 0 : i32
    %c0_i32_1 = arith.constant 0 : i32
    return %c0_i32, %c0_i32_0 : i32, i32
  }
  func.func @transform_3(%arg0: i32) -> (i32, i32) {
    %c0_i32 = arith.constant 0 : i32
    %c0_i32_0 = arith.constant 0 : i32
    return %arg0, %c0_i32 : i32, i32
  }
}

</mosaic_0001>

<bundles_post_ra>
// kernel: tpu_custom_call.1
= control target key start
LH: loop header
LB: loop body
LE: loop exit
PB: predicated region body
PF: predicated region fallthrough
CT: control target
= control target key end

     0   :  { %s12280_s12 = smov 0   ;;  %s17360_s0 = inlined_call_operand.vmem [shape: f32[16,1024,64], index: 0, kind: input, shape index: {}]   ;;  %s17361_s1 = inlined_call_operand.vmem [shape: f32[1024,3], index: 1, kind: input, shape index: {}]   ;;  %s17362_s2 = inlined_call_operand.vmem [shape: f32[1,3], index: 2, kind: input, shape index: {}]   ;;  %s17363_s3 = inlined_call_operand.vmem [shape: f32[16,3], index: 3, kind: output, shape index: {}]  }
   0x1 LB: > { %s12286_s13 = sadd.s32 4294967295, %s12258_s12   ;;  %p11963_p0 = scmp.ge.s32.totalorder %s12258_s12, 1  ;;  %s12258_s12 = sphi %s12280_s12, %s13_s12  }
   0x2   : > { %p139_p1 = scmp.lt.s32.totalorder %s12258_s12, 3 }
   0x4   : > { %p140_p2 = pnand %p11963_p0, %p139_p1 }
   0x6   : > { %143 = sbr.rel (%p140_p2) target bundleno = 2747 (0xabb), region = 32 }
   0xd   : > { %s11964_s14 = sshll.u32 %s12286_s13, 3  ;;  %vm1198_vm0 = vcmask 523264   ;;  %vm6465_vm1 = vcmask 130112   ;;  %vm6472_vm2 = vcmask 195712   ;;  %vm6479_vm3 = vcmask 261312   ;;  %p170_p4 = scmp.lt.s32.totalorder %s12286_s13, 1 }
   0xe   : > { %p164_p3 = scmp.lt.s32.totalorder %s11964_s14, 15  ;;  %vm6486_vm4 = vcmask 326912   ;;  %vm6493_vm5 = vcmask 392512   ;;  %vm6500_vm6 = vcmask 458112   ;;  %vm17372_vm7 = vcmask 523712  }
   0xf   : > { %vm17367_vm8 = vcmask 589312   ;;  %vm17365_vm9 = vcmask 654912   ;;  %vm6528_vm10 = vcmask 720512   ;;  %vm17364_vm11 = vcmask 786112   ;;  %s17499_s13 = smov (!%p170_p4, %s12286_s13), 1 }
  0x10   : > { %s17497_s14 = smov (!%p164_p3, %s11964_s14), 15  ;;  %vm6542_vm12 = vcmask 851712   ;;  %vm6549_vm13 = vcmask 917312   ;;  %vm6556_vm14 = vcmask 982912   ;;  %vm6563_vm15 = vcmask 1048512   ;;  %s11967_s7 = sshll.u32 %s17499_s13, 3 }
  0x11   : > { %s11971_s15 = sshll.u32 %s17497_s14, 10  ;;  %s173_s10 = scalar_lea.vmem %s17363_s3, %s11967_s7 }
  0x12   : > { %s12294_s18 = scalar_lea.vmem %s17360_s0, %s11971_s15 }
  0x13   : > { %v176_v0 = vld [vmem:[%s12294_s18 + $0x10] sm:$0xff]  ;;  %v174_v1 = vld [vmem:[%s12294_s18] sm:$0xff]  ;;  %v177_v2 = vld [vmem:[%s12294_s18 + $0x18] sm:$0xff] }
  0x14   : > { %v1205_v3 = vsel %vm1198_vm0, %v176_v0, 0.0  ;;  %v1199_v4 = vsel %vm1198_vm0, %v174_v1, 0.0  ;;  %v175_v5 = vld [vmem:[%s12294_s18 + $0x8] sm:$0xff]  ;;  %v1208_v6 = vsel %vm1198_vm0, %v177_v2, 0.0  ;;  %v178_v9 = vld [vmem:[%s12294_s18 + $0x20] sm:$0xff]  ;;  %v181_v12 = vld [vmem:[%s12294_s18 + $0x38] sm:$0xff] }
  0x15   : > { %1206 = vadd.xlane.f32.xlu1 %v1205_v3  ;;  %1200 = vadd.xlane.f32.xlu0 %v1199_v4  ;;  %v1202_v7 = vsel %vm1198_vm0, %v175_v5, 0.0  ;;  %v179_v8 = vld [vmem:[%s12294_s18 + $0x28] sm:$0xff]  ;;  %v1211_v11 = vsel %vm1198_vm0, %v178_v9, 0.0  ;;  %v180_v13 = vld [vmem:[%s12294_s18 + $0x30] sm:$0xff]  ;;  %v1220_v14 = vsel %vm1198_vm0, %v181_v12, 0.0  ;;  %v182_v17 = vld [vmem:[%s12294_s18 + $0x40] sm:$0xff] }
  0x16   : > { %v1214_v10 = vsel %vm1198_vm0, %v179_v8, 0.0  ;;  %v1217_v15 = vsel %vm1198_vm0, %v180_v13, 0.0  ;;  %v183_v16 = vld [vmem:[%s12294_s18 + $0x48] sm:$0xff]  ;;  %v1223_v19 = vsel %vm1198_vm0, %v182_v17, 0.0  ;;  %v185_v20 = vld [vmem:[%s12294_s18 + $0x58] sm:$0xff]  ;;  %v184_v21 = vld [vmem:[%s12294_s18 + $0x50] sm:$0xff] }
  0x17   : > { %v1226_v18 = vsel %vm1198_vm0, %v183_v16, 0.0  ;;  %v1232_v22 = vsel %vm1198_vm0, %v185_v20, 0.0  ;;  %v1229_v23 = vsel %vm1198_vm0, %v184_v21, 0.0  ;;  %v187_v24 = vld [vmem:[%s12294_s18 + $0x68] sm:$0xff]  ;;  %v186_v25 = vld [vmem:[%s12294_s18 + $0x60] sm:$0xff]  ;;  %v189_v28 = vld [vmem:[%s12294_s18 + $0x78] sm:$0xff] }
  0x18   : > { %v1238_v26 = vsel %vm1198_vm0, %v187_v24, 0.0  ;;  %v1235_v27 = vsel %vm1198_vm0, %v186_v25, 0.0  ;;  %v188_v29 = vld [vmem:[%s12294_s18 + $0x70] sm:$0xff]  ;;  %v1244_v30 = vsel %vm1198_vm0, %v189_v28, 0.0  ;;  %v191_v32 = vld [vmem:[%s12294_s18 + $0x88] sm:$0xff]  ;;  %v190_v33 = vld [vmem:[%s12294_s18 + $0x80] sm:$0xff] }
  0x19   : > { %1209 = vadd.xlane.f32.xlu1 %v1208_v6  ;;  %1203 = vadd.xlane.f32.xlu0 %v1202_v7  ;;  %v1241_v31 = vsel %vm1198_vm0, %v188_v29, 0.0  ;;  %v1250_v34 = vsel %vm1198_vm0, %v191_v32, 0.0  ;;  %v1247_v35 = vsel %vm1198_vm0, %v190_v33, 0.0  ;;  %v193_v36 = vld [vmem:[%s12294_s18 + $0x98] sm:$0xff]  ;;  %v192_v37 = vld [vmem:[%s12294_s18 + $0x90] sm:$0xff]  ;;  %v195_v40 = vld [vmem:[%s12294_s18 + $0xa8] sm:$0xff] }
  0x1a   : > { %v1256_v38 = vsel %vm1198_vm0, %v193_v36, 0.0  ;;  %v1253_v39 = vsel %vm1198_vm0, %v192_v37, 0.0  ;;  %v194_v41 = vld [vmem:[%s12294_s18 + $0xa0] sm:$0xff]  ;;  %v1262_v42 = vsel %vm1198_vm0, %v195_v40, 0.0  ;;  %v197_v44 = vld [vmem:[%s12294_s18 + $0xb8] sm:$0xff]  ;;  %v196_v45 = vld [vmem:[%s12294_s18 + $0xb0] sm:$0xff] }
  0x1b   : > { %v1259_v43 = vsel %vm1198_vm0, %v194_v41, 0.0  ;;  %v1268_v46 = vsel %vm1198_vm0, %v197_v44, 0.0  ;;  %v1265_v47 = vsel %vm1198_vm0, %v196_v45, 0.0  ;;  %v199_v48 = vld [vmem:[%s12294_s18 + $0xc8] sm:$0xff]  ;;  %v198_v49 = vld [vmem:[%s12294_s18 + $0xc0] sm:$0xff]  ;;  %v201_v52 = vld [vmem:[%s12294_s18 + $0xd8] sm:$0xff] }
  0x1c   : > { %v1274_v50 = vsel %vm1198_vm0, %v199_v48, 0.0  ;;  %v1271_v51 = vsel %vm1198_vm0, %v198_v49, 0.0  ;;  %v200_v53 = vld [vmem:[%s12294_s18 + $0xd0] sm:$0xff]  ;;  %v1280_v54 = vsel %vm1198_vm0, %v201_v52, 0.0  ;;  %v203_v56 = vld [vmem:[%s12294_s18 + $0xe8] sm:$0xff]  ;;  %v202_v57 = vld [vmem:[%s12294_s18 + $0xe0] sm:$0xff] }
  0x1d   : > { %1215 = vadd.xlane.f32.xlu1 %v1214_v10  ;;  %1212 = vadd.xlane.f32.xlu0 %v1211_v11  ;;  %v1277_v55 = vsel %vm1198_vm0, %v200_v53, 0.0  ;;  %v1286_v58 = vsel %vm1198_vm0, %v203_v56, 0.0  ;;  %v1283_v59 = vsel %vm1198_vm0, %v202_v57, 0.0  ;;  %v205_v60 = vld [vmem:[%s12294_s18 + $0xf8] sm:$0xff]  ;;  %v204_v61 = vld [vmem:[%s12294_s18 + $0xf0] sm:$0xff]  ;;  %v207_v0 = vld [vmem:[%s12294_s18 + $0x108] sm:$0xff] }
  0x1e   : > { %v1292_v62 = vsel %vm1198_vm0, %v205_v60, 0.0  ;;  %v1289_v63 = vsel %vm1198_vm0, %v204_v61, 0.0  ;;  %v206_v1 = vld [vmem:[%s12294_s18 + $0x100] sm:$0xff]  ;;  %v1298_v2 = vsel %vm1198_vm0, %v207_v0, 0.0  ;;  %v209_v4 = vld [vmem:[%s12294_s18 + $0x118] sm:$0xff]  ;;  %v208_v5 = vld [vmem:[%s12294_s18 + $0x110] sm:$0xff] }
  0x1f   : > { %v1295_v3 = vsel %vm1198_vm0, %v206_v1, 0.0  ;;  %v1304_v6 = vsel %vm1198_vm0, %v209_v4, 0.0  ;;  %v1301_v7 = vsel %vm1198_vm0, %v208_v5, 0.0  ;;  %v211_v8 = vld [vmem:[%s12294_s18 + $0x128] sm:$0xff]  ;;  %v210_v9 = vld [vmem:[%s12294_s18 + $0x120] sm:$0xff]  ;;  %v213_v12 = vld [vmem:[%s12294_s18 + $0x138] sm:$0xff] }
  0x20   : > { %v1310_v10 = vsel %vm1198_vm0, %v211_v8, 0.0  ;;  %v1307_v11 = vsel %vm1198_vm0, %v210_v9, 0.0  ;;  %v212_v13 = vld [vmem:[%s12294_s18 + $0x130] sm:$0xff]  ;;  %v215_v16 = vld [vmem:[%s12294_s18 + $0x148] sm:$0xff]  ;;  %v214_v17 = vld [vmem:[%s12294_s18 + $0x140] sm:$0xff] }
  0x21   : > { %1221 = vadd.xlane.f32.xlu1 %v1220_v14  ;;  %1218 = vadd.xlane.f32.xlu0 %v1217_v15  ;;  %v1316_v14 = vsel %vm1198_vm0, %v213_v12, 0.0  ;;  %v1313_v15 = vsel %vm1198_vm0, %v212_v13, 0.0  ;;  %v217_v20 = vld [vmem:[%s12294_s18 + $0x158] sm:$0xff]  ;;  %v216_v21 = vld [vmem:[%s12294_s18 + $0x150] sm:$0xff]  ;;  %v219_v24 = vld [vmem:[%s12294_s18 + $0x168] sm:$0xff]  ;;  %v6454_v12 = vlaneseq }
  0x22   : > { %v218_v25 = vld [vmem:[%s12294_s18 + $0x160] sm:$0xff]  ;;  %v221_v28 = vld [vmem:[%s12294_s18 + $0x178] sm:$0xff]  ;;  %v220_v29 = vld [vmem:[%s12294_s18 + $0x170] sm:$0xff] }
  0x23   : > { %v223_v32 = vld [vmem:[%s12294_s18 + $0x188] sm:$0xff]  ;;  %v222_v33 = vld [vmem:[%s12294_s18 + $0x180] sm:$0xff]  ;;  %v225_v36 = vld [vmem:[%s12294_s18 + $0x198] sm:$0xff] }
  0x24   : > { %v224_v37 = vld [vmem:[%s12294_s18 + $0x190] sm:$0xff]  ;;  %v227_v40 = vld [vmem:[%s12294_s18 + $0x1a8] sm:$0xff]  ;;  %v226_v41 = vld [vmem:[%s12294_s18 + $0x1a0] sm:$0xff] }
  0x25   : > { %1227 = vadd.xlane.f32.xlu1 %v1226_v18  ;;  %1224 = vadd.xlane.f32.xlu0 %v1223_v19  ;;  %v1322_v18 = vsel %vm1198_vm0, %v215_v16, 0.0  ;;  %v1319_v19 = vsel %vm1198_vm0, %v214_v17, 0.0  ;;  %v229_v44 = vld [vmem:[%s12294_s18 + $0x1b8] sm:$0xff]  ;;  %v228_v45 = vld [vmem:[%s12294_s18 + $0x1b0] sm:$0xff]  ;;  %v231_v48 = vld [vmem:[%s12294_s18 + $0x1c8] sm:$0xff]  ;;  %v12440_v17 = vand.u32 127, %v6454_v12 }
  0x26   : > { %v230_v49 = vld [vmem:[%s12294_s18 + $0x1c0] sm:$0xff]  ;;  %v233_v52 = vld [vmem:[%s12294_s18 + $0x1d8] sm:$0xff]  ;;  %v232_v53 = vld [vmem:[%s12294_s18 + $0x1d0] sm:$0xff] }
  0x27   : > { %v235_v56 = vld [vmem:[%s12294_s18 + $0x1e8] sm:$0xff]  ;;  %v234_v57 = vld [vmem:[%s12294_s18 + $0x1e0] sm:$0xff]  ;;  %v237_v60 = vld [vmem:[%s12294_s18 + $0x1f8] sm:$0xff] }
  0x28   : > { %v236_v61 = vld [vmem:[%s12294_s18 + $0x1f0] sm:$0xff]  ;;  %v239_v0 = vld [vmem:[%s12294_s18 + $0x208] sm:$0xff]  ;;  %v238_v1 = vld [vmem:[%s12294_s18 + $0x200] sm:$0xff] }
  0x29   : > { %1233 = vadd.xlane.f32.xlu1 %v1232_v22  ;;  %1230 = vadd.xlane.f32.xlu0 %v1229_v23  ;;  %v1328_v22 = vsel %vm1198_vm0, %v217_v20, 0.0  ;;  %v1325_v23 = vsel %vm1198_vm0, %v216_v21, 0.0  ;;  %v241_v4 = vld [vmem:[%s12294_s18 + $0x218] sm:$0xff]  ;;  %v240_v5 = vld [vmem:[%s12294_s18 + $0x210] sm:$0xff]  ;;  %v243_v8 = vld [vmem:[%s12294_s18 + $0x228] sm:$0xff]  ;;  %v12444_v20 = vshrl.u32 %v6454_v12, 7 }
  0x2a   : > { %v242_v9 = vld [vmem:[%s12294_s18 + $0x220] sm:$0xff]  ;;  %v245_v13 = vld [vmem:[%s12294_s18 + $0x238] sm:$0xff]  ;;  %v6474_v21 = vadd.s32 4294967272, %v12440_v17 }
  0x2d   : > { %1239 = vadd.xlane.f32.xlu1 %v1238_v26  ;;  %1236 = vadd.xlane.f32.xlu0 %v1235_v27  ;;  %v1334_v26 = vsel %vm1198_vm0, %v219_v24, 0.0  ;;  %v1331_v27 = vsel %vm1198_vm0, %v218_v25, 0.0 }
  0x31   : > { %1245 = vadd.xlane.f32.xlu1 %v1244_v30  ;;  %1242 = vadd.xlane.f32.xlu0 %v1241_v31  ;;  %v1340_v30 = vsel %vm1198_vm0, %v221_v28, 0.0  ;;  %v1337_v31 = vsel %vm1198_vm0, %v220_v29, 0.0  ;;  %v249_v28 = vld [vmem:[%s12294_s18 + $0x258] sm:$0xff]  ;;  %v248_v29 = vld [vmem:[%s12294_s18 + $0x250] sm:$0xff] }
  0x35   : > { %1251 = vadd.xlane.f32.xlu1 %v1250_v34  ;;  %1248 = vadd.xlane.f32.xlu0 %v1247_v35  ;;  %v1346_v34 = vsel %vm1198_vm0, %v223_v32, 0.0  ;;  %v1343_v35 = vsel %vm1198_vm0, %v222_v33, 0.0  ;;  %v12457_v32 = vsub.s32 %v12440_v17, %v12444_v20 }
  0x39   : > { %1257 = vadd.xlane.f32.xlu1 %v1256_v38  ;;  %1254 = vadd.xlane.f32.xlu0 %v1253_v39  ;;  %v1352_v38 = vsel %vm1198_vm0, %v225_v36, 0.0  ;;  %v1349_v39 = vsel %vm1198_vm0, %v224_v37, 0.0 }
  0x3d   : > { %1263 = vadd.xlane.f32.xlu1 %v1262_v42  ;;  %1260 = vadd.xlane.f32.xlu0 %v1259_v43  ;;  %v1358_v42 = vsel %vm1198_vm0, %v227_v40, 0.0  ;;  %v1355_v43 = vsel %vm1198_vm0, %v226_v41, 0.0  ;;  %v1424_v40 = vsel %vm1198_vm0, %v249_v28, 0.0  ;;  %v1421_v41 = vsel %vm1198_vm0, %v248_v29, 0.0 }
  0x41   : > { %1269 = vadd.xlane.f32.xlu1 %v1268_v46  ;;  %1266 = vadd.xlane.f32.xlu0 %v1265_v47  ;;  %v1364_v46 = vsel %vm1198_vm0, %v229_v44, 0.0  ;;  %v1361_v47 = vsel %vm1198_vm0, %v228_v45, 0.0  ;;  %v251_v44 = vld [vmem:[%s12294_s18 + $0x268] sm:$0xff]  ;;  %v250_v45 = vld [vmem:[%s12294_s18 + $0x260] sm:$0xff] }
  0x45   : > { %1275 = vadd.xlane.f32.xlu1 %v1274_v50  ;;  %1272 = vadd.xlane.f32.xlu0 %v1271_v51  ;;  %v1370_v50 = vsel %vm1198_vm0, %v231_v48, 0.0  ;;  %v1367_v51 = vsel %vm1198_vm0, %v230_v49, 0.0  ;;  %v6502_v48 = vadd.s32 4294967240, %v12440_v17  ;;  %v6495_v49 = vadd.s32 4294967248, %v12440_v17 }
  0x49   : > { %1281 = vadd.xlane.f32.xlu1 %v1280_v54  ;;  %1278 = vadd.xlane.f32.xlu0 %v1277_v55  ;;  %v1376_v54 = vsel %vm1198_vm0, %v233_v52, 0.0  ;;  %v1373_v55 = vsel %vm1198_vm0, %v232_v53, 0.0 }
  0x4d   : > { %1287 = vadd.xlane.f32.xlu1 %v1286_v58  ;;  %1284 = vadd.xlane.f32.xlu0 %v1283_v59  ;;  %v1382_v58 = vsel %vm1198_vm0, %v235_v56, 0.0  ;;  %v1379_v59 = vsel %vm1198_vm0, %v234_v57, 0.0  ;;  %v1430_v56 = vsel %vm1198_vm0, %v251_v44, 0.0  ;;  %v1427_v57 = vsel %vm1198_vm0, %v250_v45, 0.0 }
  0x4e   : > { %v6544_v44 = vadd.s32 4294967192, %v12440_v17 }
  0x51   : > { %1293 = vadd.xlane.f32.xlu1 %v1292_v62  ;;  %1290 = vadd.xlane.f32.xlu0 %v1289_v63  ;;  %v1388_v62 = vsel %vm1198_vm0, %v237_v60, 0.0  ;;  %v1385_v63 = vsel %vm1198_vm0, %v236_v61, 0.0  ;;  %v253_v61 = vld [vmem:[%s12294_s18 + $0x278] sm:$0xff] }
  0x55   : > { %1299 = vadd.xlane.f32.xlu1 %v1298_v2  ;;  %1296 = vadd.xlane.f32.xlu0 %v1295_v3  ;;  %v1394_v2 = vsel %vm1198_vm0, %v239_v0, 0.0  ;;  %v1391_v3 = vsel %vm1198_vm0, %v238_v1, 0.0  ;;  %v12491_v0 = vsub.s32 %v6502_v48, %v12444_v20  ;;  %v12494_v1 = vsub.s32 %v6495_v49, %v12444_v20 }
  0x57   : > { %17373 = vst [vmem:[#allocation2_spill] sm:$0xff] %v12491_v0 }
  0x59   : > { %1305 = vadd.xlane.f32.xlu1 %v1304_v6  ;;  %1302 = vadd.xlane.f32.xlu0 %v1301_v7  ;;  %v1400_v6 = vsel %vm1198_vm0, %v241_v4, 0.0  ;;  %v1397_v7 = vsel %vm1198_vm0, %v240_v5, 0.0 }
  0x5d   : > { %1311 = vadd.xlane.f32.xlu1 %v1310_v10  ;;  %1308 = vadd.xlane.f32.xlu0 %v1307_v11  ;;  %v1406_v10 = vsel %vm1198_vm0, %v243_v8, 0.0  ;;  %v1403_v11 = vsel %vm1198_vm0, %v242_v9, 0.0  ;;  %v1436_v9 = vsel %vm1198_vm0, %v253_v61, 0.0  ;;  %v12546_v61 = vsub.s32 %v6544_v44, %v12444_v20 }
  0x61   : > { %1317 = vadd.xlane.f32.xlu1 %v1316_v14  ;;  %1314 = vadd.xlane.f32.xlu0 %v1313_v15  ;;  %v244_v14 = vld [vmem:[%s12294_s18 + $0x230] sm:$0xff]  ;;  %v1412_v15 = vsel %vm1198_vm0, %v245_v13, 0.0 }
  0x62   : > { %v1409_v16 = vsel %vm1198_vm0, %v244_v14, 0.0  ;;  %v255_v14 = vld [vmem:[%s12294_s18 + $0x288] sm:$0xff] }
  0x65   : > { %1323 = vadd.xlane.f32.xlu1 %v1322_v18  ;;  %1320 = vadd.xlane.f32.xlu0 %v1319_v19  ;;  %v247_v18 = vld [vmem:[%s12294_s18 + $0x248] sm:$0xff]  ;;  %v246_v19 = vld [vmem:[%s12294_s18 + $0x240] sm:$0xff] }
  0x69   : > { %1329 = vadd.xlane.f32.xlu1 %v1328_v22  ;;  %1326 = vadd.xlane.f32.xlu0 %v1325_v23  ;;  %v6460_v22 = vadd.s32 4294967288, %v12440_v17  ;;  %v6467_v23 = vadd.s32 4294967280, %v12440_v17 }
  0x6b   : > { %v12466_v36 = vsub.s32 %v6467_v23, %v12444_v20 }
  0x6d   : > { %1335 = vadd.xlane.f32.xlu1 %v1334_v26  ;;  %1332 = vadd.xlane.f32.xlu0 %v1331_v27  ;;  %v1418_v26 = vsel %vm1198_vm0, %v247_v18, 0.0  ;;  %v1415_v27 = vsel %vm1198_vm0, %v246_v19, 0.0  ;;  %v6523_v19 = vadd.s32 4294967216, %v12440_v17 }
  0x71   : > { %1341 = vadd.xlane.f32.xlu1 %v1340_v30  ;;  %1338 = vadd.xlane.f32.xlu0 %v1337_v31  ;;  %v6488_v30 = vadd.s32 4294967256, %v12440_v17  ;;  %v6481_v31 = vadd.s32 4294967264, %v12440_v17 }
  0x75   : > { %1347 = vadd.xlane.f32.xlu1 %v1346_v34  ;;  %1344 = vadd.xlane.f32.xlu0 %v1343_v35  ;;  %v12460_v34 = vsub.s32 %v6474_v21, %v12444_v20  ;;  %v12463_v35 = vsub.s32 %v6460_v22, %v12444_v20 }
  0x79   : > { %1353 = vadd.xlane.f32.xlu1 %v1352_v38  ;;  %1350 = vadd.xlane.f32.xlu0 %v1349_v39 }
  0x7d   : > { %1359 = vadd.xlane.f32.xlu1 %v1358_v42  ;;  %1356 = vadd.xlane.f32.xlu0 %v1355_v43 }
  0x81   : > { %1365 = vadd.xlane.f32.xlu1 %v1364_v46  ;;  %1362 = vadd.xlane.f32.xlu0 %v1361_v47  ;;  %v12473_v46 = vsub.s32 %v6488_v30, %v12444_v20  ;;  %v12476_v47 = vsub.s32 %v6481_v31, %v12444_v20 }
  0x85   : > { %1371 = vadd.xlane.f32.xlu1 %v1370_v50  ;;  %1368 = vadd.xlane.f32.xlu0 %v1367_v51 }
  0x89   : > { %1377 = vadd.xlane.f32.xlu1 %v1376_v54  ;;  %1374 = vadd.xlane.f32.xlu0 %v1373_v55 }
  0x8d   : > { %1383 = vadd.xlane.f32.xlu1 %v1382_v58  ;;  %1380 = vadd.xlane.f32.xlu0 %v1379_v59 }
  0x91   : > { %1389 = vadd.xlane.f32.xlu1 %v1388_v62  ;;  %1386 = vadd.xlane.f32.xlu0 %v1385_v63  ;;  %v252_v62 = vld [vmem:[%s12294_s18 + $0x270] sm:$0xff] }
  0x95   : > { %1395 = vadd.xlane.f32.xlu1 %v1394_v2  ;;  %1392 = vadd.xlane.f32.xlu0 %v1391_v3  ;;  %v6516_v2 = vadd.s32 4294967224, %v12440_v17 }
  0x97   : > { %v12508_v18 = vsub.s32 %v6516_v2, %v12444_v20 }
  0x99   : > { %1401 = vadd.xlane.f32.xlu1 %v1400_v6  ;;  %1398 = vadd.xlane.f32.xlu0 %v1397_v7  ;;  %v6509_v6 = vadd.s32 4294967232, %v12440_v17 }
  0x9b   : > { %v12514_v23 = vsub.s32 %v6509_v6, %v12444_v20 }
  0x9d   : > { %1407 = vadd.xlane.f32.xlu1 %v1406_v10  ;;  %1404 = vadd.xlane.f32.xlu0 %v1403_v11  ;;  %v1433_v10 = vsel %vm1198_vm0, %v252_v62, 0.0  ;;  %17374 = vst [vmem:[#allocation3_spill] sm:$0xff] %v12514_v23  ;;  %v6558_v62 = vadd.s32 4294967176, %v12440_v17 }
  0xa1   : > { %1413 = vadd.xlane.f32.xlu1 %v1412_v15  ;;  %1410 = vadd.xlane.f32.xlu0 %v1409_v16  ;;  %v254_v15 = vld [vmem:[%s12294_s18 + $0x280] sm:$0xff] }
  0xa2   : > { %v1207_v24 = vpop.xlane.xlu1 %1206  ;;  %v1201_v25 = vpop.xlane.xlu0 %1200  ;;  %v1439_v28 = vsel %vm1198_vm0, %v254_v15, 0.0 }
  0xa3   : > { %v4271_v33 = vmul.f32 0.015625, %v1201_v25  ;;  %v4273_v37 = vmul.f32 0.015625, %v1207_v24  ;;  %v6530_v24 = vadd.s32 4294967208, %v12440_v17 }
  0xa5   : > { %1419 = vadd.xlane.f32.xlu1 %v1418_v26  ;;  %1416 = vadd.xlane.f32.xlu0 %v1415_v27  ;;  %v6459_v50 = vrot.slane %v4271_v33, %v12457_v32  ;;  %v6471_v53 = vrot.slane %v4273_v37, %v12466_v36  ;;  %v1442_v27 = vsel %vm1198_vm0, %v255_v14, 0.0  ;;  %v257_v33 = vld [vmem:[%s12294_s18 + $0x298] sm:$0xff]  ;;  %v256_v37 = vld [vmem:[%s12294_s18 + $0x290] sm:$0xff] }
  0xa6   : > { %v1210_v38 = vpop.xlane.xlu1 %1209  ;;  %v1204_v39 = vpop.xlane.xlu0 %1203  ;;  %v1448_v49 = vsel %vm1198_vm0, %v257_v33, 0.0 }
  0xa7   : > { %v4274_v42 = vmul.f32 0.015625, %v1210_v38  ;;  %v4272_v43 = vmul.f32 0.015625, %v1204_v39  ;;  %v12524_v39 = vsub.s32 %v6523_v19, %v12444_v20 }
  0xa9   : > { %v6478_v51 = vrot.slane %v4274_v42, %v12460_v34  ;;  %v6464_v52 = vrot.slane %v4272_v43, %v12463_v35  ;;  %1425 = vadd.xlane.f32.xlu1 %v1424_v40  ;;  %1422 = vadd.xlane.f32.xlu0 %v1421_v41  ;;  %v6537_v40 = vadd.s32 4294967200, %v12440_v17  ;;  %v12530_v43 = vsub.s32 %v6530_v24, %v12444_v20 }
  0xaa   : > { %v1216_v54 = vpop.xlane.xlu1 %1215  ;;  %v1213_v55 = vpop.xlane.xlu0 %1212 }
  0xab   : > { %v6466_v58 = vsel %vm6465_vm1, %v6464_v52, %v6459_v50  ;;  %v4276_v59 = vmul.f32 0.015625, %v1216_v54  ;;  %v4275_v60 = vmul.f32 0.015625, %v1213_v55  ;;  %v1445_v50 = vsel %vm1198_vm0, %v256_v37, 0.0  ;;  %v259_v54 = vld [vmem:[%s12294_s18 + $0x2a8] sm:$0xff]  ;;  %v258_v55 = vld [vmem:[%s12294_s18 + $0x2a0] sm:$0xff] }
  0xac   : > { %v6473_v63 = vsel %vm6472_vm2, %v6471_v53, %v6466_v58  ;;  %v6551_v58 = vadd.s32 4294967184, %v12440_v17 }
  0xad   : > { %v6492_v3 = vrot.slane %v4276_v59, %v12473_v46  ;;  %v6480_v4 = vsel %vm6479_vm3, %v6478_v51, %v6473_v63  ;;  %v6485_v5 = vrot.slane %v4275_v60, %v12476_v47  ;;  %1431 = vadd.xlane.f32.xlu1 %v1430_v56  ;;  %1428 = vadd.xlane.f32.xlu0 %v1427_v57 }
  0xae   : > { %v1222_v7 = vpop.xlane.xlu1 %1221  ;;  %v1219_v8 = vpop.xlane.xlu0 %1218  ;;  %v12540_v57 = vsub.s32 %v6537_v40, %v12444_v20 }
  0xaf   : > { %v6487_v11 = vsel %vm6486_vm4, %v6485_v5, %v6480_v4  ;;  %v4278_v12 = vmul.f32 0.015625, %v1222_v7  ;;  %v4277_v13 = vmul.f32 0.015625, %v1219_v8  ;;  %v1451_v4 = vsel %vm1198_vm0, %v258_v55, 0.0  ;;  %v261_v8 = vld [vmem:[%s12294_s18 + $0x2b8] sm:$0xff] }
  0xb0   : > { %v6494_v16 = vsel %vm6493_vm5, %v6492_v3, %v6487_v11  ;;  %v1454_v3 = vsel %vm1198_vm0, %v259_v54, 0.0  ;;  %v12556_v11 = vsub.s32 %v6551_v58, %v12444_v20  ;;  %v266_v58 = vld [vmem:[%s12294_s18 + $0x2e0] sm:$0xff] }
  0xb1   : > { %v6506_v21 = vrot.slane %v4278_v12, %v12491_v0  ;;  %v6499_v22 = vrot.slane %v4277_v13, %v12494_v1  ;;  %1437 = vadd.xlane.f32.xlu1 %v1436_v9  ;;  %1434 = vadd.xlane.f32.xlu0 %v1433_v10  ;;  %v260_v9 = vld [vmem:[%s12294_s18 + $0x2b0] sm:$0xff]  ;;  %v12561_v13 = vsub.s32 %v6558_v62, %v12444_v20 }
  0xb2   : > { %v1228_v25 = vpop.xlane.xlu1 %1227  ;;  %v1225_v26 = vpop.xlane.xlu0 %1224  ;;  %v1457_v19 = vsel %vm1198_vm0, %v260_v9, 0.0 }
  0xb3   : > { %v6501_v29 = vsel %vm6500_vm6, %v6499_v22, %v6494_v16  ;;  %v4280_v30 = vmul.f32 0.015625, %v1228_v25  ;;  %v4279_v31 = vmul.f32 0.015625, %v1225_v26  ;;  %v1460_v16 = vsel %vm1198_vm0, %v261_v8, 0.0  ;;  %v263_v25 = vld [vmem:[%s12294_s18 + $0x2c8] sm:$0xff]  ;;  %v262_v26 = vld [vmem:[%s12294_s18 + $0x2c0] sm:$0xff]  ;;  %v268_v8 = vld [vmem:[%s12294_s18 + $0x2f0] sm:$0xff] }
  0xb4   : > { %v6508_v38 = vsel %vm17372_vm7, %v6506_v21, %v6501_v29  ;;  %v1463_v33 = vsel %vm1198_vm0, %v262_v26, 0.0 }
  0xb5   : > { %v6520_v41 = vrot.slane %v4280_v30, %v12508_v18  ;;  %v6513_v42 = vrot.slane %v4279_v31, %v12514_v23  ;;  %1443 = vadd.xlane.f32.xlu1 %v1442_v27  ;;  %1440 = vadd.xlane.f32.xlu0 %v1439_v28  ;;  %v1466_v31 = vsel %vm1198_vm0, %v263_v25, 0.0  ;;  %v270_v25 = vld [vmem:[%s12294_s18 + $0x300] sm:$0xff] }
  0xb6   : > { %v1234_v45 = vpop.xlane.xlu1 %1233  ;;  %v1231_v48 = vpop.xlane.xlu0 %1230 }
  0xb7   : > { %v6515_v51 = vsel %vm17367_vm8, %v6513_v42, %v6508_v38  ;;  %v4282_v52 = vmul.f32 0.015625, %v1234_v45  ;;  %v4281_v53 = vmul.f32 0.015625, %v1231_v48  ;;  %v264_v42 = vld [vmem:[%s12294_s18 + $0x2d0] sm:$0xff] }
  0xb8   : > { %v6522_v56 = vsel %vm17365_vm9, %v6520_v41, %v6515_v51  ;;  %v265_v41 = vld [vmem:[%s12294_s18 + $0x2d8] sm:$0xff] }
  0xb9   : > { %v6534_v59 = vrot.slane %v4282_v52, %v12530_v43  ;;  %v6527_v60 = vrot.slane %v4281_v53, %v12524_v39  ;;  %1449 = vadd.xlane.f32.xlu1 %v1448_v49  ;;  %1446 = vadd.xlane.f32.xlu0 %v1445_v50  ;;  %v1472_v51 = vsel %vm1198_vm0, %v265_v41, 0.0  ;;  %v1469_v52 = vsel %vm1198_vm0, %v264_v42, 0.0  ;;  %v272_v41 = vld [vmem:[%s12294_s18 + $0x310] sm:$0xff] }
  0xba   : > { %v1240_v63 = vpop.xlane.xlu1 %1239  ;;  %v1237_v2 = vpop.xlane.xlu0 %1236 }
  0xbb   : > { %v6529_v5 = vsel %vm6528_vm10, %v6527_v60, %v6522_v56  ;;  %v4284_v6 = vmul.f32 0.015625, %v1240_v63  ;;  %v4283_v7 = vmul.f32 0.015625, %v1237_v2  ;;  %v267_v56 = vld [vmem:[%s12294_s18 + $0x2e8] sm:$0xff] }
  0xbc   : > { %v6536_v10 = vsel %vm17364_vm11, %v6534_v59, %v6529_v5  ;;  %v1478_v2 = vsel %vm1198_vm0, %v267_v56, 0.0  ;;  %v275_v56 = vld [vmem:[%s12294_s18 + $0x328] sm:$0xff] }
  0xbd   : > { %v6548_v17 = vrot.slane %v4284_v6, %v12546_v61  ;;  %v6541_v12 = vrot.slane %v4283_v7, %v12540_v57  ;;  %1455 = vadd.xlane.f32.xlu1 %v1454_v3  ;;  %1452 = vadd.xlane.f32.xlu0 %v1451_v4  ;;  %v1475_v3 = vsel %vm1198_vm0, %v266_v58, 0.0  ;;  %v269_v7 = vld [vmem:[%s12294_s18 + $0x2f8] sm:$0xff]  ;;  %v274_v58 = vld [vmem:[%s12294_s18 + $0x320] sm:$0xff] }
  0xbe   : > { %v1246_v14 = vpop.xlane.xlu1 %1245  ;;  %v1243_v15 = vpop.xlane.xlu0 %1242 }
  0xbf   : > { %v6543_v21 = vsel %vm6542_vm12, %v6541_v12, %v6536_v10  ;;  %v4286_v22 = vmul.f32 0.015625, %v1246_v14  ;;  %v4285_v24 = vmul.f32 0.015625, %v1243_v15  ;;  %v1484_v15 = vsel %vm1198_vm0, %v269_v7, 0.0 }
  0xc0   : > { %v6550_v27 = vsel %vm6549_vm13, %v6548_v17, %v6543_v21 }
  0xc1   : > { %v6562_v20 = vrot.slane %v4286_v22, %v12561_v13  ;;  %v6555_v28 = vrot.slane %v4285_v24, %v12556_v11  ;;  %1461 = vadd.xlane.f32.xlu1 %v1460_v16  ;;  %1458 = vadd.xlane.f32.xlu0 %v1457_v19  ;;  %v1481_v16 = vsel %vm1198_vm0, %v268_v8, 0.0  ;;  %v271_v24 = vld [vmem:[%s12294_s18 + $0x308] sm:$0xff]  ;;  %v277_v8 = vld [vmem:[%s12294_s18 + $0x338] sm:$0xff] }
  0xc2   : > { %v1252_v29 = vpop.xlane.xlu1 %1251  ;;  %v1249_v30 = vpop.xlane.xlu0 %1248 }
  0xc3   : > { %v6557_v37 = vsel %vm6556_vm14, %v6555_v28, %v6550_v27  ;;  %v4288_v38 = vmul.f32 0.015625, %v1252_v29  ;;  %v4287_v40 = vmul.f32 0.015625, %v1249_v30  ;;  %v1490_v30 = vsel %vm1198_vm0, %v271_v24, 0.0 }
  0xc4   : > { %v12577_v44 = vsel %vm6563_vm15, %v6562_v20, %v6557_v37 }
  0xc5   : > { %v6572_v45 = vrot.slane %v4288_v38, %v12463_v35  ;;  %v6568_v48 = vrot.slane %v4287_v40, %v12457_v32  ;;  %1467 = vadd.xlane.f32.xlu1 %v1466_v31  ;;  %1464 = vadd.xlane.f32.xlu0 %v1463_v33  ;;  %v1487_v31 = vsel %vm1198_vm0, %v270_v25, 0.0  ;;  %v273_v40 = vld [vmem:[%s12294_s18 + $0x318] sm:$0xff]  ;;  %v279_v25 = vld [vmem:[%s12294_s18 + $0x348] sm:$0xff] }
  0xc6   : > { %v1258_v49 = vpop.xlane.xlu1 %1257  ;;  %v1255_v50 = vpop.xlane.xlu0 %1254 }
  0xc7   : > { %v6573_v53 = vsel %vm6465_vm1, %v6572_v45, %v6568_v48  ;;  %v4290_v54 = vmul.f32 0.015625, %v1258_v49  ;;  %v4289_v55 = vmul.f32 0.015625, %v1255_v50 }
  0xc9   : > { %v6582_v59 = vrot.slane %v4290_v54, %v12460_v34  ;;  %v6577_v60 = vrot.slane %v4289_v55, %v12466_v36  ;;  %1473 = vadd.xlane.f32.xlu1 %v1472_v51  ;;  %1470 = vadd.xlane.f32.xlu0 %v1469_v52  ;;  %v1496_v51 = vsel %vm1198_vm0, %v273_v40, 0.0  ;;  %v1493_v52 = vsel %vm1198_vm0, %v272_v41, 0.0  ;;  %v281_v41 = vld [vmem:[%s12294_s18 + $0x358] sm:$0xff] }
  0xca   : > { %v1264_v62 = vpop.xlane.xlu1 %1263  ;;  %v1261_v63 = vpop.xlane.xlu0 %1260 }
  0xcb   : > { %v6578_v4 = vsel %vm6472_vm2, %v6577_v60, %v6573_v53  ;;  %v4292_v5 = vmul.f32 0.015625, %v1264_v62  ;;  %v4291_v6 = vmul.f32 0.015625, %v1261_v63 }
  0xcc   : > { %v6583_v9 = vsel %vm6479_vm3, %v6582_v59, %v6578_v4  ;;  %v1499_v4 = vsel %vm1198_vm0, %v274_v58, 0.0  ;;  %v283_v58 = vld [vmem:[%s12294_s18 + $0x368] sm:$0xff] }
  0xcd   : > { %v6592_v10 = vrot.slane %v4292_v5, %v12473_v46  ;;  %v6587_v17 = vrot.slane %v4291_v6, %v12476_v47  ;;  %1479 = vadd.xlane.f32.xlu1 %v1478_v2  ;;  %1476 = vadd.xlane.f32.xlu0 %v1475_v3  ;;  %v1502_v3 = vsel %vm1198_vm0, %v275_v56, 0.0 }
  0xce   : > { %v1270_v12 = vpop.xlane.xlu1 %1269  ;;  %v1267_v14 = vpop.xlane.xlu0 %1266 }
  0xcf   : > { %v6588_v19 = vsel %vm6486_vm4, %v6587_v17, %v6583_v9  ;;  %v4294_v21 = vmul.f32 0.015625, %v1270_v12  ;;  %v4293_v22 = vmul.f32 0.015625, %v1267_v14  ;;  %v276_v9 = vld [vmem:[%s12294_s18 + $0x330] sm:$0xff] }
  0xd0   : > { %v6593_v26 = vsel %vm6493_vm5, %v6592_v10, %v6588_v19  ;;  %v1505_v19 = vsel %vm1198_vm0, %v276_v9, 0.0  ;;  %v284_v9 = vld [vmem:[%s12294_s18 + $0x370] sm:$0xff] }
  0xd1   : > { %v6602_v27 = vrot.slane %v4294_v21, %v12491_v0  ;;  %v6597_v20 = vrot.slane %v4293_v22, %v12494_v1  ;;  %1485 = vadd.xlane.f32.xlu1 %v1484_v15  ;;  %1482 = vadd.xlane.f32.xlu0 %v1481_v16  ;;  %v1508_v16 = vsel %vm1198_vm0, %v277_v8, 0.0  ;;  %v285_v8 = vld [vmem:[%s12294_s18 + $0x378] sm:$0xff] }
  0xd2   : > { %v1276_v28 = vpop.xlane.xlu1 %1275  ;;  %v1273_v29 = vpop.xlane.xlu0 %1272 }
  0xd3   : > { %v6598_v33 = vsel %vm6500_vm6, %v6597_v20, %v6593_v26  ;;  %v4296_v37 = vmul.f32 0.015625, %v1276_v28  ;;  %v4295_v38 = vmul.f32 0.015625, %v1273_v29  ;;  %v278_v26 = vld [vmem:[%s12294_s18 + $0x340] sm:$0xff] }
  0xd4   : > { %v6603_v42 = vsel %vm17372_vm7, %v6602_v27, %v6598_v33  ;;  %v1511_v33 = vsel %vm1198_vm0, %v278_v26, 0.0  ;;  %v286_v26 = vld [vmem:[%s12294_s18 + $0x380] sm:$0xff] }
  0xd5   : > { %v6612_v45 = vrot.slane %v4296_v37, %v12508_v18  ;;  %v6607_v48 = vrot.slane %v4295_v38, %v12514_v23  ;;  %1491 = vadd.xlane.f32.xlu1 %v1490_v30  ;;  %1488 = vadd.xlane.f32.xlu0 %v1487_v31  ;;  %v1514_v31 = vsel %vm1198_vm0, %v279_v25, 0.0  ;;  %v287_v25 = vld [vmem:[%s12294_s18 + $0x388] sm:$0xff] }
  0xd6   : > { %v1282_v49 = vpop.xlane.xlu1 %1281  ;;  %v1279_v50 = vpop.xlane.xlu0 %1278 }
  0xd7   : > { %v6608_v53 = vsel %vm17367_vm8, %v6607_v48, %v6603_v42  ;;  %v4298_v54 = vmul.f32 0.015625, %v1282_v49  ;;  %v4297_v55 = vmul.f32 0.015625, %v1279_v50  ;;  %v280_v42 = vld [vmem:[%s12294_s18 + $0x350] sm:$0xff] }
  0xd8   : > { %v6613_v59 = vsel %vm17365_vm9, %v6612_v45, %v6608_v53  ;;  %v1517_v53 = vsel %vm1198_vm0, %v280_v42, 0.0  ;;  %v288_v42 = vld [vmem:[%s12294_s18 + $0x390] sm:$0xff] }
  0xd9   : > { %v6622_v60 = vrot.slane %v4298_v54, %v12530_v43  ;;  %v6617_v62 = vrot.slane %v4297_v55, %v12524_v39  ;;  %1497 = vadd.xlane.f32.xlu1 %v1496_v51  ;;  %1494 = vadd.xlane.f32.xlu0 %v1493_v52  ;;  %v1520_v52 = vsel %vm1198_vm0, %v281_v41, 0.0  ;;  %v289_v41 = vld [vmem:[%s12294_s18 + $0x398] sm:$0xff] }
  0xda   : > { %v1288_v63 = vpop.xlane.xlu1 %1287  ;;  %v1285_v2 = vpop.xlane.xlu0 %1284 }
  0xdb   : > { %v6618_v5 = vsel %vm6528_vm10, %v6617_v62, %v6613_v59  ;;  %v4300_v6 = vmul.f32 0.015625, %v1288_v63  ;;  %v4299_v7 = vmul.f32 0.015625, %v1285_v2  ;;  %v282_v59 = vld [vmem:[%s12294_s18 + $0x360] sm:$0xff] }
  0xdc   : > { %v6623_v10 = vsel %vm17364_vm11, %v6622_v60, %v6618_v5 }
  0xdd   : > { %v6632_v17 = vrot.slane %v4300_v6, %v12546_v61  ;;  %v6627_v12 = vrot.slane %v4299_v7, %v12540_v57  ;;  %1503 = vadd.xlane.f32.xlu1 %v1502_v3  ;;  %1500 = vadd.xlane.f32.xlu0 %v1499_v4  ;;  %v1526_v3 = vsel %vm1198_vm0, %v283_v58, 0.0  ;;  %v1523_v4 = vsel %vm1198_vm0, %v282_v59, 0.0  ;;  %v291_v59 = vld [vmem:[%s12294_s18 + $0x3a8] sm:$0xff] }
  0xde   : > { %v1294_v14 = vpop.xlane.xlu1 %1293  ;;  %v1291_v15 = vpop.xlane.xlu0 %1290 }
  0xdf   : > { %v6628_v21 = vsel %vm6542_vm12, %v6627_v12, %v6623_v10  ;;  %v4302_v22 = vmul.f32 0.015625, %v1294_v14  ;;  %v4301_v24 = vmul.f32 0.015625, %v1291_v15 }
  0xe0   : > { %v6633_v27 = vsel %vm6549_vm13, %v6632_v17, %v6628_v21 }
  0xe1   : > { %v6642_v20 = vrot.slane %v4302_v22, %v12561_v13  ;;  %v6637_v28 = vrot.slane %v4301_v24, %v12556_v11  ;;  %1509 = vadd.xlane.f32.xlu1 %v1508_v16  ;;  %1506 = vadd.xlane.f32.xlu0 %v1505_v19  ;;  %v1532_v16 = vsel %vm1198_vm0, %v285_v8, 0.0  ;;  %v1529_v19 = vsel %vm1198_vm0, %v284_v9, 0.0 }
  0xe2   : > { %v1300_v29 = vpop.xlane.xlu1 %1299  ;;  %v1297_v30 = vpop.xlane.xlu0 %1296 }
  0xe3   : > { %v6638_v37 = vsel %vm6556_vm14, %v6637_v28, %v6633_v27  ;;  %v4304_v38 = vmul.f32 0.015625, %v1300_v29  ;;  %v4303_v40 = vmul.f32 0.015625, %v1297_v30 }
  0xe4   : > { %v12642_v45 = vsel %vm6563_vm15, %v6642_v20, %v6638_v37 }
  0xe5   : > { %v6651_v48 = vrot.slane %v4304_v38, %v12463_v35  ;;  %v6647_v49 = vrot.slane %v4303_v40, %v12457_v32  ;;  %1515 = vadd.xlane.f32.xlu1 %v1514_v31  ;;  %1512 = vadd.xlane.f32.xlu0 %v1511_v33  ;;  %v1538_v31 = vsel %vm1198_vm0, %v287_v25, 0.0  ;;  %v1535_v33 = vsel %vm1198_vm0, %v286_v26, 0.0 }
  0xe6   : > { %v1306_v50 = vpop.xlane.xlu1 %1305  ;;  %v1303_v51 = vpop.xlane.xlu0 %1302 }
  0xe7   : > { %v6652_v54 = vsel %vm6465_vm1, %v6651_v48, %v6647_v49  ;;  %v4306_v55 = vmul.f32 0.015625, %v1306_v50  ;;  %v4305_v56 = vmul.f32 0.015625, %v1303_v51 }
  0xe9   : > { %v6661_v60 = vrot.slane %v4306_v55, %v12460_v34  ;;  %v6656_v62 = vrot.slane %v4305_v56, %v12466_v36  ;;  %1521 = vadd.xlane.f32.xlu1 %v1520_v52  ;;  %1518 = vadd.xlane.f32.xlu0 %v1517_v53  ;;  %v1544_v53 = vsel %vm1198_vm0, %v289_v41, 0.0 }
  0xea   : > { %v1312_v63 = vpop.xlane.xlu1 %1311  ;;  %v1309_v2 = vpop.xlane.xlu0 %1308 }
  0xeb   : > { %v6657_v5 = vsel %vm6472_vm2, %v6656_v62, %v6652_v54  ;;  %v4308_v6 = vmul.f32 0.015625, %v1312_v63  ;;  %v4307_v7 = vmul.f32 0.015625, %v1309_v2  ;;  %v1541_v54 = vsel %vm1198_vm0, %v288_v42, 0.0 }
  0xec   : > { %v6662_v10 = vsel %vm6479_vm3, %v6661_v60, %v6657_v5  ;;  %v290_v60 = vld [vmem:[%s12294_s18 + $0x3a0] sm:$0xff]  ;;  %v1550_v5 = vsel %vm1198_vm0, %v291_v59, 0.0 }
  0xed   : > { %v6671_v17 = vrot.slane %v4308_v6, %v12473_v46  ;;  %v6666_v12 = vrot.slane %v4307_v7, %v12476_v47  ;;  %1527 = vadd.xlane.f32.xlu1 %v1526_v3  ;;  %1524 = vadd.xlane.f32.xlu0 %v1523_v4  ;;  %v1547_v6 = vsel %vm1198_vm0, %v290_v60, 0.0 }
  0xee   : > { %v1318_v14 = vpop.xlane.xlu1 %1317  ;;  %v1315_v15 = vpop.xlane.xlu0 %1314 }
  0xef   : > { %v6667_v21 = vsel %vm6486_vm4, %v6666_v12, %v6662_v10  ;;  %v4310_v22 = vmul.f32 0.015625, %v1318_v14  ;;  %v4309_v24 = vmul.f32 0.015625, %v1315_v15  ;;  %v293_v10 = vld [vmem:[%s12294_s18 + $0x3b8] sm:$0xff] }
  0xf0   : > { %v6672_v27 = vsel %vm6493_vm5, %v6671_v17, %v6667_v21  ;;  %v292_v17 = vld [vmem:[%s12294_s18 + $0x3b0] sm:$0xff]  ;;  %v1556_v21 = vsel %vm1198_vm0, %v293_v10, 0.0 }
  0xf1   : > { %v6681_v20 = vrot.slane %v4310_v22, %v12491_v0  ;;  %v6676_v28 = vrot.slane %v4309_v24, %v12494_v1  ;;  %1533 = vadd.xlane.f32.xlu1 %v1532_v16  ;;  %1530 = vadd.xlane.f32.xlu0 %v1529_v19  ;;  %v1553_v22 = vsel %vm1198_vm0, %v292_v17, 0.0  ;;  %v301_v17 = vld [vmem:[%s12294_s18 + $0x3f8] sm:$0xff] }
  0xf2   : > { %v1324_v29 = vpop.xlane.xlu1 %1323  ;;  %v1321_v30 = vpop.xlane.xlu0 %1320 }
  0xf3   : > { %v6677_v37 = vsel %vm6500_vm6, %v6676_v28, %v6672_v27  ;;  %v4312_v38 = vmul.f32 0.015625, %v1324_v29  ;;  %v4311_v40 = vmul.f32 0.015625, %v1321_v30  ;;  %v295_v27 = vld [vmem:[%s12294_s18 + $0x3c8] sm:$0xff] }
  0xf4   : > { %v6682_v48 = vsel %vm17372_vm7, %v6681_v20, %v6677_v37  ;;  %v294_v20 = vld [vmem:[%s12294_s18 + $0x3c0] sm:$0xff]  ;;  %v1562_v37 = vsel %vm1198_vm0, %v295_v27, 0.0 }
  0xf5   : > { %v6691_v49 = vrot.slane %v4312_v38, %v12508_v18  ;;  %v6686_v50 = vrot.slane %v4311_v40, %v12514_v23  ;;  %1539 = vadd.xlane.f32.xlu1 %v1538_v31  ;;  %1536 = vadd.xlane.f32.xlu0 %v1535_v33  ;;  %v1559_v38 = vsel %vm1198_vm0, %v294_v20, 0.0  ;;  %v303_v20 = vld [vmem:[%s12294_s18 + $0x408] sm:$0xff] }
  0xf6   : > { %v1330_v51 = vpop.xlane.xlu1 %1329  ;;  %v1327_v52 = vpop.xlane.xlu0 %1326 }
  0xf7   : > { %v6687_v55 = vsel %vm17367_vm8, %v6686_v50, %v6682_v48  ;;  %v4314_v56 = vmul.f32 0.015625, %v1330_v51  ;;  %v4313_v58 = vmul.f32 0.015625, %v1327_v52  ;;  %v297_v48 = vld [vmem:[%s12294_s18 + $0x3d8] sm:$0xff] }
  0xf8   : > { %v6692_v62 = vsel %vm17365_vm9, %v6691_v49, %v6687_v55  ;;  %v296_v49 = vld [vmem:[%s12294_s18 + $0x3d0] sm:$0xff]  ;;  %v1568_v55 = vsel %vm1198_vm0, %v297_v48, 0.0 }
  0xf9   : > { %v6701_v63 = vrot.slane %v4314_v56, %v12530_v43  ;;  %v6696_v2 = vrot.slane %v4313_v58, %v12524_v39  ;;  %1545 = vadd.xlane.f32.xlu1 %v1544_v53  ;;  %1542 = vadd.xlane.f32.xlu0 %v1541_v54  ;;  %v1565_v56 = vsel %vm1198_vm0, %v296_v49, 0.0  ;;  %v305_v49 = vld [vmem:[%s12294_s18 + $0x418] sm:$0xff] }
  0xfa   : > { %v1336_v3 = vpop.xlane.xlu1 %1335  ;;  %v1333_v4 = vpop.xlane.xlu0 %1332 }
  0xfb   : > { %v6697_v7 = vsel %vm6528_vm10, %v6696_v2, %v6692_v62  ;;  %v4316_v8 = vmul.f32 0.015625, %v1336_v3  ;;  %v4315_v9 = vmul.f32 0.015625, %v1333_v4  ;;  %v299_v62 = vld [vmem:[%s12294_s18 + $0x3e8] sm:$0xff] }
  0xfc   : > { %v6702_v12 = vsel %vm17364_vm11, %v6701_v63, %v6697_v7  ;;  %v298_v63 = vld [vmem:[%s12294_s18 + $0x3e0] sm:$0xff] }
  0xfd   : > { %v6711_v14 = vrot.slane %v4316_v8, %v12546_v61  ;;  %v6706_v15 = vrot.slane %v4315_v9, %v12540_v57  ;;  %1551 = vadd.xlane.f32.xlu1 %v1550_v5  ;;  %1548 = vadd.xlane.f32.xlu0 %v1547_v6  ;;  %v1574_v6 = vsel %vm1198_vm0, %v299_v62, 0.0  ;;  %v1571_v7 = vsel %vm1198_vm0, %v298_v63, 0.0 }
  0xfe   : > { %v1342_v16 = vpop.xlane.xlu1 %1341  ;;  %v1339_v19 = vpop.xlane.xlu0 %1338 }
  0xff   : > { %v6707_v24 = vsel %vm6542_vm12, %v6706_v15, %v6702_v12  ;;  %v4318_v25 = vmul.f32 0.015625, %v1342_v16  ;;  %v4317_v26 = vmul.f32 0.015625, %v1339_v19  ;;  %v300_v12 = vld [vmem:[%s12294_s18 + $0x3f0] sm:$0xff] }
 0x100   : > { %v6712_v28 = vsel %vm6549_vm13, %v6711_v14, %v6707_v24  ;;  %v1577_v24 = vsel %vm1198_vm0, %v300_v12, 0.0 }
 0x101   : > { %v6721_v29 = vrot.slane %v4318_v25, %v12561_v13  ;;  %v6716_v30 = vrot.slane %v4317_v26, %v12556_v11  ;;  %1557 = vadd.xlane.f32.xlu1 %v1556_v21  ;;  %1554 = vadd.xlane.f32.xlu0 %v1553_v22  ;;  %v1580_v22 = vsel %vm1198_vm0, %v301_v17, 0.0 }
 0x102   : > { %v1348_v31 = vpop.xlane.xlu1 %1347  ;;  %v1345_v33 = vpop.xlane.xlu0 %1344 }
 0x103   : > { %v6717_v40 = vsel %vm6556_vm14, %v6716_v30, %v6712_v28  ;;  %v4320_v41 = vmul.f32 0.015625, %v1348_v31  ;;  %v4319_v42 = vmul.f32 0.015625, %v1345_v33  ;;  %v302_v28 = vld [vmem:[%s12294_s18 + $0x400] sm:$0xff] }
 0x104   : > { %v12707_v50 = vsel %vm6563_vm15, %v6721_v29, %v6717_v40  ;;  %v1583_v40 = vsel %vm1198_vm0, %v302_v28, 0.0 }
 0x105   : > { %v6730_v51 = vrot.slane %v4320_v41, %v12463_v35  ;;  %v6726_v52 = vrot.slane %v4319_v42, %v12457_v32  ;;  %1563 = vadd.xlane.f32.xlu1 %v1562_v37  ;;  %1560 = vadd.xlane.f32.xlu0 %v1559_v38  ;;  %v1586_v38 = vsel %vm1198_vm0, %v303_v20, 0.0 }
 0x106   : > { %v1354_v53 = vpop.xlane.xlu1 %1353  ;;  %v1351_v54 = vpop.xlane.xlu0 %1350 }
 0x107   : > { %v6731_v58 = vsel %vm6465_vm1, %v6730_v51, %v6726_v52  ;;  %v4322_v59 = vmul.f32 0.015625, %v1354_v53  ;;  %v4321_v60 = vmul.f32 0.015625, %v1351_v54  ;;  %v304_v51 = vld [vmem:[%s12294_s18 + $0x410] sm:$0xff] }
 0x109   : > { %v6740_v2 = vrot.slane %v4322_v59, %v12460_v34  ;;  %v6735_v3 = vrot.slane %v4321_v60, %v12466_v36  ;;  %1569 = vadd.xlane.f32.xlu1 %v1568_v55  ;;  %1566 = vadd.xlane.f32.xlu0 %v1565_v56  ;;  %v1589_v59 = vsel %vm1198_vm0, %v304_v51, 0.0 }
 0x10a   : > { %v1360_v4 = vpop.xlane.xlu1 %1359  ;;  %v1357_v5 = vpop.xlane.xlu0 %1356 }
 0x10b   : > { %v6736_v8 = vsel %vm6472_vm2, %v6735_v3, %v6731_v58  ;;  %v4324_v9 = vmul.f32 0.015625, %v1360_v4  ;;  %v4323_v10 = vmul.f32 0.015625, %v1357_v5  ;;  %v1592_v58 = vsel %vm1198_vm0, %v305_v49, 0.0  ;;  %v306_v3 = vld [vmem:[%s12294_s18 + $0x420] sm:$0xff] }
 0x10c   : > { %v6741_v14 = vsel %vm6479_vm3, %v6740_v2, %v6736_v8  ;;  %v307_v2 = vld [vmem:[%s12294_s18 + $0x428] sm:$0xff] }
 0x10d   : > { %v6750_v15 = vrot.slane %v4324_v9, %v12473_v46  ;;  %v6745_v16 = vrot.slane %v4323_v10, %v12476_v47  ;;  %1575 = vadd.xlane.f32.xlu1 %v1574_v6  ;;  %1572 = vadd.xlane.f32.xlu0 %v1571_v7  ;;  %v1598_v9 = vsel %vm1198_vm0, %v307_v2, 0.0  ;;  %v1595_v10 = vsel %vm1198_vm0, %v306_v3, 0.0 }
 0x10e   : > { %v1366_v19 = vpop.xlane.xlu1 %1365  ;;  %v1363_v21 = vpop.xlane.xlu0 %1362 }
 0x10f   : > { %v6746_v25 = vsel %vm6486_vm4, %v6745_v16, %v6741_v14  ;;  %v4326_v26 = vmul.f32 0.015625, %v1366_v19  ;;  %v4325_v27 = vmul.f32 0.015625, %v1363_v21  ;;  %v308_v16 = vld [vmem:[%s12294_s18 + $0x430] sm:$0xff] }
 0x110   : > { %v6751_v29 = vsel %vm6493_vm5, %v6750_v15, %v6746_v25  ;;  %v309_v15 = vld [vmem:[%s12294_s18 + $0x438] sm:$0xff] }
 0x111   : > { %v6760_v30 = vrot.slane %v4326_v26, %v12491_v0  ;;  %v6755_v31 = vrot.slane %v4325_v27, %v12494_v1  ;;  %1581 = vadd.xlane.f32.xlu1 %v1580_v22  ;;  %1578 = vadd.xlane.f32.xlu0 %v1577_v24  ;;  %v1604_v26 = vsel %vm1198_vm0, %v309_v15, 0.0  ;;  %v1601_v27 = vsel %vm1198_vm0, %v308_v16, 0.0 }
 0x112   : > { %v1372_v33 = vpop.xlane.xlu1 %1371  ;;  %v1369_v37 = vpop.xlane.xlu0 %1368 }
 0x113   : > { %v6756_v41 = vsel %vm6500_vm6, %v6755_v31, %v6751_v29  ;;  %v4328_v42 = vmul.f32 0.015625, %v1372_v33  ;;  %v4327_v48 = vmul.f32 0.015625, %v1369_v37  ;;  %v310_v31 = vld [vmem:[%s12294_s18 + $0x440] sm:$0xff] }
 0x114   : > { %v6761_v52 = vsel %vm17372_vm7, %v6760_v30, %v6756_v41  ;;  %v311_v30 = vld [vmem:[%s12294_s18 + $0x448] sm:$0xff] }
 0x115   : > { %v6770_v53 = vrot.slane %v4328_v42, %v12508_v18  ;;  %v6765_v54 = vrot.slane %v4327_v48, %v12514_v23  ;;  %1587 = vadd.xlane.f32.xlu1 %v1586_v38  ;;  %1584 = vadd.xlane.f32.xlu0 %v1583_v40  ;;  %v1610_v42 = vsel %vm1198_vm0, %v311_v30, 0.0  ;;  %v1607_v48 = vsel %vm1198_vm0, %v310_v31, 0.0 }
 0x116   : > { %v1378_v55 = vpop.xlane.xlu1 %1377  ;;  %v1375_v56 = vpop.xlane.xlu0 %1374 }
 0x117   : > { %v6766_v60 = vsel %vm17367_vm8, %v6765_v54, %v6761_v52  ;;  %v4330_v62 = vmul.f32 0.015625, %v1378_v55  ;;  %v4329_v63 = vmul.f32 0.015625, %v1375_v56  ;;  %v312_v54 = vld [vmem:[%s12294_s18 + $0x450] sm:$0xff] }
 0x118   : > { %v6771_v4 = vsel %vm17365_vm9, %v6770_v53, %v6766_v60  ;;  %v313_v53 = vld [vmem:[%s12294_s18 + $0x458] sm:$0xff] }
 0x119   : > { %v6780_v5 = vrot.slane %v4330_v62, %v12530_v43  ;;  %v6775_v6 = vrot.slane %v4329_v63, %v12524_v39  ;;  %1593 = vadd.xlane.f32.xlu1 %v1592_v58  ;;  %1590 = vadd.xlane.f32.xlu0 %v1589_v59  ;;  %v1616_v62 = vsel %vm1198_vm0, %v313_v53, 0.0  ;;  %v1613_v63 = vsel %vm1198_vm0, %v312_v54, 0.0 }
 0x11a   : > { %v1384_v7 = vpop.xlane.xlu1 %1383  ;;  %v1381_v8 = vpop.xlane.xlu0 %1380 }
 0x11b   : > { %v6776_v17 = vsel %vm6528_vm10, %v6775_v6, %v6771_v4  ;;  %v4332_v12 = vmul.f32 0.015625, %v1384_v7  ;;  %v4331_v14 = vmul.f32 0.015625, %v1381_v8  ;;  %v314_v6 = vld [vmem:[%s12294_s18 + $0x460] sm:$0xff] }
 0x11c   : > { %v6781_v19 = vsel %vm17364_vm11, %v6780_v5, %v6776_v17  ;;  %v315_v5 = vld [vmem:[%s12294_s18 + $0x468] sm:$0xff] }
 0x11d   : > { %v6790_v21 = vrot.slane %v4332_v12, %v12546_v61  ;;  %v6785_v22 = vrot.slane %v4331_v14, %v12540_v57  ;;  %1599 = vadd.xlane.f32.xlu1 %v1598_v9  ;;  %1596 = vadd.xlane.f32.xlu0 %v1595_v10  ;;  %v1622_v17 = vsel %vm1198_vm0, %v315_v5, 0.0  ;;  %v1619_v12 = vsel %vm1198_vm0, %v314_v6, 0.0 }
 0x11e   : > { %v1390_v24 = vpop.xlane.xlu1 %1389  ;;  %v1387_v25 = vpop.xlane.xlu0 %1386 }
 0x11f   : > { %v6786_v20 = vsel %vm6542_vm12, %v6785_v22, %v6781_v19  ;;  %v4334_v28 = vmul.f32 0.015625, %v1390_v24  ;;  %v4333_v29 = vmul.f32 0.015625, %v1387_v25  ;;  %v317_v19 = vld [vmem:[%s12294_s18 + $0x478] sm:$0xff] }
 0x120   : > { %v6791_v33 = vsel %vm6549_vm13, %v6790_v21, %v6786_v20  ;;  %v316_v21 = vld [vmem:[%s12294_s18 + $0x470] sm:$0xff]  ;;  %v1628_v20 = vsel %vm1198_vm0, %v317_v19, 0.0 }
 0x121   : > { %v6800_v37 = vrot.slane %v4334_v28, %v12561_v13  ;;  %v6795_v38 = vrot.slane %v4333_v29, %v12556_v11  ;;  %1605 = vadd.xlane.f32.xlu1 %v1604_v26  ;;  %1602 = vadd.xlane.f32.xlu0 %v1601_v27  ;;  %v1625_v28 = vsel %vm1198_vm0, %v316_v21, 0.0 }
 0x122   : > { %v1396_v40 = vpop.xlane.xlu1 %1395  ;;  %v1393_v41 = vpop.xlane.xlu0 %1392 }
 0x123   : > { %v6796_v49 = vsel %vm6556_vm14, %v6795_v38, %v6791_v33  ;;  %v4336_v51 = vmul.f32 0.015625, %v1396_v40  ;;  %v4335_v52 = vmul.f32 0.015625, %v1393_v41  ;;  %v319_v33 = vld [vmem:[%s12294_s18 + $0x488] sm:$0xff] }
 0x124   : > { %v12772_v55 = vsel %vm6563_vm15, %v6800_v37, %v6796_v49  ;;  %v318_v37 = vld [vmem:[%s12294_s18 + $0x480] sm:$0xff]  ;;  %v1634_v49 = vsel %vm1198_vm0, %v319_v33, 0.0 }
 0x125   : > { %v6809_v56 = vrot.slane %v4336_v51, %v12463_v35  ;;  %v6805_v58 = vrot.slane %v4335_v52, %v12457_v32  ;;  %1611 = vadd.xlane.f32.xlu1 %v1610_v42  ;;  %1608 = vadd.xlane.f32.xlu0 %v1607_v48  ;;  %v1631_v51 = vsel %vm1198_vm0, %v318_v37, 0.0 }
 0x126   : > { %v1402_v59 = vpop.xlane.xlu1 %1401  ;;  %v1399_v60 = vpop.xlane.xlu0 %1398 }
 0x127   : > { %v6810_v2 = vsel %vm6465_vm1, %v6809_v56, %v6805_v58  ;;  %v4338_v3 = vmul.f32 0.015625, %v1402_v59  ;;  %v4337_v4 = vmul.f32 0.015625, %v1399_v60  ;;  %v321_v56 = vld [vmem:[%s12294_s18 + $0x498] sm:$0xff]  ;;  %v320_v58 = vld [vmem:[%s12294_s18 + $0x490] sm:$0xff] }
 0x129   : > { %v6819_v7 = vrot.slane %v4338_v3, %v12460_v34  ;;  %v6814_v8 = vrot.slane %v4337_v4, %v12466_v36  ;;  %1617 = vadd.xlane.f32.xlu1 %v1616_v62  ;;  %1614 = vadd.xlane.f32.xlu0 %v1613_v63  ;;  %v1640_v3 = vsel %vm1198_vm0, %v321_v56, 0.0  ;;  %v1637_v4 = vsel %vm1198_vm0, %v320_v58, 0.0 }
 0x12a   : > { %v1408_v9 = vpop.xlane.xlu1 %1407  ;;  %v1405_v10 = vpop.xlane.xlu0 %1404 }
 0x12b   : > { %v6815_v14 = vsel %vm6472_vm2, %v6814_v8, %v6810_v2  ;;  %v4340_v15 = vmul.f32 0.015625, %v1408_v9  ;;  %v4339_v16 = vmul.f32 0.015625, %v1405_v10  ;;  %v323_v8 = vld [vmem:[%s12294_s18 + $0x4a8] sm:$0xff]  ;;  %v322_v9 = vld [vmem:[%s12294_s18 + $0x4a0] sm:$0xff] }
 0x12c   : > { %v6820_v22 = vsel %vm6479_vm3, %v6819_v7, %v6815_v14  ;;  %v1643_v19 = vsel %vm1198_vm0, %v322_v9, 0.0 }
 0x12d   : > { %v6829_v24 = vrot.slane %v4340_v15, %v12473_v46  ;;  %v6824_v25 = vrot.slane %v4339_v16, %v12476_v47  ;;  %1623 = vadd.xlane.f32.xlu1 %v1622_v17  ;;  %1620 = vadd.xlane.f32.xlu0 %v1619_v12  ;;  %v1646_v16 = vsel %vm1198_vm0, %v323_v8, 0.0 }
 0x12e   : > { %v1414_v26 = vpop.xlane.xlu1 %1413  ;;  %v1411_v27 = vpop.xlane.xlu0 %1410 }
 0x12f   : > { %v6825_v29 = vsel %vm6486_vm4, %v6824_v25, %v6820_v22  ;;  %v4342_v30 = vmul.f32 0.015625, %v1414_v26  ;;  %v4341_v31 = vmul.f32 0.015625, %v1411_v27  ;;  %v325_v25 = vld [vmem:[%s12294_s18 + $0x4b8] sm:$0xff]  ;;  %v324_v26 = vld [vmem:[%s12294_s18 + $0x4b0] sm:$0xff] }
 0x130   : > { %v6830_v38 = vsel %vm6493_vm5, %v6829_v24, %v6825_v29  ;;  %v1649_v33 = vsel %vm1198_vm0, %v324_v26, 0.0 }
 0x131   : > { %v6839_v40 = vrot.slane %v4342_v30, %v12491_v0  ;;  %v6834_v41 = vrot.slane %v4341_v31, %v12494_v1  ;;  %1629 = vadd.xlane.f32.xlu1 %v1628_v20  ;;  %1626 = vadd.xlane.f32.xlu0 %v1625_v28  ;;  %v1652_v31 = vsel %vm1198_vm0, %v325_v25, 0.0 }
 0x132   : > { %v1420_v42 = vpop.xlane.xlu1 %1419  ;;  %v1417_v48 = vpop.xlane.xlu0 %1416 }
 0x133   : > { %v6835_v52 = vsel %vm6500_vm6, %v6834_v41, %v6830_v38  ;;  %v4344_v53 = vmul.f32 0.015625, %v1420_v42  ;;  %v4343_v54 = vmul.f32 0.015625, %v1417_v48  ;;  %v327_v41 = vld [vmem:[%s12294_s18 + $0x4c8] sm:$0xff]  ;;  %v326_v42 = vld [vmem:[%s12294_s18 + $0x4c0] sm:$0xff] }
 0x134   : > { %v6840_v59 = vsel %vm17372_vm7, %v6839_v40, %v6835_v52  ;;  %v1655_v56 = vsel %vm1198_vm0, %v326_v42, 0.0 }
 0x135   : > { %v6849_v60 = vrot.slane %v4344_v53, %v12508_v18  ;;  %v6844_v62 = vrot.slane %v4343_v54, %v12514_v23  ;;  %1635 = vadd.xlane.f32.xlu1 %v1634_v49  ;;  %1632 = vadd.xlane.f32.xlu0 %v1631_v51  ;;  %v1658_v54 = vsel %vm1198_vm0, %v327_v41, 0.0 }
 0x136   : > { %v1426_v63 = vpop.xlane.xlu1 %1425  ;;  %v1423_v2 = vpop.xlane.xlu0 %1422 }
 0x137   : > { %v6845_v5 = vsel %vm17367_vm8, %v6844_v62, %v6840_v59  ;;  %v4346_v6 = vmul.f32 0.015625, %v1426_v63  ;;  %v4345_v7 = vmul.f32 0.015625, %v1423_v2  ;;  %v329_v62 = vld [vmem:[%s12294_s18 + $0x4d8] sm:$0xff]  ;;  %v328_v63 = vld [vmem:[%s12294_s18 + $0x4d0] sm:$0xff] }
 0x138   : > { %v6850_v10 = vsel %vm17365_vm9, %v6849_v60, %v6845_v5  ;;  %v1661_v8 = vsel %vm1198_vm0, %v328_v63, 0.0 }
 0x139   : > { %v6859_v17 = vrot.slane %v4346_v6, %v12530_v43  ;;  %v6854_v12 = vrot.slane %v4345_v7, %v12524_v39  ;;  %1641 = vadd.xlane.f32.xlu1 %v1640_v3  ;;  %1638 = vadd.xlane.f32.xlu0 %v1637_v4  ;;  %v1664_v7 = vsel %vm1198_vm0, %v329_v62, 0.0 }
 0x13a   : > { %v1432_v14 = vpop.xlane.xlu1 %1431  ;;  %v1429_v15 = vpop.xlane.xlu0 %1428 }
 0x13b   : > { %v6855_v21 = vsel %vm6528_vm10, %v6854_v12, %v6850_v10  ;;  %v4348_v22 = vmul.f32 0.015625, %v1432_v14  ;;  %v4347_v24 = vmul.f32 0.015625, %v1429_v15  ;;  %v331_v12 = vld [vmem:[%s12294_s18 + $0x4e8] sm:$0xff]  ;;  %v330_v14 = vld [vmem:[%s12294_s18 + $0x4e0] sm:$0xff] }
 0x13c   : > { %v6860_v27 = vsel %vm17364_vm11, %v6859_v17, %v6855_v21 }
 0x13d   : > { %v6869_v20 = vrot.slane %v4348_v22, %v12546_v61  ;;  %v6864_v28 = vrot.slane %v4347_v24, %v12540_v57  ;;  %1647 = vadd.xlane.f32.xlu1 %v1646_v16  ;;  %1644 = vadd.xlane.f32.xlu0 %v1643_v19  ;;  %v1670_v22 = vsel %vm1198_vm0, %v331_v12, 0.0  ;;  %v1667_v24 = vsel %vm1198_vm0, %v330_v14, 0.0 }
 0x13e   : > { %v1438_v29 = vpop.xlane.xlu1 %1437  ;;  %v1435_v30 = vpop.xlane.xlu0 %1434 }
 0x13f   : > { %v6865_v37 = vsel %vm6542_vm12, %v6864_v28, %v6860_v27  ;;  %v4350_v38 = vmul.f32 0.015625, %v1438_v29  ;;  %v4349_v40 = vmul.f32 0.015625, %v1435_v30  ;;  %v332_v28 = vld [vmem:[%s12294_s18 + $0x4f0] sm:$0xff] }
 0x140   : > { %v6870_v48 = vsel %vm6549_vm13, %v6869_v20, %v6865_v37  ;;  %v333_v20 = vld [vmem:[%s12294_s18 + $0x4f8] sm:$0xff] }
 0x141   : > { %v6879_v49 = vrot.slane %v4350_v38, %v12561_v13  ;;  %v6874_v51 = vrot.slane %v4349_v40, %v12556_v11  ;;  %1653 = vadd.xlane.f32.xlu1 %v1652_v31  ;;  %1650 = vadd.xlane.f32.xlu0 %v1649_v33  ;;  %v1676_v38 = vsel %vm1198_vm0, %v333_v20, 0.0  ;;  %v1673_v40 = vsel %vm1198_vm0, %v332_v28, 0.0 }
 0x142   : > { %v1444_v52 = vpop.xlane.xlu1 %1443  ;;  %v1441_v53 = vpop.xlane.xlu0 %1440 }
 0x143   : > { %v6875_v58 = vsel %vm6556_vm14, %v6874_v51, %v6870_v48  ;;  %v4352_v59 = vmul.f32 0.015625, %v1444_v52  ;;  %v4351_v60 = vmul.f32 0.015625, %v1441_v53  ;;  %v334_v51 = vld [vmem:[%s12294_s18 + $0x500] sm:$0xff] }
 0x144   : > { %v12837_v2 = vsel %vm6563_vm15, %v6879_v49, %v6875_v58  ;;  %v335_v49 = vld [vmem:[%s12294_s18 + $0x508] sm:$0xff] }
 0x145   : > { %v6888_v3 = vrot.slane %v4352_v59, %v12463_v35  ;;  %v6884_v4 = vrot.slane %v4351_v60, %v12457_v32  ;;  %1659 = vadd.xlane.f32.xlu1 %v1658_v54  ;;  %1656 = vadd.xlane.f32.xlu0 %v1655_v56  ;;  %v1682_v59 = vsel %vm1198_vm0, %v335_v49, 0.0  ;;  %v1679_v60 = vsel %vm1198_vm0, %v334_v51, 0.0 }
 0x146   : > { %v1450_v5 = vpop.xlane.xlu1 %1449  ;;  %v1447_v6 = vpop.xlane.xlu0 %1446 }
 0x147   : > { %v6889_v9 = vsel %vm6465_vm1, %v6888_v3, %v6884_v4  ;;  %v4354_v10 = vmul.f32 0.015625, %v1450_v5  ;;  %v4353_v17 = vmul.f32 0.015625, %v1447_v6  ;;  %v337_v4 = vld [vmem:[%s12294_s18 + $0x518] sm:$0xff]  ;;  %v336_v5 = vld [vmem:[%s12294_s18 + $0x510] sm:$0xff] }
 0x148   : > { %v1685_v12 = vsel %vm1198_vm0, %v336_v5, 0.0 }
 0x149   : > { %v6898_v15 = vrot.slane %v4354_v10, %v12460_v34  ;;  %v6893_v16 = vrot.slane %v4353_v17, %v12466_v36  ;;  %1665 = vadd.xlane.f32.xlu1 %v1664_v7  ;;  %1662 = vadd.xlane.f32.xlu0 %v1661_v8  ;;  %v1688_v17 = vsel %vm1198_vm0, %v337_v4, 0.0 }
 0x14a   : > { %v1456_v19 = vpop.xlane.xlu1 %1455  ;;  %v1453_v21 = vpop.xlane.xlu0 %1452 }
 0x14b   : > { %v6894_v25 = vsel %vm6472_vm2, %v6893_v16, %v6889_v9  ;;  %v4356_v26 = vmul.f32 0.015625, %v1456_v19  ;;  %v4355_v27 = vmul.f32 0.015625, %v1453_v21  ;;  %v339_v19 = vld [vmem:[%s12294_s18 + $0x528] sm:$0xff]  ;;  %v338_v21 = vld [vmem:[%s12294_s18 + $0x520] sm:$0xff] }
 0x14c   : > { %v6899_v29 = vsel %vm6479_vm3, %v6898_v15, %v6894_v25  ;;  %v1694_v20 = vsel %vm1198_vm0, %v339_v19, 0.0  ;;  %v1691_v28 = vsel %vm1198_vm0, %v338_v21, 0.0 }
 0x14d   : > { %v6908_v30 = vrot.slane %v4356_v26, %v12473_v46  ;;  %v6903_v31 = vrot.slane %v4355_v27, %v12476_v47  ;;  %1671 = vadd.xlane.f32.xlu1 %v1670_v22  ;;  %1668 = vadd.xlane.f32.xlu0 %v1667_v24 }
 0x14e   : > { %v1462_v33 = vpop.xlane.xlu1 %1461  ;;  %v1459_v37 = vpop.xlane.xlu0 %1458 }
 0x14f   : > { %v6904_v41 = vsel %vm6486_vm4, %v6903_v31, %v6899_v29  ;;  %v4358_v42 = vmul.f32 0.015625, %v1462_v33  ;;  %v4357_v48 = vmul.f32 0.015625, %v1459_v37  ;;  %v341_v33 = vld [vmem:[%s12294_s18 + $0x538] sm:$0xff]  ;;  %v340_v37 = vld [vmem:[%s12294_s18 + $0x530] sm:$0xff] }
 0x150   : > { %v6909_v52 = vsel %vm6493_vm5, %v6908_v30, %v6904_v41  ;;  %v1700_v49 = vsel %vm1198_vm0, %v341_v33, 0.0  ;;  %v1697_v51 = vsel %vm1198_vm0, %v340_v37, 0.0 }
 0x151   : > { %v6918_v53 = vrot.slane %v4358_v42, %v12491_v0  ;;  %v6913_v54 = vrot.slane %v4357_v48, %v12494_v1  ;;  %1677 = vadd.xlane.f32.xlu1 %v1676_v38  ;;  %1674 = vadd.xlane.f32.xlu0 %v1673_v40 }
 0x152   : > { %v1468_v56 = vpop.xlane.xlu1 %1467  ;;  %v1465_v58 = vpop.xlane.xlu0 %1464 }
 0x153   : > { %v6914_v62 = vsel %vm6500_vm6, %v6913_v54, %v6909_v52  ;;  %v4360_v63 = vmul.f32 0.015625, %v1468_v56  ;;  %v4359_v3 = vmul.f32 0.015625, %v1465_v58  ;;  %v343_v56 = vld [vmem:[%s12294_s18 + $0x548] sm:$0xff]  ;;  %v342_v58 = vld [vmem:[%s12294_s18 + $0x540] sm:$0xff] }
 0x154   : > { %v6919_v6 = vsel %vm17372_vm7, %v6918_v53, %v6914_v62  ;;  %v1706_v4 = vsel %vm1198_vm0, %v343_v56, 0.0  ;;  %v1703_v5 = vsel %vm1198_vm0, %v342_v58, 0.0 }
 0x155   : > { %v6928_v7 = vrot.slane %v4360_v63, %v12508_v18  ;;  %v6923_v8 = vrot.slane %v4359_v3, %v12514_v23  ;;  %1683 = vadd.xlane.f32.xlu1 %v1682_v59  ;;  %1680 = vadd.xlane.f32.xlu0 %v1679_v60 }
 0x156   : > { %v1474_v9 = vpop.xlane.xlu1 %1473  ;;  %v1471_v10 = vpop.xlane.xlu0 %1470 }
 0x157   : > { %v6924_v14 = vsel %vm17367_vm8, %v6923_v8, %v6919_v6  ;;  %v4362_v15 = vmul.f32 0.015625, %v1474_v9  ;;  %v4361_v16 = vmul.f32 0.015625, %v1471_v10  ;;  %v345_v9 = vld [vmem:[%s12294_s18 + $0x558] sm:$0xff]  ;;  %v344_v10 = vld [vmem:[%s12294_s18 + $0x550] sm:$0xff] }
 0x158   : > { %v6929_v22 = vsel %vm17365_vm9, %v6928_v7, %v6924_v14  ;;  %v1712_v19 = vsel %vm1198_vm0, %v345_v9, 0.0  ;;  %v1709_v21 = vsel %vm1198_vm0, %v344_v10, 0.0 }
 0x159   : > { %v6938_v24 = vrot.slane %v4362_v15, %v12530_v43  ;;  %v6933_v25 = vrot.slane %v4361_v16, %v12524_v39  ;;  %1689 = vadd.xlane.f32.xlu1 %v1688_v17  ;;  %1686 = vadd.xlane.f32.xlu0 %v1685_v12 }
 0x15a   : > { %v1480_v26 = vpop.xlane.xlu1 %1479  ;;  %v1477_v27 = vpop.xlane.xlu0 %1476 }
 0x15b   : > { %v6934_v29 = vsel %vm6528_vm10, %v6933_v25, %v6929_v22  ;;  %v4364_v30 = vmul.f32 0.015625, %v1480_v26  ;;  %v4363_v31 = vmul.f32 0.015625, %v1477_v27  ;;  %v347_v26 = vld [vmem:[%s12294_s18 + $0x568] sm:$0xff]  ;;  %v346_v27 = vld [vmem:[%s12294_s18 + $0x560] sm:$0xff] }
 0x15c   : > { %v6939_v38 = vsel %vm17364_vm11, %v6938_v24, %v6934_v29  ;;  %v1715_v33 = vsel %vm1198_vm0, %v346_v27, 0.0 }
 0x15d   : > { %v6948_v40 = vrot.slane %v4364_v30, %v12546_v61  ;;  %v6943_v41 = vrot.slane %v4363_v31, %v12540_v57  ;;  %1695 = vadd.xlane.f32.xlu1 %v1694_v20  ;;  %1692 = vadd.xlane.f32.xlu0 %v1691_v28  ;;  %v1718_v31 = vsel %vm1198_vm0, %v347_v26, 0.0 }
 0x15e   : > { %v1486_v42 = vpop.xlane.xlu1 %1485  ;;  %v1483_v48 = vpop.xlane.xlu0 %1482 }
 0x15f   : > { %v6944_v52 = vsel %vm6542_vm12, %v6943_v41, %v6939_v38  ;;  %v4366_v53 = vmul.f32 0.015625, %v1486_v42  ;;  %v4365_v54 = vmul.f32 0.015625, %v1483_v48  ;;  %v349_v41 = vld [vmem:[%s12294_s18 + $0x578] sm:$0xff]  ;;  %v348_v42 = vld [vmem:[%s12294_s18 + $0x570] sm:$0xff] }
 0x160   : > { %v6949_v59 = vsel %vm6549_vm13, %v6948_v40, %v6944_v52  ;;  %v1721_v56 = vsel %vm1198_vm0, %v348_v42, 0.0 }
 0x161   : > { %v6958_v60 = vrot.slane %v4366_v53, %v12561_v13  ;;  %v6953_v62 = vrot.slane %v4365_v54, %v12556_v11  ;;  %1701 = vadd.xlane.f32.xlu1 %v1700_v49  ;;  %1698 = vadd.xlane.f32.xlu0 %v1697_v51  ;;  %v1724_v54 = vsel %vm1198_vm0, %v349_v41, 0.0 }
 0x162   : > { %v1492_v63 = vpop.xlane.xlu1 %1491  ;;  %v1489_v3 = vpop.xlane.xlu0 %1488 }
 0x163   : > { %v6954_v6 = vsel %vm6556_vm14, %v6953_v62, %v6949_v59  ;;  %v4368_v7 = vmul.f32 0.015625, %v1492_v63  ;;  %v4367_v8 = vmul.f32 0.015625, %v1489_v3  ;;  %v351_v62 = vld [vmem:[%s12294_s18 + $0x588] sm:$0xff]  ;;  %v350_v63 = vld [vmem:[%s12294_s18 + $0x580] sm:$0xff] }
 0x164   : > { %v12902_v17 = vsel %vm6563_vm15, %v6958_v60, %v6954_v6  ;;  %v1727_v9 = vsel %vm1198_vm0, %v350_v63, 0.0 }
 0x165   : > { %v6967_v12 = vrot.slane %v4368_v7, %v12463_v35  ;;  %v6963_v14 = vrot.slane %v4367_v8, %v12457_v32  ;;  %1707 = vadd.xlane.f32.xlu1 %v1706_v4  ;;  %1704 = vadd.xlane.f32.xlu0 %v1703_v5  ;;  %v1730_v8 = vsel %vm1198_vm0, %v351_v62, 0.0 }
 0x166   : > { %v1498_v15 = vpop.xlane.xlu1 %1497  ;;  %v1495_v16 = vpop.xlane.xlu0 %1494 }
 0x167   : > { %v6968_v22 = vsel %vm6465_vm1, %v6967_v12, %v6963_v14  ;;  %v4370_v24 = vmul.f32 0.015625, %v1498_v15  ;;  %v4369_v25 = vmul.f32 0.015625, %v1495_v16  ;;  %v353_v15 = vld [vmem:[%s12294_s18 + $0x598] sm:$0xff]  ;;  %v352_v16 = vld [vmem:[%s12294_s18 + $0x590] sm:$0xff] }
 0x168   : > { %v1736_v26 = vsel %vm1198_vm0, %v353_v15, 0.0  ;;  %v1733_v27 = vsel %vm1198_vm0, %v352_v16, 0.0 }
 0x169   : > { %v6977_v20 = vrot.slane %v4370_v24, %v12460_v34  ;;  %v6972_v28 = vrot.slane %v4369_v25, %v12466_v36  ;;  %1713 = vadd.xlane.f32.xlu1 %v1712_v19  ;;  %1710 = vadd.xlane.f32.xlu0 %v1709_v21 }
 0x16a   : > { %v1504_v29 = vpop.xlane.xlu1 %1503  ;;  %v1501_v30 = vpop.xlane.xlu0 %1500 }
 0x16b   : > { %v6973_v37 = vsel %vm6472_vm2, %v6972_v28, %v6968_v22  ;;  %v4372_v38 = vmul.f32 0.015625, %v1504_v29  ;;  %v4371_v40 = vmul.f32 0.015625, %v1501_v30  ;;  %v355_v30 = vld [vmem:[%s12294_s18 + $0x5a8] sm:$0xff] }
 0x16c   : > { %v6978_v48 = vsel %vm6479_vm3, %v6977_v20, %v6973_v37  ;;  %v1742_v42 = vsel %vm1198_vm0, %v355_v30, 0.0 }
 0x16d   : > { %v6987_v49 = vrot.slane %v4372_v38, %v12473_v46  ;;  %v6982_v51 = vrot.slane %v4371_v40, %v12476_v47  ;;  %1719 = vadd.xlane.f32.xlu1 %v1718_v31  ;;  %1716 = vadd.xlane.f32.xlu0 %v1715_v33  ;;  %v354_v31 = vld [vmem:[%s12294_s18 + $0x5a0] sm:$0xff] }
 0x16e   : > { %v1510_v52 = vpop.xlane.xlu1 %1509  ;;  %v1507_v53 = vpop.xlane.xlu0 %1506 }
 0x16f   : > { %v6983_v58 = vsel %vm6486_vm4, %v6982_v51, %v6978_v48  ;;  %v4374_v59 = vmul.f32 0.015625, %v1510_v52  ;;  %v4373_v60 = vmul.f32 0.015625, %v1507_v53  ;;  %v1739_v48 = vsel %vm1198_vm0, %v354_v31, 0.0  ;;  %v357_v53 = vld [vmem:[%s12294_s18 + $0x5b8] sm:$0xff] }
 0x170   : > { %v6988_v3 = vsel %vm6493_vm5, %v6987_v49, %v6983_v58  ;;  %v1748_v63 = vsel %vm1198_vm0, %v357_v53, 0.0 }
 0x171   : > { %v6997_v4 = vrot.slane %v4374_v59, %v12491_v0  ;;  %v6992_v5 = vrot.slane %v4373_v60, %v12494_v1  ;;  %1725 = vadd.xlane.f32.xlu1 %v1724_v54  ;;  %1722 = vadd.xlane.f32.xlu0 %v1721_v56  ;;  %v356_v54 = vld [vmem:[%s12294_s18 + $0x5b0] sm:$0xff] }
 0x172   : > { %v1516_v6 = vpop.xlane.xlu1 %1515  ;;  %v1513_v7 = vpop.xlane.xlu0 %1512 }
 0x173   : > { %v6993_v10 = vsel %vm6500_vm6, %v6992_v5, %v6988_v3  ;;  %v4376_v12 = vmul.f32 0.015625, %v1516_v6  ;;  %v4375_v14 = vmul.f32 0.015625, %v1513_v7  ;;  %v1745_v3 = vsel %vm1198_vm0, %v356_v54, 0.0  ;;  %v359_v7 = vld [vmem:[%s12294_s18 + $0x5c8] sm:$0xff] }
 0x174   : > { %v6998_v19 = vsel %vm17372_vm7, %v6997_v4, %v6993_v10  ;;  %v1754_v16 = vsel %vm1198_vm0, %v359_v7, 0.0 }
 0x175   : > { %v7007_v21 = vrot.slane %v4376_v12, %v12508_v18  ;;  %v7002_v22 = vrot.slane %v4375_v14, %v12514_v23  ;;  %1731 = vadd.xlane.f32.xlu1 %v1730_v8  ;;  %1728 = vadd.xlane.f32.xlu0 %v1727_v9  ;;  %v358_v8 = vld [vmem:[%s12294_s18 + $0x5c0] sm:$0xff] }
 0x176   : > { %v1522_v24 = vpop.xlane.xlu1 %1521  ;;  %v1519_v25 = vpop.xlane.xlu0 %1518 }
 0x177   : > { %v7003_v20 = vsel %vm17367_vm8, %v7002_v22, %v6998_v19  ;;  %v4378_v28 = vmul.f32 0.015625, %v1522_v24  ;;  %v4377_v29 = vmul.f32 0.015625, %v1519_v25  ;;  %v1751_v19 = vsel %vm1198_vm0, %v358_v8, 0.0  ;;  %v361_v25 = vld [vmem:[%s12294_s18 + $0x5d8] sm:$0xff] }
 0x178   : > { %v7008_v33 = vsel %vm17365_vm9, %v7007_v21, %v7003_v20  ;;  %v1760_v31 = vsel %vm1198_vm0, %v361_v25, 0.0 }
 0x179   : > { %v7017_v37 = vrot.slane %v4378_v28, %v12530_v43  ;;  %v7012_v38 = vrot.slane %v4377_v29, %v12524_v39  ;;  %1737 = vadd.xlane.f32.xlu1 %v1736_v26  ;;  %1734 = vadd.xlane.f32.xlu0 %v1733_v27  ;;  %v360_v26 = vld [vmem:[%s12294_s18 + $0x5d0] sm:$0xff] }
 0x17a   : > { %v1528_v40 = vpop.xlane.xlu1 %1527  ;;  %v1525_v41 = vpop.xlane.xlu0 %1524 }
 0x17b   : > { %v7013_v49 = vsel %vm6528_vm10, %v7012_v38, %v7008_v33  ;;  %v4380_v51 = vmul.f32 0.015625, %v1528_v40  ;;  %v4379_v52 = vmul.f32 0.015625, %v1525_v41  ;;  %v1757_v33 = vsel %vm1198_vm0, %v360_v26, 0.0  ;;  %v363_v41 = vld [vmem:[%s12294_s18 + $0x5e8] sm:$0xff] }
 0x17c   : > { %v7018_v56 = vsel %vm17364_vm11, %v7017_v37, %v7013_v49  ;;  %v1766_v53 = vsel %vm1198_vm0, %v363_v41, 0.0 }
 0x17d   : > { %v7027_v58 = vrot.slane %v4380_v51, %v12546_v61  ;;  %v7022_v59 = vrot.slane %v4379_v52, %v12540_v57  ;;  %1743 = vadd.xlane.f32.xlu1 %v1742_v42  ;;  %1740 = vadd.xlane.f32.xlu0 %v1739_v48  ;;  %v362_v42 = vld [vmem:[%s12294_s18 + $0x5e0] sm:$0xff] }
 0x17e   : > { %v1534_v60 = vpop.xlane.xlu1 %1533  ;;  %v1531_v62 = vpop.xlane.xlu0 %1530  ;;  %v1763_v54 = vsel %vm1198_vm0, %v362_v42, 0.0 }
 0x17f   : > { %v7023_v4 = vsel %vm6542_vm12, %v7022_v59, %v7018_v56  ;;  %v4382_v5 = vmul.f32 0.015625, %v1534_v60  ;;  %v4381_v6 = vmul.f32 0.015625, %v1531_v62  ;;  %v365_v60 = vld [vmem:[%s12294_s18 + $0x5f8] sm:$0xff]  ;;  %v364_v62 = vld [vmem:[%s12294_s18 + $0x5f0] sm:$0xff] }
 0x180   : > { %v7028_v9 = vsel %vm6549_vm13, %v7027_v58, %v7023_v4  ;;  %v1772_v7 = vsel %vm1198_vm0, %v365_v60, 0.0  ;;  %v1769_v8 = vsel %vm1198_vm0, %v364_v62, 0.0 }
 0x181   : > { %v7037_v10 = vrot.slane %v4382_v5, %v12561_v13  ;;  %v7032_v12 = vrot.slane %v4381_v6, %v12556_v11  ;;  %1749 = vadd.xlane.f32.xlu1 %v1748_v63  ;;  %1746 = vadd.xlane.f32.xlu0 %v1745_v3 }
 0x182   : > { %v1540_v14 = vpop.xlane.xlu1 %1539  ;;  %v1537_v15 = vpop.xlane.xlu0 %1536 }
 0x183   : > { %v7033_v21 = vsel %vm6556_vm14, %v7032_v12, %v7028_v9  ;;  %v4384_v22 = vmul.f32 0.015625, %v1540_v14  ;;  %v4383_v24 = vmul.f32 0.015625, %v1537_v15  ;;  %v367_v14 = vld [vmem:[%s12294_s18 + $0x608] sm:$0xff]  ;;  %v366_v15 = vld [vmem:[%s12294_s18 + $0x600] sm:$0xff] }
 0x184   : > { %v12967_v27 = vsel %vm6563_vm15, %v7037_v10, %v7033_v21  ;;  %v1778_v25 = vsel %vm1198_vm0, %v367_v14, 0.0  ;;  %v1775_v26 = vsel %vm1198_vm0, %v366_v15, 0.0 }
 0x185   : > { %v7046_v20 = vrot.slane %v4384_v22, %v12463_v35  ;;  %v7042_v28 = vrot.slane %v4383_v24, %v12457_v32  ;;  %1755 = vadd.xlane.f32.xlu1 %v1754_v16  ;;  %1752 = vadd.xlane.f32.xlu0 %v1751_v19 }
 0x186   : > { %v1546_v29 = vpop.xlane.xlu1 %1545  ;;  %v1543_v30 = vpop.xlane.xlu0 %1542 }
 0x187   : > { %v7047_v37 = vsel %vm6465_vm1, %v7046_v20, %v7042_v28  ;;  %v4386_v38 = vmul.f32 0.015625, %v1546_v29  ;;  %v4385_v40 = vmul.f32 0.015625, %v1543_v30  ;;  %v369_v30 = vld [vmem:[%s12294_s18 + $0x618] sm:$0xff] }
 0x188   : > { %v1784_v42 = vsel %vm1198_vm0, %v369_v30, 0.0 }
 0x189   : > { %v7056_v48 = vrot.slane %v4386_v38, %v12460_v34  ;;  %v7051_v49 = vrot.slane %v4385_v40, %v12466_v36  ;;  %1761 = vadd.xlane.f32.xlu1 %v1760_v31  ;;  %1758 = vadd.xlane.f32.xlu0 %v1757_v33  ;;  %v368_v31 = vld [vmem:[%s12294_s18 + $0x610] sm:$0xff] }
 0x18a   : > { %v1552_v51 = vpop.xlane.xlu1 %1551  ;;  %v1549_v52 = vpop.xlane.xlu0 %1548 }
 0x18b   : > { %v7052_v56 = vsel %vm6472_vm2, %v7051_v49, %v7047_v37  ;;  %v4388_v58 = vmul.f32 0.015625, %v1552_v51  ;;  %v4387_v59 = vmul.f32 0.015625, %v1549_v52 }
 0x18c   : > { %v7057_v63 = vsel %vm6479_vm3, %v7056_v48, %v7052_v56  ;;  %v1781_v48 = vsel %vm1198_vm0, %v368_v31, 0.0 }
 0x18d   : > { %v7066_v3 = vrot.slane %v4388_v58, %v12473_v46  ;;  %v7061_v4 = vrot.slane %v4387_v59, %v12476_v47  ;;  %1767 = vadd.xlane.f32.xlu1 %v1766_v53  ;;  %1764 = vadd.xlane.f32.xlu0 %v1763_v54  ;;  %v371_v53 = vld [vmem:[%s12294_s18 + $0x628] sm:$0xff]  ;;  %v370_v54 = vld [vmem:[%s12294_s18 + $0x620] sm:$0xff] }
 0x18e   : > { %v1558_v5 = vpop.xlane.xlu1 %1557  ;;  %v1555_v6 = vpop.xlane.xlu0 %1554 }
 0x18f   : > { %v7062_v9 = vsel %vm6486_vm4, %v7061_v4, %v7057_v63  ;;  %v4390_v10 = vmul.f32 0.015625, %v1558_v5  ;;  %v4389_v12 = vmul.f32 0.015625, %v1555_v6  ;;  %v1790_v63 = vsel %vm1198_vm0, %v371_v53, 0.0 }
 0x190   : > { %v7067_v16 = vsel %vm6493_vm5, %v7066_v3, %v7062_v9  ;;  %v1787_v3 = vsel %vm1198_vm0, %v370_v54, 0.0 }
 0x191   : > { %v7076_v19 = vrot.slane %v4390_v10, %v12491_v0  ;;  %v7071_v21 = vrot.slane %v4389_v12, %v12494_v1  ;;  %1773 = vadd.xlane.f32.xlu1 %v1772_v7  ;;  %1770 = vadd.xlane.f32.xlu0 %v1769_v8  ;;  %v373_v7 = vld [vmem:[%s12294_s18 + $0x638] sm:$0xff]  ;;  %v372_v8 = vld [vmem:[%s12294_s18 + $0x630] sm:$0xff] }
 0x192   : > { %v1564_v22 = vpop.xlane.xlu1 %1563  ;;  %v1561_v24 = vpop.xlane.xlu0 %1560 }
 0x193   : > { %v7072_v20 = vsel %vm6500_vm6, %v7071_v21, %v7067_v16  ;;  %v4392_v28 = vmul.f32 0.015625, %v1564_v22  ;;  %v4391_v29 = vmul.f32 0.015625, %v1561_v24  ;;  %v1796_v16 = vsel %vm1198_vm0, %v373_v7, 0.0 }
 0x194   : > { %v7077_v33 = vsel %vm17372_vm7, %v7076_v19, %v7072_v20  ;;  %v1793_v19 = vsel %vm1198_vm0, %v372_v8, 0.0 }
 0x195   : > { %v7086_v37 = vrot.slane %v4392_v28, %v12508_v18  ;;  %v7081_v38 = vrot.slane %v4391_v29, %v12514_v23  ;;  %1779 = vadd.xlane.f32.xlu1 %v1778_v25  ;;  %1776 = vadd.xlane.f32.xlu0 %v1775_v26  ;;  %v375_v25 = vld [vmem:[%s12294_s18 + $0x648] sm:$0xff]  ;;  %v374_v26 = vld [vmem:[%s12294_s18 + $0x640] sm:$0xff] }
 0x196   : > { %v1570_v40 = vpop.xlane.xlu1 %1569  ;;  %v1567_v41 = vpop.xlane.xlu0 %1566 }
 0x197   : > { %v7082_v49 = vsel %vm17367_vm8, %v7081_v38, %v7077_v33  ;;  %v4394_v51 = vmul.f32 0.015625, %v1570_v40  ;;  %v4393_v52 = vmul.f32 0.015625, %v1567_v41  ;;  %v1802_v33 = vsel %vm1198_vm0, %v375_v25, 0.0 }
 0x198   : > { %v7087_v56 = vsel %vm17365_vm9, %v7086_v37, %v7082_v49  ;;  %v1799_v37 = vsel %vm1198_vm0, %v374_v26, 0.0 }
 0x199   : > { %v7096_v58 = vrot.slane %v4394_v51, %v12530_v43  ;;  %v7091_v59 = vrot.slane %v4393_v52, %v12524_v39  ;;  %1785 = vadd.xlane.f32.xlu1 %v1784_v42  ;;  %1782 = vadd.xlane.f32.xlu0 %v1781_v48  ;;  %v377_v42 = vld [vmem:[%s12294_s18 + $0x658] sm:$0xff]  ;;  %v376_v48 = vld [vmem:[%s12294_s18 + $0x650] sm:$0xff] }
 0x19a   : > { %v1576_v60 = vpop.xlane.xlu1 %1575  ;;  %v1573_v62 = vpop.xlane.xlu0 %1572 }
 0x19b   : > { %v7092_v4 = vsel %vm6528_vm10, %v7091_v59, %v7087_v56  ;;  %v4396_v5 = vmul.f32 0.015625, %v1576_v60  ;;  %v4395_v6 = vmul.f32 0.015625, %v1573_v62  ;;  %v1808_v56 = vsel %vm1198_vm0, %v377_v42, 0.0 }
 0x19c   : > { %v7097_v9 = vsel %vm17364_vm11, %v7096_v58, %v7092_v4  ;;  %v1805_v58 = vsel %vm1198_vm0, %v376_v48, 0.0 }
 0x19d   : > { %v7106_v10 = vrot.slane %v4396_v5, %v12546_v61  ;;  %v7101_v12 = vrot.slane %v4395_v6, %v12540_v57  ;;  %1791 = vadd.xlane.f32.xlu1 %v1790_v63  ;;  %1788 = vadd.xlane.f32.xlu0 %v1787_v3  ;;  %v379_v63 = vld [vmem:[%s12294_s18 + $0x668] sm:$0xff]  ;;  %v378_v3 = vld [vmem:[%s12294_s18 + $0x660] sm:$0xff] }
 0x19e   : > { %v1582_v14 = vpop.xlane.xlu1 %1581  ;;  %v1579_v15 = vpop.xlane.xlu0 %1578  ;;  %v1814_v8 = vsel %vm1198_vm0, %v379_v63, 0.0 }
 0x19f   : > { %v7102_v21 = vsel %vm6542_vm12, %v7101_v12, %v7097_v9  ;;  %v4398_v22 = vmul.f32 0.015625, %v1582_v14  ;;  %v4397_v24 = vmul.f32 0.015625, %v1579_v15  ;;  %v1811_v9 = vsel %vm1198_vm0, %v378_v3, 0.0  ;;  %v381_v15 = vld [vmem:[%s12294_s18 + $0x678] sm:$0xff] }
 0x1a0   : > { %v7107_v20 = vsel %vm6549_vm13, %v7106_v10, %v7102_v21  ;;  %v1820_v26 = vsel %vm1198_vm0, %v381_v15, 0.0 }
 0x1a1   : > { %v7116_v28 = vrot.slane %v4398_v22, %v12561_v13  ;;  %v7111_v29 = vrot.slane %v4397_v24, %v12556_v11  ;;  %1797 = vadd.xlane.f32.xlu1 %v1796_v16  ;;  %1794 = vadd.xlane.f32.xlu0 %v1793_v19  ;;  %v380_v16 = vld [vmem:[%s12294_s18 + $0x670] sm:$0xff] }
 0x1a2   : > { %v1588_v30 = vpop.xlane.xlu1 %1587  ;;  %v1585_v31 = vpop.xlane.xlu0 %1584 }
 0x1a3   : > { %v7112_v38 = vsel %vm6556_vm14, %v7111_v29, %v7107_v20  ;;  %v4400_v40 = vmul.f32 0.015625, %v1588_v30  ;;  %v4399_v41 = vmul.f32 0.015625, %v1585_v31  ;;  %v1817_v20 = vsel %vm1198_vm0, %v380_v16, 0.0  ;;  %v383_v31 = vld [vmem:[%s12294_s18 + $0x688] sm:$0xff] }
 0x1a4   : > { %v13032_v49 = vsel %vm6563_vm15, %v7116_v28, %v7112_v38  ;;  %v1826_v48 = vsel %vm1198_vm0, %v383_v31, 0.0 }
 0x1a5   : > { %v7125_v51 = vrot.slane %v4400_v40, %v12463_v35  ;;  %v7121_v52 = vrot.slane %v4399_v41, %v12457_v32  ;;  %1803 = vadd.xlane.f32.xlu1 %v1802_v33  ;;  %1800 = vadd.xlane.f32.xlu0 %v1799_v37  ;;  %v382_v33 = vld [vmem:[%s12294_s18 + $0x680] sm:$0xff] }
 0x1a6   : > { %v1594_v53 = vpop.xlane.xlu1 %1593  ;;  %v1591_v54 = vpop.xlane.xlu0 %1590 }
 0x1a7   : > { %v7126_v59 = vsel %vm6465_vm1, %v7125_v51, %v7121_v52  ;;  %v4402_v60 = vmul.f32 0.015625, %v1594_v53  ;;  %v4401_v62 = vmul.f32 0.015625, %v1591_v54  ;;  %v1823_v51 = vsel %vm1198_vm0, %v382_v33, 0.0 }
 0x1a9   : > { %v7135_v4 = vrot.slane %v4402_v60, %v12460_v34  ;;  %v7130_v5 = vrot.slane %v4401_v62, %v12466_v36  ;;  %1809 = vadd.xlane.f32.xlu1 %v1808_v56  ;;  %1806 = vadd.xlane.f32.xlu0 %v1805_v58  ;;  %v385_v56 = vld [vmem:[%s12294_s18 + $0x698] sm:$0xff]  ;;  %v384_v58 = vld [vmem:[%s12294_s18 + $0x690] sm:$0xff] }
 0x1aa   : > { %v1600_v6 = vpop.xlane.xlu1 %1599  ;;  %v1597_v7 = vpop.xlane.xlu0 %1596 }
 0x1ab   : > { %v7131_v10 = vsel %vm6472_vm2, %v7130_v5, %v7126_v59  ;;  %v4404_v12 = vmul.f32 0.015625, %v1600_v6  ;;  %v4403_v14 = vmul.f32 0.015625, %v1597_v7  ;;  %v1829_v5 = vsel %vm1198_vm0, %v384_v58, 0.0 }
 0x1ac   : > { %v7136_v19 = vsel %vm6479_vm3, %v7135_v4, %v7131_v10  ;;  %v1832_v4 = vsel %vm1198_vm0, %v385_v56, 0.0  ;;  %v386_v10 = vld [vmem:[%s12294_s18 + $0x6a0] sm:$0xff] }
 0x1ad   : > { %v7145_v21 = vrot.slane %v4404_v12, %v12473_v46  ;;  %v7140_v22 = vrot.slane %v4403_v14, %v12476_v47  ;;  %1815 = vadd.xlane.f32.xlu1 %v1814_v8  ;;  %1812 = vadd.xlane.f32.xlu0 %v1811_v9  ;;  %v387_v9 = vld [vmem:[%s12294_s18 + $0x6a8] sm:$0xff] }
 0x1ae   : > { %v1606_v24 = vpop.xlane.xlu1 %1605  ;;  %v1603_v25 = vpop.xlane.xlu0 %1602 }
 0x1af   : > { %v7141_v28 = vsel %vm6486_vm4, %v7140_v22, %v7136_v19  ;;  %v4406_v29 = vmul.f32 0.015625, %v1606_v24  ;;  %v4405_v30 = vmul.f32 0.015625, %v1603_v25  ;;  %v1835_v22 = vsel %vm1198_vm0, %v386_v10, 0.0 }
 0x1b0   : > { %v7146_v37 = vsel %vm6493_vm5, %v7145_v21, %v7141_v28  ;;  %v1838_v21 = vsel %vm1198_vm0, %v387_v9, 0.0  ;;  %v388_v28 = vld [vmem:[%s12294_s18 + $0x6b0] sm:$0xff] }
 0x1b1   : > { %v7155_v38 = vrot.slane %v4406_v29, %v12491_v0  ;;  %v7150_v40 = vrot.slane %v4405_v30, %v12494_v1  ;;  %1821 = vadd.xlane.f32.xlu1 %v1820_v26  ;;  %1818 = vadd.xlane.f32.xlu0 %v1817_v20  ;;  %v389_v20 = vld [vmem:[%s12294_s18 + $0x6b8] sm:$0xff] }
 0x1b2   : > { %v1612_v41 = vpop.xlane.xlu1 %1611  ;;  %v1609_v42 = vpop.xlane.xlu0 %1608 }
 0x1b3   : > { %v7151_v52 = vsel %vm6500_vm6, %v7150_v40, %v7146_v37  ;;  %v4408_v53 = vmul.f32 0.015625, %v1612_v41  ;;  %v4407_v54 = vmul.f32 0.015625, %v1609_v42  ;;  %v1841_v40 = vsel %vm1198_vm0, %v388_v28, 0.0 }
 0x1b4   : > { %v7156_v59 = vsel %vm17372_vm7, %v7155_v38, %v7151_v52  ;;  %v1844_v38 = vsel %vm1198_vm0, %v389_v20, 0.0  ;;  %v390_v52 = vld [vmem:[%s12294_s18 + $0x6c0] sm:$0xff] }
 0x1b5   : > { %v7165_v60 = vrot.slane %v4408_v53, %v12508_v18  ;;  %v7160_v62 = vrot.slane %v4407_v54, %v12514_v23  ;;  %1827 = vadd.xlane.f32.xlu1 %v1826_v48  ;;  %1824 = vadd.xlane.f32.xlu0 %v1823_v51  ;;  %v391_v51 = vld [vmem:[%s12294_s18 + $0x6c8] sm:$0xff] }
 0x1b6   : > { %v1618_v63 = vpop.xlane.xlu1 %1617  ;;  %v1615_v3 = vpop.xlane.xlu0 %1614 }
 0x1b7   : > { %v7161_v6 = vsel %vm17367_vm8, %v7160_v62, %v7156_v59  ;;  %v4410_v7 = vmul.f32 0.015625, %v1618_v63  ;;  %v4409_v8 = vmul.f32 0.015625, %v1615_v3  ;;  %v1847_v62 = vsel %vm1198_vm0, %v390_v52, 0.0 }
 0x1b8   : > { %v7166_v12 = vsel %vm17365_vm9, %v7165_v60, %v7161_v6  ;;  %v1850_v60 = vsel %vm1198_vm0, %v391_v51, 0.0  ;;  %v392_v6 = vld [vmem:[%s12294_s18 + $0x6d0] sm:$0xff] }
 0x1b9   : > { %v7175_v14 = vrot.slane %v4410_v7, %v12530_v43  ;;  %v7170_v15 = vrot.slane %v4409_v8, %v12524_v39  ;;  %1833 = vadd.xlane.f32.xlu1 %v1832_v4  ;;  %1830 = vadd.xlane.f32.xlu0 %v1829_v5  ;;  %v393_v5 = vld [vmem:[%s12294_s18 + $0x6d8] sm:$0xff] }
 0x1ba   : > { %v1624_v16 = vpop.xlane.xlu1 %1623  ;;  %v1621_v19 = vpop.xlane.xlu0 %1620 }
 0x1bb   : > { %v7171_v24 = vsel %vm6528_vm10, %v7170_v15, %v7166_v12  ;;  %v4412_v25 = vmul.f32 0.015625, %v1624_v16  ;;  %v4411_v26 = vmul.f32 0.015625, %v1621_v19  ;;  %v1856_v15 = vsel %vm1198_vm0, %v393_v5, 0.0 }
 0x1bc   : > { %v7176_v29 = vsel %vm17364_vm11, %v7175_v14, %v7171_v24  ;;  %vm11542_vm11 = vcmask 1041409   ;;  %v1853_v16 = vsel %vm1198_vm0, %v392_v6, 0.0  ;;  %v394_v24 = vld [vmem:[%s12294_s18 + $0x6e0] sm:$0xff] }
 0x1bd   : > { %v7185_v30 = vrot.slane %v4412_v25, %v12546_v61  ;;  %v7180_v31 = vrot.slane %v4411_v26, %v12540_v57  ;;  %1839 = vadd.xlane.f32.xlu1 %v1838_v21  ;;  %1836 = vadd.xlane.f32.xlu0 %v1835_v22 }
 0x1be   : > { %v1630_v33 = vpop.xlane.xlu1 %1629  ;;  %v1627_v37 = vpop.xlane.xlu0 %1626 }
 0x1bf   : > { %v7181_v41 = vsel %vm6542_vm12, %v7180_v31, %v7176_v29  ;;  %v4414_v42 = vmul.f32 0.015625, %v1630_v33  ;;  %v4413_v48 = vmul.f32 0.015625, %v1627_v37 }
 0x1c0   : > { %v7186_v53 = vsel %vm6549_vm13, %v7185_v30, %v7181_v41  ;;  %v1859_v30 = vsel %vm1198_vm0, %v394_v24, 0.0 }
 0x1c1   : > { %v7195_v54 = vrot.slane %v4414_v42, %v12561_v13  ;;  %v7190_v56 = vrot.slane %v4413_v48, %v12556_v11  ;;  %1845 = vadd.xlane.f32.xlu1 %v1844_v38  ;;  %1842 = vadd.xlane.f32.xlu0 %v1841_v40  ;;  %v397_v38 = vld [vmem:[%s12294_s18 + $0x6f8] sm:$0xff]  ;;  %v396_v40 = vld [vmem:[%s12294_s18 + $0x6f0] sm:$0xff] }
 0x1c2   : > { %v1636_v58 = vpop.xlane.xlu1 %1635  ;;  %v1633_v59 = vpop.xlane.xlu0 %1632 }
 0x1c3   : > { %v7191_v63 = vsel %vm6556_vm14, %v7190_v56, %v7186_v53  ;;  %v4416_v3 = vmul.f32 0.015625, %v1636_v58  ;;  %v4415_v4 = vmul.f32 0.015625, %v1633_v59  ;;  %v1868_v53 = vsel %vm1198_vm0, %v397_v38, 0.0 }
 0x1c4   : > { %v7196_v7 = vsel %vm6563_vm15, %v7195_v54, %v7191_v63  ;;  %v1865_v54 = vsel %vm1198_vm0, %v396_v40, 0.0 }
 0x1c5   : > { %v13099_v8 = vsel %vm11542_vm11, %v7196_v7, %v12577_v44  ;;  %v7204_v9 = vrot.slane %v4416_v3, %v12463_v35  ;;  %v7200_v10 = vrot.slane %v4415_v4, %v12457_v32  ;;  %1851 = vadd.xlane.f32.xlu1 %v1850_v60  ;;  %1848 = vadd.xlane.f32.xlu0 %v1847_v62  ;;  %v395_v44 = vld [vmem:[%s12294_s18 + $0x6e8] sm:$0xff]  ;;  %v398_v62 = vld [vmem:[%s12294_s18 + $0x700] sm:$0xff] }
 0x1c6   : > { %v1642_v12 = vpop.xlane.xlu1 %1641  ;;  %v1639_v14 = vpop.xlane.xlu0 %1638  ;;  %v1862_v29 = vsel %vm1198_vm0, %v395_v44, 0.0  ;;  %v399_v60 = vld [vmem:[%s12294_s18 + $0x708] sm:$0xff] }
 0x1c7   : > { %v7205_v19 = vsel %vm6465_vm1, %v7204_v9, %v7200_v10  ;;  %v4418_v21 = vmul.f32 0.015625, %v1642_v12  ;;  %v4417_v22 = vmul.f32 0.015625, %v1639_v14  ;;  %v1874_v7 = vsel %vm1198_vm0, %v399_v60, 0.0 }
 0x1c8   : > { %v1871_v9 = vsel %vm1198_vm0, %v398_v62, 0.0 }
 0x1c9   : > { %v7214_v25 = vrot.slane %v4418_v21, %v12460_v34  ;;  %v7209_v26 = vrot.slane %v4417_v22, %v12466_v36  ;;  %1857 = vadd.xlane.f32.xlu1 %v1856_v15  ;;  %1854 = vadd.xlane.f32.xlu0 %v1853_v16  ;;  %v401_v15 = vld [vmem:[%s12294_s18 + $0x718] sm:$0xff]  ;;  %v400_v16 = vld [vmem:[%s12294_s18 + $0x710] sm:$0xff] }
 0x1ca   : > { %v1648_v20 = vpop.xlane.xlu1 %1647  ;;  %v1645_v28 = vpop.xlane.xlu0 %1644 }
 0x1cb   : > { %v7210_v31 = vsel %vm6472_vm2, %v7209_v26, %v7205_v19  ;;  %v4420_v33 = vmul.f32 0.015625, %v1648_v20  ;;  %v4419_v37 = vmul.f32 0.015625, %v1645_v28  ;;  %v1877_v26 = vsel %vm1198_vm0, %v400_v16, 0.0 }
 0x1cc   : > { %v7215_v41 = vsel %vm6479_vm3, %v7214_v25, %v7210_v31  ;;  %v1880_v25 = vsel %vm1198_vm0, %v401_v15, 0.0  ;;  %v402_v31 = vld [vmem:[%s12294_s18 + $0x720] sm:$0xff] }
 0x1cd   : > { %v7224_v42 = vrot.slane %v4420_v33, %v12473_v46  ;;  %v7219_v48 = vrot.slane %v4419_v37, %v12476_v47  ;;  %1863 = vadd.xlane.f32.xlu1 %v1862_v29  ;;  %1860 = vadd.xlane.f32.xlu0 %v1859_v30  ;;  %v403_v30 = vld [vmem:[%s12294_s18 + $0x728] sm:$0xff] }
 0x1ce   : > { %v1654_v51 = vpop.xlane.xlu1 %1653  ;;  %v1651_v52 = vpop.xlane.xlu0 %1650 }
 0x1cf   : > { %v7220_v56 = vsel %vm6486_vm4, %v7219_v48, %v7215_v41  ;;  %v4422_v58 = vmul.f32 0.015625, %v1654_v51  ;;  %v4421_v59 = vmul.f32 0.015625, %v1651_v52  ;;  %v1883_v48 = vsel %vm1198_vm0, %v402_v31, 0.0 }
 0x1d0   : > { %v7225_v63 = vsel %vm6493_vm5, %v7224_v42, %v7220_v56  ;;  %v1886_v42 = vsel %vm1198_vm0, %v403_v30, 0.0  ;;  %v404_v56 = vld [vmem:[%s12294_s18 + $0x730] sm:$0xff] }
 0x1d1   : > { %v7234_v3 = vrot.slane %v4422_v58, %v12491_v0  ;;  %v7229_v4 = vrot.slane %v4421_v59, %v12494_v1  ;;  %1869 = vadd.xlane.f32.xlu1 %v1868_v53  ;;  %1866 = vadd.xlane.f32.xlu0 %v1865_v54  ;;  %v405_v54 = vld [vmem:[%s12294_s18 + $0x738] sm:$0xff] }
 0x1d2   : > { %v1660_v5 = vpop.xlane.xlu1 %1659  ;;  %v1657_v6 = vpop.xlane.xlu0 %1656 }
 0x1d3   : > { %v7230_v10 = vsel %vm6500_vm6, %v7229_v4, %v7225_v63  ;;  %v4424_v12 = vmul.f32 0.015625, %v1660_v5  ;;  %v4423_v14 = vmul.f32 0.015625, %v1657_v6  ;;  %v1889_v4 = vsel %vm1198_vm0, %v404_v56, 0.0 }
 0x1d4   : > { %v7235_v19 = vsel %vm17372_vm7, %v7234_v3, %v7230_v10  ;;  %v1892_v3 = vsel %vm1198_vm0, %v405_v54, 0.0  ;;  %v406_v10 = vld [vmem:[%s12294_s18 + $0x740] sm:$0xff] }
 0x1d5   : > { %v7244_v21 = vrot.slane %v4424_v12, %v12508_v18  ;;  %v7239_v22 = vrot.slane %v4423_v14, %v12514_v23  ;;  %1875 = vadd.xlane.f32.xlu1 %v1874_v7  ;;  %1872 = vadd.xlane.f32.xlu0 %v1871_v9  ;;  %v407_v9 = vld [vmem:[%s12294_s18 + $0x748] sm:$0xff] }
 0x1d6   : > { %v1666_v44 = vpop.xlane.xlu1 %1665  ;;  %v1663_v24 = vpop.xlane.xlu0 %1662 }
 0x1d7   : > { %v7240_v20 = vsel %vm17367_vm8, %v7239_v22, %v7235_v19  ;;  %v4426_v28 = vmul.f32 0.015625, %v1666_v44  ;;  %v4425_v29 = vmul.f32 0.015625, %v1663_v24  ;;  %v1895_v22 = vsel %vm1198_vm0, %v406_v10, 0.0 }
 0x1d8   : > { %v7245_v33 = vsel %vm17365_vm9, %v7244_v21, %v7240_v20  ;;  %vm17375_vm9 = vcmask 786112   ;;  %v1898_v21 = vsel %vm1198_vm0, %v407_v9, 0.0  ;;  %v408_v20 = vld [vmem:[%s12294_s18 + $0x750] sm:$0xff] }
 0x1d9   : > { %v7254_v37 = vrot.slane %v4426_v28, %v12530_v43  ;;  %v7249_v38 = vrot.slane %v4425_v29, %v12524_v39  ;;  %1881 = vadd.xlane.f32.xlu1 %v1880_v25  ;;  %1878 = vadd.xlane.f32.xlu0 %v1877_v26  ;;  %v409_v26 = vld [vmem:[%s12294_s18 + $0x758] sm:$0xff] }
 0x1da   : > { %v1672_v40 = vpop.xlane.xlu1 %1671  ;;  %v1669_v41 = vpop.xlane.xlu0 %1668 }
 0x1db   : > { %v7250_v51 = vsel %vm6528_vm10, %v7249_v38, %v7245_v33  ;;  %v4428_v52 = vmul.f32 0.015625, %v1672_v40  ;;  %v4427_v53 = vmul.f32 0.015625, %v1669_v41  ;;  %v1904_v38 = vsel %vm1198_vm0, %v409_v26, 0.0 }
 0x1dc   : > { %v7255_v58 = vsel %vm17375_vm9, %v7254_v37, %v7250_v51  ;;  %v1901_v40 = vsel %vm1198_vm0, %v408_v20, 0.0  ;;  %v410_v51 = vld [vmem:[%s12294_s18 + $0x760] sm:$0xff]  ;;  %vm17376_vm9 = vcmask 654912  }
 0x1dd   : > { %v7264_v59 = vrot.slane %v4428_v52, %v12546_v61  ;;  %v7259_v60 = vrot.slane %v4427_v53, %v12540_v57  ;;  %1887 = vadd.xlane.f32.xlu1 %v1886_v42  ;;  %1884 = vadd.xlane.f32.xlu0 %v1883_v48 }
 0x1de   : > { %v1678_v62 = vpop.xlane.xlu1 %1677  ;;  %v1675_v63 = vpop.xlane.xlu0 %1674 }
 0x1df   : > { %v7260_v5 = vsel %vm6542_vm12, %v7259_v60, %v7255_v58  ;;  %v4430_v6 = vmul.f32 0.015625, %v1678_v62  ;;  %v4429_v7 = vmul.f32 0.015625, %v1675_v63 }
 0x1e0   : > { %v7265_v12 = vsel %vm6549_vm13, %v7264_v59, %v7260_v5  ;;  %v1907_v59 = vsel %vm1198_vm0, %v410_v51, 0.0 }
 0x1e1   : > { %v7274_v14 = vrot.slane %v4430_v6, %v12561_v13  ;;  %v7269_v15 = vrot.slane %v4429_v7, %v12556_v11  ;;  %1893 = vadd.xlane.f32.xlu1 %v1892_v3  ;;  %1890 = vadd.xlane.f32.xlu0 %v1889_v4  ;;  %v413_v3 = vld [vmem:[%s12294_s18 + $0x778] sm:$0xff]  ;;  %v412_v4 = vld [vmem:[%s12294_s18 + $0x770] sm:$0xff] }
 0x1e2   : > { %v1684_v16 = vpop.xlane.xlu1 %1683  ;;  %v1681_v19 = vpop.xlane.xlu0 %1680 }
 0x1e3   : > { %v7270_v44 = vsel %vm6556_vm14, %v7269_v15, %v7265_v12  ;;  %v4432_v24 = vmul.f32 0.015625, %v1684_v16  ;;  %v4431_v25 = vmul.f32 0.015625, %v1681_v19  ;;  %v1916_v12 = vsel %vm1198_vm0, %v413_v3, 0.0 }
 0x1e4   : > { %v7275_v28 = vsel %vm6563_vm15, %v7274_v14, %v7270_v44  ;;  %v1913_v14 = vsel %vm1198_vm0, %v412_v4, 0.0 }
 0x1e5   : > { %v13166_v29 = vsel %vm11542_vm11, %v7275_v28, %v12642_v45  ;;  %v7283_v30 = vrot.slane %v4432_v24, %v12463_v35  ;;  %v7279_v31 = vrot.slane %v4431_v25, %v12457_v32  ;;  %1899 = vadd.xlane.f32.xlu1 %v1898_v21  ;;  %1896 = vadd.xlane.f32.xlu0 %v1895_v22  ;;  %v411_v45 = vld [vmem:[%s12294_s18 + $0x768] sm:$0xff]  ;;  %v414_v22 = vld [vmem:[%s12294_s18 + $0x780] sm:$0xff] }
 0x1e6   : > { %v1690_v33 = vpop.xlane.xlu1 %1689  ;;  %v1687_v37 = vpop.xlane.xlu0 %1686  ;;  %v1910_v58 = vsel %vm1198_vm0, %v411_v45, 0.0  ;;  %v415_v21 = vld [vmem:[%s12294_s18 + $0x788] sm:$0xff] }
 0x1e7   : > { %v7284_v41 = vsel %vm6465_vm1, %v7283_v30, %v7279_v31  ;;  %v4434_v42 = vmul.f32 0.015625, %v1690_v33  ;;  %v4433_v48 = vmul.f32 0.015625, %v1687_v37  ;;  %v1922_v28 = vsel %vm1198_vm0, %v415_v21, 0.0 }
 0x1e8   : > { %v1919_v30 = vsel %vm1198_vm0, %v414_v22, 0.0 }
 0x1e9   : > { %v7293_v52 = vrot.slane %v4434_v42, %v12460_v34  ;;  %v7288_v53 = vrot.slane %v4433_v48, %v12466_v36  ;;  %1905 = vadd.xlane.f32.xlu1 %v1904_v38  ;;  %1902 = vadd.xlane.f32.xlu0 %v1901_v40  ;;  %v417_v38 = vld [vmem:[%s12294_s18 + $0x798] sm:$0xff]  ;;  %v416_v40 = vld [vmem:[%s12294_s18 + $0x790] sm:$0xff] }
 0x1ea   : > { %v1696_v54 = vpop.xlane.xlu1 %1695  ;;  %v1693_v56 = vpop.xlane.xlu0 %1692 }
 0x1eb   : > { %v7289_v60 = vsel %vm6472_vm2, %v7288_v53, %v7284_v41  ;;  %v4436_v62 = vmul.f32 0.015625, %v1696_v54  ;;  %v4435_v63 = vmul.f32 0.015625, %v1693_v56  ;;  %v1925_v53 = vsel %vm1198_vm0, %v416_v40, 0.0 }
 0x1ec   : > { %v7294_v5 = vsel %vm6479_vm3, %v7293_v52, %v7289_v60  ;;  %v1928_v52 = vsel %vm1198_vm0, %v417_v38, 0.0  ;;  %v418_v60 = vld [vmem:[%s12294_s18 + $0x7a0] sm:$0xff] }
 0x1ed   : > { %v7303_v6 = vrot.slane %v4436_v62, %v12473_v46  ;;  %v7298_v7 = vrot.slane %v4435_v63, %v12476_v47  ;;  %1911 = vadd.xlane.f32.xlu1 %v1910_v58  ;;  %1908 = vadd.xlane.f32.xlu0 %v1907_v59  ;;  %v419_v59 = vld [vmem:[%s12294_s18 + $0x7a8] sm:$0xff] }
 0x1ee   : > { %v1702_v9 = vpop.xlane.xlu1 %1701  ;;  %v1699_v10 = vpop.xlane.xlu0 %1698 }
 0x1ef   : > { %v7299_v15 = vsel %vm6486_vm4, %v7298_v7, %v7294_v5  ;;  %v4438_v16 = vmul.f32 0.015625, %v1702_v9  ;;  %v4437_v19 = vmul.f32 0.015625, %v1699_v10  ;;  %v1931_v7 = vsel %vm1198_vm0, %v418_v60, 0.0 }
 0x1f0   : > { %v7304_v44 = vsel %vm6493_vm5, %v7303_v6, %v7299_v15  ;;  %v1934_v6 = vsel %vm1198_vm0, %v419_v59, 0.0  ;;  %v420_v15 = vld [vmem:[%s12294_s18 + $0x7b0] sm:$0xff] }
 0x1f1   : > { %v7313_v24 = vrot.slane %v4438_v16, %v12491_v0  ;;  %v7308_v25 = vrot.slane %v4437_v19, %v12494_v1  ;;  %1917 = vadd.xlane.f32.xlu1 %v1916_v12  ;;  %1914 = vadd.xlane.f32.xlu0 %v1913_v14  ;;  %v421_v14 = vld [vmem:[%s12294_s18 + $0x7b8] sm:$0xff] }
 0x1f2   : > { %v1708_v26 = vpop.xlane.xlu1 %1707  ;;  %v1705_v20 = vpop.xlane.xlu0 %1704 }
 0x1f3   : > { %v7309_v31 = vsel %vm6500_vm6, %v7308_v25, %v7304_v44  ;;  %v4440_v33 = vmul.f32 0.015625, %v1708_v26  ;;  %v4439_v37 = vmul.f32 0.015625, %v1705_v20  ;;  %v1937_v25 = vsel %vm1198_vm0, %v420_v15, 0.0 }
 0x1f4   : > { %v7314_v41 = vsel %vm17372_vm7, %v7313_v24, %v7309_v31  ;;  %v1940_v24 = vsel %vm1198_vm0, %v421_v14, 0.0  ;;  %v422_v31 = vld [vmem:[%s12294_s18 + $0x7c0] sm:$0xff] }
 0x1f5   : > { %v7323_v42 = vrot.slane %v4440_v33, %v12508_v18  ;;  %v7318_v48 = vrot.slane %v4439_v37, %v12514_v23  ;;  %1923 = vadd.xlane.f32.xlu1 %v1922_v28  ;;  %1920 = vadd.xlane.f32.xlu0 %v1919_v30  ;;  %v423_v30 = vld [vmem:[%s12294_s18 + $0x7c8] sm:$0xff] }
 0x1f6   : > { %v1714_v45 = vpop.xlane.xlu1 %1713  ;;  %v1711_v51 = vpop.xlane.xlu0 %1710 }
 0x1f7   : > { %v7319_v54 = vsel %vm17367_vm8, %v7318_v48, %v7314_v41  ;;  %v4442_v56 = vmul.f32 0.015625, %v1714_v45  ;;  %v4441_v58 = vmul.f32 0.015625, %v1711_v51  ;;  %v1943_v48 = vsel %vm1198_vm0, %v422_v31, 0.0 }
 0x1f8   : > { %v7324_v62 = vsel %vm17376_vm9, %v7323_v42, %v7319_v54  ;;  %vm17377_vm9 = vcmask 786112   ;;  %v1946_v42 = vsel %vm1198_vm0, %v423_v30, 0.0  ;;  %v424_v54 = vld [vmem:[%s12294_s18 + $0x7d0] sm:$0xff] }
 0x1f9   : > { %v7333_v63 = vrot.slane %v4442_v56, %v12530_v43  ;;  %v7328_v3 = vrot.slane %v4441_v58, %v12524_v39  ;;  %1929 = vadd.xlane.f32.xlu1 %v1928_v52  ;;  %1926 = vadd.xlane.f32.xlu0 %v1925_v53  ;;  %v425_v53 = vld [vmem:[%s12294_s18 + $0x7d8] sm:$0xff] }
 0x1fa   : > { %v1720_v4 = vpop.xlane.xlu1 %1719  ;;  %v1717_v5 = vpop.xlane.xlu0 %1716 }
 0x1fb   : > { %v7329_v9 = vsel %vm6528_vm10, %v7328_v3, %v7324_v62  ;;  %v4444_v10 = vmul.f32 0.015625, %v1720_v4  ;;  %v4443_v12 = vmul.f32 0.015625, %v1717_v5  ;;  %v1952_v3 = vsel %vm1198_vm0, %v425_v53, 0.0 }
 0x1fc   : > { %v7334_v16 = vsel %vm17377_vm9, %v7333_v63, %v7329_v9  ;;  %v1949_v4 = vsel %vm1198_vm0, %v424_v54, 0.0  ;;  %v426_v9 = vld [vmem:[%s12294_s18 + $0x7e0] sm:$0xff]  ;;  %vm17378_vm9 = vcmask 654912  }
 0x1fd   : > { %v7343_v19 = vrot.slane %v4444_v10, %v12546_v61  ;;  %v7338_v21 = vrot.slane %v4443_v12, %v12540_v57  ;;  %1935 = vadd.xlane.f32.xlu1 %v1934_v6  ;;  %1932 = vadd.xlane.f32.xlu0 %v1931_v7 }
 0x1fe   : > { %v1726_v22 = vpop.xlane.xlu1 %1725  ;;  %v1723_v44 = vpop.xlane.xlu0 %1722 }
 0x1ff   : > { %v7339_v26 = vsel %vm6542_vm12, %v7338_v21, %v7334_v16  ;;  %v4446_v20 = vmul.f32 0.015625, %v1726_v22  ;;  %v4445_v28 = vmul.f32 0.015625, %v1723_v44 }
 0x200   : > { %v7344_v33 = vsel %vm6549_vm13, %v7343_v19, %v7339_v26  ;;  %v1955_v19 = vsel %vm1198_vm0, %v426_v9, 0.0 }
 0x201   : > { %v7353_v37 = vrot.slane %v4446_v20, %v12561_v13  ;;  %v7348_v38 = vrot.slane %v4445_v28, %v12556_v11  ;;  %1941 = vadd.xlane.f32.xlu1 %v1940_v24  ;;  %1938 = vadd.xlane.f32.xlu0 %v1937_v25  ;;  %v429_v24 = vld [vmem:[%s12294_s18 + $0x7f8] sm:$0xff]  ;;  %v428_v25 = vld [vmem:[%s12294_s18 + $0x7f0] sm:$0xff] }
 0x202   : > { %v1732_v40 = vpop.xlane.xlu1 %1731  ;;  %v1729_v41 = vpop.xlane.xlu0 %1728 }
 0x203   : > { %v7349_v45 = vsel %vm6556_vm14, %v7348_v38, %v7344_v33  ;;  %v4448_v51 = vmul.f32 0.015625, %v1732_v40  ;;  %v4447_v52 = vmul.f32 0.015625, %v1729_v41  ;;  %v1964_v33 = vsel %vm1198_vm0, %v429_v24, 0.0 }
 0x204   : > { %v7354_v56 = vsel %vm6563_vm15, %v7353_v37, %v7349_v45  ;;  %v1961_v37 = vsel %vm1198_vm0, %v428_v25, 0.0 }
 0x205   : > { %v13233_v58 = vsel %vm11542_vm11, %v7354_v56, %v12707_v50  ;;  %v7362_v59 = vrot.slane %v4448_v51, %v12463_v35  ;;  %v7358_v60 = vrot.slane %v4447_v52, %v12457_v32  ;;  %1947 = vadd.xlane.f32.xlu1 %v1946_v42  ;;  %1944 = vadd.xlane.f32.xlu0 %v1943_v48  ;;  %v427_v50 = vld [vmem:[%s12294_s18 + $0x7e8] sm:$0xff]  ;;  %v430_v48 = vld [vmem:[%s12294_s18 + $0x800] sm:$0xff] }
 0x206   : > { %v1738_v62 = vpop.xlane.xlu1 %1737  ;;  %v1735_v63 = vpop.xlane.xlu0 %1734  ;;  %v1958_v16 = vsel %vm1198_vm0, %v427_v50, 0.0  ;;  %v431_v42 = vld [vmem:[%s12294_s18 + $0x808] sm:$0xff] }
 0x207   : > { %v7363_v5 = vsel %vm6465_vm1, %v7362_v59, %v7358_v60  ;;  %v4450_v6 = vmul.f32 0.015625, %v1738_v62  ;;  %v4449_v7 = vmul.f32 0.015625, %v1735_v63  ;;  %v1970_v56 = vsel %vm1198_vm0, %v431_v42, 0.0 }
 0x208   : > { %v1967_v59 = vsel %vm1198_vm0, %v430_v48, 0.0 }
 0x209   : > { %v7372_v10 = vrot.slane %v4450_v6, %v12460_v34  ;;  %v7367_v12 = vrot.slane %v4449_v7, %v12466_v36  ;;  %1953 = vadd.xlane.f32.xlu1 %v1952_v3  ;;  %1950 = vadd.xlane.f32.xlu0 %v1949_v4  ;;  %v433_v3 = vld [vmem:[%s12294_s18 + $0x818] sm:$0xff]  ;;  %v432_v4 = vld [vmem:[%s12294_s18 + $0x810] sm:$0xff] }
 0x20a   : > { %v1744_v14 = vpop.xlane.xlu1 %1743  ;;  %v1741_v15 = vpop.xlane.xlu0 %1740 }
 0x20b   : > { %v7368_v21 = vsel %vm6472_vm2, %v7367_v12, %v7363_v5  ;;  %v4452_v22 = vmul.f32 0.015625, %v1744_v14  ;;  %v4451_v44 = vmul.f32 0.015625, %v1741_v15  ;;  %v1973_v12 = vsel %vm1198_vm0, %v432_v4, 0.0 }
 0x20c   : > { %v7373_v26 = vsel %vm6479_vm3, %v7372_v10, %v7368_v21  ;;  %v1976_v10 = vsel %vm1198_vm0, %v433_v3, 0.0  ;;  %v434_v21 = vld [vmem:[%s12294_s18 + $0x820] sm:$0xff] }
 0x20d   : > { %v7382_v20 = vrot.slane %v4452_v22, %v12473_v46  ;;  %v7377_v28 = vrot.slane %v4451_v44, %v12476_v47  ;;  %1959 = vadd.xlane.f32.xlu1 %v1958_v16  ;;  %1956 = vadd.xlane.f32.xlu0 %v1955_v19  ;;  %v435_v19 = vld [vmem:[%s12294_s18 + $0x828] sm:$0xff] }
 0x20e   : > { %v1750_v30 = vpop.xlane.xlu1 %1749  ;;  %v1747_v31 = vpop.xlane.xlu0 %1746 }
 0x20f   : > { %v7378_v38 = vsel %vm6486_vm4, %v7377_v28, %v7373_v26  ;;  %v4454_v40 = vmul.f32 0.015625, %v1750_v30  ;;  %v4453_v41 = vmul.f32 0.015625, %v1747_v31  ;;  %v1979_v28 = vsel %vm1198_vm0, %v434_v21, 0.0 }
 0x210   : > { %v7383_v45 = vsel %vm6493_vm5, %v7382_v20, %v7378_v38  ;;  %v1982_v20 = vsel %vm1198_vm0, %v435_v19, 0.0  ;;  %v436_v38 = vld [vmem:[%s12294_s18 + $0x830] sm:$0xff] }
 0x211   : > { %v7392_v51 = vrot.slane %v4454_v40, %v12491_v0  ;;  %v7387_v52 = vrot.slane %v4453_v41, %v12494_v1  ;;  %1965 = vadd.xlane.f32.xlu1 %v1964_v33  ;;  %1962 = vadd.xlane.f32.xlu0 %v1961_v37  ;;  %v437_v37 = vld [vmem:[%s12294_s18 + $0x838] sm:$0xff] }
 0x212   : > { %v1756_v53 = vpop.xlane.xlu1 %1755  ;;  %v1753_v54 = vpop.xlane.xlu0 %1752 }
 0x213   : > { %v7388_v60 = vsel %vm6500_vm6, %v7387_v52, %v7383_v45  ;;  %v4456_v62 = vmul.f32 0.015625, %v1756_v53  ;;  %v4455_v63 = vmul.f32 0.015625, %v1753_v54  ;;  %v1985_v52 = vsel %vm1198_vm0, %v436_v38, 0.0 }
 0x214   : > { %v7393_v5 = vsel %vm17372_vm7, %v7392_v51, %v7388_v60  ;;  %v1988_v51 = vsel %vm1198_vm0, %v437_v37, 0.0  ;;  %v438_v60 = vld [vmem:[%s12294_s18 + $0x840] sm:$0xff] }
 0x215   : > { %v7402_v6 = vrot.slane %v4456_v62, %v12508_v18  ;;  %v7397_v7 = vrot.slane %v4455_v63, %v12514_v23  ;;  %1971 = vadd.xlane.f32.xlu1 %v1970_v56  ;;  %1968 = vadd.xlane.f32.xlu0 %v1967_v59  ;;  %v439_v59 = vld [vmem:[%s12294_s18 + $0x848] sm:$0xff] }
 0x216   : > { %v1762_v50 = vpop.xlane.xlu1 %1761  ;;  %v1759_v9 = vpop.xlane.xlu0 %1758 }
 0x217   : > { %v7398_v14 = vsel %vm17367_vm8, %v7397_v7, %v7393_v5  ;;  %v4458_v15 = vmul.f32 0.015625, %v1762_v50  ;;  %v4457_v16 = vmul.f32 0.015625, %v1759_v9  ;;  %v1991_v7 = vsel %vm1198_vm0, %v438_v60, 0.0 }
 0x218   : > { %v7403_v22 = vsel %vm17378_vm9, %v7402_v6, %v7398_v14  ;;  %vm17379_vm9 = vcmask 786112   ;;  %v1994_v6 = vsel %vm1198_vm0, %v439_v59, 0.0  ;;  %v440_v14 = vld [vmem:[%s12294_s18 + $0x850] sm:$0xff] }
 0x219   : > { %v7412_v44 = vrot.slane %v4458_v15, %v12530_v43  ;;  %v7407_v24 = vrot.slane %v4457_v16, %v12524_v39  ;;  %1977 = vadd.xlane.f32.xlu1 %v1976_v10  ;;  %1974 = vadd.xlane.f32.xlu0 %v1973_v12  ;;  %v441_v12 = vld [vmem:[%s12294_s18 + $0x858] sm:$0xff] }
 0x21a   : > { %v1768_v25 = vpop.xlane.xlu1 %1767  ;;  %v1765_v26 = vpop.xlane.xlu0 %1764 }
 0x21b   : > { %v7408_v30 = vsel %vm6528_vm10, %v7407_v24, %v7403_v22  ;;  %v4460_v31 = vmul.f32 0.015625, %v1768_v25  ;;  %v4459_v33 = vmul.f32 0.015625, %v1765_v26  ;;  %v2000_v24 = vsel %vm1198_vm0, %v441_v12, 0.0 }
 0x21c   : > { %v7413_v40 = vsel %vm17379_vm9, %v7412_v44, %v7408_v30  ;;  %v1997_v25 = vsel %vm1198_vm0, %v440_v14, 0.0  ;;  %v442_v30 = vld [vmem:[%s12294_s18 + $0x860] sm:$0xff]  ;;  %vm17380_vm9 = vcmask 654912  }
 0x21d   : > { %v7422_v41 = vrot.slane %v4460_v31, %v12546_v61  ;;  %v7417_v42 = vrot.slane %v4459_v33, %v12540_v57  ;;  %1983 = vadd.xlane.f32.xlu1 %v1982_v20  ;;  %1980 = vadd.xlane.f32.xlu0 %v1979_v28 }
 0x21e   : > { %v1774_v48 = vpop.xlane.xlu1 %1773  ;;  %v1771_v45 = vpop.xlane.xlu0 %1770 }
 0x21f   : > { %v7418_v53 = vsel %vm6542_vm12, %v7417_v42, %v7413_v40  ;;  %v4462_v54 = vmul.f32 0.015625, %v1774_v48  ;;  %v4461_v56 = vmul.f32 0.015625, %v1771_v45 }
 0x220   : > { %v7423_v62 = vsel %vm6549_vm13, %v7422_v41, %v7418_v53  ;;  %v2003_v41 = vsel %vm1198_vm0, %v442_v30, 0.0 }
 0x221   : > { %v7432_v63 = vrot.slane %v4462_v54, %v12561_v13  ;;  %v7427_v3 = vrot.slane %v4461_v56, %v12556_v11  ;;  %1989 = vadd.xlane.f32.xlu1 %v1988_v51  ;;  %1986 = vadd.xlane.f32.xlu0 %v1985_v52  ;;  %v445_v51 = vld [vmem:[%s12294_s18 + $0x878] sm:$0xff]  ;;  %v444_v52 = vld [vmem:[%s12294_s18 + $0x870] sm:$0xff] }
 0x222   : > { %v1780_v4 = vpop.xlane.xlu1 %1779  ;;  %v1777_v5 = vpop.xlane.xlu0 %1776 }
 0x223   : > { %v7428_v50 = vsel %vm6556_vm14, %v7427_v3, %v7423_v62  ;;  %v4464_v9 = vmul.f32 0.015625, %v1780_v4  ;;  %v4463_v10 = vmul.f32 0.015625, %v1777_v5  ;;  %v2012_v62 = vsel %vm1198_vm0, %v445_v51, 0.0 }
 0x224   : > { %v7433_v15 = vsel %vm6563_vm15, %v7432_v63, %v7428_v50  ;;  %v2009_v63 = vsel %vm1198_vm0, %v444_v52, 0.0 }
 0x225   : > { %v13300_v16 = vsel %vm11542_vm11, %v7433_v15, %v12772_v55  ;;  %v7441_v19 = vrot.slane %v4464_v9, %v12463_v35  ;;  %v7437_v21 = vrot.slane %v4463_v10, %v12457_v32  ;;  %1995 = vadd.xlane.f32.xlu1 %v1994_v6  ;;  %1992 = vadd.xlane.f32.xlu0 %v1991_v7  ;;  %v443_v55 = vld [vmem:[%s12294_s18 + $0x868] sm:$0xff]  ;;  %v446_v7 = vld [vmem:[%s12294_s18 + $0x880] sm:$0xff] }
 0x226   : > { %v1786_v22 = vpop.xlane.xlu1 %1785  ;;  %v1783_v44 = vpop.xlane.xlu0 %1782  ;;  %v2006_v40 = vsel %vm1198_vm0, %v443_v55, 0.0  ;;  %v447_v6 = vld [vmem:[%s12294_s18 + $0x888] sm:$0xff] }
 0x227   : > { %v7442_v26 = vsel %vm6465_vm1, %v7441_v19, %v7437_v21  ;;  %v4466_v20 = vmul.f32 0.015625, %v1786_v22  ;;  %v4465_v28 = vmul.f32 0.015625, %v1783_v44  ;;  %v2018_v15 = vsel %vm1198_vm0, %v447_v6, 0.0 }
 0x228   : > { %v2015_v19 = vsel %vm1198_vm0, %v446_v7, 0.0 }
 0x229   : > { %v7451_v31 = vrot.slane %v4466_v20, %v12460_v34  ;;  %v7446_v33 = vrot.slane %v4465_v28, %v12466_v36  ;;  %2001 = vadd.xlane.f32.xlu1 %v2000_v24  ;;  %1998 = vadd.xlane.f32.xlu0 %v1997_v25  ;;  %v449_v24 = vld [vmem:[%s12294_s18 + $0x898] sm:$0xff]  ;;  %v448_v25 = vld [vmem:[%s12294_s18 + $0x890] sm:$0xff] }
 0x22a   : > { %v1792_v37 = vpop.xlane.xlu1 %1791  ;;  %v1789_v38 = vpop.xlane.xlu0 %1788 }
 0x22b   : > { %v7447_v42 = vsel %vm6472_vm2, %v7446_v33, %v7442_v26  ;;  %v4468_v48 = vmul.f32 0.015625, %v1792_v37  ;;  %v4467_v45 = vmul.f32 0.015625, %v1789_v38  ;;  %v2021_v33 = vsel %vm1198_vm0, %v448_v25, 0.0 }
 0x22c   : > { %v7452_v53 = vsel %vm6479_vm3, %v7451_v31, %v7447_v42  ;;  %v2024_v31 = vsel %vm1198_vm0, %v449_v24, 0.0  ;;  %v450_v42 = vld [vmem:[%s12294_s18 + $0x8a0] sm:$0xff] }
 0x22d   : > { %v7461_v54 = vrot.slane %v4468_v48, %v12473_v46  ;;  %v7456_v56 = vrot.slane %v4467_v45, %v12476_v47  ;;  %2007 = vadd.xlane.f32.xlu1 %v2006_v40  ;;  %2004 = vadd.xlane.f32.xlu0 %v2003_v41  ;;  %v451_v41 = vld [vmem:[%s12294_s18 + $0x8a8] sm:$0xff] }
 0x22e   : > { %v1798_v59 = vpop.xlane.xlu1 %1797  ;;  %v1795_v60 = vpop.xlane.xlu0 %1794 }
 0x22f   : > { %v7457_v3 = vsel %vm6486_vm4, %v7456_v56, %v7452_v53  ;;  %v4470_v4 = vmul.f32 0.015625, %v1798_v59  ;;  %v4469_v5 = vmul.f32 0.015625, %v1795_v60  ;;  %v2027_v56 = vsel %vm1198_vm0, %v450_v42, 0.0 }
 0x230   : > { %v7462_v50 = vsel %vm6493_vm5, %v7461_v54, %v7457_v3  ;;  %v2030_v54 = vsel %vm1198_vm0, %v451_v41, 0.0  ;;  %v452_v3 = vld [vmem:[%s12294_s18 + $0x8b0] sm:$0xff] }
 0x231   : > { %v7471_v9 = vrot.slane %v4470_v4, %v12491_v0  ;;  %v7466_v10 = vrot.slane %v4469_v5, %v12494_v1  ;;  %2013 = vadd.xlane.f32.xlu1 %v2012_v62  ;;  %2010 = vadd.xlane.f32.xlu0 %v2009_v63  ;;  %v453_v63 = vld [vmem:[%s12294_s18 + $0x8b8] sm:$0xff] }
 0x232   : > { %v1804_v12 = vpop.xlane.xlu1 %1803  ;;  %v1801_v14 = vpop.xlane.xlu0 %1800 }
 0x233   : > { %v7467_v21 = vsel %vm6500_vm6, %v7466_v10, %v7462_v50  ;;  %v4472_v22 = vmul.f32 0.015625, %v1804_v12  ;;  %v4471_v44 = vmul.f32 0.015625, %v1801_v14  ;;  %v2033_v10 = vsel %vm1198_vm0, %v452_v3, 0.0 }
 0x234   : > { %v7472_v26 = vsel %vm17372_vm7, %v7471_v9, %v7467_v21  ;;  %v2036_v9 = vsel %vm1198_vm0, %v453_v63, 0.0  ;;  %v454_v21 = vld [vmem:[%s12294_s18 + $0x8c0] sm:$0xff] }
 0x235   : > { %v7481_v20 = vrot.slane %v4472_v22, %v12508_v18  ;;  %v7476_v28 = vrot.slane %v4471_v44, %v12514_v23  ;;  %2019 = vadd.xlane.f32.xlu1 %v2018_v15  ;;  %2016 = vadd.xlane.f32.xlu0 %v2015_v19  ;;  %v455_v19 = vld [vmem:[%s12294_s18 + $0x8c8] sm:$0xff] }
 0x236   : > { %v1810_v55 = vpop.xlane.xlu1 %1809  ;;  %v1807_v30 = vpop.xlane.xlu0 %1806 }
 0x237   : > { %v7477_v37 = vsel %vm17367_vm8, %v7476_v28, %v7472_v26  ;;  %v4474_v38 = vmul.f32 0.015625, %v1810_v55  ;;  %v4473_v40 = vmul.f32 0.015625, %v1807_v30  ;;  %v2039_v28 = vsel %vm1198_vm0, %v454_v21, 0.0 }
 0x238   : > { %v7482_v48 = vsel %vm17380_vm9, %v7481_v20, %v7477_v37  ;;  %vm17381_vm9 = vcmask 786112   ;;  %v2042_v20 = vsel %vm1198_vm0, %v455_v19, 0.0  ;;  %v456_v37 = vld [vmem:[%s12294_s18 + $0x8d0] sm:$0xff] }
 0x239   : > { %v7491_v45 = vrot.slane %v4474_v38, %v12530_v43  ;;  %v7486_v51 = vrot.slane %v4473_v40, %v12524_v39  ;;  %2025 = vadd.xlane.f32.xlu1 %v2024_v31  ;;  %2022 = vadd.xlane.f32.xlu0 %v2021_v33  ;;  %v457_v33 = vld [vmem:[%s12294_s18 + $0x8d8] sm:$0xff] }
 0x23a   : > { %v1816_v52 = vpop.xlane.xlu1 %1815  ;;  %v1813_v53 = vpop.xlane.xlu0 %1812 }
 0x23b   : > { %v7487_v59 = vsel %vm6528_vm10, %v7486_v51, %v7482_v48  ;;  %v4476_v60 = vmul.f32 0.015625, %v1816_v52  ;;  %v4475_v62 = vmul.f32 0.015625, %v1813_v53  ;;  %v2048_v51 = vsel %vm1198_vm0, %v457_v33, 0.0 }
 0x23c   : > { %v7492_v4 = vsel %vm17381_vm9, %v7491_v45, %v7487_v59  ;;  %v2045_v52 = vsel %vm1198_vm0, %v456_v37, 0.0  ;;  %v458_v59 = vld [vmem:[%s12294_s18 + $0x8e0] sm:$0xff]  ;;  %vm17382_vm9 = vcmask 654912  }
 0x23d   : > { %v7501_v5 = vrot.slane %v4476_v60, %v12546_v61  ;;  %v7496_v6 = vrot.slane %v4475_v62, %v12540_v57  ;;  %2031 = vadd.xlane.f32.xlu1 %v2030_v54  ;;  %2028 = vadd.xlane.f32.xlu0 %v2027_v56 }
 0x23e   : > { %v1822_v7 = vpop.xlane.xlu1 %1821  ;;  %v1819_v50 = vpop.xlane.xlu0 %1818 }
 0x23f   : > { %v7497_v12 = vsel %vm6542_vm12, %v7496_v6, %v7492_v4  ;;  %v4478_v14 = vmul.f32 0.015625, %v1822_v7  ;;  %v4477_v15 = vmul.f32 0.015625, %v1819_v50 }
 0x240   : > { %v7502_v22 = vsel %vm6549_vm13, %v7501_v5, %v7497_v12  ;;  %v2051_v5 = vsel %vm1198_vm0, %v458_v59, 0.0 }
 0x241   : > { %v7511_v44 = vrot.slane %v4478_v14, %v12561_v13  ;;  %v7506_v24 = vrot.slane %v4477_v15, %v12556_v11  ;;  %2037 = vadd.xlane.f32.xlu1 %v2036_v9  ;;  %2034 = vadd.xlane.f32.xlu0 %v2033_v10  ;;  %v461_v9 = vld [vmem:[%s12294_s18 + $0x8f8] sm:$0xff]  ;;  %v460_v10 = vld [vmem:[%s12294_s18 + $0x8f0] sm:$0xff] }
 0x242   : > { %v1828_v25 = vpop.xlane.xlu1 %1827  ;;  %v1825_v26 = vpop.xlane.xlu0 %1824 }
 0x243   : > { %v7507_v55 = vsel %vm6556_vm14, %v7506_v24, %v7502_v22  ;;  %v4480_v30 = vmul.f32 0.015625, %v1828_v25  ;;  %v4479_v31 = vmul.f32 0.015625, %v1825_v26  ;;  %v2060_v22 = vsel %vm1198_vm0, %v461_v9, 0.0 }
 0x244   : > { %v7512_v38 = vsel %vm6563_vm15, %v7511_v44, %v7507_v55  ;;  %v2057_v44 = vsel %vm1198_vm0, %v460_v10, 0.0 }
 0x245   : > { %v13367_v40 = vsel %vm11542_vm11, %v7512_v38, %v12837_v2  ;;  %v7520_v41 = vrot.slane %v4480_v30, %v12463_v35  ;;  %v7516_v42 = vrot.slane %v4479_v31, %v12457_v32  ;;  %2043 = vadd.xlane.f32.xlu1 %v2042_v20  ;;  %2040 = vadd.xlane.f32.xlu0 %v2039_v28  ;;  %v459_v2 = vld [vmem:[%s12294_s18 + $0x8e8] sm:$0xff]  ;;  %v462_v28 = vld [vmem:[%s12294_s18 + $0x900] sm:$0xff] }
 0x246   : > { %v1834_v48 = vpop.xlane.xlu1 %1833  ;;  %v1831_v45 = vpop.xlane.xlu0 %1830  ;;  %v2054_v4 = vsel %vm1198_vm0, %v459_v2, 0.0  ;;  %v463_v20 = vld [vmem:[%s12294_s18 + $0x908] sm:$0xff] }
 0x247   : > { %v7521_v53 = vsel %vm6465_vm1, %v7520_v41, %v7516_v42  ;;  %v4482_v54 = vmul.f32 0.015625, %v1834_v48  ;;  %v4481_v56 = vmul.f32 0.015625, %v1831_v45  ;;  %v2066_v38 = vsel %vm1198_vm0, %v463_v20, 0.0 }
 0x248   : > { %v2063_v41 = vsel %vm1198_vm0, %v462_v28, 0.0 }
 0x249   : > { %v7530_v60 = vrot.slane %v4482_v54, %v12460_v34  ;;  %v7525_v62 = vrot.slane %v4481_v56, %v12466_v36  ;;  %2049 = vadd.xlane.f32.xlu1 %v2048_v51  ;;  %2046 = vadd.xlane.f32.xlu0 %v2045_v52  ;;  %v465_v51 = vld [vmem:[%s12294_s18 + $0x918] sm:$0xff]  ;;  %v464_v52 = vld [vmem:[%s12294_s18 + $0x910] sm:$0xff] }
 0x24a   : > { %v1840_v63 = vpop.xlane.xlu1 %1839  ;;  %v1837_v3 = vpop.xlane.xlu0 %1836 }
 0x24b   : > { %v7526_v6 = vsel %vm6472_vm2, %v7525_v62, %v7521_v53  ;;  %v4484_v7 = vmul.f32 0.015625, %v1840_v63  ;;  %v4483_v50 = vmul.f32 0.015625, %v1837_v3  ;;  %v2069_v62 = vsel %vm1198_vm0, %v464_v52, 0.0 }
 0x24c   : > { %v7531_v12 = vsel %vm6479_vm3, %v7530_v60, %v7526_v6  ;;  %v2072_v60 = vsel %vm1198_vm0, %v465_v51, 0.0  ;;  %v466_v6 = vld [vmem:[%s12294_s18 + $0x920] sm:$0xff] }
 0x24d   : > { %v7540_v14 = vrot.slane %v4484_v7, %v12473_v46  ;;  %v7535_v15 = vrot.slane %v4483_v50, %v12476_v47  ;;  %2055 = vadd.xlane.f32.xlu1 %v2054_v4  ;;  %2052 = vadd.xlane.f32.xlu0 %v2051_v5  ;;  %v467_v5 = vld [vmem:[%s12294_s18 + $0x928] sm:$0xff] }
 0x24e   : > { %v1846_v19 = vpop.xlane.xlu1 %1845  ;;  %v1843_v21 = vpop.xlane.xlu0 %1842 }
 0x24f   : > { %v7536_v24 = vsel %vm6486_vm4, %v7535_v15, %v7531_v12  ;;  %v4486_v25 = vmul.f32 0.015625, %v1846_v19  ;;  %v4485_v26 = vmul.f32 0.015625, %v1843_v21  ;;  %v2075_v15 = vsel %vm1198_vm0, %v466_v6, 0.0 }
 0x250   : > { %v7541_v55 = vsel %vm6493_vm5, %v7540_v14, %v7536_v24  ;;  %v2078_v14 = vsel %vm1198_vm0, %v467_v5, 0.0  ;;  %v468_v24 = vld [vmem:[%s12294_s18 + $0x930] sm:$0xff] }
 0x251   : > { %v7550_v30 = vrot.slane %v4486_v25, %v12491_v0  ;;  %v7545_v31 = vrot.slane %v4485_v26, %v12494_v1  ;;  %2061 = vadd.xlane.f32.xlu1 %v2060_v22  ;;  %2058 = vadd.xlane.f32.xlu0 %v2057_v44  ;;  %v469_v44 = vld [vmem:[%s12294_s18 + $0x938] sm:$0xff] }
 0x252   : > { %v1852_v33 = vpop.xlane.xlu1 %1851  ;;  %v1849_v37 = vpop.xlane.xlu0 %1848 }
 0x253   : > { %v7546_v42 = vsel %vm6500_vm6, %v7545_v31, %v7541_v55  ;;  %v4488_v48 = vmul.f32 0.015625, %v1852_v33  ;;  %v4487_v45 = vmul.f32 0.015625, %v1849_v37  ;;  %v2081_v31 = vsel %vm1198_vm0, %v468_v24, 0.0 }
 0x254   : > { %v7551_v53 = vsel %vm17372_vm7, %v7550_v30, %v7546_v42  ;;  %v2084_v30 = vsel %vm1198_vm0, %v469_v44, 0.0  ;;  %v470_v42 = vld [vmem:[%s12294_s18 + $0x940] sm:$0xff] }
 0x255   : > { %v7560_v54 = vrot.slane %v4488_v48, %v12508_v18  ;;  %v7555_v56 = vrot.slane %v4487_v45, %v12514_v23  ;;  %2067 = vadd.xlane.f32.xlu1 %v2066_v38  ;;  %2064 = vadd.xlane.f32.xlu0 %v2063_v41  ;;  %v471_v41 = vld [vmem:[%s12294_s18 + $0x948] sm:$0xff] }
 0x256   : > { %v1858_v2 = vpop.xlane.xlu1 %1857  ;;  %v1855_v59 = vpop.xlane.xlu0 %1854 }
 0x257   : > { %v7556_v63 = vsel %vm17367_vm8, %v7555_v56, %v7551_v53  ;;  %v4490_v3 = vmul.f32 0.015625, %v1858_v2  ;;  %v4489_v4 = vmul.f32 0.015625, %v1855_v59  ;;  %v2087_v56 = vsel %vm1198_vm0, %v470_v42, 0.0 }
 0x258   : > { %v7561_v7 = vsel %vm17382_vm9, %v7560_v54, %v7556_v63  ;;  %vm17383_vm9 = vcmask 786112   ;;  %v2090_v54 = vsel %vm1198_vm0, %v471_v41, 0.0  ;;  %v472_v63 = vld [vmem:[%s12294_s18 + $0x950] sm:$0xff] }
 0x259   : > { %v7570_v50 = vrot.slane %v4490_v3, %v12530_v43  ;;  %v7565_v9 = vrot.slane %v4489_v4, %v12524_v39  ;;  %2073 = vadd.xlane.f32.xlu1 %v2072_v60  ;;  %2070 = vadd.xlane.f32.xlu0 %v2069_v62  ;;  %v473_v62 = vld [vmem:[%s12294_s18 + $0x958] sm:$0xff] }
 0x25a   : > { %v1864_v10 = vpop.xlane.xlu1 %1863  ;;  %v1861_v12 = vpop.xlane.xlu0 %1860 }
 0x25b   : > { %v7566_v19 = vsel %vm6528_vm10, %v7565_v9, %v7561_v7  ;;  %v4492_v21 = vmul.f32 0.015625, %v1864_v10  ;;  %v4491_v22 = vmul.f32 0.015625, %v1861_v12  ;;  %v2096_v9 = vsel %vm1198_vm0, %v473_v62, 0.0 }
 0x25c   : > { %v7571_v25 = vsel %vm17383_vm9, %v7570_v50, %v7566_v19  ;;  %v2093_v10 = vsel %vm1198_vm0, %v472_v63, 0.0  ;;  %v474_v19 = vld [vmem:[%s12294_s18 + $0x960] sm:$0xff]  ;;  %vm17384_vm9 = vcmask 654912  }
 0x25d   : > { %v7580_v26 = vrot.slane %v4492_v21, %v12546_v61  ;;  %v7575_v20 = vrot.slane %v4491_v22, %v12540_v57  ;;  %2079 = vadd.xlane.f32.xlu1 %v2078_v14  ;;  %2076 = vadd.xlane.f32.xlu0 %v2075_v15 }
 0x25e   : > { %v1870_v28 = vpop.xlane.xlu1 %1869  ;;  %v1867_v55 = vpop.xlane.xlu0 %1866 }
 0x25f   : > { %v7576_v33 = vsel %vm6542_vm12, %v7575_v20, %v7571_v25  ;;  %v4494_v37 = vmul.f32 0.015625, %v1870_v28  ;;  %v4493_v38 = vmul.f32 0.015625, %v1867_v55 }
 0x260   : > { %v7581_v48 = vsel %vm6549_vm13, %v7580_v26, %v7576_v33  ;;  %v2099_v26 = vsel %vm1198_vm0, %v474_v19, 0.0 }
 0x261   : > { %v7590_v45 = vrot.slane %v4494_v37, %v12561_v13  ;;  %v7585_v51 = vrot.slane %v4493_v38, %v12556_v11  ;;  %2085 = vadd.xlane.f32.xlu1 %v2084_v30  ;;  %2082 = vadd.xlane.f32.xlu0 %v2081_v31  ;;  %v477_v30 = vld [vmem:[%s12294_s18 + $0x978] sm:$0xff]  ;;  %v476_v31 = vld [vmem:[%s12294_s18 + $0x970] sm:$0xff] }
 0x262   : > { %v1876_v52 = vpop.xlane.xlu1 %1875  ;;  %v1873_v53 = vpop.xlane.xlu0 %1872 }
 0x263   : > { %v7586_v2 = vsel %vm6556_vm14, %v7585_v51, %v7581_v48  ;;  %v4496_v59 = vmul.f32 0.015625, %v1876_v52  ;;  %v4495_v60 = vmul.f32 0.015625, %v1873_v53  ;;  %v2108_v48 = vsel %vm1198_vm0, %v477_v30, 0.0 }
 0x264   : > { %v7591_v3 = vsel %vm6563_vm15, %v7590_v45, %v7586_v2  ;;  %v2105_v45 = vsel %vm1198_vm0, %v476_v31, 0.0 }
 0x265   : > { %v13434_v4 = vsel %vm11542_vm11, %v7591_v3, %v12902_v17  ;;  %v7599_v5 = vrot.slane %v4496_v59, %v12463_v35  ;;  %v7595_v6 = vrot.slane %v4495_v60, %v12457_v32  ;;  %2091 = vadd.xlane.f32.xlu1 %v2090_v54  ;;  %2088 = vadd.xlane.f32.xlu0 %v2087_v56  ;;  %v475_v17 = vld [vmem:[%s12294_s18 + $0x968] sm:$0xff]  ;;  %v478_v56 = vld [vmem:[%s12294_s18 + $0x980] sm:$0xff] }
 0x266   : > { %v1882_v7 = vpop.xlane.xlu1 %1881  ;;  %v1879_v50 = vpop.xlane.xlu0 %1878  ;;  %v2102_v25 = vsel %vm1198_vm0, %v475_v17, 0.0  ;;  %v479_v54 = vld [vmem:[%s12294_s18 + $0x988] sm:$0xff] }
 0x267   : > { %v7600_v12 = vsel %vm6465_vm1, %v7599_v5, %v7595_v6  ;;  %v4498_v14 = vmul.f32 0.015625, %v1882_v7  ;;  %v4497_v15 = vmul.f32 0.015625, %v1879_v50  ;;  %v2114_v3 = vsel %vm1198_vm0, %v479_v54, 0.0 }
 0x268   : > { %v2111_v5 = vsel %vm1198_vm0, %v478_v56, 0.0 }
 0x269   : > { %v7609_v21 = vrot.slane %v4498_v14, %v12460_v34  ;;  %v7604_v22 = vrot.slane %v4497_v15, %v12466_v36  ;;  %2097 = vadd.xlane.f32.xlu1 %v2096_v9  ;;  %2094 = vadd.xlane.f32.xlu0 %v2093_v10  ;;  %v481_v9 = vld [vmem:[%s12294_s18 + $0x998] sm:$0xff]  ;;  %v480_v10 = vld [vmem:[%s12294_s18 + $0x990] sm:$0xff] }
 0x26a   : > { %v1888_v44 = vpop.xlane.xlu1 %1887  ;;  %v1885_v24 = vpop.xlane.xlu0 %1884 }
 0x26b   : > { %v7605_v20 = vsel %vm6472_vm2, %v7604_v22, %v7600_v12  ;;  %v4500_v28 = vmul.f32 0.015625, %v1888_v44  ;;  %v4499_v55 = vmul.f32 0.015625, %v1885_v24  ;;  %v2117_v22 = vsel %vm1198_vm0, %v480_v10, 0.0 }
 0x26c   : > { %v7610_v33 = vsel %vm6479_vm3, %v7609_v21, %v7605_v20  ;;  %v2120_v21 = vsel %vm1198_vm0, %v481_v9, 0.0  ;;  %v482_v20 = vld [vmem:[%s12294_s18 + $0x9a0] sm:$0xff] }
 0x26d   : > { %v7619_v37 = vrot.slane %v4500_v28, %v12473_v46  ;;  %v7614_v38 = vrot.slane %v4499_v55, %v12476_v47  ;;  %2103 = vadd.xlane.f32.xlu1 %v2102_v25  ;;  %2100 = vadd.xlane.f32.xlu0 %v2099_v26  ;;  %v483_v26 = vld [vmem:[%s12294_s18 + $0x9a8] sm:$0xff] }
 0x26e   : > { %v1894_v41 = vpop.xlane.xlu1 %1893  ;;  %v1891_v42 = vpop.xlane.xlu0 %1890 }
 0x26f   : > { %v7615_v51 = vsel %vm6486_vm4, %v7614_v38, %v7610_v33  ;;  %v4502_v52 = vmul.f32 0.015625, %v1894_v41  ;;  %v4501_v53 = vmul.f32 0.015625, %v1891_v42  ;;  %v2123_v38 = vsel %vm1198_vm0, %v482_v20, 0.0 }
 0x270   : > { %v7620_v2 = vsel %vm6493_vm5, %v7619_v37, %v7615_v51  ;;  %v2126_v37 = vsel %vm1198_vm0, %v483_v26, 0.0  ;;  %v484_v51 = vld [vmem:[%s12294_s18 + $0x9b0] sm:$0xff] }
 0x271   : > { %v7629_v59 = vrot.slane %v4502_v52, %v12491_v0  ;;  %v7624_v60 = vrot.slane %v4501_v53, %v12494_v1  ;;  %2109 = vadd.xlane.f32.xlu1 %v2108_v48  ;;  %2106 = vadd.xlane.f32.xlu0 %v2105_v45  ;;  %v485_v45 = vld [vmem:[%s12294_s18 + $0x9b8] sm:$0xff] }
 0x272   : > { %v1900_v62 = vpop.xlane.xlu1 %1899  ;;  %v1897_v63 = vpop.xlane.xlu0 %1896 }
 0x273   : > { %v7625_v6 = vsel %vm6500_vm6, %v7624_v60, %v7620_v2  ;;  %v4504_v7 = vmul.f32 0.015625, %v1900_v62  ;;  %v4503_v50 = vmul.f32 0.015625, %v1897_v63  ;;  %v2129_v60 = vsel %vm1198_vm0, %v484_v51, 0.0 }
 0x274   : > { %v7630_v12 = vsel %vm17372_vm7, %v7629_v59, %v7625_v6  ;;  %v2132_v59 = vsel %vm1198_vm0, %v485_v45, 0.0  ;;  %v486_v6 = vld [vmem:[%s12294_s18 + $0x9c0] sm:$0xff] }
 0x275   : > { %v7639_v14 = vrot.slane %v4504_v7, %v12508_v18  ;;  %v7634_v15 = vrot.slane %v4503_v50, %v12514_v23  ;;  %2115 = vadd.xlane.f32.xlu1 %v2114_v3  ;;  %2112 = vadd.xlane.f32.xlu0 %v2111_v5  ;;  %v487_v5 = vld [vmem:[%s12294_s18 + $0x9c8] sm:$0xff] }
 0x276   : > { %v1906_v17 = vpop.xlane.xlu1 %1905  ;;  %v1903_v19 = vpop.xlane.xlu0 %1902 }
 0x277   : > { %v7635_v44 = vsel %vm17367_vm8, %v7634_v15, %v7630_v12  ;;  %v4506_v24 = vmul.f32 0.015625, %v1906_v17  ;;  %v4505_v25 = vmul.f32 0.015625, %v1903_v19  ;;  %v2135_v15 = vsel %vm1198_vm0, %v486_v6, 0.0 }
 0x278   : > { %v7640_v28 = vsel %vm17384_vm9, %v7639_v14, %v7635_v44  ;;  %vm17385_vm9 = vcmask 786112   ;;  %v2138_v14 = vsel %vm1198_vm0, %v487_v5, 0.0  ;;  %v488_v44 = vld [vmem:[%s12294_s18 + $0x9d0] sm:$0xff] }
 0x279   : > { %v7649_v55 = vrot.slane %v4506_v24, %v12530_v43  ;;  %v7644_v30 = vrot.slane %v4505_v25, %v12524_v39  ;;  %2121 = vadd.xlane.f32.xlu1 %v2120_v21  ;;  %2118 = vadd.xlane.f32.xlu0 %v2117_v22  ;;  %v489_v22 = vld [vmem:[%s12294_s18 + $0x9d8] sm:$0xff] }
 0x27a   : > { %v1912_v31 = vpop.xlane.xlu1 %1911  ;;  %v1909_v33 = vpop.xlane.xlu0 %1908 }
 0x27b   : > { %v7645_v41 = vsel %vm6528_vm10, %v7644_v30, %v7640_v28  ;;  %v4508_v42 = vmul.f32 0.015625, %v1912_v31  ;;  %v4507_v48 = vmul.f32 0.015625, %v1909_v33  ;;  %v2144_v30 = vsel %vm1198_vm0, %v489_v22, 0.0 }
 0x27c   : > { %v7650_v52 = vsel %vm17385_vm9, %v7649_v55, %v7645_v41  ;;  %v2141_v31 = vsel %vm1198_vm0, %v488_v44, 0.0  ;;  %v490_v41 = vld [vmem:[%s12294_s18 + $0x9e0] sm:$0xff]  ;;  %vm17386_vm9 = vcmask 654912  }
 0x27d   : > { %v7659_v53 = vrot.slane %v4508_v42, %v12546_v61  ;;  %v7654_v54 = vrot.slane %v4507_v48, %v12540_v57  ;;  %2127 = vadd.xlane.f32.xlu1 %v2126_v37  ;;  %2124 = vadd.xlane.f32.xlu0 %v2123_v38 }
 0x27e   : > { %v1918_v56 = vpop.xlane.xlu1 %1917  ;;  %v1915_v2 = vpop.xlane.xlu0 %1914 }
 0x27f   : > { %v7655_v62 = vsel %vm6542_vm12, %v7654_v54, %v7650_v52  ;;  %v4510_v63 = vmul.f32 0.015625, %v1918_v56  ;;  %v4509_v3 = vmul.f32 0.015625, %v1915_v2 }
 0x280   : > { %v7660_v7 = vsel %vm6549_vm13, %v7659_v53, %v7655_v62  ;;  %v2147_v53 = vsel %vm1198_vm0, %v490_v41, 0.0 }
 0x281   : > { %v7669_v50 = vrot.slane %v4510_v63, %v12561_v13  ;;  %v7664_v9 = vrot.slane %v4509_v3, %v12556_v11  ;;  %2133 = vadd.xlane.f32.xlu1 %v2132_v59  ;;  %2130 = vadd.xlane.f32.xlu0 %v2129_v60  ;;  %v493_v59 = vld [vmem:[%s12294_s18 + $0x9f8] sm:$0xff]  ;;  %v492_v60 = vld [vmem:[%s12294_s18 + $0x9f0] sm:$0xff] }
 0x282   : > { %v1924_v10 = vpop.xlane.xlu1 %1923  ;;  %v1921_v12 = vpop.xlane.xlu0 %1920 }
 0x283   : > { %v7665_v17 = vsel %vm6556_vm14, %v7664_v9, %v7660_v7  ;;  %v4512_v19 = vmul.f32 0.015625, %v1924_v10  ;;  %v4511_v21 = vmul.f32 0.015625, %v1921_v12  ;;  %v2156_v7 = vsel %vm1198_vm0, %v493_v59, 0.0 }
 0x284   : > { %v7670_v24 = vsel %vm6563_vm15, %v7669_v50, %v7665_v17  ;;  %v2153_v50 = vsel %vm1198_vm0, %v492_v60, 0.0 }
 0x285   : > { %v13501_v25 = vsel %vm11542_vm11, %v7670_v24, %v12967_v27  ;;  %v7678_v26 = vrot.slane %v4512_v19, %v12463_v35  ;;  %v7674_v20 = vrot.slane %v4511_v21, %v12457_v32  ;;  %2139 = vadd.xlane.f32.xlu1 %v2138_v14  ;;  %2136 = vadd.xlane.f32.xlu0 %v2135_v15  ;;  %v491_v27 = vld [vmem:[%s12294_s18 + $0x9e8] sm:$0xff]  ;;  %v494_v15 = vld [vmem:[%s12294_s18 + $0xa00] sm:$0xff] }
 0x286   : > { %v1930_v28 = vpop.xlane.xlu1 %1929  ;;  %v1927_v55 = vpop.xlane.xlu0 %1926  ;;  %v2150_v52 = vsel %vm1198_vm0, %v491_v27, 0.0  ;;  %v495_v14 = vld [vmem:[%s12294_s18 + $0xa08] sm:$0xff] }
 0x287   : > { %v7679_v33 = vsel %vm6465_vm1, %v7678_v26, %v7674_v20  ;;  %v4514_v37 = vmul.f32 0.015625, %v1930_v28  ;;  %v4513_v38 = vmul.f32 0.015625, %v1927_v55  ;;  %v2162_v24 = vsel %vm1198_vm0, %v495_v14, 0.0 }
 0x288   : > { %v2159_v26 = vsel %vm1198_vm0, %v494_v15, 0.0 }
 0x289   : > { %v7688_v42 = vrot.slane %v4514_v37, %v12460_v34  ;;  %v7683_v48 = vrot.slane %v4513_v38, %v12466_v36  ;;  %2145 = vadd.xlane.f32.xlu1 %v2144_v30  ;;  %2142 = vadd.xlane.f32.xlu0 %v2141_v31  ;;  %v497_v30 = vld [vmem:[%s12294_s18 + $0xa18] sm:$0xff]  ;;  %v496_v31 = vld [vmem:[%s12294_s18 + $0xa10] sm:$0xff] }
 0x28a   : > { %v1936_v45 = vpop.xlane.xlu1 %1935  ;;  %v1933_v51 = vpop.xlane.xlu0 %1932 }
 0x28b   : > { %v7684_v54 = vsel %vm6472_vm2, %v7683_v48, %v7679_v33  ;;  %v4516_v56 = vmul.f32 0.015625, %v1936_v45  ;;  %v4515_v2 = vmul.f32 0.015625, %v1933_v51  ;;  %v2165_v48 = vsel %vm1198_vm0, %v496_v31, 0.0 }
 0x28c   : > { %v7689_v62 = vsel %vm6479_vm3, %v7688_v42, %v7684_v54  ;;  %v2168_v42 = vsel %vm1198_vm0, %v497_v30, 0.0  ;;  %v498_v54 = vld [vmem:[%s12294_s18 + $0xa20] sm:$0xff] }
 0x28d   : > { %v7698_v63 = vrot.slane %v4516_v56, %v12473_v46  ;;  %v7693_v3 = vrot.slane %v4515_v2, %v12476_v47  ;;  %2151 = vadd.xlane.f32.xlu1 %v2150_v52  ;;  %2148 = vadd.xlane.f32.xlu0 %v2147_v53  ;;  %v499_v53 = vld [vmem:[%s12294_s18 + $0xa28] sm:$0xff] }
 0x28e   : > { %v1942_v5 = vpop.xlane.xlu1 %1941  ;;  %v1939_v6 = vpop.xlane.xlu0 %1938 }
 0x28f   : > { %v7694_v9 = vsel %vm6486_vm4, %v7693_v3, %v7689_v62  ;;  %v4518_v10 = vmul.f32 0.015625, %v1942_v5  ;;  %v4517_v12 = vmul.f32 0.015625, %v1939_v6  ;;  %v2171_v3 = vsel %vm1198_vm0, %v498_v54, 0.0 }
 0x290   : > { %v7699_v17 = vsel %vm6493_vm5, %v7698_v63, %v7694_v9  ;;  %v2174_v63 = vsel %vm1198_vm0, %v499_v53, 0.0  ;;  %v500_v9 = vld [vmem:[%s12294_s18 + $0xa30] sm:$0xff] }
 0x291   : > { %v7708_v19 = vrot.slane %v4518_v10, %v12491_v0  ;;  %v7703_v21 = vrot.slane %v4517_v12, %v12494_v1  ;;  %2157 = vadd.xlane.f32.xlu1 %v2156_v7  ;;  %2154 = vadd.xlane.f32.xlu0 %v2153_v50  ;;  %v501_v50 = vld [vmem:[%s12294_s18 + $0xa38] sm:$0xff] }
 0x292   : > { %v1948_v22 = vpop.xlane.xlu1 %1947  ;;  %v1945_v44 = vpop.xlane.xlu0 %1944 }
 0x293   : > { %v7704_v20 = vsel %vm6500_vm6, %v7703_v21, %v7699_v17  ;;  %v4520_v28 = vmul.f32 0.015625, %v1948_v22  ;;  %v4519_v55 = vmul.f32 0.015625, %v1945_v44  ;;  %v2177_v21 = vsel %vm1198_vm0, %v500_v9, 0.0 }
 0x294   : > { %v7709_v33 = vsel %vm17372_vm7, %v7708_v19, %v7704_v20  ;;  %v2180_v19 = vsel %vm1198_vm0, %v501_v50, 0.0  ;;  %v502_v20 = vld [vmem:[%s12294_s18 + $0xa40] sm:$0xff] }
 0x295   : > { %v7718_v37 = vrot.slane %v4520_v28, %v12508_v18  ;;  %v7713_v38 = vrot.slane %v4519_v55, %v12514_v23  ;;  %2163 = vadd.xlane.f32.xlu1 %v2162_v24  ;;  %2160 = vadd.xlane.f32.xlu0 %v2159_v26  ;;  %v503_v26 = vld [vmem:[%s12294_s18 + $0xa48] sm:$0xff] }
 0x296   : > { %v1954_v27 = vpop.xlane.xlu1 %1953  ;;  %v1951_v41 = vpop.xlane.xlu0 %1950 }
 0x297   : > { %v7714_v45 = vsel %vm17367_vm8, %v7713_v38, %v7709_v33  ;;  %v4522_v51 = vmul.f32 0.015625, %v1954_v27  ;;  %v4521_v52 = vmul.f32 0.015625, %v1951_v41  ;;  %v2183_v38 = vsel %vm1198_vm0, %v502_v20, 0.0 }
 0x298   : > { %v7719_v56 = vsel %vm17386_vm9, %v7718_v37, %v7714_v45  ;;  %vm17387_vm9 = vcmask 786112   ;;  %v2186_v37 = vsel %vm1198_vm0, %v503_v26, 0.0  ;;  %v504_v45 = vld [vmem:[%s12294_s18 + $0xa50] sm:$0xff] }
 0x299   : > { %v7728_v2 = vrot.slane %v4522_v51, %v12530_v43  ;;  %v7723_v59 = vrot.slane %v4521_v52, %v12524_v39  ;;  %2169 = vadd.xlane.f32.xlu1 %v2168_v42  ;;  %2166 = vadd.xlane.f32.xlu0 %v2165_v48  ;;  %v505_v48 = vld [vmem:[%s12294_s18 + $0xa58] sm:$0xff] }
 0x29a   : > { %v1960_v60 = vpop.xlane.xlu1 %1959  ;;  %v1957_v62 = vpop.xlane.xlu0 %1956 }
 0x29b   : > { %v7724_v5 = vsel %vm6528_vm10, %v7723_v59, %v7719_v56  ;;  %v4524_v6 = vmul.f32 0.015625, %v1960_v60  ;;  %v4523_v7 = vmul.f32 0.015625, %v1957_v62  ;;  %v2192_v59 = vsel %vm1198_vm0, %v505_v48, 0.0 }
 0x29c   : > { %v7729_v10 = vsel %vm17387_vm9, %v7728_v2, %v7724_v5  ;;  %v2189_v60 = vsel %vm1198_vm0, %v504_v45, 0.0  ;;  %v506_v5 = vld [vmem:[%s12294_s18 + $0xa60] sm:$0xff] }
 0x29d   : > { %v7738_v12 = vrot.slane %v4524_v6, %v12546_v61  ;;  %v7733_v14 = vrot.slane %v4523_v7, %v12540_v57  ;;  %2175 = vadd.xlane.f32.xlu1 %v2174_v63  ;;  %2172 = vadd.xlane.f32.xlu0 %v2171_v3 }
 0x29e   : > { %v1966_v15 = vpop.xlane.xlu1 %1965  ;;  %v1963_v17 = vpop.xlane.xlu0 %1962 }
 0x29f   : > { %v7734_v22 = vsel %vm6542_vm12, %v7733_v14, %v7729_v10  ;;  %v4526_v44 = vmul.f32 0.015625, %v1966_v15  ;;  %v4525_v24 = vmul.f32 0.015625, %v1963_v17 }
 0x2a0   : > { %v7739_v28 = vsel %vm6549_vm13, %v7738_v12, %v7734_v22  ;;  %v2195_v12 = vsel %vm1198_vm0, %v506_v5, 0.0 }
 0x2a1   : > { %v7748_v55 = vrot.slane %v4526_v44, %v12561_v13  ;;  %v7743_v30 = vrot.slane %v4525_v24, %v12556_v11  ;;  %2181 = vadd.xlane.f32.xlu1 %v2180_v19  ;;  %2178 = vadd.xlane.f32.xlu0 %v2177_v21  ;;  %v509_v19 = vld [vmem:[%s12294_s18 + $0xa78] sm:$0xff]  ;;  %v508_v21 = vld [vmem:[%s12294_s18 + $0xa70] sm:$0xff] }
 0x2a2   : > { %v1972_v31 = vpop.xlane.xlu1 %1971  ;;  %v1969_v33 = vpop.xlane.xlu0 %1968 }
 0x2a3   : > { %v7744_v27 = vsel %vm6556_vm14, %v7743_v30, %v7739_v28  ;;  %v4528_v41 = vmul.f32 0.015625, %v1972_v31  ;;  %v4527_v42 = vmul.f32 0.015625, %v1969_v33  ;;  %v2204_v28 = vsel %vm1198_vm0, %v509_v19, 0.0 }
 0x2a4   : > { %v7749_v51 = vsel %vm6563_vm15, %v7748_v55, %v7744_v27  ;;  %v2201_v55 = vsel %vm1198_vm0, %v508_v21, 0.0 }
 0x2a5   : > { %v13568_v52 = vsel %vm11542_vm11, %v7749_v51, %v13032_v49  ;;  %v7757_v53 = vrot.slane %v4528_v41, %v12463_v35  ;;  %v7753_v54 = vrot.slane %v4527_v42, %v12457_v32  ;;  %2187 = vadd.xlane.f32.xlu1 %v2186_v37  ;;  %2184 = vadd.xlane.f32.xlu0 %v2183_v38  ;;  %v507_v49 = vld [vmem:[%s12294_s18 + $0xa68] sm:$0xff]  ;;  %v510_v38 = vld [vmem:[%s12294_s18 + $0xa80] sm:$0xff]  ;;  %vm17388_vm11 = vcmask 654912  }
 0x2a6   : > { %v1978_v56 = vpop.xlane.xlu1 %1977  ;;  %v1975_v2 = vpop.xlane.xlu0 %1974  ;;  %v2198_v10 = vsel %vm1198_vm0, %v507_v49, 0.0  ;;  %v511_v37 = vld [vmem:[%s12294_s18 + $0xa88] sm:$0xff] }
 0x2a7   : > { %v7758_v62 = vsel %vm6465_vm1, %v7757_v53, %v7753_v54  ;;  %v4530_v63 = vmul.f32 0.015625, %v1978_v56  ;;  %v4529_v3 = vmul.f32 0.015625, %v1975_v2  ;;  %v2210_v51 = vsel %vm1198_vm0, %v511_v37, 0.0 }
 0x2a8   : > { %v2207_v53 = vsel %vm1198_vm0, %v510_v38, 0.0 }
 0x2a9   : > { %v7767_v6 = vrot.slane %v4530_v63, %v12460_v34  ;;  %v7762_v7 = vrot.slane %v4529_v3, %v12466_v36  ;;  %2193 = vadd.xlane.f32.xlu1 %v2192_v59  ;;  %2190 = vadd.xlane.f32.xlu0 %v2189_v60  ;;  %v513_v59 = vld [vmem:[%s12294_s18 + $0xa98] sm:$0xff]  ;;  %v512_v60 = vld [vmem:[%s12294_s18 + $0xa90] sm:$0xff] }
 0x2aa   : > { %v1984_v50 = vpop.xlane.xlu1 %1983  ;;  %v1981_v9 = vpop.xlane.xlu0 %1980 }
 0x2ab   : > { %v7763_v14 = vsel %vm6472_vm2, %v7762_v7, %v7758_v62  ;;  %v4532_v15 = vmul.f32 0.015625, %v1984_v50  ;;  %v4531_v17 = vmul.f32 0.015625, %v1981_v9  ;;  %v2213_v7 = vsel %vm1198_vm0, %v512_v60, 0.0 }
 0x2ac   : > { %v7768_v22 = vsel %vm6479_vm3, %v7767_v6, %v7763_v14  ;;  %v2216_v6 = vsel %vm1198_vm0, %v513_v59, 0.0  ;;  %v514_v14 = vld [vmem:[%s12294_s18 + $0xaa0] sm:$0xff] }
 0x2ad   : > { %v7777_v44 = vrot.slane %v4532_v15, %v12473_v46  ;;  %v7772_v24 = vrot.slane %v4531_v17, %v12476_v47  ;;  %2199 = vadd.xlane.f32.xlu1 %v2198_v10  ;;  %2196 = vadd.xlane.f32.xlu0 %v2195_v12  ;;  %v515_v12 = vld [vmem:[%s12294_s18 + $0xaa8] sm:$0xff] }
 0x2ae   : > { %v1990_v26 = vpop.xlane.xlu1 %1989  ;;  %v1987_v20 = vpop.xlane.xlu0 %1986 }
 0x2af   : > { %v7773_v30 = vsel %vm6486_vm4, %v7772_v24, %v7768_v22  ;;  %v4534_v31 = vmul.f32 0.015625, %v1990_v26  ;;  %v4533_v33 = vmul.f32 0.015625, %v1987_v20  ;;  %v2219_v24 = vsel %vm1198_vm0, %v514_v14, 0.0 }
 0x2b0   : > { %v7778_v27 = vsel %vm6493_vm5, %v7777_v44, %v7773_v30  ;;  %v2222_v44 = vsel %vm1198_vm0, %v515_v12, 0.0  ;;  %v516_v30 = vld [vmem:[%s12294_s18 + $0xab0] sm:$0xff] }
 0x2b1   : > { %v7787_v41 = vrot.slane %v4534_v31, %v12491_v0  ;;  %v7782_v42 = vrot.slane %v4533_v33, %v12494_v1  ;;  %2205 = vadd.xlane.f32.xlu1 %v2204_v28  ;;  %2202 = vadd.xlane.f32.xlu0 %v2201_v55  ;;  %v517_v55 = vld [vmem:[%s12294_s18 + $0xab8] sm:$0xff] }
 0x2b2   : > { %v1996_v48 = vpop.xlane.xlu1 %1995  ;;  %v1993_v45 = vpop.xlane.xlu0 %1992 }
 0x2b3   : > { %v7783_v54 = vsel %vm6500_vm6, %v7782_v42, %v7778_v27  ;;  %v4536_v56 = vmul.f32 0.015625, %v1996_v48  ;;  %v4535_v2 = vmul.f32 0.015625, %v1993_v45  ;;  %v2225_v42 = vsel %vm1198_vm0, %v516_v30, 0.0 }
 0x2b4   : > { %v7788_v62 = vsel %vm17372_vm7, %v7787_v41, %v7783_v54  ;;  %v2228_v41 = vsel %vm1198_vm0, %v517_v55, 0.0  ;;  %v518_v54 = vld [vmem:[%s12294_s18 + $0xac0] sm:$0xff] }
 0x2b5   : > { %v7797_v63 = vrot.slane %v4536_v56, %v12508_v18  ;;  %v7792_v3 = vrot.slane %v4535_v2, %v12514_v23  ;;  %2211 = vadd.xlane.f32.xlu1 %v2210_v51  ;;  %2208 = vadd.xlane.f32.xlu0 %v2207_v53  ;;  %v519_v53 = vld [vmem:[%s12294_s18 + $0xac8] sm:$0xff] }
 0x2b6   : > { %v2002_v49 = vpop.xlane.xlu1 %2001  ;;  %v1999_v5 = vpop.xlane.xlu0 %1998 }
 0x2b7   : > { %v7793_v50 = vsel %vm17367_vm8, %v7792_v3, %v7788_v62  ;;  %v4538_v9 = vmul.f32 0.015625, %v2002_v49  ;;  %v4537_v10 = vmul.f32 0.015625, %v1999_v5  ;;  %v2231_v3 = vsel %vm1198_vm0, %v518_v54, 0.0 }
 0x2b8   : > { %v7798_v15 = vsel %vm17388_vm11, %v7797_v63, %v7793_v50  ;;  %vm11544_vm11 = vcmask 1042434   ;;  %v2234_v63 = vsel %vm1198_vm0, %v519_v53, 0.0  ;;  %v520_v50 = vld [vmem:[%s12294_s18 + $0xad0] sm:$0xff] }
 0x2b9   : > { %v7807_v17 = vrot.slane %v4538_v9, %v12530_v43  ;;  %v7802_v19 = vrot.slane %v4537_v10, %v12524_v39  ;;  %2217 = vadd.xlane.f32.xlu1 %v2216_v6  ;;  %2214 = vadd.xlane.f32.xlu0 %v2213_v7  ;;  %v521_v7 = vld [vmem:[%s12294_s18 + $0xad8] sm:$0xff] }
 0x2ba   : > { %v2008_v21 = vpop.xlane.xlu1 %2007  ;;  %v2005_v22 = vpop.xlane.xlu0 %2004 }
 0x2bb   : > { %v7803_v26 = vsel %vm6528_vm10, %v7802_v19, %v7798_v15  ;;  %v4540_v20 = vmul.f32 0.015625, %v2008_v21  ;;  %v4539_v28 = vmul.f32 0.015625, %v2005_v22  ;;  %v2240_v19 = vsel %vm1198_vm0, %v521_v7, 0.0 }
 0x2bc   : > { %v7808_v31 = vsel %vm17387_vm9, %v7807_v17, %v7803_v26  ;;  %v2237_v21 = vsel %vm1198_vm0, %v520_v50, 0.0  ;;  %v522_v26 = vld [vmem:[%s12294_s18 + $0xae0] sm:$0xff]  ;;  %vm17389_vm9 = vcmask 654912  }
 0x2bd   : > { %v7817_v33 = vrot.slane %v4540_v20, %v12546_v61  ;;  %v7812_v37 = vrot.slane %v4539_v28, %v12540_v57  ;;  %2223 = vadd.xlane.f32.xlu1 %v2222_v44  ;;  %2220 = vadd.xlane.f32.xlu0 %v2219_v24 }
 0x2be   : > { %v2014_v38 = vpop.xlane.xlu1 %2013  ;;  %v2011_v27 = vpop.xlane.xlu0 %2010 }
 0x2bf   : > { %v7813_v48 = vsel %vm6542_vm12, %v7812_v37, %v7808_v31  ;;  %v4542_v45 = vmul.f32 0.015625, %v2014_v38  ;;  %v4541_v51 = vmul.f32 0.015625, %v2011_v27 }
 0x2c0   : > { %v7818_v56 = vsel %vm6549_vm13, %v7817_v33, %v7813_v48  ;;  %v2243_v33 = vsel %vm1198_vm0, %v522_v26, 0.0 }
 0x2c1   : > { %v7827_v2 = vrot.slane %v4542_v45, %v12561_v13  ;;  %v7822_v59 = vrot.slane %v4541_v51, %v12556_v11  ;;  %2229 = vadd.xlane.f32.xlu1 %v2228_v41  ;;  %2226 = vadd.xlane.f32.xlu0 %v2225_v42  ;;  %v525_v41 = vld [vmem:[%s12294_s18 + $0xaf8] sm:$0xff]  ;;  %v524_v42 = vld [vmem:[%s12294_s18 + $0xaf0] sm:$0xff] }
 0x2c2   : > { %v2020_v60 = vpop.xlane.xlu1 %2019  ;;  %v2017_v62 = vpop.xlane.xlu0 %2016 }
 0x2c3   : > { %v7823_v49 = vsel %vm6556_vm14, %v7822_v59, %v7818_v56  ;;  %v4544_v5 = vmul.f32 0.015625, %v2020_v60  ;;  %v4543_v6 = vmul.f32 0.015625, %v2017_v62  ;;  %v2252_v56 = vsel %vm1198_vm0, %v525_v41, 0.0 }
 0x2c4   : > { %v7828_v9 = vsel %vm6563_vm15, %v7827_v2, %v7823_v49  ;;  %v2249_v2 = vsel %vm1198_vm0, %v524_v42, 0.0 }
 0x2c5   : > { %v13635_v10 = vsel %vm11544_vm11, %v7828_v9, %v13099_v8  ;;  %v7836_v12 = vrot.slane %v4544_v5, %v12463_v35  ;;  %v7832_v14 = vrot.slane %v4543_v6, %v12457_v32  ;;  %2235 = vadd.xlane.f32.xlu1 %v2234_v63  ;;  %2232 = vadd.xlane.f32.xlu0 %v2231_v3  ;;  %v523_v8 = vld [vmem:[%s12294_s18 + $0xae8] sm:$0xff]  ;;  %v526_v3 = vld [vmem:[%s12294_s18 + $0xb00] sm:$0xff] }
 0x2c6   : > { %v2026_v15 = vpop.xlane.xlu1 %2025  ;;  %v2023_v17 = vpop.xlane.xlu0 %2022  ;;  %v2246_v31 = vsel %vm1198_vm0, %v523_v8, 0.0  ;;  %v527_v63 = vld [vmem:[%s12294_s18 + $0xb08] sm:$0xff] }
 0x2c7   : > { %v7837_v22 = vsel %vm6465_vm1, %v7836_v12, %v7832_v14  ;;  %v4546_v44 = vmul.f32 0.015625, %v2026_v15  ;;  %v4545_v24 = vmul.f32 0.015625, %v2023_v17  ;;  %v2258_v9 = vsel %vm1198_vm0, %v527_v63, 0.0 }
 0x2c8   : > { %v2255_v12 = vsel %vm1198_vm0, %v526_v3, 0.0 }
 0x2c9   : > { %v7846_v20 = vrot.slane %v4546_v44, %v12460_v34  ;;  %v7841_v28 = vrot.slane %v4545_v24, %v12466_v36  ;;  %2241 = vadd.xlane.f32.xlu1 %v2240_v19  ;;  %2238 = vadd.xlane.f32.xlu0 %v2237_v21  ;;  %v529_v19 = vld [vmem:[%s12294_s18 + $0xb18] sm:$0xff]  ;;  %v528_v21 = vld [vmem:[%s12294_s18 + $0xb10] sm:$0xff] }
 0x2ca   : > { %v2032_v55 = vpop.xlane.xlu1 %2031  ;;  %v2029_v30 = vpop.xlane.xlu0 %2028 }
 0x2cb   : > { %v7842_v37 = vsel %vm6472_vm2, %v7841_v28, %v7837_v22  ;;  %v4548_v38 = vmul.f32 0.015625, %v2032_v55  ;;  %v4547_v27 = vmul.f32 0.015625, %v2029_v30  ;;  %v2261_v28 = vsel %vm1198_vm0, %v528_v21, 0.0 }
 0x2cc   : > { %v7847_v48 = vsel %vm6479_vm3, %v7846_v20, %v7842_v37  ;;  %v2264_v20 = vsel %vm1198_vm0, %v529_v19, 0.0  ;;  %v530_v37 = vld [vmem:[%s12294_s18 + $0xb20] sm:$0xff] }
 0x2cd   : > { %v7856_v45 = vrot.slane %v4548_v38, %v12473_v46  ;;  %v7851_v51 = vrot.slane %v4547_v27, %v12476_v47  ;;  %2247 = vadd.xlane.f32.xlu1 %v2246_v31  ;;  %2244 = vadd.xlane.f32.xlu0 %v2243_v33  ;;  %v531_v33 = vld [vmem:[%s12294_s18 + $0xb28] sm:$0xff] }
 0x2ce   : > { %v2038_v53 = vpop.xlane.xlu1 %2037  ;;  %v2035_v54 = vpop.xlane.xlu0 %2034 }
 0x2cf   : > { %v7852_v59 = vsel %vm6486_vm4, %v7851_v51, %v7847_v48  ;;  %v4550_v60 = vmul.f32 0.015625, %v2038_v53  ;;  %v4549_v62 = vmul.f32 0.015625, %v2035_v54  ;;  %v2267_v51 = vsel %vm1198_vm0, %v530_v37, 0.0 }
 0x2d0   : > { %v7857_v49 = vsel %vm6493_vm5, %v7856_v45, %v7852_v59  ;;  %v2270_v45 = vsel %vm1198_vm0, %v531_v33, 0.0  ;;  %v532_v59 = vld [vmem:[%s12294_s18 + $0xb30] sm:$0xff] }
 0x2d1   : > { %v7866_v5 = vrot.slane %v4550_v60, %v12491_v0  ;;  %v7861_v6 = vrot.slane %v4549_v62, %v12494_v1  ;;  %2253 = vadd.xlane.f32.xlu1 %v2252_v56  ;;  %2250 = vadd.xlane.f32.xlu0 %v2249_v2  ;;  %v533_v2 = vld [vmem:[%s12294_s18 + $0xb38] sm:$0xff] }
 0x2d2   : > { %v2044_v7 = vpop.xlane.xlu1 %2043  ;;  %v2041_v50 = vpop.xlane.xlu0 %2040 }
 0x2d3   : > { %v7862_v14 = vsel %vm6500_vm6, %v7861_v6, %v7857_v49  ;;  %v4552_v15 = vmul.f32 0.015625, %v2044_v7  ;;  %v4551_v17 = vmul.f32 0.015625, %v2041_v50  ;;  %v2273_v6 = vsel %vm1198_vm0, %v532_v59, 0.0 }
 0x2d4   : > { %v7867_v22 = vsel %vm17372_vm7, %v7866_v5, %v7862_v14  ;;  %v2276_v5 = vsel %vm1198_vm0, %v533_v2, 0.0  ;;  %v534_v14 = vld [vmem:[%s12294_s18 + $0xb40] sm:$0xff] }
 0x2d5   : > { %v7876_v44 = vrot.slane %v4552_v15, %v12508_v18  ;;  %v7871_v24 = vrot.slane %v4551_v17, %v12514_v23  ;;  %2259 = vadd.xlane.f32.xlu1 %v2258_v9  ;;  %2256 = vadd.xlane.f32.xlu0 %v2255_v12  ;;  %v535_v12 = vld [vmem:[%s12294_s18 + $0xb48] sm:$0xff] }
 0x2d6   : > { %v2050_v8 = vpop.xlane.xlu1 %2049  ;;  %v2047_v26 = vpop.xlane.xlu0 %2046 }
 0x2d7   : > { %v7872_v55 = vsel %vm17367_vm8, %v7871_v24, %v7867_v22  ;;  %v4554_v30 = vmul.f32 0.015625, %v2050_v8  ;;  %v4553_v31 = vmul.f32 0.015625, %v2047_v26  ;;  %v2279_v24 = vsel %vm1198_vm0, %v534_v14, 0.0 }
 0x2d8   : > { %v7877_v38 = vsel %vm17389_vm9, %v7876_v44, %v7872_v55  ;;  %vm17390_vm9 = vcmask 786112   ;;  %v2282_v44 = vsel %vm1198_vm0, %v535_v12, 0.0  ;;  %v536_v55 = vld [vmem:[%s12294_s18 + $0xb50] sm:$0xff] }
 0x2d9   : > { %v7886_v27 = vrot.slane %v4554_v30, %v12530_v43  ;;  %v7881_v41 = vrot.slane %v4553_v31, %v12524_v39  ;;  %2265 = vadd.xlane.f32.xlu1 %v2264_v20  ;;  %2262 = vadd.xlane.f32.xlu0 %v2261_v28  ;;  %v537_v28 = vld [vmem:[%s12294_s18 + $0xb58] sm:$0xff] }
 0x2da   : > { %v2056_v42 = vpop.xlane.xlu1 %2055  ;;  %v2053_v48 = vpop.xlane.xlu0 %2052 }
 0x2db   : > { %v7882_v53 = vsel %vm6528_vm10, %v7881_v41, %v7877_v38  ;;  %v4556_v54 = vmul.f32 0.015625, %v2056_v42  ;;  %v4555_v56 = vmul.f32 0.015625, %v2053_v48  ;;  %v2288_v41 = vsel %vm1198_vm0, %v537_v28, 0.0 }
 0x2dc   : > { %v7887_v60 = vsel %vm17390_vm9, %v7886_v27, %v7882_v53  ;;  %v2285_v42 = vsel %vm1198_vm0, %v536_v55, 0.0  ;;  %v539_v53 = vld [vmem:[%s12294_s18 + $0xb68] sm:$0xff]  ;;  %vm17391_vm9 = vcmask 654912  }
 0x2dd   : > { %v7896_v62 = vrot.slane %v4556_v54, %v12546_v61  ;;  %v7891_v63 = vrot.slane %v4555_v56, %v12540_v57  ;;  %2271 = vadd.xlane.f32.xlu1 %v2270_v45  ;;  %2268 = vadd.xlane.f32.xlu0 %v2267_v51  ;;  %v538_v54 = vld [vmem:[%s12294_s18 + $0xb60] sm:$0xff] }
 0x2de   : > { %v2062_v3 = vpop.xlane.xlu1 %2061  ;;  %v2059_v49 = vpop.xlane.xlu0 %2058 }
 0x2df   : > { %v7892_v7 = vsel %vm6542_vm12, %v7891_v63, %v7887_v60  ;;  %v4558_v50 = vmul.f32 0.015625, %v2062_v3  ;;  %v4557_v9 = vmul.f32 0.015625, %v2059_v49  ;;  %v2294_v60 = vsel %vm1198_vm0, %v539_v53, 0.0 }
 0x2e0   : > { %v7897_v15 = vsel %vm6549_vm13, %v7896_v62, %v7892_v7  ;;  %v2291_v62 = vsel %vm1198_vm0, %v538_v54, 0.0 }
 0x2e1   : > { %v7906_v17 = vrot.slane %v4558_v50, %v12561_v13  ;;  %v7901_v19 = vrot.slane %v4557_v9, %v12556_v11  ;;  %2277 = vadd.xlane.f32.xlu1 %v2276_v5  ;;  %2274 = vadd.xlane.f32.xlu0 %v2273_v6  ;;  %v541_v5 = vld [vmem:[%s12294_s18 + $0xb78] sm:$0xff]  ;;  %v540_v6 = vld [vmem:[%s12294_s18 + $0xb70] sm:$0xff] }
 0x2e2   : > { %v2068_v21 = vpop.xlane.xlu1 %2067  ;;  %v2065_v22 = vpop.xlane.xlu0 %2064 }
 0x2e3   : > { %v7902_v8 = vsel %vm6556_vm14, %v7901_v19, %v7897_v15  ;;  %v4560_v26 = vmul.f32 0.015625, %v2068_v21  ;;  %v4559_v20 = vmul.f32 0.015625, %v2065_v22  ;;  %v2300_v15 = vsel %vm1198_vm0, %v541_v5, 0.0 }
 0x2e4   : > { %v7907_v30 = vsel %vm6563_vm15, %v7906_v17, %v7902_v8  ;;  %v2297_v17 = vsel %vm1198_vm0, %v540_v6, 0.0 }
 0x2e5   : > { %v7915_v31 = vrot.slane %v4560_v26, %v12463_v35  ;;  %v7911_v33 = vrot.slane %v4559_v20, %v12457_v32  ;;  %2283 = vadd.xlane.f32.xlu1 %v2282_v44  ;;  %2280 = vadd.xlane.f32.xlu0 %v2279_v24  ;;  %v13704_v37 = vsel %vm11544_vm11, %v7907_v30, %v13166_v29  ;;  %v543_v44 = vld [vmem:[%s12294_s18 + $0xb88] sm:$0xff]  ;;  %v542_v24 = vld [vmem:[%s12294_s18 + $0xb80] sm:$0xff] }
 0x2e6   : > { %v2074_v38 = vpop.xlane.xlu1 %2073  ;;  %v2071_v27 = vpop.xlane.xlu0 %2070  ;;  %v2306_v30 = vsel %vm1198_vm0, %v543_v44, 0.0 }
 0x2e7   : > { %v7916_v48 = vsel %vm6465_vm1, %v7915_v31, %v7911_v33  ;;  %v4562_v45 = vmul.f32 0.015625, %v2074_v38  ;;  %v4561_v51 = vmul.f32 0.015625, %v2071_v27  ;;  %v2303_v31 = vsel %vm1198_vm0, %v542_v24, 0.0 }
 0x2e9   : > { %v7925_v56 = vrot.slane %v4562_v45, %v12460_v34  ;;  %v7920_v2 = vrot.slane %v4561_v51, %v12466_v36  ;;  %2289 = vadd.xlane.f32.xlu1 %v2288_v41  ;;  %2286 = vadd.xlane.f32.xlu0 %v2285_v42  ;;  %v545_v41 = vld [vmem:[%s12294_s18 + $0xb98] sm:$0xff]  ;;  %v544_v42 = vld [vmem:[%s12294_s18 + $0xb90] sm:$0xff] }
 0x2ea   : > { %v2080_v29 = vpop.xlane.xlu1 %2079  ;;  %v2077_v59 = vpop.xlane.xlu0 %2076 }
 0x2eb   : > { %v7921_v63 = vsel %vm6472_vm2, %v7920_v2, %v7916_v48  ;;  %v4564_v3 = vmul.f32 0.015625, %v2080_v29  ;;  %v4563_v49 = vmul.f32 0.015625, %v2077_v59  ;;  %v2309_v2 = vsel %vm1198_vm0, %v544_v42, 0.0 }
 0x2ec   : > { %v7926_v7 = vsel %vm6479_vm3, %v7925_v56, %v7921_v63  ;;  %v2312_v56 = vsel %vm1198_vm0, %v545_v41, 0.0  ;;  %v546_v63 = vld [vmem:[%s12294_s18 + $0xba0] sm:$0xff] }
 0x2ed   : > { %v7935_v50 = vrot.slane %v4564_v3, %v12473_v46  ;;  %v7930_v9 = vrot.slane %v4563_v49, %v12476_v47  ;;  %2295 = vadd.xlane.f32.xlu1 %v2294_v60  ;;  %2292 = vadd.xlane.f32.xlu0 %v2291_v62  ;;  %v547_v62 = vld [vmem:[%s12294_s18 + $0xba8] sm:$0xff] }
 0x2ee   : > { %v2086_v12 = vpop.xlane.xlu1 %2085  ;;  %v2083_v14 = vpop.xlane.xlu0 %2082 }
 0x2ef   : > { %v7931_v19 = vsel %vm6486_vm4, %v7930_v9, %v7926_v7  ;;  %v4566_v21 = vmul.f32 0.015625, %v2086_v12  ;;  %v4565_v22 = vmul.f32 0.015625, %v2083_v14  ;;  %v2315_v9 = vsel %vm1198_vm0, %v546_v63, 0.0 }
 0x2f0   : > { %v7936_v8 = vsel %vm6493_vm5, %v7935_v50, %v7931_v19  ;;  %v2318_v50 = vsel %vm1198_vm0, %v547_v62, 0.0  ;;  %v548_v19 = vld [vmem:[%s12294_s18 + $0xbb0] sm:$0xff] }
 0x2f1   : > { %v7945_v26 = vrot.slane %v4566_v21, %v12491_v0  ;;  %v7940_v20 = vrot.slane %v4565_v22, %v12494_v1  ;;  %2301 = vadd.xlane.f32.xlu1 %v2300_v15  ;;  %2298 = vadd.xlane.f32.xlu0 %v2297_v17  ;;  %v549_v17 = vld [vmem:[%s12294_s18 + $0xbb8] sm:$0xff] }
 0x2f2   : > { %v2092_v28 = vpop.xlane.xlu1 %2091  ;;  %v2089_v55 = vpop.xlane.xlu0 %2088 }
 0x2f3   : > { %v7941_v33 = vsel %vm6500_vm6, %v7940_v20, %v7936_v8  ;;  %v4568_v38 = vmul.f32 0.015625, %v2092_v28  ;;  %v4567_v27 = vmul.f32 0.015625, %v2089_v55  ;;  %v2321_v20 = vsel %vm1198_vm0, %v548_v19, 0.0 }
 0x2f4   : > { %v7946_v48 = vsel %vm17372_vm7, %v7945_v26, %v7941_v33  ;;  %v2324_v26 = vsel %vm1198_vm0, %v549_v17, 0.0  ;;  %v550_v33 = vld [vmem:[%s12294_s18 + $0xbc0] sm:$0xff] }
 0x2f5   : > { %v7955_v45 = vrot.slane %v4568_v38, %v12508_v18  ;;  %v7950_v51 = vrot.slane %v4567_v27, %v12514_v23  ;;  %2307 = vadd.xlane.f32.xlu1 %v2306_v30  ;;  %2304 = vadd.xlane.f32.xlu0 %v2303_v31  ;;  %v551_v31 = vld [vmem:[%s12294_s18 + $0xbc8] sm:$0xff] }
 0x2f6   : > { %v2098_v53 = vpop.xlane.xlu1 %2097  ;;  %v2095_v54 = vpop.xlane.xlu0 %2094 }
 0x2f7   : > { %v7951_v29 = vsel %vm17367_vm8, %v7950_v51, %v7946_v48  ;;  %v4570_v59 = vmul.f32 0.015625, %v2098_v53  ;;  %v4569_v60 = vmul.f32 0.015625, %v2095_v54  ;;  %v2327_v51 = vsel %vm1198_vm0, %v550_v33, 0.0 }
 0x2f8   : > { %v7956_v3 = vsel %vm17391_vm9, %v7955_v45, %v7951_v29  ;;  %vm17392_vm9 = vcmask 786112   ;;  %v2330_v45 = vsel %vm1198_vm0, %v551_v31, 0.0  ;;  %v552_v29 = vld [vmem:[%s12294_s18 + $0xbd0] sm:$0xff] }
 0x2f9   : > { %v7965_v49 = vrot.slane %v4570_v59, %v12530_v43  ;;  %v7960_v5 = vrot.slane %v4569_v60, %v12524_v39  ;;  %2313 = vadd.xlane.f32.xlu1 %v2312_v56  ;;  %2310 = vadd.xlane.f32.xlu0 %v2309_v2  ;;  %v553_v2 = vld [vmem:[%s12294_s18 + $0xbd8] sm:$0xff] }
 0x2fa   : > { %v2104_v6 = vpop.xlane.xlu1 %2103  ;;  %v2101_v7 = vpop.xlane.xlu0 %2100 }
 0x2fb   : > { %v7961_v12 = vsel %vm6528_vm10, %v7960_v5, %v7956_v3  ;;  %v4572_v14 = vmul.f32 0.015625, %v2104_v6  ;;  %v4571_v15 = vmul.f32 0.015625, %v2101_v7  ;;  %v2336_v5 = vsel %vm1198_vm0, %v553_v2, 0.0 }
 0x2fc   : > { %v7966_v21 = vsel %vm17392_vm9, %v7965_v49, %v7961_v12  ;;  %v2333_v6 = vsel %vm1198_vm0, %v552_v29, 0.0  ;;  %v554_v12 = vld [vmem:[%s12294_s18 + $0xbe0] sm:$0xff]  ;;  %vm17393_vm9 = vcmask 654912  }
 0x2fd   : > { %v7975_v22 = vrot.slane %v4572_v14, %v12546_v61  ;;  %v7970_v44 = vrot.slane %v4571_v15, %v12540_v57  ;;  %2319 = vadd.xlane.f32.xlu1 %v2318_v50  ;;  %2316 = vadd.xlane.f32.xlu0 %v2315_v9 }
 0x2fe   : > { %v2110_v24 = vpop.xlane.xlu1 %2109  ;;  %v2107_v8 = vpop.xlane.xlu0 %2106 }
 0x2ff   : > { %v7971_v28 = vsel %vm6542_vm12, %v7970_v44, %v7966_v21  ;;  %v4574_v55 = vmul.f32 0.015625, %v2110_v24  ;;  %v4573_v30 = vmul.f32 0.015625, %v2107_v8 }
 0x300   : > { %v7976_v38 = vsel %vm6549_vm13, %v7975_v22, %v7971_v28  ;;  %v2339_v22 = vsel %vm1198_vm0, %v554_v12, 0.0 }
 0x301   : > { %v7985_v27 = vrot.slane %v4574_v55, %v12561_v13  ;;  %v7980_v41 = vrot.slane %v4573_v30, %v12556_v11  ;;  %2325 = vadd.xlane.f32.xlu1 %v2324_v26  ;;  %2322 = vadd.xlane.f32.xlu0 %v2321_v20  ;;  %v557_v26 = vld [vmem:[%s12294_s18 + $0xbf8] sm:$0xff]  ;;  %v556_v20 = vld [vmem:[%s12294_s18 + $0xbf0] sm:$0xff] }
 0x302   : > { %v2116_v42 = vpop.xlane.xlu1 %2115  ;;  %v2113_v48 = vpop.xlane.xlu0 %2112 }
 0x303   : > { %v7981_v53 = vsel %vm6556_vm14, %v7980_v41, %v7976_v38  ;;  %v4576_v54 = vmul.f32 0.015625, %v2116_v42  ;;  %v4575_v56 = vmul.f32 0.015625, %v2113_v48  ;;  %v2348_v38 = vsel %vm1198_vm0, %v557_v26, 0.0 }
 0x304   : > { %v7986_v59 = vsel %vm6563_vm15, %v7985_v27, %v7981_v53  ;;  %v2345_v27 = vsel %vm1198_vm0, %v556_v20, 0.0 }
 0x305   : > { %v13769_v60 = vsel %vm11544_vm11, %v7986_v59, %v13233_v58  ;;  %v7994_v62 = vrot.slane %v4576_v54, %v12463_v35  ;;  %v7990_v63 = vrot.slane %v4575_v56, %v12457_v32  ;;  %2331 = vadd.xlane.f32.xlu1 %v2330_v45  ;;  %2328 = vadd.xlane.f32.xlu0 %v2327_v51  ;;  %v555_v58 = vld [vmem:[%s12294_s18 + $0xbe8] sm:$0xff]  ;;  %v558_v51 = vld [vmem:[%s12294_s18 + $0xc00] sm:$0xff] }
 0x306   : > { %v2122_v3 = vpop.xlane.xlu1 %2121  ;;  %v2119_v49 = vpop.xlane.xlu0 %2118  ;;  %v2342_v21 = vsel %vm1198_vm0, %v555_v58, 0.0  ;;  %v559_v45 = vld [vmem:[%s12294_s18 + $0xc08] sm:$0xff] }
 0x307   : > { %v7995_v7 = vsel %vm6465_vm1, %v7994_v62, %v7990_v63  ;;  %v4578_v50 = vmul.f32 0.015625, %v2122_v3  ;;  %v4577_v9 = vmul.f32 0.015625, %v2119_v49  ;;  %v2354_v59 = vsel %vm1198_vm0, %v559_v45, 0.0 }
 0x308   : > { %v2351_v62 = vsel %vm1198_vm0, %v558_v51, 0.0 }
 0x309   : > { %v8004_v14 = vrot.slane %v4578_v50, %v12460_v34  ;;  %v7999_v15 = vrot.slane %v4577_v9, %v12466_v36  ;;  %2337 = vadd.xlane.f32.xlu1 %v2336_v5  ;;  %2334 = vadd.xlane.f32.xlu0 %v2333_v6  ;;  %v561_v5 = vld [vmem:[%s12294_s18 + $0xc18] sm:$0xff]  ;;  %v560_v6 = vld [vmem:[%s12294_s18 + $0xc10] sm:$0xff] }
 0x30a   : > { %v2128_v17 = vpop.xlane.xlu1 %2127  ;;  %v2125_v19 = vpop.xlane.xlu0 %2124 }
 0x30b   : > { %v8000_v44 = vsel %vm6472_vm2, %v7999_v15, %v7995_v7  ;;  %v4580_v24 = vmul.f32 0.015625, %v2128_v17  ;;  %v4579_v8 = vmul.f32 0.015625, %v2125_v19  ;;  %v2357_v15 = vsel %vm1198_vm0, %v560_v6, 0.0 }
 0x30c   : > { %v8005_v28 = vsel %vm6479_vm3, %v8004_v14, %v8000_v44  ;;  %v2360_v14 = vsel %vm1198_vm0, %v561_v5, 0.0  ;;  %v562_v44 = vld [vmem:[%s12294_s18 + $0xc20] sm:$0xff] }
 0x30d   : > { %v8014_v55 = vrot.slane %v4580_v24, %v12473_v46  ;;  %v8009_v30 = vrot.slane %v4579_v8, %v12476_v47  ;;  %2343 = vadd.xlane.f32.xlu1 %v2342_v21  ;;  %2340 = vadd.xlane.f32.xlu0 %v2339_v22  ;;  %v563_v22 = vld [vmem:[%s12294_s18 + $0xc28] sm:$0xff] }
 0x30e   : > { %v2134_v31 = vpop.xlane.xlu1 %2133  ;;  %v2131_v33 = vpop.xlane.xlu0 %2130 }
 0x30f   : > { %v8010_v41 = vsel %vm6486_vm4, %v8009_v30, %v8005_v28  ;;  %v4582_v42 = vmul.f32 0.015625, %v2134_v31  ;;  %v4581_v48 = vmul.f32 0.015625, %v2131_v33  ;;  %v2363_v30 = vsel %vm1198_vm0, %v562_v44, 0.0 }
 0x310   : > { %v8015_v53 = vsel %vm6493_vm5, %v8014_v55, %v8010_v41  ;;  %v2366_v55 = vsel %vm1198_vm0, %v563_v22, 0.0  ;;  %v564_v41 = vld [vmem:[%s12294_s18 + $0xc30] sm:$0xff] }
 0x311   : > { %v8024_v54 = vrot.slane %v4582_v42, %v12491_v0  ;;  %v8019_v56 = vrot.slane %v4581_v48, %v12494_v1  ;;  %2349 = vadd.xlane.f32.xlu1 %v2348_v38  ;;  %2346 = vadd.xlane.f32.xlu0 %v2345_v27  ;;  %v565_v27 = vld [vmem:[%s12294_s18 + $0xc38] sm:$0xff] }
 0x312   : > { %v2140_v2 = vpop.xlane.xlu1 %2139  ;;  %v2137_v29 = vpop.xlane.xlu0 %2136 }
 0x313   : > { %v8020_v63 = vsel %vm6500_vm6, %v8019_v56, %v8015_v53  ;;  %v4584_v3 = vmul.f32 0.015625, %v2140_v2  ;;  %v4583_v49 = vmul.f32 0.015625, %v2137_v29  ;;  %v2369_v56 = vsel %vm1198_vm0, %v564_v41, 0.0 }
 0x314   : > { %v8025_v7 = vsel %vm17372_vm7, %v8024_v54, %v8020_v63  ;;  %v2372_v54 = vsel %vm1198_vm0, %v565_v27, 0.0  ;;  %v566_v63 = vld [vmem:[%s12294_s18 + $0xc40] sm:$0xff] }
 0x315   : > { %v8034_v50 = vrot.slane %v4584_v3, %v12508_v18  ;;  %v8029_v9 = vrot.slane %v4583_v49, %v12514_v23  ;;  %2355 = vadd.xlane.f32.xlu1 %v2354_v59  ;;  %2352 = vadd.xlane.f32.xlu0 %v2351_v62  ;;  %v567_v62 = vld [vmem:[%s12294_s18 + $0xc48] sm:$0xff] }
 0x316   : > { %v2146_v58 = vpop.xlane.xlu1 %2145  ;;  %v2143_v12 = vpop.xlane.xlu0 %2142 }
 0x317   : > { %v8030_v17 = vsel %vm17367_vm8, %v8029_v9, %v8025_v7  ;;  %v4586_v19 = vmul.f32 0.015625, %v2146_v58  ;;  %v4585_v21 = vmul.f32 0.015625, %v2143_v12  ;;  %v2375_v9 = vsel %vm1198_vm0, %v566_v63, 0.0 }
 0x318   : > { %v8035_v24 = vsel %vm17393_vm9, %v8034_v50, %v8030_v17  ;;  %vm17394_vm9 = vcmask 786112   ;;  %v2378_v50 = vsel %vm1198_vm0, %v567_v62, 0.0  ;;  %v568_v17 = vld [vmem:[%s12294_s18 + $0xc50] sm:$0xff] }
 0x319   : > { %v8044_v8 = vrot.slane %v4586_v19, %v12530_v43  ;;  %v8039_v26 = vrot.slane %v4585_v21, %v12524_v39  ;;  %2361 = vadd.xlane.f32.xlu1 %v2360_v14  ;;  %2358 = vadd.xlane.f32.xlu0 %v2357_v15  ;;  %v569_v15 = vld [vmem:[%s12294_s18 + $0xc58] sm:$0xff] }
 0x31a   : > { %v2152_v20 = vpop.xlane.xlu1 %2151  ;;  %v2149_v28 = vpop.xlane.xlu0 %2148 }
 0x31b   : > { %v8040_v31 = vsel %vm6528_vm10, %v8039_v26, %v8035_v24  ;;  %v4588_v33 = vmul.f32 0.015625, %v2152_v20  ;;  %v4587_v38 = vmul.f32 0.015625, %v2149_v28  ;;  %v2384_v26 = vsel %vm1198_vm0, %v569_v15, 0.0 }
 0x31c   : > { %v8045_v42 = vsel %vm17394_vm9, %v8044_v8, %v8040_v31  ;;  %v2381_v20 = vsel %vm1198_vm0, %v568_v17, 0.0  ;;  %v571_v31 = vld [vmem:[%s12294_s18 + $0xc68] sm:$0xff]  ;;  %vm17395_vm9 = vcmask 654912  }
 0x31d   : > { %v8054_v48 = vrot.slane %v4588_v33, %v12546_v61  ;;  %v8049_v45 = vrot.slane %v4587_v38, %v12540_v57  ;;  %2367 = vadd.xlane.f32.xlu1 %v2366_v55  ;;  %2364 = vadd.xlane.f32.xlu0 %v2363_v30  ;;  %v570_v33 = vld [vmem:[%s12294_s18 + $0xc60] sm:$0xff] }
 0x31e   : > { %v2158_v51 = vpop.xlane.xlu1 %2157  ;;  %v2155_v53 = vpop.xlane.xlu0 %2154 }
 0x31f   : > { %v8050_v2 = vsel %vm6542_vm12, %v8049_v45, %v8045_v42  ;;  %v4590_v29 = vmul.f32 0.015625, %v2158_v51  ;;  %v4589_v59 = vmul.f32 0.015625, %v2155_v53  ;;  %v2390_v42 = vsel %vm1198_vm0, %v571_v31, 0.0 }
 0x320   : > { %v8055_v3 = vsel %vm6549_vm13, %v8054_v48, %v8050_v2  ;;  %v2387_v48 = vsel %vm1198_vm0, %v570_v33, 0.0 }
 0x321   : > { %v8064_v49 = vrot.slane %v4590_v29, %v12561_v13  ;;  %v8059_v5 = vrot.slane %v4589_v59, %v12556_v11  ;;  %2373 = vadd.xlane.f32.xlu1 %v2372_v54  ;;  %2370 = vadd.xlane.f32.xlu0 %v2369_v56  ;;  %v573_v54 = vld [vmem:[%s12294_s18 + $0xc78] sm:$0xff]  ;;  %v572_v56 = vld [vmem:[%s12294_s18 + $0xc70] sm:$0xff] }
 0x322   : > { %v2164_v6 = vpop.xlane.xlu1 %2163  ;;  %v2161_v7 = vpop.xlane.xlu0 %2160 }
 0x323   : > { %v8060_v58 = vsel %vm6556_vm14, %v8059_v5, %v8055_v3  ;;  %v4592_v12 = vmul.f32 0.015625, %v2164_v6  ;;  %v4591_v14 = vmul.f32 0.015625, %v2161_v7  ;;  %v2396_v3 = vsel %vm1198_vm0, %v573_v54, 0.0 }
 0x324   : > { %v8065_v19 = vsel %vm6563_vm15, %v8064_v49, %v8060_v58  ;;  %v2393_v49 = vsel %vm1198_vm0, %v572_v56, 0.0 }
 0x325   : > { %v8073_v21 = vrot.slane %v4592_v12, %v12463_v35  ;;  %v8069_v22 = vrot.slane %v4591_v14, %v12457_v32  ;;  %2379 = vadd.xlane.f32.xlu1 %v2378_v50  ;;  %2376 = vadd.xlane.f32.xlu0 %v2375_v9  ;;  %v13838_v44 = vsel %vm11544_vm11, %v8065_v19, %v13300_v16  ;;  %v575_v50 = vld [vmem:[%s12294_s18 + $0xc88] sm:$0xff]  ;;  %v574_v9 = vld [vmem:[%s12294_s18 + $0xc80] sm:$0xff] }
 0x326   : > { %v2170_v24 = vpop.xlane.xlu1 %2169  ;;  %v2167_v8 = vpop.xlane.xlu0 %2166  ;;  %v2402_v19 = vsel %vm1198_vm0, %v575_v50, 0.0 }
 0x327   : > { %v8074_v28 = vsel %vm6465_vm1, %v8073_v21, %v8069_v22  ;;  %v4594_v55 = vmul.f32 0.015625, %v2170_v24  ;;  %v4593_v30 = vmul.f32 0.015625, %v2167_v8  ;;  %v2399_v21 = vsel %vm1198_vm0, %v574_v9, 0.0 }
 0x329   : > { %v8083_v38 = vrot.slane %v4594_v55, %v12460_v34  ;;  %v8078_v27 = vrot.slane %v4593_v30, %v12466_v36  ;;  %2385 = vadd.xlane.f32.xlu1 %v2384_v26  ;;  %2382 = vadd.xlane.f32.xlu0 %v2381_v20  ;;  %v577_v26 = vld [vmem:[%s12294_s18 + $0xc98] sm:$0xff]  ;;  %v576_v20 = vld [vmem:[%s12294_s18 + $0xc90] sm:$0xff] }
 0x32a   : > { %v2176_v16 = vpop.xlane.xlu1 %2175  ;;  %v2173_v41 = vpop.xlane.xlu0 %2172 }
 0x32b   : > { %v8079_v45 = vsel %vm6472_vm2, %v8078_v27, %v8074_v28  ;;  %v4596_v51 = vmul.f32 0.015625, %v2176_v16  ;;  %v4595_v53 = vmul.f32 0.015625, %v2173_v41  ;;  %v2405_v27 = vsel %vm1198_vm0, %v576_v20, 0.0 }
 0x32c   : > { %v8084_v2 = vsel %vm6479_vm3, %v8083_v38, %v8079_v45  ;;  %v2408_v38 = vsel %vm1198_vm0, %v577_v26, 0.0  ;;  %v578_v45 = vld [vmem:[%s12294_s18 + $0xca0] sm:$0xff] }
 0x32d   : > { %v8093_v29 = vrot.slane %v4596_v51, %v12473_v46  ;;  %v8088_v59 = vrot.slane %v4595_v53, %v12476_v47  ;;  %2391 = vadd.xlane.f32.xlu1 %v2390_v42  ;;  %2388 = vadd.xlane.f32.xlu0 %v2387_v48  ;;  %v579_v48 = vld [vmem:[%s12294_s18 + $0xca8] sm:$0xff] }
 0x32e   : > { %v2182_v62 = vpop.xlane.xlu1 %2181  ;;  %v2179_v63 = vpop.xlane.xlu0 %2178 }
 0x32f   : > { %v8089_v5 = vsel %vm6486_vm4, %v8088_v59, %v8084_v2  ;;  %v4598_v6 = vmul.f32 0.015625, %v2182_v62  ;;  %v4597_v7 = vmul.f32 0.015625, %v2179_v63  ;;  %v2411_v59 = vsel %vm1198_vm0, %v578_v45, 0.0 }
 0x330   : > { %v8094_v58 = vsel %vm6493_vm5, %v8093_v29, %v8089_v5  ;;  %v2414_v29 = vsel %vm1198_vm0, %v579_v48, 0.0  ;;  %v580_v5 = vld [vmem:[%s12294_s18 + $0xcb0] sm:$0xff] }
 0x331   : > { %v8103_v12 = vrot.slane %v4598_v6, %v12491_v0  ;;  %v8098_v14 = vrot.slane %v4597_v7, %v12494_v1  ;;  %2397 = vadd.xlane.f32.xlu1 %v2396_v3  ;;  %2394 = vadd.xlane.f32.xlu0 %v2393_v49  ;;  %v581_v49 = vld [vmem:[%s12294_s18 + $0xcb8] sm:$0xff] }
 0x332   : > { %v2188_v15 = vpop.xlane.xlu1 %2187  ;;  %v2185_v17 = vpop.xlane.xlu0 %2184 }
 0x333   : > { %v8099_v22 = vsel %vm6500_vm6, %v8098_v14, %v8094_v58  ;;  %v4600_v24 = vmul.f32 0.015625, %v2188_v15  ;;  %v4599_v8 = vmul.f32 0.015625, %v2185_v17  ;;  %v2417_v14 = vsel %vm1198_vm0, %v580_v5, 0.0 }
 0x334   : > { %v8104_v28 = vsel %vm17372_vm7, %v8103_v12, %v8099_v22  ;;  %v2420_v12 = vsel %vm1198_vm0, %v581_v49, 0.0  ;;  %v582_v22 = vld [vmem:[%s12294_s18 + $0xcc0] sm:$0xff] }
 0x335   : > { %v8113_v55 = vrot.slane %v4600_v24, %v12508_v18  ;;  %v8108_v30 = vrot.slane %v4599_v8, %v12514_v23  ;;  %2403 = vadd.xlane.f32.xlu1 %v2402_v19  ;;  %2400 = vadd.xlane.f32.xlu0 %v2399_v21  ;;  %v583_v21 = vld [vmem:[%s12294_s18 + $0xcc8] sm:$0xff] }
 0x336   : > { %v2194_v31 = vpop.xlane.xlu1 %2193  ;;  %v2191_v33 = vpop.xlane.xlu0 %2190 }
 0x337   : > { %v8109_v16 = vsel %vm17367_vm8, %v8108_v30, %v8104_v28  ;;  %v4602_v41 = vmul.f32 0.015625, %v2194_v31  ;;  %v4601_v42 = vmul.f32 0.015625, %v2191_v33  ;;  %v2423_v30 = vsel %vm1198_vm0, %v582_v22, 0.0 }
 0x338   : > { %v8114_v51 = vsel %vm17395_vm9, %v8113_v55, %v8109_v16  ;;  %vm17396_vm9 = vcmask 786112   ;;  %v2426_v55 = vsel %vm1198_vm0, %v583_v21, 0.0  ;;  %v584_v16 = vld [vmem:[%s12294_s18 + $0xcd0] sm:$0xff] }
 0x339   : > { %v8123_v53 = vrot.slane %v4602_v41, %v12530_v43  ;;  %v8118_v54 = vrot.slane %v4601_v42, %v12524_v39  ;;  %2409 = vadd.xlane.f32.xlu1 %v2408_v38  ;;  %2406 = vadd.xlane.f32.xlu0 %v2405_v27  ;;  %v585_v27 = vld [vmem:[%s12294_s18 + $0xcd8] sm:$0xff] }
 0x33a   : > { %v2200_v56 = vpop.xlane.xlu1 %2199  ;;  %v2197_v2 = vpop.xlane.xlu0 %2196 }
 0x33b   : > { %v8119_v62 = vsel %vm6528_vm10, %v8118_v54, %v8114_v51  ;;  %v4604_v63 = vmul.f32 0.015625, %v2200_v56  ;;  %v4603_v3 = vmul.f32 0.015625, %v2197_v2  ;;  %v2432_v54 = vsel %vm1198_vm0, %v585_v27, 0.0 }
 0x33c   : > { %v8124_v6 = vsel %vm17396_vm9, %v8123_v53, %v8119_v62  ;;  %v2429_v56 = vsel %vm1198_vm0, %v584_v16, 0.0  ;;  %v586_v62 = vld [vmem:[%s12294_s18 + $0xce0] sm:$0xff]  ;;  %vm17397_vm9 = vcmask 654912  }
 0x33d   : > { %v8133_v7 = vrot.slane %v4604_v63, %v12546_v61  ;;  %v8128_v50 = vrot.slane %v4603_v3, %v12540_v57  ;;  %2415 = vadd.xlane.f32.xlu1 %v2414_v29  ;;  %2412 = vadd.xlane.f32.xlu0 %v2411_v59 }
 0x33e   : > { %v2206_v9 = vpop.xlane.xlu1 %2205  ;;  %v2203_v58 = vpop.xlane.xlu0 %2202 }
 0x33f   : > { %v8129_v15 = vsel %vm6542_vm12, %v8128_v50, %v8124_v6  ;;  %v4606_v17 = vmul.f32 0.015625, %v2206_v9  ;;  %v4605_v19 = vmul.f32 0.015625, %v2203_v58 }
 0x340   : > { %v8134_v24 = vsel %vm6549_vm13, %v8133_v7, %v8129_v15  ;;  %v2435_v7 = vsel %vm1198_vm0, %v586_v62, 0.0 }
 0x341   : > { %v8143_v8 = vrot.slane %v4606_v17, %v12561_v13  ;;  %v8138_v26 = vrot.slane %v4605_v19, %v12556_v11  ;;  %2421 = vadd.xlane.f32.xlu1 %v2420_v12  ;;  %2418 = vadd.xlane.f32.xlu0 %v2417_v14  ;;  %v589_v12 = vld [vmem:[%s12294_s18 + $0xcf8] sm:$0xff]  ;;  %v588_v14 = vld [vmem:[%s12294_s18 + $0xcf0] sm:$0xff] }
 0x342   : > { %v2212_v20 = vpop.xlane.xlu1 %2211  ;;  %v2209_v28 = vpop.xlane.xlu0 %2208 }
 0x343   : > { %v8139_v31 = vsel %vm6556_vm14, %v8138_v26, %v8134_v24  ;;  %v4608_v33 = vmul.f32 0.015625, %v2212_v20  ;;  %v4607_v38 = vmul.f32 0.015625, %v2209_v28  ;;  %v2444_v24 = vsel %vm1198_vm0, %v589_v12, 0.0 }
 0x344   : > { %v8144_v41 = vsel %vm6563_vm15, %v8143_v8, %v8139_v31  ;;  %v2441_v8 = vsel %vm1198_vm0, %v588_v14, 0.0 }
 0x345   : > { %v13903_v42 = vsel %vm11544_vm11, %v8144_v41, %v13367_v40  ;;  %v8152_v48 = vrot.slane %v4608_v33, %v12463_v35  ;;  %v8148_v45 = vrot.slane %v4607_v38, %v12457_v32  ;;  %2427 = vadd.xlane.f32.xlu1 %v2426_v55  ;;  %2424 = vadd.xlane.f32.xlu0 %v2423_v30  ;;  %v587_v40 = vld [vmem:[%s12294_s18 + $0xce8] sm:$0xff]  ;;  %v590_v30 = vld [vmem:[%s12294_s18 + $0xd00] sm:$0xff] }
 0x346   : > { %v2218_v51 = vpop.xlane.xlu1 %2217  ;;  %v2215_v53 = vpop.xlane.xlu0 %2214  ;;  %v2438_v6 = vsel %vm1198_vm0, %v587_v40, 0.0  ;;  %v591_v55 = vld [vmem:[%s12294_s18 + $0xd08] sm:$0xff] }
 0x347   : > { %v8153_v2 = vsel %vm6465_vm1, %v8152_v48, %v8148_v45  ;;  %v4610_v29 = vmul.f32 0.015625, %v2218_v51  ;;  %v4609_v59 = vmul.f32 0.015625, %v2215_v53  ;;  %v2450_v41 = vsel %vm1198_vm0, %v591_v55, 0.0 }
 0x348   : > { %v2447_v48 = vsel %vm1198_vm0, %v590_v30, 0.0 }
 0x349   : > { %v8162_v63 = vrot.slane %v4610_v29, %v12460_v34  ;;  %v8157_v3 = vrot.slane %v4609_v59, %v12466_v36  ;;  %2433 = vadd.xlane.f32.xlu1 %v2432_v54  ;;  %2430 = vadd.xlane.f32.xlu0 %v2429_v56  ;;  %v593_v54 = vld [vmem:[%s12294_s18 + $0xd18] sm:$0xff]  ;;  %v592_v56 = vld [vmem:[%s12294_s18 + $0xd10] sm:$0xff] }
 0x34a   : > { %v2224_v49 = vpop.xlane.xlu1 %2223  ;;  %v2221_v5 = vpop.xlane.xlu0 %2220 }
 0x34b   : > { %v8158_v50 = vsel %vm6472_vm2, %v8157_v3, %v8153_v2  ;;  %v4612_v9 = vmul.f32 0.015625, %v2224_v49  ;;  %v4611_v58 = vmul.f32 0.015625, %v2221_v5  ;;  %v2453_v3 = vsel %vm1198_vm0, %v592_v56, 0.0 }
 0x34c   : > { %v8163_v15 = vsel %vm6479_vm3, %v8162_v63, %v8158_v50  ;;  %v2456_v63 = vsel %vm1198_vm0, %v593_v54, 0.0  ;;  %v594_v50 = vld [vmem:[%s12294_s18 + $0xd20] sm:$0xff] }
 0x34d   : > { %v8172_v17 = vrot.slane %v4612_v9, %v12473_v46  ;;  %v8167_v19 = vrot.slane %v4611_v58, %v12476_v47  ;;  %2439 = vadd.xlane.f32.xlu1 %v2438_v6  ;;  %2436 = vadd.xlane.f32.xlu0 %v2435_v7  ;;  %v595_v7 = vld [vmem:[%s12294_s18 + $0xd28] sm:$0xff] }
 0x34e   : > { %v2230_v21 = vpop.xlane.xlu1 %2229  ;;  %v2227_v22 = vpop.xlane.xlu0 %2226 }
 0x34f   : > { %v8168_v26 = vsel %vm6486_vm4, %v8167_v19, %v8163_v15  ;;  %v4614_v20 = vmul.f32 0.015625, %v2230_v21  ;;  %v4613_v28 = vmul.f32 0.015625, %v2227_v22  ;;  %v2459_v19 = vsel %vm1198_vm0, %v594_v50, 0.0 }
 0x350   : > { %v8173_v31 = vsel %vm6493_vm5, %v8172_v17, %v8168_v26  ;;  %v2462_v17 = vsel %vm1198_vm0, %v595_v7, 0.0  ;;  %v596_v26 = vld [vmem:[%s12294_s18 + $0xd30] sm:$0xff] }
 0x351   : > { %v8182_v33 = vrot.slane %v4614_v20, %v12491_v0  ;;  %v8177_v38 = vrot.slane %v4613_v28, %v12494_v1  ;;  %2445 = vadd.xlane.f32.xlu1 %v2444_v24  ;;  %2442 = vadd.xlane.f32.xlu0 %v2441_v8  ;;  %v597_v8 = vld [vmem:[%s12294_s18 + $0xd38] sm:$0xff] }
 0x352   : > { %v2236_v27 = vpop.xlane.xlu1 %2235  ;;  %v2233_v16 = vpop.xlane.xlu0 %2232 }
 0x353   : > { %v8178_v45 = vsel %vm6500_vm6, %v8177_v38, %v8173_v31  ;;  %v4616_v51 = vmul.f32 0.015625, %v2236_v27  ;;  %v4615_v53 = vmul.f32 0.015625, %v2233_v16  ;;  %v2465_v38 = vsel %vm1198_vm0, %v596_v26, 0.0 }
 0x354   : > { %v8183_v2 = vsel %vm17372_vm7, %v8182_v33, %v8178_v45  ;;  %v2468_v33 = vsel %vm1198_vm0, %v597_v8, 0.0  ;;  %v598_v45 = vld [vmem:[%s12294_s18 + $0xd40] sm:$0xff] }
 0x355   : > { %v8192_v29 = vrot.slane %v4616_v51, %v12508_v18  ;;  %v8187_v59 = vrot.slane %v4615_v53, %v12514_v23  ;;  %2451 = vadd.xlane.f32.xlu1 %v2450_v41  ;;  %2448 = vadd.xlane.f32.xlu0 %v2447_v48  ;;  %v599_v48 = vld [vmem:[%s12294_s18 + $0xd48] sm:$0xff] }
 0x356   : > { %v2242_v40 = vpop.xlane.xlu1 %2241  ;;  %v2239_v62 = vpop.xlane.xlu0 %2238 }
 0x357   : > { %v8188_v49 = vsel %vm17367_vm8, %v8187_v59, %v8183_v2  ;;  %v4618_v5 = vmul.f32 0.015625, %v2242_v40  ;;  %v4617_v6 = vmul.f32 0.015625, %v2239_v62  ;;  %v2471_v59 = vsel %vm1198_vm0, %v598_v45, 0.0 }
 0x358   : > { %v8193_v9 = vsel %vm17397_vm9, %v8192_v29, %v8188_v49  ;;  %vm17398_vm9 = vcmask 786112   ;;  %v2474_v29 = vsel %vm1198_vm0, %v599_v48, 0.0  ;;  %v600_v49 = vld [vmem:[%s12294_s18 + $0xd50] sm:$0xff] }
 0x359   : > { %v8202_v58 = vrot.slane %v4618_v5, %v12530_v43  ;;  %v8197_v12 = vrot.slane %v4617_v6, %v12524_v39  ;;  %2457 = vadd.xlane.f32.xlu1 %v2456_v63  ;;  %2454 = vadd.xlane.f32.xlu0 %v2453_v3  ;;  %v601_v3 = vld [vmem:[%s12294_s18 + $0xd58] sm:$0xff] }
 0x35a   : > { %v2248_v14 = vpop.xlane.xlu1 %2247  ;;  %v2245_v15 = vpop.xlane.xlu0 %2244 }
 0x35b   : > { %v8198_v21 = vsel %vm6528_vm10, %v8197_v12, %v8193_v9  ;;  %v4620_v22 = vmul.f32 0.015625, %v2248_v14  ;;  %v4619_v24 = vmul.f32 0.015625, %v2245_v15  ;;  %v2480_v12 = vsel %vm1198_vm0, %v601_v3, 0.0 }
 0x35c   : > { %v8203_v20 = vsel %vm17398_vm9, %v8202_v58, %v8198_v21  ;;  %v2477_v14 = vsel %vm1198_vm0, %v600_v49, 0.0  ;;  %v602_v21 = vld [vmem:[%s12294_s18 + $0xd60] sm:$0xff]  ;;  %vm17399_vm9 = vcmask 654912  }
 0x35d   : > { %v8212_v28 = vrot.slane %v4620_v22, %v12546_v61  ;;  %v8207_v55 = vrot.slane %v4619_v24, %v12540_v57  ;;  %2463 = vadd.xlane.f32.xlu1 %v2462_v17  ;;  %2460 = vadd.xlane.f32.xlu0 %v2459_v19 }
 0x35e   : > { %v2254_v30 = vpop.xlane.xlu1 %2253  ;;  %v2251_v31 = vpop.xlane.xlu0 %2250 }
 0x35f   : > { %v8208_v27 = vsel %vm6542_vm12, %v8207_v55, %v8203_v20  ;;  %v4622_v16 = vmul.f32 0.015625, %v2254_v30  ;;  %v4621_v41 = vmul.f32 0.015625, %v2251_v31 }
 0x360   : > { %v8213_v51 = vsel %vm6549_vm13, %v8212_v28, %v8208_v27  ;;  %v2483_v28 = vsel %vm1198_vm0, %v602_v21, 0.0 }
 0x361   : > { %v8222_v53 = vrot.slane %v4622_v16, %v12561_v13  ;;  %v8217_v54 = vrot.slane %v4621_v41, %v12556_v11  ;;  %2469 = vadd.xlane.f32.xlu1 %v2468_v33  ;;  %2466 = vadd.xlane.f32.xlu0 %v2465_v38  ;;  %v605_v33 = vld [vmem:[%s12294_s18 + $0xd78] sm:$0xff]  ;;  %v604_v38 = vld [vmem:[%s12294_s18 + $0xd70] sm:$0xff] }
 0x362   : > { %v2260_v56 = vpop.xlane.xlu1 %2259  ;;  %v2257_v2 = vpop.xlane.xlu0 %2256 }
 0x363   : > { %v8218_v40 = vsel %vm6556_vm14, %v8217_v54, %v8213_v51  ;;  %v4624_v62 = vmul.f32 0.015625, %v2260_v56  ;;  %v4623_v63 = vmul.f32 0.015625, %v2257_v2  ;;  %v2492_v51 = vsel %vm1198_vm0, %v605_v33, 0.0 }
 0x364   : > { %v8223_v5 = vsel %vm6563_vm15, %v8222_v53, %v8218_v40  ;;  %v2489_v53 = vsel %vm1198_vm0, %v604_v38, 0.0 }
 0x365   : > { %v13970_v6 = vsel %vm11544_vm11, %v8223_v5, %v13434_v4  ;;  %v8231_v7 = vrot.slane %v4624_v62, %v12463_v35  ;;  %v8227_v50 = vrot.slane %v4623_v63, %v12457_v32  ;;  %2475 = vadd.xlane.f32.xlu1 %v2474_v29  ;;  %2472 = vadd.xlane.f32.xlu0 %v2471_v59  ;;  %v603_v4 = vld [vmem:[%s12294_s18 + $0xd68] sm:$0xff]  ;;  %v606_v59 = vld [vmem:[%s12294_s18 + $0xd80] sm:$0xff] }
 0x366   : > { %v2266_v9 = vpop.xlane.xlu1 %2265  ;;  %v2263_v58 = vpop.xlane.xlu0 %2262  ;;  %v2486_v20 = vsel %vm1198_vm0, %v603_v4, 0.0  ;;  %v607_v29 = vld [vmem:[%s12294_s18 + $0xd88] sm:$0xff] }
 0x367   : > { %v8232_v15 = vsel %vm6465_vm1, %v8231_v7, %v8227_v50  ;;  %v4626_v17 = vmul.f32 0.015625, %v2266_v9  ;;  %v4625_v19 = vmul.f32 0.015625, %v2263_v58  ;;  %v2498_v5 = vsel %vm1198_vm0, %v607_v29, 0.0 }
 0x368   : > { %v2495_v7 = vsel %vm1198_vm0, %v606_v59, 0.0 }
 0x369   : > { %v8241_v22 = vrot.slane %v4626_v17, %v12460_v34  ;;  %v8236_v24 = vrot.slane %v4625_v19, %v12466_v36  ;;  %2481 = vadd.xlane.f32.xlu1 %v2480_v12  ;;  %2478 = vadd.xlane.f32.xlu0 %v2477_v14  ;;  %v609_v12 = vld [vmem:[%s12294_s18 + $0xd98] sm:$0xff]  ;;  %v608_v14 = vld [vmem:[%s12294_s18 + $0xd90] sm:$0xff] }
 0x36a   : > { %v2272_v8 = vpop.xlane.xlu1 %2271  ;;  %v2269_v26 = vpop.xlane.xlu0 %2268 }
 0x36b   : > { %v8237_v55 = vsel %vm6472_vm2, %v8236_v24, %v8232_v15  ;;  %v4628_v30 = vmul.f32 0.015625, %v2272_v8  ;;  %v4627_v31 = vmul.f32 0.015625, %v2269_v26  ;;  %v2501_v24 = vsel %vm1198_vm0, %v608_v14, 0.0 }
 0x36c   : > { %v8242_v27 = vsel %vm6479_vm3, %v8241_v22, %v8237_v55  ;;  %v2504_v22 = vsel %vm1198_vm0, %v609_v12, 0.0  ;;  %v610_v55 = vld [vmem:[%s12294_s18 + $0xda0] sm:$0xff] }
 0x36d   : > { %v8251_v16 = vrot.slane %v4628_v30, %v12473_v46  ;;  %v8246_v41 = vrot.slane %v4627_v31, %v12476_v47  ;;  %2487 = vadd.xlane.f32.xlu1 %v2486_v20  ;;  %2484 = vadd.xlane.f32.xlu0 %v2483_v28  ;;  %v611_v28 = vld [vmem:[%s12294_s18 + $0xda8] sm:$0xff] }
 0x36e   : > { %v2278_v48 = vpop.xlane.xlu1 %2277  ;;  %v2275_v45 = vpop.xlane.xlu0 %2274 }
 0x36f   : > { %v8247_v54 = vsel %vm6486_vm4, %v8246_v41, %v8242_v27  ;;  %v4630_v56 = vmul.f32 0.015625, %v2278_v48  ;;  %v4629_v2 = vmul.f32 0.015625, %v2275_v45  ;;  %v2507_v41 = vsel %vm1198_vm0, %v610_v55, 0.0 }
 0x370   : > { %v8252_v40 = vsel %vm6493_vm5, %v8251_v16, %v8247_v54  ;;  %v2510_v16 = vsel %vm1198_vm0, %v611_v28, 0.0  ;;  %v612_v54 = vld [vmem:[%s12294_s18 + $0xdb0] sm:$0xff] }
 0x371   : > { %v8261_v62 = vrot.slane %v4630_v56, %v12491_v0  ;;  %v8256_v63 = vrot.slane %v4629_v2, %v12494_v1  ;;  %2493 = vadd.xlane.f32.xlu1 %v2492_v51  ;;  %2490 = vadd.xlane.f32.xlu0 %v2489_v53  ;;  %v613_v53 = vld [vmem:[%s12294_s18 + $0xdb8] sm:$0xff] }
 0x372   : > { %v2284_v3 = vpop.xlane.xlu1 %2283  ;;  %v2281_v49 = vpop.xlane.xlu0 %2280 }
 0x373   : > { %v8257_v50 = vsel %vm6500_vm6, %v8256_v63, %v8252_v40  ;;  %v4632_v9 = vmul.f32 0.015625, %v2284_v3  ;;  %v4631_v58 = vmul.f32 0.015625, %v2281_v49  ;;  %v2513_v63 = vsel %vm1198_vm0, %v612_v54, 0.0 }
 0x374   : > { %v8262_v15 = vsel %vm17372_vm7, %v8261_v62, %v8257_v50  ;;  %v2516_v62 = vsel %vm1198_vm0, %v613_v53, 0.0  ;;  %v614_v50 = vld [vmem:[%s12294_s18 + $0xdc0] sm:$0xff] }
 0x375   : > { %v8271_v17 = vrot.slane %v4632_v9, %v12508_v18  ;;  %v8266_v19 = vrot.slane %v4631_v58, %v12514_v23  ;;  %2499 = vadd.xlane.f32.xlu1 %v2498_v5  ;;  %2496 = vadd.xlane.f32.xlu0 %v2495_v7  ;;  %v615_v7 = vld [vmem:[%s12294_s18 + $0xdc8] sm:$0xff] }
 0x376   : > { %v2290_v4 = vpop.xlane.xlu1 %2289  ;;  %v2287_v21 = vpop.xlane.xlu0 %2286 }
 0x377   : > { %v8267_v8 = vsel %vm17367_vm8, %v8266_v19, %v8262_v15  ;;  %v4634_v26 = vmul.f32 0.015625, %v2290_v4  ;;  %v4633_v20 = vmul.f32 0.015625, %v2287_v21  ;;  %v2519_v19 = vsel %vm1198_vm0, %v614_v50, 0.0 }
 0x378   : > { %v8272_v30 = vsel %vm17399_vm9, %v8271_v17, %v8267_v8  ;;  %vm17400_vm9 = vcmask 786112   ;;  %v2522_v17 = vsel %vm1198_vm0, %v615_v7, 0.0  ;;  %v616_v8 = vld [vmem:[%s12294_s18 + $0xdd0] sm:$0xff] }
 0x379   : > { %v8281_v31 = vrot.slane %v4634_v26, %v12530_v43  ;;  %v8276_v33 = vrot.slane %v4633_v20, %v12524_v39  ;;  %2505 = vadd.xlane.f32.xlu1 %v2504_v22  ;;  %2502 = vadd.xlane.f32.xlu0 %v2501_v24  ;;  %v617_v24 = vld [vmem:[%s12294_s18 + $0xdd8] sm:$0xff] }
 0x37a   : > { %v2296_v38 = vpop.xlane.xlu1 %2295  ;;  %v2293_v27 = vpop.xlane.xlu0 %2292 }
 0x37b   : > { %v8277_v48 = vsel %vm6528_vm10, %v8276_v33, %v8272_v30  ;;  %v4636_v45 = vmul.f32 0.015625, %v2296_v38  ;;  %v4635_v51 = vmul.f32 0.015625, %v2293_v27  ;;  %v2528_v33 = vsel %vm1198_vm0, %v617_v24, 0.0 }
 0x37c   : > { %v8282_v56 = vsel %vm17400_vm9, %v8281_v31, %v8277_v48  ;;  %v2525_v38 = vsel %vm1198_vm0, %v616_v8, 0.0  ;;  %v618_v48 = vld [vmem:[%s12294_s18 + $0xde0] sm:$0xff]  ;;  %vm17401_vm9 = vcmask 654912  }
 0x37d   : > { %v8291_v2 = vrot.slane %v4636_v45, %v12546_v61  ;;  %v8286_v29 = vrot.slane %v4635_v51, %v12540_v57  ;;  %2511 = vadd.xlane.f32.xlu1 %v2510_v16  ;;  %2508 = vadd.xlane.f32.xlu0 %v2507_v41 }
 0x37e   : > { %v2302_v59 = vpop.xlane.xlu1 %2301  ;;  %v2299_v40 = vpop.xlane.xlu0 %2298 }
 0x37f   : > { %v8287_v3 = vsel %vm6542_vm12, %v8286_v29, %v8282_v56  ;;  %v4638_v49 = vmul.f32 0.015625, %v2302_v59  ;;  %v4637_v5 = vmul.f32 0.015625, %v2299_v40 }
 0x380   : > { %v8292_v9 = vsel %vm6549_vm13, %v8291_v2, %v8287_v3  ;;  %v2531_v2 = vsel %vm1198_vm0, %v618_v48, 0.0 }
 0x381   : > { %v8301_v58 = vrot.slane %v4638_v49, %v12561_v13  ;;  %v8296_v12 = vrot.slane %v4637_v5, %v12556_v11  ;;  %2517 = vadd.xlane.f32.xlu1 %v2516_v62  ;;  %2514 = vadd.xlane.f32.xlu0 %v2513_v63  ;;  %v621_v62 = vld [vmem:[%s12294_s18 + $0xdf8] sm:$0xff]  ;;  %v620_v63 = vld [vmem:[%s12294_s18 + $0xdf0] sm:$0xff] }
 0x382   : > { %v2308_v14 = vpop.xlane.xlu1 %2307  ;;  %v2305_v15 = vpop.xlane.xlu0 %2304 }
 0x383   : > { %v8297_v4 = vsel %vm6556_vm14, %v8296_v12, %v8292_v9  ;;  %v4640_v21 = vmul.f32 0.015625, %v2308_v14  ;;  %v4639_v22 = vmul.f32 0.015625, %v2305_v15  ;;  %v2540_v9 = vsel %vm1198_vm0, %v621_v62, 0.0 }
 0x384   : > { %v8302_v26 = vsel %vm6563_vm15, %v8301_v58, %v8297_v4  ;;  %v2537_v58 = vsel %vm1198_vm0, %v620_v63, 0.0 }
 0x385   : > { %v14037_v20 = vsel %vm11544_vm11, %v8302_v26, %v13501_v25  ;;  %v8310_v28 = vrot.slane %v4640_v21, %v12463_v35  ;;  %v8306_v55 = vrot.slane %v4639_v22, %v12457_v32  ;;  %2523 = vadd.xlane.f32.xlu1 %v2522_v17  ;;  %2520 = vadd.xlane.f32.xlu0 %v2519_v19  ;;  %v619_v25 = vld [vmem:[%s12294_s18 + $0xde8] sm:$0xff]  ;;  %v622_v19 = vld [vmem:[%s12294_s18 + $0xe00] sm:$0xff] }
 0x386   : > { %v2314_v30 = vpop.xlane.xlu1 %2313  ;;  %v2311_v31 = vpop.xlane.xlu0 %2310  ;;  %v2534_v56 = vsel %vm1198_vm0, %v619_v25, 0.0  ;;  %v623_v17 = vld [vmem:[%s12294_s18 + $0xe08] sm:$0xff] }
 0x387   : > { %v8311_v27 = vsel %vm6465_vm1, %v8310_v28, %v8306_v55  ;;  %v4642_v16 = vmul.f32 0.015625, %v2314_v30  ;;  %v4641_v41 = vmul.f32 0.015625, %v2311_v31  ;;  %v2546_v26 = vsel %vm1198_vm0, %v623_v17, 0.0 }
 0x388   : > { %v2543_v28 = vsel %vm1198_vm0, %v622_v19, 0.0 }
 0x389   : > { %v8320_v45 = vrot.slane %v4642_v16, %v12460_v34  ;;  %v8315_v51 = vrot.slane %v4641_v41, %v12466_v36  ;;  %2529 = vadd.xlane.f32.xlu1 %v2528_v33  ;;  %2526 = vadd.xlane.f32.xlu0 %v2525_v38  ;;  %v625_v33 = vld [vmem:[%s12294_s18 + $0xe18] sm:$0xff]  ;;  %v624_v38 = vld [vmem:[%s12294_s18 + $0xe10] sm:$0xff] }
 0x38a   : > { %v2320_v53 = vpop.xlane.xlu1 %2319  ;;  %v2317_v54 = vpop.xlane.xlu0 %2316 }
 0x38b   : > { %v8316_v29 = vsel %vm6472_vm2, %v8315_v51, %v8311_v27  ;;  %v4644_v59 = vmul.f32 0.015625, %v2320_v53  ;;  %v4643_v40 = vmul.f32 0.015625, %v2317_v54  ;;  %v2549_v51 = vsel %vm1198_vm0, %v624_v38, 0.0 }
 0x38c   : > { %v8321_v3 = vsel %vm6479_vm3, %v8320_v45, %v8316_v29  ;;  %v2552_v45 = vsel %vm1198_vm0, %v625_v33, 0.0  ;;  %v626_v29 = vld [vmem:[%s12294_s18 + $0xe20] sm:$0xff] }
 0x38d   : > { %v8330_v49 = vrot.slane %v4644_v59, %v12473_v46  ;;  %v8325_v5 = vrot.slane %v4643_v40, %v12476_v47  ;;  %2535 = vadd.xlane.f32.xlu1 %v2534_v56  ;;  %2532 = vadd.xlane.f32.xlu0 %v2531_v2  ;;  %v627_v2 = vld [vmem:[%s12294_s18 + $0xe28] sm:$0xff] }
 0x38e   : > { %v2326_v7 = vpop.xlane.xlu1 %2325  ;;  %v2323_v50 = vpop.xlane.xlu0 %2322 }
 0x38f   : > { %v8326_v12 = vsel %vm6486_vm4, %v8325_v5, %v8321_v3  ;;  %v4646_v14 = vmul.f32 0.015625, %v2326_v7  ;;  %v4645_v15 = vmul.f32 0.015625, %v2323_v50  ;;  %v2555_v5 = vsel %vm1198_vm0, %v626_v29, 0.0 }
 0x390   : > { %v8331_v4 = vsel %vm6493_vm5, %v8330_v49, %v8326_v12  ;;  %v2558_v49 = vsel %vm1198_vm0, %v627_v2, 0.0  ;;  %v628_v12 = vld [vmem:[%s12294_s18 + $0xe30] sm:$0xff] }
 0x391   : > { %v8340_v21 = vrot.slane %v4646_v14, %v12491_v0  ;;  %v8335_v22 = vrot.slane %v4645_v15, %v12494_v1  ;;  %2541 = vadd.xlane.f32.xlu1 %v2540_v9  ;;  %2538 = vadd.xlane.f32.xlu0 %v2537_v58  ;;  %v629_v58 = vld [vmem:[%s12294_s18 + $0xe38] sm:$0xff] }
 0x392   : > { %v2332_v24 = vpop.xlane.xlu1 %2331  ;;  %v2329_v8 = vpop.xlane.xlu0 %2328 }
 0x393   : > { %v8336_v55 = vsel %vm6500_vm6, %v8335_v22, %v8331_v4  ;;  %v4648_v30 = vmul.f32 0.015625, %v2332_v24  ;;  %v4647_v31 = vmul.f32 0.015625, %v2329_v8  ;;  %v2561_v22 = vsel %vm1198_vm0, %v628_v12, 0.0 }
 0x394   : > { %v8341_v27 = vsel %vm17372_vm7, %v8340_v21, %v8336_v55  ;;  %v2564_v21 = vsel %vm1198_vm0, %v629_v58, 0.0  ;;  %v630_v55 = vld [vmem:[%s12294_s18 + $0xe40] sm:$0xff] }
 0x395   : > { %v8350_v16 = vrot.slane %v4648_v30, %v12508_v18  ;;  %v8345_v41 = vrot.slane %v4647_v31, %v12514_v23  ;;  %2547 = vadd.xlane.f32.xlu1 %v2546_v26  ;;  %2544 = vadd.xlane.f32.xlu0 %v2543_v28  ;;  %v631_v28 = vld [vmem:[%s12294_s18 + $0xe48] sm:$0xff] }
 0x396   : > { %v2338_v25 = vpop.xlane.xlu1 %2337  ;;  %v2335_v48 = vpop.xlane.xlu0 %2334 }
 0x397   : > { %v8346_v53 = vsel %vm17367_vm8, %v8345_v41, %v8341_v27  ;;  %v4650_v54 = vmul.f32 0.015625, %v2338_v25  ;;  %v4649_v56 = vmul.f32 0.015625, %v2335_v48  ;;  %v2567_v41 = vsel %vm1198_vm0, %v630_v55, 0.0 }
 0x398   : > { %v8351_v59 = vsel %vm17401_vm9, %v8350_v16, %v8346_v53  ;;  %vm17402_vm9 = vcmask 786112   ;;  %v2570_v16 = vsel %vm1198_vm0, %v631_v28, 0.0  ;;  %v632_v53 = vld [vmem:[%s12294_s18 + $0xe50] sm:$0xff] }
 0x399   : > { %v8360_v40 = vrot.slane %v4650_v54, %v12530_v43  ;;  %v8355_v62 = vrot.slane %v4649_v56, %v12524_v39  ;;  %2553 = vadd.xlane.f32.xlu1 %v2552_v45  ;;  %2550 = vadd.xlane.f32.xlu0 %v2549_v51  ;;  %v633_v51 = vld [vmem:[%s12294_s18 + $0xe58] sm:$0xff] }
 0x39a   : > { %v2344_v63 = vpop.xlane.xlu1 %2343  ;;  %v2341_v3 = vpop.xlane.xlu0 %2340 }
 0x39b   : > { %v8356_v7 = vsel %vm6528_vm10, %v8355_v62, %v8351_v59  ;;  %v4652_v50 = vmul.f32 0.015625, %v2344_v63  ;;  %v4651_v9 = vmul.f32 0.015625, %v2341_v3  ;;  %v2576_v62 = vsel %vm1198_vm0, %v633_v51, 0.0 }
 0x39c   : > { %v8361_v14 = vsel %vm17402_vm9, %v8360_v40, %v8356_v7  ;;  %v2573_v63 = vsel %vm1198_vm0, %v632_v53, 0.0  ;;  %v634_v7 = vld [vmem:[%s12294_s18 + $0xe60] sm:$0xff] }
 0x39d   : > { %v8370_v15 = vrot.slane %v4652_v50, %v12546_v61  ;;  %v8365_v17 = vrot.slane %v4651_v9, %v12540_v57  ;;  %2559 = vadd.xlane.f32.xlu1 %v2558_v49  ;;  %2556 = vadd.xlane.f32.xlu0 %v2555_v5 }
 0x39e   : > { %v2350_v19 = vpop.xlane.xlu1 %2349  ;;  %v2347_v4 = vpop.xlane.xlu0 %2346 }
 0x39f   : > { %v8366_v24 = vsel %vm6542_vm12, %v8365_v17, %v8361_v14  ;;  %v4654_v8 = vmul.f32 0.015625, %v2350_v19  ;;  %v4653_v26 = vmul.f32 0.015625, %v2347_v4 }
 0x3a0   : > { %v8371_v30 = vsel %vm6549_vm13, %v8370_v15, %v8366_v24  ;;  %v2579_v15 = vsel %vm1198_vm0, %v634_v7, 0.0 }
 0x3a1   : > { %v8380_v31 = vrot.slane %v4654_v8, %v12561_v13  ;;  %v8375_v33 = vrot.slane %v4653_v26, %v12556_v11  ;;  %2565 = vadd.xlane.f32.xlu1 %v2564_v21  ;;  %2562 = vadd.xlane.f32.xlu0 %v2561_v22  ;;  %v637_v21 = vld [vmem:[%s12294_s18 + $0xe78] sm:$0xff]  ;;  %v636_v22 = vld [vmem:[%s12294_s18 + $0xe70] sm:$0xff] }
 0x3a2   : > { %v2356_v38 = vpop.xlane.xlu1 %2355  ;;  %v2353_v27 = vpop.xlane.xlu0 %2352 }
 0x3a3   : > { %v8376_v25 = vsel %vm6556_vm14, %v8375_v33, %v8371_v30  ;;  %v4656_v48 = vmul.f32 0.015625, %v2356_v38  ;;  %v4655_v45 = vmul.f32 0.015625, %v2353_v27  ;;  %v2588_v30 = vsel %vm1198_vm0, %v637_v21, 0.0 }
 0x3a4   : > { %v8381_v54 = vsel %vm6563_vm15, %v8380_v31, %v8376_v25  ;;  %v2585_v31 = vsel %vm1198_vm0, %v636_v22, 0.0 }
 0x3a5   : > { %v14104_v56 = vsel %vm11544_vm11, %v8381_v54, %v13568_v52  ;;  %v8389_v2 = vrot.slane %v4656_v48, %v12463_v35  ;;  %v8385_v29 = vrot.slane %v4655_v45, %v12457_v32  ;;  %2571 = vadd.xlane.f32.xlu1 %v2570_v16  ;;  %2568 = vadd.xlane.f32.xlu0 %v2567_v41  ;;  %v635_v52 = vld [vmem:[%s12294_s18 + $0xe68] sm:$0xff]  ;;  %v638_v41 = vld [vmem:[%s12294_s18 + $0xe80] sm:$0xff]  ;;  %vm17403_vm11 = vcmask 654912  }
 0x3a6   : > { %v2362_v59 = vpop.xlane.xlu1 %2361  ;;  %v2359_v40 = vpop.xlane.xlu0 %2358  ;;  %v2582_v14 = vsel %vm1198_vm0, %v635_v52, 0.0  ;;  %v639_v16 = vld [vmem:[%s12294_s18 + $0xe88] sm:$0xff] }
 0x3a7   : > { %v8390_v3 = vsel %vm6465_vm1, %v8389_v2, %v8385_v29  ;;  %v4658_v49 = vmul.f32 0.015625, %v2362_v59  ;;  %v4657_v5 = vmul.f32 0.015625, %v2359_v40  ;;  %v2594_v54 = vsel %vm1198_vm0, %v639_v16, 0.0 }
 0x3a8   : > { %v2591_v2 = vsel %vm1198_vm0, %v638_v41, 0.0 }
 0x3a9   : > { %v8399_v50 = vrot.slane %v4658_v49, %v12460_v34  ;;  %v8394_v9 = vrot.slane %v4657_v5, %v12466_v36  ;;  %2577 = vadd.xlane.f32.xlu1 %v2576_v62  ;;  %2574 = vadd.xlane.f32.xlu0 %v2573_v63  ;;  %v641_v62 = vld [vmem:[%s12294_s18 + $0xe98] sm:$0xff]  ;;  %v640_v63 = vld [vmem:[%s12294_s18 + $0xe90] sm:$0xff] }
 0x3aa   : > { %v2368_v58 = vpop.xlane.xlu1 %2367  ;;  %v2365_v12 = vpop.xlane.xlu0 %2364 }
 0x3ab   : > { %v8395_v17 = vsel %vm6472_vm2, %v8394_v9, %v8390_v3  ;;  %v4660_v19 = vmul.f32 0.015625, %v2368_v58  ;;  %v4659_v4 = vmul.f32 0.015625, %v2365_v12  ;;  %v2597_v9 = vsel %vm1198_vm0, %v640_v63, 0.0 }
 0x3ac   : > { %v8400_v24 = vsel %vm6479_vm3, %v8399_v50, %v8395_v17  ;;  %v2600_v50 = vsel %vm1198_vm0, %v641_v62, 0.0  ;;  %v642_v17 = vld [vmem:[%s12294_s18 + $0xea0] sm:$0xff] }
 0x3ad   : > { %v8409_v8 = vrot.slane %v4660_v19, %v12473_v46  ;;  %v8404_v26 = vrot.slane %v4659_v4, %v12476_v47  ;;  %2583 = vadd.xlane.f32.xlu1 %v2582_v14  ;;  %2580 = vadd.xlane.f32.xlu0 %v2579_v15  ;;  %v643_v15 = vld [vmem:[%s12294_s18 + $0xea8] sm:$0xff] }
 0x3ae   : > { %v2374_v28 = vpop.xlane.xlu1 %2373  ;;  %v2371_v55 = vpop.xlane.xlu0 %2370 }
 0x3af   : > { %v8405_v33 = vsel %vm6486_vm4, %v8404_v26, %v8400_v24  ;;  %v4662_v38 = vmul.f32 0.015625, %v2374_v28  ;;  %v4661_v27 = vmul.f32 0.015625, %v2371_v55  ;;  %v2603_v26 = vsel %vm1198_vm0, %v642_v17, 0.0 }
 0x3b0   : > { %v8410_v25 = vsel %vm6493_vm5, %v8409_v8, %v8405_v33  ;;  %v2606_v8 = vsel %vm1198_vm0, %v643_v15, 0.0  ;;  %v644_v33 = vld [vmem:[%s12294_s18 + $0xeb0] sm:$0xff] }
 0x3b1   : > { %v8419_v48 = vrot.slane %v4662_v38, %v12491_v0  ;;  %v8414_v45 = vrot.slane %v4661_v27, %v12494_v1  ;;  %2589 = vadd.xlane.f32.xlu1 %v2588_v30  ;;  %2586 = vadd.xlane.f32.xlu0 %v2585_v31  ;;  %v645_v31 = vld [vmem:[%s12294_s18 + $0xeb8] sm:$0xff] }
 0x3b2   : > { %v2380_v51 = vpop.xlane.xlu1 %2379  ;;  %v2377_v53 = vpop.xlane.xlu0 %2376 }
 0x3b3   : > { %v8415_v29 = vsel %vm6500_vm6, %v8414_v45, %v8410_v25  ;;  %v4664_v59 = vmul.f32 0.015625, %v2380_v51  ;;  %v4663_v40 = vmul.f32 0.015625, %v2377_v53  ;;  %v2609_v45 = vsel %vm1198_vm0, %v644_v33, 0.0 }
 0x3b4   : > { %v8420_v3 = vsel %vm17372_vm7, %v8419_v48, %v8415_v29  ;;  %v2612_v48 = vsel %vm1198_vm0, %v645_v31, 0.0  ;;  %v646_v29 = vld [vmem:[%s12294_s18 + $0xec0] sm:$0xff] }
 0x3b5   : > { %v8429_v49 = vrot.slane %v4664_v59, %v12508_v18  ;;  %v8424_v5 = vrot.slane %v4663_v40, %v12514_v23  ;;  %2595 = vadd.xlane.f32.xlu1 %v2594_v54  ;;  %2592 = vadd.xlane.f32.xlu0 %v2591_v2  ;;  %v647_v2 = vld [vmem:[%s12294_s18 + $0xec8] sm:$0xff] }
 0x3b6   : > { %v2386_v52 = vpop.xlane.xlu1 %2385  ;;  %v2383_v7 = vpop.xlane.xlu0 %2382 }
 0x3b7   : > { %v8425_v58 = vsel %vm17367_vm8, %v8424_v5, %v8420_v3  ;;  %v4666_v12 = vmul.f32 0.015625, %v2386_v52  ;;  %v4665_v14 = vmul.f32 0.015625, %v2383_v7  ;;  %v2615_v5 = vsel %vm1198_vm0, %v646_v29, 0.0 }
 0x3b8   : > { %v8430_v19 = vsel %vm17403_vm11, %v8429_v49, %v8425_v58  ;;  %v2618_v49 = vsel %vm1198_vm0, %v647_v2, 0.0  ;;  %vm11546_vm11 = vcmask 1043459   ;;  %v648_v58 = vld [vmem:[%s12294_s18 + $0xed0] sm:$0xff] }
 0x3b9   : > { %v8439_v4 = vrot.slane %v4666_v12, %v12530_v43  ;;  %v8434_v21 = vrot.slane %v4665_v14, %v12524_v39  ;;  %2601 = vadd.xlane.f32.xlu1 %v2600_v50  ;;  %2598 = vadd.xlane.f32.xlu0 %v2597_v9  ;;  %v649_v9 = vld [vmem:[%s12294_s18 + $0xed8] sm:$0xff] }
 0x3ba   : > { %v2392_v22 = vpop.xlane.xlu1 %2391  ;;  %v2389_v24 = vpop.xlane.xlu0 %2388 }
 0x3bb   : > { %v8435_v28 = vsel %vm6528_vm10, %v8434_v21, %v8430_v19  ;;  %v4668_v55 = vmul.f32 0.015625, %v2392_v22  ;;  %v4667_v30 = vmul.f32 0.015625, %v2389_v24  ;;  %v2624_v21 = vsel %vm1198_vm0, %v649_v9, 0.0 }
 0x3bc   : > { %v8440_v38 = vsel %vm17402_vm9, %v8439_v4, %v8435_v28  ;;  %v2621_v22 = vsel %vm1198_vm0, %v648_v58, 0.0  ;;  %v651_v28 = vld [vmem:[%s12294_s18 + $0xee8] sm:$0xff]  ;;  %vm17404_vm9 = vcmask 654912  }
 0x3bd   : > { %v8449_v27 = vrot.slane %v4668_v55, %v12546_v61  ;;  %v8444_v16 = vrot.slane %v4667_v30, %v12540_v57  ;;  %2607 = vadd.xlane.f32.xlu1 %v2606_v8  ;;  %2604 = vadd.xlane.f32.xlu0 %v2603_v26  ;;  %v650_v55 = vld [vmem:[%s12294_s18 + $0xee0] sm:$0xff] }
 0x3be   : > { %v2398_v41 = vpop.xlane.xlu1 %2397  ;;  %v2395_v25 = vpop.xlane.xlu0 %2394 }
 0x3bf   : > { %v8445_v51 = vsel %vm6542_vm12, %v8444_v16, %v8440_v38  ;;  %v4670_v53 = vmul.f32 0.015625, %v2398_v41  ;;  %v4669_v54 = vmul.f32 0.015625, %v2395_v25  ;;  %v2630_v38 = vsel %vm1198_vm0, %v651_v28, 0.0 }
 0x3c0   : > { %v8450_v59 = vsel %vm6549_vm13, %v8449_v27, %v8445_v51  ;;  %v2627_v27 = vsel %vm1198_vm0, %v650_v55, 0.0 }
 0x3c1   : > { %v8459_v40 = vrot.slane %v4670_v53, %v12561_v13  ;;  %v8454_v62 = vrot.slane %v4669_v54, %v12556_v11  ;;  %2613 = vadd.xlane.f32.xlu1 %v2612_v48  ;;  %2610 = vadd.xlane.f32.xlu0 %v2609_v45  ;;  %v653_v48 = vld [vmem:[%s12294_s18 + $0xef8] sm:$0xff]  ;;  %v652_v45 = vld [vmem:[%s12294_s18 + $0xef0] sm:$0xff] }
 0x3c2   : > { %v2404_v63 = vpop.xlane.xlu1 %2403  ;;  %v2401_v3 = vpop.xlane.xlu0 %2400 }
 0x3c3   : > { %v8455_v52 = vsel %vm6556_vm14, %v8454_v62, %v8450_v59  ;;  %v4672_v7 = vmul.f32 0.015625, %v2404_v63  ;;  %v4671_v50 = vmul.f32 0.015625, %v2401_v3  ;;  %v2636_v59 = vsel %vm1198_vm0, %v653_v48, 0.0 }
 0x3c4   : > { %v8460_v12 = vsel %vm6563_vm15, %v8459_v40, %v8455_v52  ;;  %v2633_v40 = vsel %vm1198_vm0, %v652_v45, 0.0 }
 0x3c5   : > { %v8468_v14 = vrot.slane %v4672_v7, %v12463_v35  ;;  %v8464_v15 = vrot.slane %v4671_v50, %v12457_v32  ;;  %2619 = vadd.xlane.f32.xlu1 %v2618_v49  ;;  %2616 = vadd.xlane.f32.xlu0 %v2615_v5  ;;  %v14173_v17 = vsel %vm11546_vm11, %v8460_v12, %v13635_v10  ;;  %v655_v49 = vld [vmem:[%s12294_s18 + $0xf08] sm:$0xff]  ;;  %v654_v5 = vld [vmem:[%s12294_s18 + $0xf00] sm:$0xff] }
 0x3c6   : > { %v2410_v19 = vpop.xlane.xlu1 %2409  ;;  %v2407_v4 = vpop.xlane.xlu0 %2406  ;;  %v2642_v12 = vsel %vm1198_vm0, %v655_v49, 0.0 }
 0x3c7   : > { %v8469_v24 = vsel %vm6465_vm1, %v8468_v14, %v8464_v15  ;;  %v4674_v8 = vmul.f32 0.015625, %v2410_v19  ;;  %v4673_v26 = vmul.f32 0.015625, %v2407_v4  ;;  %v2639_v14 = vsel %vm1198_vm0, %v654_v5, 0.0 }
 0x3c9   : > { %v8478_v30 = vrot.slane %v4674_v8, %v12460_v34  ;;  %v8473_v31 = vrot.slane %v4673_v26, %v12466_v36  ;;  %2625 = vadd.xlane.f32.xlu1 %v2624_v21  ;;  %2622 = vadd.xlane.f32.xlu0 %v2621_v22  ;;  %v657_v21 = vld [vmem:[%s12294_s18 + $0xf18] sm:$0xff]  ;;  %v656_v22 = vld [vmem:[%s12294_s18 + $0xf10] sm:$0xff] }
 0x3ca   : > { %v2416_v10 = vpop.xlane.xlu1 %2415  ;;  %v2413_v33 = vpop.xlane.xlu0 %2412 }
 0x3cb   : > { %v8474_v16 = vsel %vm6472_vm2, %v8473_v31, %v8469_v24  ;;  %v4676_v41 = vmul.f32 0.015625, %v2416_v10  ;;  %v4675_v25 = vmul.f32 0.015625, %v2413_v33  ;;  %v2645_v31 = vsel %vm1198_vm0, %v656_v22, 0.0 }
 0x3cc   : > { %v8479_v51 = vsel %vm6479_vm3, %v8478_v30, %v8474_v16  ;;  %v2648_v30 = vsel %vm1198_vm0, %v657_v21, 0.0  ;;  %v658_v16 = vld [vmem:[%s12294_s18 + $0xf20] sm:$0xff] }
 0x3cd   : > { %v8488_v53 = vrot.slane %v4676_v41, %v12473_v46  ;;  %v8483_v54 = vrot.slane %v4675_v25, %v12476_v47  ;;  %2631 = vadd.xlane.f32.xlu1 %v2630_v38  ;;  %2628 = vadd.xlane.f32.xlu0 %v2627_v27  ;;  %v659_v27 = vld [vmem:[%s12294_s18 + $0xf28] sm:$0xff] }
 0x3ce   : > { %v2422_v2 = vpop.xlane.xlu1 %2421  ;;  %v2419_v29 = vpop.xlane.xlu0 %2418 }
 0x3cf   : > { %v8484_v62 = vsel %vm6486_vm4, %v8483_v54, %v8479_v51  ;;  %v4678_v63 = vmul.f32 0.015625, %v2422_v2  ;;  %v4677_v3 = vmul.f32 0.015625, %v2419_v29  ;;  %v2651_v54 = vsel %vm1198_vm0, %v658_v16, 0.0 }
 0x3d0   : > { %v8489_v52 = vsel %vm6493_vm5, %v8488_v53, %v8484_v62  ;;  %v2654_v53 = vsel %vm1198_vm0, %v659_v27, 0.0  ;;  %v660_v62 = vld [vmem:[%s12294_s18 + $0xf30] sm:$0xff] }
 0x3d1   : > { %v8498_v7 = vrot.slane %v4678_v63, %v12491_v0  ;;  %v8493_v50 = vrot.slane %v4677_v3, %v12494_v1  ;;  %2637 = vadd.xlane.f32.xlu1 %v2636_v59  ;;  %2634 = vadd.xlane.f32.xlu0 %v2633_v40  ;;  %v661_v40 = vld [vmem:[%s12294_s18 + $0xf38] sm:$0xff] }
 0x3d2   : > { %v2428_v9 = vpop.xlane.xlu1 %2427  ;;  %v2425_v58 = vpop.xlane.xlu0 %2424 }
 0x3d3   : > { %v8494_v15 = vsel %vm6500_vm6, %v8493_v50, %v8489_v52  ;;  %v4680_v19 = vmul.f32 0.015625, %v2428_v9  ;;  %v4679_v4 = vmul.f32 0.015625, %v2425_v58  ;;  %v2657_v50 = vsel %vm1198_vm0, %v660_v62, 0.0 }
 0x3d4   : > { %v8499_v24 = vsel %vm17372_vm7, %v8498_v7, %v8494_v15  ;;  %v2660_v7 = vsel %vm1198_vm0, %v661_v40, 0.0  ;;  %v662_v15 = vld [vmem:[%s12294_s18 + $0xf40] sm:$0xff] }
 0x3d5   : > { %v8508_v8 = vrot.slane %v4680_v19, %v12508_v18  ;;  %v8503_v26 = vrot.slane %v4679_v4, %v12514_v23  ;;  %2643 = vadd.xlane.f32.xlu1 %v2642_v12  ;;  %2640 = vadd.xlane.f32.xlu0 %v2639_v14  ;;  %v663_v14 = vld [vmem:[%s12294_s18 + $0xf48] sm:$0xff] }
 0x3d6   : > { %v2434_v28 = vpop.xlane.xlu1 %2433  ;;  %v2431_v55 = vpop.xlane.xlu0 %2430 }
 0x3d7   : > { %v8504_v10 = vsel %vm17367_vm8, %v8503_v26, %v8499_v24  ;;  %v4682_v33 = vmul.f32 0.015625, %v2434_v28  ;;  %v4681_v38 = vmul.f32 0.015625, %v2431_v55  ;;  %v2663_v26 = vsel %vm1198_vm0, %v662_v15, 0.0 }
 0x3d8   : > { %v8509_v41 = vsel %vm17404_vm9, %v8508_v8, %v8504_v10  ;;  %vm17405_vm9 = vcmask 786112   ;;  %v2666_v8 = vsel %vm1198_vm0, %v663_v14, 0.0  ;;  %v664_v10 = vld [vmem:[%s12294_s18 + $0xf50] sm:$0xff] }
 0x3d9   : > { %v8518_v25 = vrot.slane %v4682_v33, %v12530_v43  ;;  %v8513_v48 = vrot.slane %v4681_v38, %v12524_v39  ;;  %2649 = vadd.xlane.f32.xlu1 %v2648_v30  ;;  %2646 = vadd.xlane.f32.xlu0 %v2645_v31  ;;  %v665_v31 = vld [vmem:[%s12294_s18 + $0xf58] sm:$0xff] }
 0x3da   : > { %v2440_v45 = vpop.xlane.xlu1 %2439  ;;  %v2437_v51 = vpop.xlane.xlu0 %2436 }
 0x3db   : > { %v8514_v2 = vsel %vm6528_vm10, %v8513_v48, %v8509_v41  ;;  %v4684_v29 = vmul.f32 0.015625, %v2440_v45  ;;  %v4683_v59 = vmul.f32 0.015625, %v2437_v51  ;;  %v2672_v48 = vsel %vm1198_vm0, %v665_v31, 0.0 }
 0x3dc   : > { %v8519_v63 = vsel %vm17405_vm9, %v8518_v25, %v8514_v2  ;;  %v2669_v45 = vsel %vm1198_vm0, %v664_v10, 0.0  ;;  %v667_v2 = vld [vmem:[%s12294_s18 + $0xf68] sm:$0xff]  ;;  %vm17406_vm9 = vcmask 654912  }
 0x3dd   : > { %v8528_v3 = vrot.slane %v4684_v29, %v12546_v61  ;;  %v8523_v49 = vrot.slane %v4683_v59, %v12540_v57  ;;  %2655 = vadd.xlane.f32.xlu1 %v2654_v53  ;;  %2652 = vadd.xlane.f32.xlu0 %v2651_v54  ;;  %v666_v29 = vld [vmem:[%s12294_s18 + $0xf60] sm:$0xff] }
 0x3de   : > { %v2446_v5 = vpop.xlane.xlu1 %2445  ;;  %v2443_v52 = vpop.xlane.xlu0 %2442 }
 0x3df   : > { %v8524_v9 = vsel %vm6542_vm12, %v8523_v49, %v8519_v63  ;;  %v4686_v58 = vmul.f32 0.015625, %v2446_v5  ;;  %v4685_v12 = vmul.f32 0.015625, %v2443_v52  ;;  %v2678_v63 = vsel %vm1198_vm0, %v667_v2, 0.0 }
 0x3e0   : > { %v8529_v19 = vsel %vm6549_vm13, %v8528_v3, %v8524_v9  ;;  %v2675_v3 = vsel %vm1198_vm0, %v666_v29, 0.0 }
 0x3e1   : > { %v8538_v4 = vrot.slane %v4686_v58, %v12561_v13  ;;  %v8533_v21 = vrot.slane %v4685_v12, %v12556_v11  ;;  %2661 = vadd.xlane.f32.xlu1 %v2660_v7  ;;  %2658 = vadd.xlane.f32.xlu0 %v2657_v50  ;;  %v669_v7 = vld [vmem:[%s12294_s18 + $0xf78] sm:$0xff]  ;;  %v668_v50 = vld [vmem:[%s12294_s18 + $0xf70] sm:$0xff] }
 0x3e2   : > { %v2452_v22 = vpop.xlane.xlu1 %2451  ;;  %v2449_v24 = vpop.xlane.xlu0 %2448 }
 0x3e3   : > { %v8534_v28 = vsel %vm6556_vm14, %v8533_v21, %v8529_v19  ;;  %v4688_v55 = vmul.f32 0.015625, %v2452_v22  ;;  %v4687_v30 = vmul.f32 0.015625, %v2449_v24  ;;  %v2684_v19 = vsel %vm1198_vm0, %v669_v7, 0.0 }
 0x3e4   : > { %v8539_v33 = vsel %vm6563_vm15, %v8538_v4, %v8534_v28  ;;  %v2681_v4 = vsel %vm1198_vm0, %v668_v50, 0.0 }
 0x3e5   : > { %v8547_v38 = vrot.slane %v4688_v55, %v12463_v35  ;;  %v8543_v27 = vrot.slane %v4687_v30, %v12457_v32  ;;  %2667 = vadd.xlane.f32.xlu1 %v2666_v8  ;;  %2664 = vadd.xlane.f32.xlu0 %v2663_v26  ;;  %v14240_v16 = vsel %vm11546_vm11, %v8539_v33, %v13704_v37  ;;  %v671_v8 = vld [vmem:[%s12294_s18 + $0xf88] sm:$0xff]  ;;  %v670_v26 = vld [vmem:[%s12294_s18 + $0xf80] sm:$0xff] }
 0x3e6   : > { %v2458_v41 = vpop.xlane.xlu1 %2457  ;;  %v2455_v25 = vpop.xlane.xlu0 %2454  ;;  %v2690_v33 = vsel %vm1198_vm0, %v671_v8, 0.0 }
 0x3e7   : > { %v8548_v51 = vsel %vm6465_vm1, %v8547_v38, %v8543_v27  ;;  %v4690_v53 = vmul.f32 0.015625, %v2458_v41  ;;  %v4689_v54 = vmul.f32 0.015625, %v2455_v25  ;;  %v2687_v38 = vsel %vm1198_vm0, %v670_v26, 0.0 }
 0x3e9   : > { %v8557_v59 = vrot.slane %v4690_v53, %v12460_v34  ;;  %v8552_v40 = vrot.slane %v4689_v54, %v12466_v36  ;;  %2673 = vadd.xlane.f32.xlu1 %v2672_v48  ;;  %2670 = vadd.xlane.f32.xlu0 %v2669_v45  ;;  %v673_v48 = vld [vmem:[%s12294_s18 + $0xf98] sm:$0xff]  ;;  %v672_v45 = vld [vmem:[%s12294_s18 + $0xf90] sm:$0xff] }
 0x3ea   : > { %v2464_v37 = vpop.xlane.xlu1 %2463  ;;  %v2461_v62 = vpop.xlane.xlu0 %2460 }
 0x3eb   : > { %v8553_v49 = vsel %vm6472_vm2, %v8552_v40, %v8548_v51  ;;  %v4692_v5 = vmul.f32 0.015625, %v2464_v37  ;;  %v4691_v52 = vmul.f32 0.015625, %v2461_v62  ;;  %v2693_v40 = vsel %vm1198_vm0, %v672_v45, 0.0 }
 0x3ec   : > { %v8558_v9 = vsel %vm6479_vm3, %v8557_v59, %v8553_v49  ;;  %v2696_v59 = vsel %vm1198_vm0, %v673_v48, 0.0  ;;  %v674_v49 = vld [vmem:[%s12294_s18 + $0xfa0] sm:$0xff] }
 0x3ed   : > { %v8567_v58 = vrot.slane %v4692_v5, %v12473_v46  ;;  %v8562_v12 = vrot.slane %v4691_v52, %v12476_v47  ;;  %2679 = vadd.xlane.f32.xlu1 %v2678_v63  ;;  %2676 = vadd.xlane.f32.xlu0 %v2675_v3  ;;  %v675_v3 = vld [vmem:[%s12294_s18 + $0xfa8] sm:$0xff] }
 0x3ee   : > { %v2470_v14 = vpop.xlane.xlu1 %2469  ;;  %v2467_v15 = vpop.xlane.xlu0 %2466 }
 0x3ef   : > { %v8563_v21 = vsel %vm6486_vm4, %v8562_v12, %v8558_v9  ;;  %v4694_v22 = vmul.f32 0.015625, %v2470_v14  ;;  %v4693_v24 = vmul.f32 0.015625, %v2467_v15  ;;  %v2699_v12 = vsel %vm1198_vm0, %v674_v49, 0.0 }
 0x3f0   : > { %v8568_v28 = vsel %vm6493_vm5, %v8567_v58, %v8563_v21  ;;  %v2702_v58 = vsel %vm1198_vm0, %v675_v3, 0.0  ;;  %v676_v21 = vld [vmem:[%s12294_s18 + $0xfb0] sm:$0xff] }
 0x3f1   : > { %v8577_v55 = vrot.slane %v4694_v22, %v12491_v0  ;;  %v8572_v30 = vrot.slane %v4693_v24, %v12494_v1  ;;  %2685 = vadd.xlane.f32.xlu1 %v2684_v19  ;;  %2682 = vadd.xlane.f32.xlu0 %v2681_v4  ;;  %v677_v4 = vld [vmem:[%s12294_s18 + $0xfb8] sm:$0xff] }
 0x3f2   : > { %v2476_v31 = vpop.xlane.xlu1 %2475  ;;  %v2473_v10 = vpop.xlane.xlu0 %2472 }
 0x3f3   : > { %v8573_v27 = vsel %vm6500_vm6, %v8572_v30, %v8568_v28  ;;  %v4696_v41 = vmul.f32 0.015625, %v2476_v31  ;;  %v4695_v25 = vmul.f32 0.015625, %v2473_v10  ;;  %v2705_v30 = vsel %vm1198_vm0, %v676_v21, 0.0 }
 0x3f4   : > { %v8578_v51 = vsel %vm17372_vm7, %v8577_v55, %v8573_v27  ;;  %v2708_v55 = vsel %vm1198_vm0, %v677_v4, 0.0  ;;  %v678_v27 = vld [vmem:[%s12294_s18 + $0xfc0] sm:$0xff] }
 0x3f5   : > { %v8587_v53 = vrot.slane %v4696_v41, %v12508_v18  ;;  %v8582_v54 = vrot.slane %v4695_v25, %v12514_v23  ;;  %2691 = vadd.xlane.f32.xlu1 %v2690_v33  ;;  %2688 = vadd.xlane.f32.xlu0 %v2687_v38  ;;  %v679_v38 = vld [vmem:[%s12294_s18 + $0xfc8] sm:$0xff] }
 0x3f6   : > { %v2482_v2 = vpop.xlane.xlu1 %2481  ;;  %v2479_v29 = vpop.xlane.xlu0 %2478 }
 0x3f7   : > { %v8583_v37 = vsel %vm17367_vm8, %v8582_v54, %v8578_v51  ;;  %v4698_v62 = vmul.f32 0.015625, %v2482_v2  ;;  %v4697_v63 = vmul.f32 0.015625, %v2479_v29  ;;  %v2711_v54 = vsel %vm1198_vm0, %v678_v27, 0.0 }
 0x3f8   : > { %v8588_v5 = vsel %vm17406_vm9, %v8587_v53, %v8583_v37  ;;  %vm17407_vm9 = vcmask 786112   ;;  %v2714_v53 = vsel %vm1198_vm0, %v679_v38, 0.0  ;;  %v680_v37 = vld [vmem:[%s12294_s18 + $0xfd0] sm:$0xff] }
 0x3f9   : > { %v8597_v52 = vrot.slane %v4698_v62, %v12530_v43  ;;  %v8592_v7 = vrot.slane %v4697_v63, %v12524_v39  ;;  %2697 = vadd.xlane.f32.xlu1 %v2696_v59  ;;  %2694 = vadd.xlane.f32.xlu0 %v2693_v40  ;;  %v681_v40 = vld [vmem:[%s12294_s18 + $0xfd8] sm:$0xff] }
 0x3fa   : > { %v2488_v50 = vpop.xlane.xlu1 %2487  ;;  %v2485_v9 = vpop.xlane.xlu0 %2484 }
 0x3fb   : > { %v8593_v14 = vsel %vm6528_vm10, %v8592_v7, %v8588_v5  ;;  %v4700_v15 = vmul.f32 0.015625, %v2488_v50  ;;  %v4699_v19 = vmul.f32 0.015625, %v2485_v9  ;;  %v2720_v7 = vsel %vm1198_vm0, %v681_v40, 0.0 }
 0x3fc   : > { %v8598_v22 = vsel %vm17407_vm9, %v8597_v52, %v8593_v14  ;;  %v2717_v50 = vsel %vm1198_vm0, %v680_v37, 0.0  ;;  %v683_v14 = vld [vmem:[%s12294_s18 + $0xfe8] sm:$0xff]  ;;  %vm17408_vm9 = vcmask 654912  }
 0x3fd   : > { %v8607_v24 = vrot.slane %v4700_v15, %v12546_v61  ;;  %v8602_v8 = vrot.slane %v4699_v19, %v12540_v57  ;;  %2703 = vadd.xlane.f32.xlu1 %v2702_v58  ;;  %2700 = vadd.xlane.f32.xlu0 %v2699_v12  ;;  %v682_v15 = vld [vmem:[%s12294_s18 + $0xfe0] sm:$0xff] }
 0x3fe   : > { %v2494_v26 = vpop.xlane.xlu1 %2493  ;;  %v2491_v28 = vpop.xlane.xlu0 %2490 }
 0x3ff   : > { %v8603_v31 = vsel %vm6542_vm12, %v8602_v8, %v8598_v22  ;;  %v4702_v10 = vmul.f32 0.015625, %v2494_v26  ;;  %v4701_v33 = vmul.f32 0.015625, %v2491_v28  ;;  %v2726_v22 = vsel %vm1198_vm0, %v683_v14, 0.0 }
 0x400   : > { %v8608_v41 = vsel %vm6549_vm13, %v8607_v24, %v8603_v31  ;;  %v2723_v24 = vsel %vm1198_vm0, %v682_v15, 0.0 }
 0x401   : > { %v8617_v25 = vrot.slane %v4702_v10, %v12561_v13  ;;  %v8612_v48 = vrot.slane %v4701_v33, %v12556_v11  ;;  %2709 = vadd.xlane.f32.xlu1 %v2708_v55  ;;  %2706 = vadd.xlane.f32.xlu0 %v2705_v30  ;;  %v685_v55 = vld [vmem:[%s12294_s18 + $0xff8] sm:$0xff]  ;;  %v684_v30 = vld [vmem:[%s12294_s18 + $0xff0] sm:$0xff] }
 0x402   : > { %v2500_v45 = vpop.xlane.xlu1 %2499  ;;  %v2497_v51 = vpop.xlane.xlu0 %2496 }
 0x403   : > { %v8613_v2 = vsel %vm6556_vm14, %v8612_v48, %v8608_v41  ;;  %v4704_v29 = vmul.f32 0.015625, %v2500_v45  ;;  %v4703_v59 = vmul.f32 0.015625, %v2497_v51  ;;  %v2732_v41 = vsel %vm1198_vm0, %v685_v55, 0.0 }
 0x404   : > { %v8618_v62 = vsel %vm6563_vm15, %v8617_v25, %v8613_v2  ;;  %v2729_v25 = vsel %vm1198_vm0, %v684_v30, 0.0 }
 0x405   : > { %v8626_v63 = vrot.slane %v4704_v29, %v12463_v35  ;;  %v8622_v3 = vrot.slane %v4703_v59, %v12457_v32  ;;  %2715 = vadd.xlane.f32.xlu1 %v2714_v53  ;;  %2712 = vadd.xlane.f32.xlu0 %v2711_v54  ;;  %v14307_v49 = vsel %vm11546_vm11, %v8618_v62, %v13769_v60  ;;  %v687_v53 = vld [vmem:[%s12294_s18 + $0x1008] sm:$0xff]  ;;  %v686_v54 = vld [vmem:[%s12294_s18 + $0x1000] sm:$0xff] }
 0x406   : > { %v2506_v5 = vpop.xlane.xlu1 %2505  ;;  %v2503_v52 = vpop.xlane.xlu0 %2502  ;;  %v2738_v62 = vsel %vm1198_vm0, %v687_v53, 0.0 }
 0x407   : > { %v8627_v9 = vsel %vm6465_vm1, %v8626_v63, %v8622_v3  ;;  %v4706_v58 = vmul.f32 0.015625, %v2506_v5  ;;  %v4705_v12 = vmul.f32 0.015625, %v2503_v52  ;;  %v2735_v63 = vsel %vm1198_vm0, %v686_v54, 0.0 }
 0x409   : > { %v8636_v19 = vrot.slane %v4706_v58, %v12460_v34  ;;  %v8631_v4 = vrot.slane %v4705_v12, %v12466_v36  ;;  %2721 = vadd.xlane.f32.xlu1 %v2720_v7  ;;  %2718 = vadd.xlane.f32.xlu0 %v2717_v50  ;;  %v689_v7 = vld [vmem:[%s12294_s18 + $0x1018] sm:$0xff]  ;;  %v688_v50 = vld [vmem:[%s12294_s18 + $0x1010] sm:$0xff] }
 0x40a   : > { %v2512_v60 = vpop.xlane.xlu1 %2511  ;;  %v2509_v21 = vpop.xlane.xlu0 %2508 }
 0x40b   : > { %v8632_v8 = vsel %vm6472_vm2, %v8631_v4, %v8627_v9  ;;  %v4708_v26 = vmul.f32 0.015625, %v2512_v60  ;;  %v4707_v28 = vmul.f32 0.015625, %v2509_v21  ;;  %v2741_v4 = vsel %vm1198_vm0, %v688_v50, 0.0 }
 0x40c   : > { %v8637_v31 = vsel %vm6479_vm3, %v8636_v19, %v8632_v8  ;;  %v2744_v19 = vsel %vm1198_vm0, %v689_v7, 0.0  ;;  %v690_v8 = vld [vmem:[%s12294_s18 + $0x1020] sm:$0xff] }
 0x40d   : > { %v8646_v10 = vrot.slane %v4708_v26, %v12473_v46  ;;  %v8641_v33 = vrot.slane %v4707_v28, %v12476_v47  ;;  %2727 = vadd.xlane.f32.xlu1 %v2726_v22  ;;  %2724 = vadd.xlane.f32.xlu0 %v2723_v24  ;;  %v691_v24 = vld [vmem:[%s12294_s18 + $0x1028] sm:$0xff] }
 0x40e   : > { %v2518_v38 = vpop.xlane.xlu1 %2517  ;;  %v2515_v27 = vpop.xlane.xlu0 %2514 }
 0x40f   : > { %v8642_v48 = vsel %vm6486_vm4, %v8641_v33, %v8637_v31  ;;  %v4710_v45 = vmul.f32 0.015625, %v2518_v38  ;;  %v4709_v51 = vmul.f32 0.015625, %v2515_v27  ;;  %v2747_v33 = vsel %vm1198_vm0, %v690_v8, 0.0 }
 0x410   : > { %v8647_v2 = vsel %vm6493_vm5, %v8646_v10, %v8642_v48  ;;  %v2750_v10 = vsel %vm1198_vm0, %v691_v24, 0.0  ;;  %v692_v48 = vld [vmem:[%s12294_s18 + $0x1030] sm:$0xff] }
 0x411   : > { %v8656_v29 = vrot.slane %v4710_v45, %v12491_v0  ;;  %v8651_v59 = vrot.slane %v4709_v51, %v12494_v1  ;;  %2733 = vadd.xlane.f32.xlu1 %v2732_v41  ;;  %2730 = vadd.xlane.f32.xlu0 %v2729_v25  ;;  %v693_v25 = vld [vmem:[%s12294_s18 + $0x1038] sm:$0xff] }
 0x412   : > { %v2524_v40 = vpop.xlane.xlu1 %2523  ;;  %v2521_v37 = vpop.xlane.xlu0 %2520 }
 0x413   : > { %v8652_v3 = vsel %vm6500_vm6, %v8651_v59, %v8647_v2  ;;  %v4712_v5 = vmul.f32 0.015625, %v2524_v40  ;;  %v4711_v52 = vmul.f32 0.015625, %v2521_v37  ;;  %v2753_v59 = vsel %vm1198_vm0, %v692_v48, 0.0 }
 0x414   : > { %v8657_v9 = vsel %vm17372_vm7, %v8656_v29, %v8652_v3  ;;  %v2756_v29 = vsel %vm1198_vm0, %v693_v25, 0.0  ;;  %v694_v3 = vld [vmem:[%s12294_s18 + $0x1040] sm:$0xff] }
 0x415   : > { %v8666_v58 = vrot.slane %v4712_v5, %v12508_v18  ;;  %v8661_v12 = vrot.slane %v4711_v52, %v12514_v23  ;;  %2739 = vadd.xlane.f32.xlu1 %v2738_v62  ;;  %2736 = vadd.xlane.f32.xlu0 %v2735_v63  ;;  %v695_v63 = vld [vmem:[%s12294_s18 + $0x1048] sm:$0xff] }
 0x416   : > { %v2530_v14 = vpop.xlane.xlu1 %2529  ;;  %v2527_v15 = vpop.xlane.xlu0 %2526 }
 0x417   : > { %v8662_v60 = vsel %vm17367_vm8, %v8661_v12, %v8657_v9  ;;  %v4714_v21 = vmul.f32 0.015625, %v2530_v14  ;;  %v4713_v22 = vmul.f32 0.015625, %v2527_v15  ;;  %v2759_v12 = vsel %vm1198_vm0, %v694_v3, 0.0 }
 0x418   : > { %v8667_v26 = vsel %vm17408_vm9, %v8666_v58, %v8662_v60  ;;  %vm17409_vm9 = vcmask 786112   ;;  %v2762_v58 = vsel %vm1198_vm0, %v695_v63, 0.0  ;;  %v696_v60 = vld [vmem:[%s12294_s18 + $0x1050] sm:$0xff] }
 0x419   : > { %v8676_v28 = vrot.slane %v4714_v21, %v12530_v43  ;;  %v8671_v55 = vrot.slane %v4713_v22, %v12524_v39  ;;  %2745 = vadd.xlane.f32.xlu1 %v2744_v19  ;;  %2742 = vadd.xlane.f32.xlu0 %v2741_v4  ;;  %v697_v4 = vld [vmem:[%s12294_s18 + $0x1058] sm:$0xff] }
 0x41a   : > { %v2536_v30 = vpop.xlane.xlu1 %2535  ;;  %v2533_v31 = vpop.xlane.xlu0 %2532 }
 0x41b   : > { %v8672_v38 = vsel %vm6528_vm10, %v8671_v55, %v8667_v26  ;;  %v4716_v27 = vmul.f32 0.015625, %v2536_v30  ;;  %v4715_v41 = vmul.f32 0.015625, %v2533_v31  ;;  %v2768_v55 = vsel %vm1198_vm0, %v697_v4, 0.0 }
 0x41c   : > { %v8677_v45 = vsel %vm17409_vm9, %v8676_v28, %v8672_v38  ;;  %v2765_v30 = vsel %vm1198_vm0, %v696_v60, 0.0  ;;  %v699_v38 = vld [vmem:[%s12294_s18 + $0x1068] sm:$0xff]  ;;  %vm17410_vm9 = vcmask 654912  }
 0x41d   : > { %v8686_v51 = vrot.slane %v4716_v27, %v12546_v61  ;;  %v8681_v53 = vrot.slane %v4715_v41, %v12540_v57  ;;  %2751 = vadd.xlane.f32.xlu1 %v2750_v10  ;;  %2748 = vadd.xlane.f32.xlu0 %v2747_v33  ;;  %v698_v27 = vld [vmem:[%s12294_s18 + $0x1060] sm:$0xff] }
 0x41e   : > { %v2542_v54 = vpop.xlane.xlu1 %2541  ;;  %v2539_v2 = vpop.xlane.xlu0 %2538 }
 0x41f   : > { %v8682_v40 = vsel %vm6542_vm12, %v8681_v53, %v8677_v45  ;;  %v4718_v37 = vmul.f32 0.015625, %v2542_v54  ;;  %v4717_v62 = vmul.f32 0.015625, %v2539_v2  ;;  %v2774_v45 = vsel %vm1198_vm0, %v699_v38, 0.0 }
 0x420   : > { %v8687_v5 = vsel %vm6549_vm13, %v8686_v51, %v8682_v40  ;;  %v2771_v51 = vsel %vm1198_vm0, %v698_v27, 0.0 }
 0x421   : > { %v8696_v52 = vrot.slane %v4718_v37, %v12561_v13  ;;  %v8691_v7 = vrot.slane %v4717_v62, %v12556_v11  ;;  %2757 = vadd.xlane.f32.xlu1 %v2756_v29  ;;  %2754 = vadd.xlane.f32.xlu0 %v2753_v59  ;;  %v701_v29 = vld [vmem:[%s12294_s18 + $0x1078] sm:$0xff]  ;;  %v700_v59 = vld [vmem:[%s12294_s18 + $0x1070] sm:$0xff] }
 0x422   : > { %v2548_v50 = vpop.xlane.xlu1 %2547  ;;  %v2545_v9 = vpop.xlane.xlu0 %2544 }
 0x423   : > { %v8692_v14 = vsel %vm6556_vm14, %v8691_v7, %v8687_v5  ;;  %v4720_v15 = vmul.f32 0.015625, %v2548_v50  ;;  %v4719_v19 = vmul.f32 0.015625, %v2545_v9  ;;  %v2780_v5 = vsel %vm1198_vm0, %v701_v29, 0.0 }
 0x424   : > { %v8697_v21 = vsel %vm6563_vm15, %v8696_v52, %v8692_v14  ;;  %v2777_v52 = vsel %vm1198_vm0, %v700_v59, 0.0 }
 0x425   : > { %v8705_v22 = vrot.slane %v4720_v15, %v12463_v35  ;;  %v8701_v24 = vrot.slane %v4719_v19, %v12457_v32  ;;  %2763 = vadd.xlane.f32.xlu1 %v2762_v58  ;;  %2760 = vadd.xlane.f32.xlu0 %v2759_v12  ;;  %v14374_v8 = vsel %vm11546_vm11, %v8697_v21, %v13838_v44  ;;  %v703_v58 = vld [vmem:[%s12294_s18 + $0x1088] sm:$0xff]  ;;  %v702_v12 = vld [vmem:[%s12294_s18 + $0x1080] sm:$0xff] }
 0x426   : > { %v2554_v26 = vpop.xlane.xlu1 %2553  ;;  %v2551_v28 = vpop.xlane.xlu0 %2550  ;;  %v2786_v21 = vsel %vm1198_vm0, %v703_v58, 0.0 }
 0x427   : > { %v8706_v31 = vsel %vm6465_vm1, %v8705_v22, %v8701_v24  ;;  %v4722_v10 = vmul.f32 0.015625, %v2554_v26  ;;  %v4721_v33 = vmul.f32 0.015625, %v2551_v28  ;;  %v2783_v22 = vsel %vm1198_vm0, %v702_v12, 0.0 }
 0x429   : > { %v8715_v41 = vrot.slane %v4722_v10, %v12460_v34  ;;  %v8710_v25 = vrot.slane %v4721_v33, %v12466_v36  ;;  %2769 = vadd.xlane.f32.xlu1 %v2768_v55  ;;  %2766 = vadd.xlane.f32.xlu0 %v2765_v30  ;;  %v705_v55 = vld [vmem:[%s12294_s18 + $0x1098] sm:$0xff]  ;;  %v704_v30 = vld [vmem:[%s12294_s18 + $0x1090] sm:$0xff] }
 0x42a   : > { %v2560_v44 = vpop.xlane.xlu1 %2559  ;;  %v2557_v48 = vpop.xlane.xlu0 %2556 }
 0x42b   : > { %v8711_v53 = vsel %vm6472_vm2, %v8710_v25, %v8706_v31  ;;  %v4724_v54 = vmul.f32 0.015625, %v2560_v44  ;;  %v4723_v2 = vmul.f32 0.015625, %v2557_v48  ;;  %v2789_v25 = vsel %vm1198_vm0, %v704_v30, 0.0 }
 0x42c   : > { %v8716_v40 = vsel %vm6479_vm3, %v8715_v41, %v8711_v53  ;;  %v2792_v41 = vsel %vm1198_vm0, %v705_v55, 0.0  ;;  %v706_v53 = vld [vmem:[%s12294_s18 + $0x10a0] sm:$0xff] }
 0x42d   : > { %v8725_v37 = vrot.slane %v4724_v54, %v12473_v46  ;;  %v8720_v62 = vrot.slane %v4723_v2, %v12476_v47  ;;  %2775 = vadd.xlane.f32.xlu1 %v2774_v45  ;;  %2772 = vadd.xlane.f32.xlu0 %v2771_v51  ;;  %v707_v51 = vld [vmem:[%s12294_s18 + $0x10a8] sm:$0xff] }
 0x42e   : > { %v2566_v63 = vpop.xlane.xlu1 %2565  ;;  %v2563_v3 = vpop.xlane.xlu0 %2562 }
 0x42f   : > { %v8721_v7 = vsel %vm6486_vm4, %v8720_v62, %v8716_v40  ;;  %v4726_v50 = vmul.f32 0.015625, %v2566_v63  ;;  %v4725_v9 = vmul.f32 0.015625, %v2563_v3  ;;  %v2795_v62 = vsel %vm1198_vm0, %v706_v53, 0.0 }
 0x430   : > { %v8726_v14 = vsel %vm6493_vm5, %v8725_v37, %v8721_v7  ;;  %v2798_v37 = vsel %vm1198_vm0, %v707_v51, 0.0  ;;  %v708_v7 = vld [vmem:[%s12294_s18 + $0x10b0] sm:$0xff] }
 0x431   : > { %v8735_v15 = vrot.slane %v4726_v50, %v12491_v0  ;;  %v8730_v19 = vrot.slane %v4725_v9, %v12494_v1  ;;  %2781 = vadd.xlane.f32.xlu1 %v2780_v5  ;;  %2778 = vadd.xlane.f32.xlu0 %v2777_v52  ;;  %v709_v52 = vld [vmem:[%s12294_s18 + $0x10b8] sm:$0xff] }
 0x432   : > { %v2572_v4 = vpop.xlane.xlu1 %2571  ;;  %v2569_v60 = vpop.xlane.xlu0 %2568 }
 0x433   : > { %v8731_v24 = vsel %vm6500_vm6, %v8730_v19, %v8726_v14  ;;  %v4728_v26 = vmul.f32 0.015625, %v2572_v4  ;;  %v4727_v28 = vmul.f32 0.015625, %v2569_v60  ;;  %v2801_v19 = vsel %vm1198_vm0, %v708_v7, 0.0 }
 0x434   : > { %v8736_v31 = vsel %vm17372_vm7, %v8735_v15, %v8731_v24  ;;  %v2804_v15 = vsel %vm1198_vm0, %v709_v52, 0.0  ;;  %v710_v24 = vld [vmem:[%s12294_s18 + $0x10c0] sm:$0xff] }
 0x435   : > { %v8745_v10 = vrot.slane %v4728_v26, %v12508_v18  ;;  %v8740_v33 = vrot.slane %v4727_v28, %v12514_v23  ;;  %2787 = vadd.xlane.f32.xlu1 %v2786_v21  ;;  %2784 = vadd.xlane.f32.xlu0 %v2783_v22  ;;  %v711_v22 = vld [vmem:[%s12294_s18 + $0x10c8] sm:$0xff] }
 0x436   : > { %v2578_v38 = vpop.xlane.xlu1 %2577  ;;  %v2575_v27 = vpop.xlane.xlu0 %2574 }
 0x437   : > { %v8741_v44 = vsel %vm17367_vm8, %v8740_v33, %v8736_v31  ;;  %v4730_v48 = vmul.f32 0.015625, %v2578_v38  ;;  %v4729_v45 = vmul.f32 0.015625, %v2575_v27  ;;  %v2807_v33 = vsel %vm1198_vm0, %v710_v24, 0.0 }
 0x438   : > { %v8746_v54 = vsel %vm17410_vm9, %v8745_v10, %v8741_v44  ;;  %vm17411_vm9 = vcmask 786112   ;;  %v2810_v10 = vsel %vm1198_vm0, %v711_v22, 0.0  ;;  %v712_v44 = vld [vmem:[%s12294_s18 + $0x10d0] sm:$0xff] }
 0x439   : > { %v8755_v2 = vrot.slane %v4730_v48, %v12530_v43  ;;  %v8750_v29 = vrot.slane %v4729_v45, %v12524_v39  ;;  %2793 = vadd.xlane.f32.xlu1 %v2792_v41  ;;  %2790 = vadd.xlane.f32.xlu0 %v2789_v25  ;;  %v713_v25 = vld [vmem:[%s12294_s18 + $0x10d8] sm:$0xff] }
 0x43a   : > { %v2584_v59 = vpop.xlane.xlu1 %2583  ;;  %v2581_v40 = vpop.xlane.xlu0 %2580 }
 0x43b   : > { %v8751_v63 = vsel %vm6528_vm10, %v8750_v29, %v8746_v54  ;;  %v4732_v3 = vmul.f32 0.015625, %v2584_v59  ;;  %v4731_v5 = vmul.f32 0.015625, %v2581_v40  ;;  %v2816_v29 = vsel %vm1198_vm0, %v713_v25, 0.0 }
 0x43c   : > { %v8756_v50 = vsel %vm17411_vm9, %v8755_v2, %v8751_v63  ;;  %v2813_v59 = vsel %vm1198_vm0, %v712_v44, 0.0  ;;  %v715_v63 = vld [vmem:[%s12294_s18 + $0x10e8] sm:$0xff]  ;;  %vm17412_vm9 = vcmask 654912  }
 0x43d   : > { %v8765_v9 = vrot.slane %v4732_v3, %v12546_v61  ;;  %v8760_v58 = vrot.slane %v4731_v5, %v12540_v57  ;;  %2799 = vadd.xlane.f32.xlu1 %v2798_v37  ;;  %2796 = vadd.xlane.f32.xlu0 %v2795_v62  ;;  %v714_v3 = vld [vmem:[%s12294_s18 + $0x10e0] sm:$0xff] }
 0x43e   : > { %v2590_v12 = vpop.xlane.xlu1 %2589  ;;  %v2587_v14 = vpop.xlane.xlu0 %2586 }
 0x43f   : > { %v8761_v4 = vsel %vm6542_vm12, %v8760_v58, %v8756_v50  ;;  %v4734_v60 = vmul.f32 0.015625, %v2590_v12  ;;  %v4733_v21 = vmul.f32 0.015625, %v2587_v14  ;;  %v2822_v50 = vsel %vm1198_vm0, %v715_v63, 0.0 }
 0x440   : > { %v8766_v26 = vsel %vm6549_vm13, %v8765_v9, %v8761_v4  ;;  %v2819_v9 = vsel %vm1198_vm0, %v714_v3, 0.0 }
 0x441   : > { %v8775_v28 = vrot.slane %v4734_v60, %v12561_v13  ;;  %v8770_v55 = vrot.slane %v4733_v21, %v12556_v11  ;;  %2805 = vadd.xlane.f32.xlu1 %v2804_v15  ;;  %2802 = vadd.xlane.f32.xlu0 %v2801_v19  ;;  %v717_v15 = vld [vmem:[%s12294_s18 + $0x10f8] sm:$0xff]  ;;  %v716_v19 = vld [vmem:[%s12294_s18 + $0x10f0] sm:$0xff] }
 0x442   : > { %v2596_v30 = vpop.xlane.xlu1 %2595  ;;  %v2593_v31 = vpop.xlane.xlu0 %2592 }
 0x443   : > { %v8771_v38 = vsel %vm6556_vm14, %v8770_v55, %v8766_v26  ;;  %v4736_v27 = vmul.f32 0.015625, %v2596_v30  ;;  %v4735_v41 = vmul.f32 0.015625, %v2593_v31  ;;  %v2828_v26 = vsel %vm1198_vm0, %v717_v15, 0.0 }
 0x444   : > { %v8776_v48 = vsel %vm6563_vm15, %v8775_v28, %v8771_v38  ;;  %v2825_v28 = vsel %vm1198_vm0, %v716_v19, 0.0 }
 0x445   : > { %v8784_v45 = vrot.slane %v4736_v27, %v12463_v35  ;;  %v8780_v51 = vrot.slane %v4735_v41, %v12457_v32  ;;  %2811 = vadd.xlane.f32.xlu1 %v2810_v10  ;;  %2808 = vadd.xlane.f32.xlu0 %v2807_v33  ;;  %v14441_v53 = vsel %vm11546_vm11, %v8776_v48, %v13903_v42  ;;  %v719_v10 = vld [vmem:[%s12294_s18 + $0x1108] sm:$0xff]  ;;  %v718_v33 = vld [vmem:[%s12294_s18 + $0x1100] sm:$0xff] }
 0x446   : > { %v2602_v54 = vpop.xlane.xlu1 %2601  ;;  %v2599_v2 = vpop.xlane.xlu0 %2598  ;;  %v2834_v48 = vsel %vm1198_vm0, %v719_v10, 0.0 }
 0x447   : > { %v8785_v40 = vsel %vm6465_vm1, %v8784_v45, %v8780_v51  ;;  %v4738_v37 = vmul.f32 0.015625, %v2602_v54  ;;  %v4737_v62 = vmul.f32 0.015625, %v2599_v2  ;;  %v2831_v45 = vsel %vm1198_vm0, %v718_v33, 0.0 }
 0x449   : > { %v8794_v5 = vrot.slane %v4738_v37, %v12460_v34  ;;  %v8789_v52 = vrot.slane %v4737_v62, %v12466_v36  ;;  %2817 = vadd.xlane.f32.xlu1 %v2816_v29  ;;  %2814 = vadd.xlane.f32.xlu0 %v2813_v59  ;;  %v721_v29 = vld [vmem:[%s12294_s18 + $0x1118] sm:$0xff]  ;;  %v720_v59 = vld [vmem:[%s12294_s18 + $0x1110] sm:$0xff] }
 0x44a   : > { %v2608_v42 = vpop.xlane.xlu1 %2607  ;;  %v2605_v7 = vpop.xlane.xlu0 %2604 }
 0x44b   : > { %v8790_v58 = vsel %vm6472_vm2, %v8789_v52, %v8785_v40  ;;  %v4740_v12 = vmul.f32 0.015625, %v2608_v42  ;;  %v4739_v14 = vmul.f32 0.015625, %v2605_v7  ;;  %v2837_v52 = vsel %vm1198_vm0, %v720_v59, 0.0 }
 0x44c   : > { %v8795_v4 = vsel %vm6479_vm3, %v8794_v5, %v8790_v58  ;;  %v2840_v5 = vsel %vm1198_vm0, %v721_v29, 0.0  ;;  %v722_v58 = vld [vmem:[%s12294_s18 + $0x1120] sm:$0xff] }
 0x44d   : > { %v8804_v60 = vrot.slane %v4740_v12, %v12473_v46  ;;  %v8799_v21 = vrot.slane %v4739_v14, %v12476_v47  ;;  %2823 = vadd.xlane.f32.xlu1 %v2822_v50  ;;  %2820 = vadd.xlane.f32.xlu0 %v2819_v9  ;;  %v723_v9 = vld [vmem:[%s12294_s18 + $0x1128] sm:$0xff] }
 0x44e   : > { %v2614_v22 = vpop.xlane.xlu1 %2613  ;;  %v2611_v24 = vpop.xlane.xlu0 %2610 }
 0x44f   : > { %v8800_v55 = vsel %vm6486_vm4, %v8799_v21, %v8795_v4  ;;  %v4742_v30 = vmul.f32 0.015625, %v2614_v22  ;;  %v4741_v31 = vmul.f32 0.015625, %v2611_v24  ;;  %v2843_v21 = vsel %vm1198_vm0, %v722_v58, 0.0 }
 0x450   : > { %v8805_v38 = vsel %vm6493_vm5, %v8804_v60, %v8800_v55  ;;  %v2846_v60 = vsel %vm1198_vm0, %v723_v9, 0.0  ;;  %v724_v55 = vld [vmem:[%s12294_s18 + $0x1130] sm:$0xff] }
 0x451   : > { %v8814_v27 = vrot.slane %v4742_v30, %v12491_v0  ;;  %v8809_v41 = vrot.slane %v4741_v31, %v12494_v1  ;;  %2829 = vadd.xlane.f32.xlu1 %v2828_v26  ;;  %2826 = vadd.xlane.f32.xlu0 %v2825_v28  ;;  %v725_v28 = vld [vmem:[%s12294_s18 + $0x1138] sm:$0xff] }
 0x452   : > { %v2620_v25 = vpop.xlane.xlu1 %2619  ;;  %v2617_v44 = vpop.xlane.xlu0 %2616 }
 0x453   : > { %v8810_v51 = vsel %vm6500_vm6, %v8809_v41, %v8805_v38  ;;  %v4744_v54 = vmul.f32 0.015625, %v2620_v25  ;;  %v4743_v2 = vmul.f32 0.015625, %v2617_v44  ;;  %v2849_v41 = vsel %vm1198_vm0, %v724_v55, 0.0 }
 0x454   : > { %v8815_v40 = vsel %vm17372_vm7, %v8814_v27, %v8810_v51  ;;  %v2852_v27 = vsel %vm1198_vm0, %v725_v28, 0.0  ;;  %v726_v51 = vld [vmem:[%s12294_s18 + $0x1140] sm:$0xff] }
 0x455   : > { %v8824_v37 = vrot.slane %v4744_v54, %v12508_v18  ;;  %v8819_v62 = vrot.slane %v4743_v2, %v12514_v23  ;;  %2835 = vadd.xlane.f32.xlu1 %v2834_v48  ;;  %2832 = vadd.xlane.f32.xlu0 %v2831_v45  ;;  %v727_v45 = vld [vmem:[%s12294_s18 + $0x1148] sm:$0xff] }
 0x456   : > { %v2626_v63 = vpop.xlane.xlu1 %2625  ;;  %v2623_v3 = vpop.xlane.xlu0 %2622 }
 0x457   : > { %v8820_v42 = vsel %vm17367_vm8, %v8819_v62, %v8815_v40  ;;  %v4746_v7 = vmul.f32 0.015625, %v2626_v63  ;;  %v4745_v50 = vmul.f32 0.015625, %v2623_v3  ;;  %v2855_v62 = vsel %vm1198_vm0, %v726_v51, 0.0 }
 0x458   : > { %v8825_v12 = vsel %vm17412_vm9, %v8824_v37, %v8820_v42  ;;  %vm17413_vm9 = vcmask 786112   ;;  %v2858_v37 = vsel %vm1198_vm0, %v727_v45, 0.0  ;;  %v728_v42 = vld [vmem:[%s12294_s18 + $0x1150] sm:$0xff] }
 0x459   : > { %v8834_v14 = vrot.slane %v4746_v7, %v12530_v43  ;;  %v8829_v15 = vrot.slane %v4745_v50, %v12524_v39  ;;  %2841 = vadd.xlane.f32.xlu1 %v2840_v5  ;;  %2838 = vadd.xlane.f32.xlu0 %v2837_v52  ;;  %v729_v52 = vld [vmem:[%s12294_s18 + $0x1158] sm:$0xff] }
 0x45a   : > { %v2632_v19 = vpop.xlane.xlu1 %2631  ;;  %v2629_v4 = vpop.xlane.xlu0 %2628 }
 0x45b   : > { %v8830_v22 = vsel %vm6528_vm10, %v8829_v15, %v8825_v12  ;;  %v4748_v24 = vmul.f32 0.015625, %v2632_v19  ;;  %v4747_v26 = vmul.f32 0.015625, %v2629_v4  ;;  %v2864_v15 = vsel %vm1198_vm0, %v729_v52, 0.0 }
 0x45c   : > { %v8835_v30 = vsel %vm17413_vm9, %v8834_v14, %v8830_v22  ;;  %v2861_v19 = vsel %vm1198_vm0, %v728_v42, 0.0  ;;  %v731_v22 = vld [vmem:[%s12294_s18 + $0x1168] sm:$0xff]  ;;  %vm17414_vm9 = vcmask 654912  }
 0x45d   : > { %v8844_v31 = vrot.slane %v4748_v24, %v12546_v61  ;;  %v8839_v10 = vrot.slane %v4747_v26, %v12540_v57  ;;  %2847 = vadd.xlane.f32.xlu1 %v2846_v60  ;;  %2844 = vadd.xlane.f32.xlu0 %v2843_v21  ;;  %v730_v24 = vld [vmem:[%s12294_s18 + $0x1160] sm:$0xff] }
 0x45e   : > { %v2638_v33 = vpop.xlane.xlu1 %2637  ;;  %v2635_v38 = vpop.xlane.xlu0 %2634 }
 0x45f   : > { %v8840_v25 = vsel %vm6542_vm12, %v8839_v10, %v8835_v30  ;;  %v4750_v44 = vmul.f32 0.015625, %v2638_v33  ;;  %v4749_v48 = vmul.f32 0.015625, %v2635_v38  ;;  %v2870_v30 = vsel %vm1198_vm0, %v731_v22, 0.0 }
 0x460   : > { %v8845_v54 = vsel %vm6549_vm13, %v8844_v31, %v8840_v25  ;;  %v2867_v31 = vsel %vm1198_vm0, %v730_v24, 0.0 }
 0x461   : > { %v8854_v2 = vrot.slane %v4750_v44, %v12561_v13  ;;  %v8849_v29 = vrot.slane %v4749_v48, %v12556_v11  ;;  %2853 = vadd.xlane.f32.xlu1 %v2852_v27  ;;  %2850 = vadd.xlane.f32.xlu0 %v2849_v41  ;;  %v733_v27 = vld [vmem:[%s12294_s18 + $0x1178] sm:$0xff]  ;;  %v732_v41 = vld [vmem:[%s12294_s18 + $0x1170] sm:$0xff] }
 0x462   : > { %v2644_v59 = vpop.xlane.xlu1 %2643  ;;  %v2641_v40 = vpop.xlane.xlu0 %2640 }
 0x463   : > { %v8850_v63 = vsel %vm6556_vm14, %v8849_v29, %v8845_v54  ;;  %v4752_v3 = vmul.f32 0.015625, %v2644_v59  ;;  %v4751_v5 = vmul.f32 0.015625, %v2641_v40  ;;  %v2876_v54 = vsel %vm1198_vm0, %v733_v27, 0.0 }
 0x464   : > { %v8855_v7 = vsel %vm6563_vm15, %v8854_v2, %v8850_v63  ;;  %v2873_v2 = vsel %vm1198_vm0, %v732_v41, 0.0 }
 0x465   : > { %v8863_v50 = vrot.slane %v4752_v3, %v12463_v35  ;;  %v8859_v9 = vrot.slane %v4751_v5, %v12457_v32  ;;  %2859 = vadd.xlane.f32.xlu1 %v2858_v37  ;;  %2856 = vadd.xlane.f32.xlu0 %v2855_v62  ;;  %v14508_v58 = vsel %vm11546_vm11, %v8855_v7, %v13970_v6  ;;  %v735_v37 = vld [vmem:[%s12294_s18 + $0x1188] sm:$0xff]  ;;  %v734_v62 = vld [vmem:[%s12294_s18 + $0x1180] sm:$0xff] }
 0x466   : > { %v2650_v12 = vpop.xlane.xlu1 %2649  ;;  %v2647_v14 = vpop.xlane.xlu0 %2646  ;;  %v2882_v7 = vsel %vm1198_vm0, %v735_v37, 0.0 }
 0x467   : > { %v8864_v4 = vsel %vm6465_vm1, %v8863_v50, %v8859_v9  ;;  %v4754_v60 = vmul.f32 0.015625, %v2650_v12  ;;  %v4753_v21 = vmul.f32 0.015625, %v2647_v14  ;;  %v2879_v50 = vsel %vm1198_vm0, %v734_v62, 0.0 }
 0x469   : > { %v8873_v26 = vrot.slane %v4754_v60, %v12460_v34  ;;  %v8868_v28 = vrot.slane %v4753_v21, %v12466_v36  ;;  %2865 = vadd.xlane.f32.xlu1 %v2864_v15  ;;  %2862 = vadd.xlane.f32.xlu0 %v2861_v19  ;;  %v737_v15 = vld [vmem:[%s12294_s18 + $0x1198] sm:$0xff]  ;;  %v736_v19 = vld [vmem:[%s12294_s18 + $0x1190] sm:$0xff] }
 0x46a   : > { %v2656_v6 = vpop.xlane.xlu1 %2655  ;;  %v2653_v55 = vpop.xlane.xlu0 %2652 }
 0x46b   : > { %v8869_v10 = vsel %vm6472_vm2, %v8868_v28, %v8864_v4  ;;  %v4756_v33 = vmul.f32 0.015625, %v2656_v6  ;;  %v4755_v38 = vmul.f32 0.015625, %v2653_v55  ;;  %v2885_v28 = vsel %vm1198_vm0, %v736_v19, 0.0 }
 0x46c   : > { %v8874_v25 = vsel %vm6479_vm3, %v8873_v26, %v8869_v10  ;;  %v2888_v26 = vsel %vm1198_vm0, %v737_v15, 0.0  ;;  %v738_v10 = vld [vmem:[%s12294_s18 + $0x11a0] sm:$0xff] }
 0x46d   : > { %v8883_v44 = vrot.slane %v4756_v33, %v12473_v46  ;;  %v8878_v48 = vrot.slane %v4755_v38, %v12476_v47  ;;  %2871 = vadd.xlane.f32.xlu1 %v2870_v30  ;;  %2868 = vadd.xlane.f32.xlu0 %v2867_v31  ;;  %v739_v31 = vld [vmem:[%s12294_s18 + $0x11a8] sm:$0xff] }
 0x46e   : > { %v2662_v45 = vpop.xlane.xlu1 %2661  ;;  %v2659_v51 = vpop.xlane.xlu0 %2658 }
 0x46f   : > { %v8879_v29 = vsel %vm6486_vm4, %v8878_v48, %v8874_v25  ;;  %v4758_v59 = vmul.f32 0.015625, %v2662_v45  ;;  %v4757_v40 = vmul.f32 0.015625, %v2659_v51  ;;  %v2891_v48 = vsel %vm1198_vm0, %v738_v10, 0.0 }
 0x470   : > { %v8884_v63 = vsel %vm6493_vm5, %v8883_v44, %v8879_v29  ;;  %v2894_v44 = vsel %vm1198_vm0, %v739_v31, 0.0  ;;  %v740_v29 = vld [vmem:[%s12294_s18 + $0x11b0] sm:$0xff] }
 0x471   : > { %v8893_v3 = vrot.slane %v4758_v59, %v12491_v0  ;;  %v8888_v5 = vrot.slane %v4757_v40, %v12494_v1  ;;  %2877 = vadd.xlane.f32.xlu1 %v2876_v54  ;;  %2874 = vadd.xlane.f32.xlu0 %v2873_v2  ;;  %v741_v2 = vld [vmem:[%s12294_s18 + $0x11b8] sm:$0xff] }
 0x472   : > { %v2668_v52 = vpop.xlane.xlu1 %2667  ;;  %v2665_v42 = vpop.xlane.xlu0 %2664 }
 0x473   : > { %v8889_v9 = vsel %vm6500_vm6, %v8888_v5, %v8884_v63  ;;  %v4760_v12 = vmul.f32 0.015625, %v2668_v52  ;;  %v4759_v14 = vmul.f32 0.015625, %v2665_v42  ;;  %v2897_v5 = vsel %vm1198_vm0, %v740_v29, 0.0 }
 0x474   : > { %v8894_v4 = vsel %vm17372_vm7, %v8893_v3, %v8889_v9  ;;  %v2900_v3 = vsel %vm1198_vm0, %v741_v2, 0.0  ;;  %v742_v9 = vld [vmem:[%s12294_s18 + $0x11c0] sm:$0xff] }
 0x475   : > { %v8903_v60 = vrot.slane %v4760_v12, %v12508_v18  ;;  %v8898_v21 = vrot.slane %v4759_v14, %v12514_v23  ;;  %2883 = vadd.xlane.f32.xlu1 %v2882_v7  ;;  %2880 = vadd.xlane.f32.xlu0 %v2879_v50  ;;  %v743_v50 = vld [vmem:[%s12294_s18 + $0x11c8] sm:$0xff] }
 0x476   : > { %v2674_v22 = vpop.xlane.xlu1 %2673  ;;  %v2671_v24 = vpop.xlane.xlu0 %2670 }
 0x477   : > { %v8899_v6 = vsel %vm17367_vm8, %v8898_v21, %v8894_v4  ;;  %v4762_v55 = vmul.f32 0.015625, %v2674_v22  ;;  %v4761_v30 = vmul.f32 0.015625, %v2671_v24  ;;  %v2903_v21 = vsel %vm1198_vm0, %v742_v9, 0.0 }
 0x478   : > { %v8904_v33 = vsel %vm17414_vm9, %v8903_v60, %v8899_v6  ;;  %vm17415_vm9 = vcmask 786112   ;;  %v2906_v60 = vsel %vm1198_vm0, %v743_v50, 0.0  ;;  %v744_v6 = vld [vmem:[%s12294_s18 + $0x11d0] sm:$0xff] }
 0x479   : > { %v8913_v38 = vrot.slane %v4762_v55, %v12530_v43  ;;  %v8908_v27 = vrot.slane %v4761_v30, %v12524_v39  ;;  %2889 = vadd.xlane.f32.xlu1 %v2888_v26  ;;  %2886 = vadd.xlane.f32.xlu0 %v2885_v28  ;;  %v745_v28 = vld [vmem:[%s12294_s18 + $0x11d8] sm:$0xff] }
 0x47a   : > { %v2680_v41 = vpop.xlane.xlu1 %2679  ;;  %v2677_v25 = vpop.xlane.xlu0 %2676 }
 0x47b   : > { %v8909_v45 = vsel %vm6528_vm10, %v8908_v27, %v8904_v33  ;;  %v4764_v51 = vmul.f32 0.015625, %v2680_v41  ;;  %v4763_v54 = vmul.f32 0.015625, %v2677_v25  ;;  %v2912_v27 = vsel %vm1198_vm0, %v745_v28, 0.0 }
 0x47c   : > { %v8914_v59 = vsel %vm17415_vm9, %v8913_v38, %v8909_v45  ;;  %v2909_v41 = vsel %vm1198_vm0, %v744_v6, 0.0  ;;  %v747_v45 = vld [vmem:[%s12294_s18 + $0x11e8] sm:$0xff]  ;;  %vm17416_vm9 = vcmask 654912  }
 0x47d   : > { %v8923_v40 = vrot.slane %v4764_v51, %v12546_v61  ;;  %v8918_v37 = vrot.slane %v4763_v54, %v12540_v57  ;;  %2895 = vadd.xlane.f32.xlu1 %v2894_v44  ;;  %2892 = vadd.xlane.f32.xlu0 %v2891_v48  ;;  %v746_v51 = vld [vmem:[%s12294_s18 + $0x11e0] sm:$0xff] }
 0x47e   : > { %v2686_v62 = vpop.xlane.xlu1 %2685  ;;  %v2683_v63 = vpop.xlane.xlu0 %2682 }
 0x47f   : > { %v8919_v52 = vsel %vm6542_vm12, %v8918_v37, %v8914_v59  ;;  %v4766_v42 = vmul.f32 0.015625, %v2686_v62  ;;  %v4765_v7 = vmul.f32 0.015625, %v2683_v63  ;;  %v2918_v59 = vsel %vm1198_vm0, %v747_v45, 0.0 }
 0x480   : > { %v8924_v12 = vsel %vm6549_vm13, %v8923_v40, %v8919_v52  ;;  %v2915_v40 = vsel %vm1198_vm0, %v746_v51, 0.0 }
 0x481   : > { %v8933_v14 = vrot.slane %v4766_v42, %v12561_v13  ;;  %v8928_v15 = vrot.slane %v4765_v7, %v12556_v11  ;;  %2901 = vadd.xlane.f32.xlu1 %v2900_v3  ;;  %2898 = vadd.xlane.f32.xlu0 %v2897_v5  ;;  %v749_v3 = vld [vmem:[%s12294_s18 + $0x11f8] sm:$0xff]  ;;  %v748_v5 = vld [vmem:[%s12294_s18 + $0x11f0] sm:$0xff] }
 0x482   : > { %v2692_v19 = vpop.xlane.xlu1 %2691  ;;  %v2689_v4 = vpop.xlane.xlu0 %2688 }
 0x483   : > { %v8929_v22 = vsel %vm6556_vm14, %v8928_v15, %v8924_v12  ;;  %v4768_v24 = vmul.f32 0.015625, %v2692_v19  ;;  %v4767_v26 = vmul.f32 0.015625, %v2689_v4  ;;  %v2924_v12 = vsel %vm1198_vm0, %v749_v3, 0.0 }
 0x484   : > { %v8934_v55 = vsel %vm6563_vm15, %v8933_v14, %v8929_v22  ;;  %v2921_v14 = vsel %vm1198_vm0, %v748_v5, 0.0 }
 0x485   : > { %v8942_v30 = vrot.slane %v4768_v24, %v12463_v35  ;;  %v8938_v31 = vrot.slane %v4767_v26, %v12457_v32  ;;  %2907 = vadd.xlane.f32.xlu1 %v2906_v60  ;;  %2904 = vadd.xlane.f32.xlu0 %v2903_v21  ;;  %v14575_v10 = vsel %vm11546_vm11, %v8934_v55, %v14037_v20  ;;  %v751_v60 = vld [vmem:[%s12294_s18 + $0x1208] sm:$0xff]  ;;  %v750_v21 = vld [vmem:[%s12294_s18 + $0x1200] sm:$0xff] }
 0x486   : > { %v2698_v33 = vpop.xlane.xlu1 %2697  ;;  %v2695_v38 = vpop.xlane.xlu0 %2694  ;;  %v2930_v55 = vsel %vm1198_vm0, %v751_v60, 0.0 }
 0x487   : > { %v8943_v25 = vsel %vm6465_vm1, %v8942_v30, %v8938_v31  ;;  %v4770_v44 = vmul.f32 0.015625, %v2698_v33  ;;  %v4769_v48 = vmul.f32 0.015625, %v2695_v38  ;;  %v2927_v30 = vsel %vm1198_vm0, %v750_v21, 0.0 }
 0x489   : > { %v8952_v54 = vrot.slane %v4770_v44, %v12460_v34  ;;  %v8947_v2 = vrot.slane %v4769_v48, %v12466_v36  ;;  %2913 = vadd.xlane.f32.xlu1 %v2912_v27  ;;  %2910 = vadd.xlane.f32.xlu0 %v2909_v41  ;;  %v753_v27 = vld [vmem:[%s12294_s18 + $0x1218] sm:$0xff]  ;;  %v752_v41 = vld [vmem:[%s12294_s18 + $0x1210] sm:$0xff] }
 0x48a   : > { %v2704_v20 = vpop.xlane.xlu1 %2703  ;;  %v2701_v29 = vpop.xlane.xlu0 %2700 }
 0x48b   : > { %v8948_v37 = vsel %vm6472_vm2, %v8947_v2, %v8943_v25  ;;  %v4772_v62 = vmul.f32 0.015625, %v2704_v20  ;;  %v4771_v63 = vmul.f32 0.015625, %v2701_v29  ;;  %v2933_v2 = vsel %vm1198_vm0, %v752_v41, 0.0 }
 0x48c   : > { %v8953_v52 = vsel %vm6479_vm3, %v8952_v54, %v8948_v37  ;;  %v2936_v54 = vsel %vm1198_vm0, %v753_v27, 0.0  ;;  %v754_v37 = vld [vmem:[%s12294_s18 + $0x1220] sm:$0xff] }
 0x48d   : > { %v8962_v42 = vrot.slane %v4772_v62, %v12473_v46  ;;  %v8957_v7 = vrot.slane %v4771_v63, %v12476_v47  ;;  %2919 = vadd.xlane.f32.xlu1 %v2918_v59  ;;  %2916 = vadd.xlane.f32.xlu0 %v2915_v40  ;;  %v755_v40 = vld [vmem:[%s12294_s18 + $0x1228] sm:$0xff] }
 0x48e   : > { %v2710_v50 = vpop.xlane.xlu1 %2709  ;;  %v2707_v9 = vpop.xlane.xlu0 %2706 }
 0x48f   : > { %v8958_v15 = vsel %vm6486_vm4, %v8957_v7, %v8953_v52  ;;  %v4774_v19 = vmul.f32 0.015625, %v2710_v50  ;;  %v4773_v4 = vmul.f32 0.015625, %v2707_v9  ;;  %v2939_v7 = vsel %vm1198_vm0, %v754_v37, 0.0 }
 0x490   : > { %v8963_v22 = vsel %vm6493_vm5, %v8962_v42, %v8958_v15  ;;  %v2942_v42 = vsel %vm1198_vm0, %v755_v40, 0.0  ;;  %v756_v15 = vld [vmem:[%s12294_s18 + $0x1230] sm:$0xff] }
 0x491   : > { %v8972_v24 = vrot.slane %v4774_v19, %v12491_v0  ;;  %v8967_v26 = vrot.slane %v4773_v4, %v12494_v1  ;;  %2925 = vadd.xlane.f32.xlu1 %v2924_v12  ;;  %2922 = vadd.xlane.f32.xlu0 %v2921_v14  ;;  %v757_v14 = vld [vmem:[%s12294_s18 + $0x1238] sm:$0xff] }
 0x492   : > { %v2716_v28 = vpop.xlane.xlu1 %2715  ;;  %v2713_v6 = vpop.xlane.xlu0 %2712 }
 0x493   : > { %v8968_v31 = vsel %vm6500_vm6, %v8967_v26, %v8963_v22  ;;  %v4776_v33 = vmul.f32 0.015625, %v2716_v28  ;;  %v4775_v38 = vmul.f32 0.015625, %v2713_v6  ;;  %v2945_v26 = vsel %vm1198_vm0, %v756_v15, 0.0 }
 0x494   : > { %v8973_v25 = vsel %vm17372_vm7, %v8972_v24, %v8968_v31  ;;  %v2948_v24 = vsel %vm1198_vm0, %v757_v14, 0.0  ;;  %v758_v31 = vld [vmem:[%s12294_s18 + $0x1240] sm:$0xff] }
 0x495   : > { %v8982_v44 = vrot.slane %v4776_v33, %v12508_v18  ;;  %v8977_v48 = vrot.slane %v4775_v38, %v12514_v23  ;;  %2931 = vadd.xlane.f32.xlu1 %v2930_v55  ;;  %2928 = vadd.xlane.f32.xlu0 %v2927_v30  ;;  %v759_v30 = vld [vmem:[%s12294_s18 + $0x1248] sm:$0xff] }
 0x496   : > { %v2722_v45 = vpop.xlane.xlu1 %2721  ;;  %v2719_v51 = vpop.xlane.xlu0 %2718 }
 0x497   : > { %v8978_v20 = vsel %vm17367_vm8, %v8977_v48, %v8973_v25  ;;  %v4778_v29 = vmul.f32 0.015625, %v2722_v45  ;;  %v4777_v59 = vmul.f32 0.015625, %v2719_v51  ;;  %v2951_v48 = vsel %vm1198_vm0, %v758_v31, 0.0 }
 0x498   : > { %v8983_v62 = vsel %vm17416_vm9, %v8982_v44, %v8978_v20  ;;  %vm17417_vm9 = vcmask 786112   ;;  %v2954_v44 = vsel %vm1198_vm0, %v759_v30, 0.0  ;;  %v760_v20 = vld [vmem:[%s12294_s18 + $0x1250] sm:$0xff] }
 0x499   : > { %v8992_v63 = vrot.slane %v4778_v29, %v12530_v43  ;;  %v8987_v3 = vrot.slane %v4777_v59, %v12524_v39  ;;  %2937 = vadd.xlane.f32.xlu1 %v2936_v54  ;;  %2934 = vadd.xlane.f32.xlu0 %v2933_v2  ;;  %v761_v2 = vld [vmem:[%s12294_s18 + $0x1258] sm:$0xff] }
 0x49a   : > { %v2728_v5 = vpop.xlane.xlu1 %2727  ;;  %v2725_v52 = vpop.xlane.xlu0 %2724 }
 0x49b   : > { %v8988_v50 = vsel %vm6528_vm10, %v8987_v3, %v8983_v62  ;;  %v4780_v9 = vmul.f32 0.015625, %v2728_v5  ;;  %v4779_v12 = vmul.f32 0.015625, %v2725_v52  ;;  %v2960_v3 = vsel %vm1198_vm0, %v761_v2, 0.0 }
 0x49c   : > { %v8993_v19 = vsel %vm17417_vm9, %v8992_v63, %v8988_v50  ;;  %v2957_v5 = vsel %vm1198_vm0, %v760_v20, 0.0  ;;  %v763_v50 = vld [vmem:[%s12294_s18 + $0x1268] sm:$0xff] }
 0x49d   : > { %v9002_v4 = vrot.slane %v4780_v9, %v12546_v61  ;;  %v8997_v60 = vrot.slane %v4779_v12, %v12540_v57  ;;  %2943 = vadd.xlane.f32.xlu1 %v2942_v42  ;;  %2940 = vadd.xlane.f32.xlu0 %v2939_v7  ;;  %v762_v9 = vld [vmem:[%s12294_s18 + $0x1260] sm:$0xff] }
 0x49e   : > { %v2734_v21 = vpop.xlane.xlu1 %2733  ;;  %v2731_v22 = vpop.xlane.xlu0 %2730 }
 0x49f   : > { %v8998_v28 = vsel %vm6542_vm12, %v8997_v60, %v8993_v19  ;;  %v4782_v6 = vmul.f32 0.015625, %v2734_v21  ;;  %v4781_v55 = vmul.f32 0.015625, %v2731_v22  ;;  %v2966_v19 = vsel %vm1198_vm0, %v763_v50, 0.0 }
 0x4a0   : > { %v9003_v33 = vsel %vm6549_vm13, %v9002_v4, %v8998_v28  ;;  %v2963_v4 = vsel %vm1198_vm0, %v762_v9, 0.0 }
 0x4a1   : > { %v9012_v38 = vrot.slane %v4782_v6, %v12561_v13  ;;  %v9007_v27 = vrot.slane %v4781_v55, %v12556_v11  ;;  %2949 = vadd.xlane.f32.xlu1 %v2948_v24  ;;  %2946 = vadd.xlane.f32.xlu0 %v2945_v26  ;;  %v765_v24 = vld [vmem:[%s12294_s18 + $0x1278] sm:$0xff]  ;;  %v764_v26 = vld [vmem:[%s12294_s18 + $0x1270] sm:$0xff] }
 0x4a2   : > { %v2740_v41 = vpop.xlane.xlu1 %2739  ;;  %v2737_v25 = vpop.xlane.xlu0 %2736 }
 0x4a3   : > { %v9008_v45 = vsel %vm6556_vm14, %v9007_v27, %v9003_v33  ;;  %v4784_v51 = vmul.f32 0.015625, %v2740_v41  ;;  %v4783_v54 = vmul.f32 0.015625, %v2737_v25  ;;  %v2972_v33 = vsel %vm1198_vm0, %v765_v24, 0.0 }
 0x4a4   : > { %v9013_v29 = vsel %vm6563_vm15, %v9012_v38, %v9008_v45  ;;  %v2969_v38 = vsel %vm1198_vm0, %v764_v26, 0.0 }
 0x4a5   : > { %v9021_v59 = vrot.slane %v4784_v51, %v12463_v35  ;;  %v9017_v40 = vrot.slane %v4783_v54, %v12457_v32  ;;  %2955 = vadd.xlane.f32.xlu1 %v2954_v44  ;;  %2952 = vadd.xlane.f32.xlu0 %v2951_v48  ;;  %v14642_v37 = vsel %vm11546_vm11, %v9013_v29, %v14104_v56  ;;  %v767_v44 = vld [vmem:[%s12294_s18 + $0x1288] sm:$0xff]  ;;  %v766_v48 = vld [vmem:[%s12294_s18 + $0x1280] sm:$0xff]  ;;  %vm17418_vm11 = vcmask 654912  }
 0x4a6   : > { %v2746_v62 = vpop.xlane.xlu1 %2745  ;;  %v2743_v63 = vpop.xlane.xlu0 %2742  ;;  %v2978_v29 = vsel %vm1198_vm0, %v767_v44, 0.0 }
 0x4a7   : > { %v9022_v52 = vsel %vm6465_vm1, %v9021_v59, %v9017_v40  ;;  %v4786_v42 = vmul.f32 0.015625, %v2746_v62  ;;  %v4785_v7 = vmul.f32 0.015625, %v2743_v63  ;;  %v2975_v59 = vsel %vm1198_vm0, %v766_v48, 0.0 }
 0x4a9   : > { %v9031_v12 = vrot.slane %v4786_v42, %v12460_v34  ;;  %v9026_v14 = vrot.slane %v4785_v7, %v12466_v36  ;;  %2961 = vadd.xlane.f32.xlu1 %v2960_v3  ;;  %2958 = vadd.xlane.f32.xlu0 %v2957_v5  ;;  %v769_v3 = vld [vmem:[%s12294_s18 + $0x1298] sm:$0xff]  ;;  %v768_v5 = vld [vmem:[%s12294_s18 + $0x1290] sm:$0xff] }
 0x4aa   : > { %v2752_v56 = vpop.xlane.xlu1 %2751  ;;  %v2749_v15 = vpop.xlane.xlu0 %2748 }
 0x4ab   : > { %v9027_v60 = vsel %vm6472_vm2, %v9026_v14, %v9022_v52  ;;  %v4788_v21 = vmul.f32 0.015625, %v2752_v56  ;;  %v4787_v22 = vmul.f32 0.015625, %v2749_v15  ;;  %v2981_v14 = vsel %vm1198_vm0, %v768_v5, 0.0 }
 0x4ac   : > { %v9032_v28 = vsel %vm6479_vm3, %v9031_v12, %v9027_v60  ;;  %v2984_v12 = vsel %vm1198_vm0, %v769_v3, 0.0  ;;  %v770_v60 = vld [vmem:[%s12294_s18 + $0x12a0] sm:$0xff] }
 0x4ad   : > { %v9041_v6 = vrot.slane %v4788_v21, %v12473_v46  ;;  %v9036_v55 = vrot.slane %v4787_v22, %v12476_v47  ;;  %2967 = vadd.xlane.f32.xlu1 %v2966_v19  ;;  %2964 = vadd.xlane.f32.xlu0 %v2963_v4  ;;  %v771_v4 = vld [vmem:[%s12294_s18 + $0x12a8] sm:$0xff] }
 0x4ae   : > { %v2758_v30 = vpop.xlane.xlu1 %2757  ;;  %v2755_v31 = vpop.xlane.xlu0 %2754 }
 0x4af   : > { %v9037_v27 = vsel %vm6486_vm4, %v9036_v55, %v9032_v28  ;;  %v4790_v41 = vmul.f32 0.015625, %v2758_v30  ;;  %v4789_v25 = vmul.f32 0.015625, %v2755_v31  ;;  %v2987_v55 = vsel %vm1198_vm0, %v770_v60, 0.0 }
 0x4b0   : > { %v9042_v45 = vsel %vm6493_vm5, %v9041_v6, %v9037_v27  ;;  %v2990_v6 = vsel %vm1198_vm0, %v771_v4, 0.0  ;;  %v772_v27 = vld [vmem:[%s12294_s18 + $0x12b0] sm:$0xff] }
 0x4b1   : > { %v9051_v51 = vrot.slane %v4790_v41, %v12491_v0  ;;  %v9046_v54 = vrot.slane %v4789_v25, %v12494_v1  ;;  %2973 = vadd.xlane.f32.xlu1 %v2972_v33  ;;  %2970 = vadd.xlane.f32.xlu0 %v2969_v38  ;;  %v773_v38 = vld [vmem:[%s12294_s18 + $0x12b8] sm:$0xff] }
 0x4b2   : > { %v2764_v2 = vpop.xlane.xlu1 %2763  ;;  %v2761_v20 = vpop.xlane.xlu0 %2760 }
 0x4b3   : > { %v9047_v40 = vsel %vm6500_vm6, %v9046_v54, %v9042_v45  ;;  %v4792_v62 = vmul.f32 0.015625, %v2764_v2  ;;  %v4791_v63 = vmul.f32 0.015625, %v2761_v20  ;;  %v2993_v54 = vsel %vm1198_vm0, %v772_v27, 0.0 }
 0x4b4   : > { %v9052_v52 = vsel %vm17372_vm7, %v9051_v51, %v9047_v40  ;;  %v2996_v51 = vsel %vm1198_vm0, %v773_v38, 0.0  ;;  %v774_v40 = vld [vmem:[%s12294_s18 + $0x12c0] sm:$0xff] }
 0x4b5   : > { %v9061_v42 = vrot.slane %v4792_v62, %v12508_v18  ;;  %v9056_v7 = vrot.slane %v4791_v63, %v12514_v23  ;;  %2979 = vadd.xlane.f32.xlu1 %v2978_v29  ;;  %2976 = vadd.xlane.f32.xlu0 %v2975_v59  ;;  %v775_v59 = vld [vmem:[%s12294_s18 + $0x12c8] sm:$0xff] }
 0x4b6   : > { %v2770_v50 = vpop.xlane.xlu1 %2769  ;;  %v2767_v9 = vpop.xlane.xlu0 %2766 }
 0x4b7   : > { %v9057_v56 = vsel %vm17367_vm8, %v9056_v7, %v9052_v52  ;;  %v4794_v15 = vmul.f32 0.015625, %v2770_v50  ;;  %v4793_v19 = vmul.f32 0.015625, %v2767_v9  ;;  %v2999_v7 = vsel %vm1198_vm0, %v774_v40, 0.0 }
 0x4b8   : > { %v9062_v21 = vsel %vm17418_vm11, %v9061_v42, %v9057_v56  ;;  %v3002_v42 = vsel %vm1198_vm0, %v775_v59, 0.0  ;;  %vm11548_vm11 = vcmask 1044484   ;;  %v776_v56 = vld [vmem:[%s12294_s18 + $0x12d0] sm:$0xff] }
 0x4b9   : > { %v9071_v22 = vrot.slane %v4794_v15, %v12530_v43  ;;  %v9066_v24 = vrot.slane %v4793_v19, %v12524_v39  ;;  %2985 = vadd.xlane.f32.xlu1 %v2984_v12  ;;  %2982 = vadd.xlane.f32.xlu0 %v2981_v14  ;;  %v777_v14 = vld [vmem:[%s12294_s18 + $0x12d8] sm:$0xff] }
 0x4ba   : > { %v2776_v26 = vpop.xlane.xlu1 %2775  ;;  %v2773_v28 = vpop.xlane.xlu0 %2772 }
 0x4bb   : > { %v9067_v30 = vsel %vm6528_vm10, %v9066_v24, %v9062_v21  ;;  %v4796_v31 = vmul.f32 0.015625, %v2776_v26  ;;  %v4795_v33 = vmul.f32 0.015625, %v2773_v28  ;;  %v3008_v24 = vsel %vm1198_vm0, %v777_v14, 0.0 }
 0x4bc   : > { %v9072_v41 = vsel %vm17417_vm9, %v9071_v22, %v9067_v30  ;;  %v3005_v26 = vsel %vm1198_vm0, %v776_v56, 0.0  ;;  %v779_v30 = vld [vmem:[%s12294_s18 + $0x12e8] sm:$0xff]  ;;  %vm17419_vm9 = vcmask 654912  }
 0x4bd   : > { %v9081_v25 = vrot.slane %v4796_v31, %v12546_v61  ;;  %v9076_v44 = vrot.slane %v4795_v33, %v12540_v57  ;;  %2991 = vadd.xlane.f32.xlu1 %v2990_v6  ;;  %2988 = vadd.xlane.f32.xlu0 %v2987_v55  ;;  %v778_v31 = vld [vmem:[%s12294_s18 + $0x12e0] sm:$0xff] }
 0x4be   : > { %v2782_v48 = vpop.xlane.xlu1 %2781  ;;  %v2779_v45 = vpop.xlane.xlu0 %2778 }
 0x4bf   : > { %v9077_v2 = vsel %vm6542_vm12, %v9076_v44, %v9072_v41  ;;  %v4798_v20 = vmul.f32 0.015625, %v2782_v48  ;;  %v4797_v29 = vmul.f32 0.015625, %v2779_v45  ;;  %v3014_v41 = vsel %vm1198_vm0, %v779_v30, 0.0 }
 0x4c0   : > { %v9082_v62 = vsel %vm6549_vm13, %v9081_v25, %v9077_v2  ;;  %v3011_v25 = vsel %vm1198_vm0, %v778_v31, 0.0 }
 0x4c1   : > { %v9091_v63 = vrot.slane %v4798_v20, %v12561_v13  ;;  %v9086_v3 = vrot.slane %v4797_v29, %v12556_v11  ;;  %2997 = vadd.xlane.f32.xlu1 %v2996_v51  ;;  %2994 = vadd.xlane.f32.xlu0 %v2993_v54  ;;  %v781_v51 = vld [vmem:[%s12294_s18 + $0x12f8] sm:$0xff]  ;;  %v780_v54 = vld [vmem:[%s12294_s18 + $0x12f0] sm:$0xff] }
 0x4c2   : > { %v2788_v5 = vpop.xlane.xlu1 %2787  ;;  %v2785_v52 = vpop.xlane.xlu0 %2784 }
 0x4c3   : > { %v9087_v50 = vsel %vm6556_vm14, %v9086_v3, %v9082_v62  ;;  %v4800_v9 = vmul.f32 0.015625, %v2788_v5  ;;  %v4799_v12 = vmul.f32 0.015625, %v2785_v52  ;;  %v3020_v62 = vsel %vm1198_vm0, %v781_v51, 0.0 }
 0x4c4   : > { %v9092_v15 = vsel %vm6563_vm15, %v9091_v63, %v9087_v50  ;;  %v3017_v63 = vsel %vm1198_vm0, %v780_v54, 0.0 }
 0x4c5   : > { %v9100_v19 = vrot.slane %v4800_v9, %v12463_v35  ;;  %v9096_v4 = vrot.slane %v4799_v12, %v12457_v32  ;;  %3003 = vadd.xlane.f32.xlu1 %v3002_v42  ;;  %3000 = vadd.xlane.f32.xlu0 %v2999_v7  ;;  %v14709_v60 = vsel %vm11548_vm11, %v9092_v15, %v14173_v17  ;;  %v783_v42 = vld [vmem:[%s12294_s18 + $0x1308] sm:$0xff]  ;;  %v782_v7 = vld [vmem:[%s12294_s18 + $0x1300] sm:$0xff] }
 0x4c6   : > { %v2794_v21 = vpop.xlane.xlu1 %2793  ;;  %v2791_v22 = vpop.xlane.xlu0 %2790  ;;  %v3026_v15 = vsel %vm1198_vm0, %v783_v42, 0.0 }
 0x4c7   : > { %v9101_v28 = vsel %vm6465_vm1, %v9100_v19, %v9096_v4  ;;  %v4802_v6 = vmul.f32 0.015625, %v2794_v21  ;;  %v4801_v55 = vmul.f32 0.015625, %v2791_v22  ;;  %v3023_v19 = vsel %vm1198_vm0, %v782_v7, 0.0 }
 0x4c9   : > { %v9110_v33 = vrot.slane %v4802_v6, %v12460_v34  ;;  %v9105_v38 = vrot.slane %v4801_v55, %v12466_v36  ;;  %3009 = vadd.xlane.f32.xlu1 %v3008_v24  ;;  %3006 = vadd.xlane.f32.xlu0 %v3005_v26  ;;  %v785_v24 = vld [vmem:[%s12294_s18 + $0x1318] sm:$0xff]  ;;  %v784_v26 = vld [vmem:[%s12294_s18 + $0x1310] sm:$0xff] }
 0x4ca   : > { %v2800_v17 = vpop.xlane.xlu1 %2799  ;;  %v2797_v27 = vpop.xlane.xlu0 %2796 }
 0x4cb   : > { %v9106_v44 = vsel %vm6472_vm2, %v9105_v38, %v9101_v28  ;;  %v4804_v48 = vmul.f32 0.015625, %v2800_v17  ;;  %v4803_v45 = vmul.f32 0.015625, %v2797_v27  ;;  %v3029_v38 = vsel %vm1198_vm0, %v784_v26, 0.0 }
 0x4cc   : > { %v9111_v2 = vsel %vm6479_vm3, %v9110_v33, %v9106_v44  ;;  %v3032_v33 = vsel %vm1198_vm0, %v785_v24, 0.0  ;;  %v786_v44 = vld [vmem:[%s12294_s18 + $0x1320] sm:$0xff] }
 0x4cd   : > { %v9120_v20 = vrot.slane %v4804_v48, %v12473_v46  ;;  %v9115_v29 = vrot.slane %v4803_v45, %v12476_v47  ;;  %3015 = vadd.xlane.f32.xlu1 %v3014_v41  ;;  %3012 = vadd.xlane.f32.xlu0 %v3011_v25  ;;  %v787_v25 = vld [vmem:[%s12294_s18 + $0x1328] sm:$0xff] }
 0x4ce   : > { %v2806_v59 = vpop.xlane.xlu1 %2805  ;;  %v2803_v40 = vpop.xlane.xlu0 %2802 }
 0x4cf   : > { %v9116_v3 = vsel %vm6486_vm4, %v9115_v29, %v9111_v2  ;;  %v4806_v5 = vmul.f32 0.015625, %v2806_v59  ;;  %v4805_v52 = vmul.f32 0.015625, %v2803_v40  ;;  %v3035_v29 = vsel %vm1198_vm0, %v786_v44, 0.0 }
 0x4d0   : > { %v9121_v50 = vsel %vm6493_vm5, %v9120_v20, %v9116_v3  ;;  %v3038_v20 = vsel %vm1198_vm0, %v787_v25, 0.0  ;;  %v788_v3 = vld [vmem:[%s12294_s18 + $0x1330] sm:$0xff] }
 0x4d1   : > { %v9130_v9 = vrot.slane %v4806_v5, %v12491_v0  ;;  %v9125_v12 = vrot.slane %v4805_v52, %v12494_v1  ;;  %3021 = vadd.xlane.f32.xlu1 %v3020_v62  ;;  %3018 = vadd.xlane.f32.xlu0 %v3017_v63  ;;  %v789_v63 = vld [vmem:[%s12294_s18 + $0x1338] sm:$0xff] }
 0x4d2   : > { %v2812_v14 = vpop.xlane.xlu1 %2811  ;;  %v2809_v56 = vpop.xlane.xlu0 %2808 }
 0x4d3   : > { %v9126_v4 = vsel %vm6500_vm6, %v9125_v12, %v9121_v50  ;;  %v4808_v21 = vmul.f32 0.015625, %v2812_v14  ;;  %v4807_v22 = vmul.f32 0.015625, %v2809_v56  ;;  %v3041_v12 = vsel %vm1198_vm0, %v788_v3, 0.0 }
 0x4d4   : > { %v9131_v28 = vsel %vm17372_vm7, %v9130_v9, %v9126_v4  ;;  %v3044_v9 = vsel %vm1198_vm0, %v789_v63, 0.0  ;;  %v790_v4 = vld [vmem:[%s12294_s18 + $0x1340] sm:$0xff] }
 0x4d5   : > { %v9140_v6 = vrot.slane %v4808_v21, %v12508_v18  ;;  %v9135_v55 = vrot.slane %v4807_v22, %v12514_v23  ;;  %3027 = vadd.xlane.f32.xlu1 %v3026_v15  ;;  %3024 = vadd.xlane.f32.xlu0 %v3023_v19  ;;  %v791_v19 = vld [vmem:[%s12294_s18 + $0x1348] sm:$0xff] }
 0x4d6   : > { %v2818_v30 = vpop.xlane.xlu1 %2817  ;;  %v2815_v31 = vpop.xlane.xlu0 %2814 }
 0x4d7   : > { %v9136_v17 = vsel %vm17367_vm8, %v9135_v55, %v9131_v28  ;;  %v4810_v27 = vmul.f32 0.015625, %v2818_v30  ;;  %v4809_v41 = vmul.f32 0.015625, %v2815_v31  ;;  %v3047_v55 = vsel %vm1198_vm0, %v790_v4, 0.0 }
 0x4d8   : > { %v9141_v48 = vsel %vm17419_vm9, %v9140_v6, %v9136_v17  ;;  %vm17420_vm9 = vcmask 786112   ;;  %v3050_v6 = vsel %vm1198_vm0, %v791_v19, 0.0  ;;  %v792_v17 = vld [vmem:[%s12294_s18 + $0x1350] sm:$0xff] }
 0x4d9   : > { %v9150_v45 = vrot.slane %v4810_v27, %v12530_v43  ;;  %v9145_v51 = vrot.slane %v4809_v41, %v12524_v39  ;;  %3033 = vadd.xlane.f32.xlu1 %v3032_v33  ;;  %3030 = vadd.xlane.f32.xlu0 %v3029_v38  ;;  %v793_v38 = vld [vmem:[%s12294_s18 + $0x1358] sm:$0xff] }
 0x4da   : > { %v2824_v54 = vpop.xlane.xlu1 %2823  ;;  %v2821_v2 = vpop.xlane.xlu0 %2820 }
 0x4db   : > { %v9146_v59 = vsel %vm6528_vm10, %v9145_v51, %v9141_v48  ;;  %v4812_v40 = vmul.f32 0.015625, %v2824_v54  ;;  %v4811_v62 = vmul.f32 0.015625, %v2821_v2  ;;  %v3056_v51 = vsel %vm1198_vm0, %v793_v38, 0.0 }
 0x4dc   : > { %v9151_v5 = vsel %vm17420_vm9, %v9150_v45, %v9146_v59  ;;  %v3053_v54 = vsel %vm1198_vm0, %v792_v17, 0.0  ;;  %v795_v59 = vld [vmem:[%s12294_s18 + $0x1368] sm:$0xff]  ;;  %vm17421_vm9 = vcmask 654912  }
 0x4dd   : > { %v9160_v52 = vrot.slane %v4812_v40, %v12546_v61  ;;  %v9155_v42 = vrot.slane %v4811_v62, %v12540_v57  ;;  %3039 = vadd.xlane.f32.xlu1 %v3038_v20  ;;  %3036 = vadd.xlane.f32.xlu0 %v3035_v29  ;;  %v794_v40 = vld [vmem:[%s12294_s18 + $0x1360] sm:$0xff] }
 0x4de   : > { %v2830_v7 = vpop.xlane.xlu1 %2829  ;;  %v2827_v50 = vpop.xlane.xlu0 %2826 }
 0x4df   : > { %v9156_v14 = vsel %vm6542_vm12, %v9155_v42, %v9151_v5  ;;  %v4814_v56 = vmul.f32 0.015625, %v2830_v7  ;;  %v4813_v15 = vmul.f32 0.015625, %v2827_v50  ;;  %v3062_v5 = vsel %vm1198_vm0, %v795_v59, 0.0 }
 0x4e0   : > { %v9161_v21 = vsel %vm6549_vm13, %v9160_v52, %v9156_v14  ;;  %v3059_v52 = vsel %vm1198_vm0, %v794_v40, 0.0 }
 0x4e1   : > { %v9170_v22 = vrot.slane %v4814_v56, %v12561_v13  ;;  %v9165_v24 = vrot.slane %v4813_v15, %v12556_v11  ;;  %3045 = vadd.xlane.f32.xlu1 %v3044_v9  ;;  %3042 = vadd.xlane.f32.xlu0 %v3041_v12  ;;  %v797_v9 = vld [vmem:[%s12294_s18 + $0x1378] sm:$0xff]  ;;  %v796_v12 = vld [vmem:[%s12294_s18 + $0x1370] sm:$0xff] }
 0x4e2   : > { %v2836_v26 = vpop.xlane.xlu1 %2835  ;;  %v2833_v28 = vpop.xlane.xlu0 %2832 }
 0x4e3   : > { %v9166_v30 = vsel %vm6556_vm14, %v9165_v24, %v9161_v21  ;;  %v4816_v31 = vmul.f32 0.015625, %v2836_v26  ;;  %v4815_v33 = vmul.f32 0.015625, %v2833_v28  ;;  %v3068_v21 = vsel %vm1198_vm0, %v797_v9, 0.0 }
 0x4e4   : > { %v9171_v27 = vsel %vm6563_vm15, %v9170_v22, %v9166_v30  ;;  %v3065_v22 = vsel %vm1198_vm0, %v796_v12, 0.0 }
 0x4e5   : > { %v9179_v41 = vrot.slane %v4816_v31, %v12463_v35  ;;  %v9175_v25 = vrot.slane %v4815_v33, %v12457_v32  ;;  %3051 = vadd.xlane.f32.xlu1 %v3050_v6  ;;  %3048 = vadd.xlane.f32.xlu0 %v3047_v55  ;;  %v14776_v44 = vsel %vm11548_vm11, %v9171_v27, %v14240_v16  ;;  %v799_v6 = vld [vmem:[%s12294_s18 + $0x1388] sm:$0xff]  ;;  %v798_v55 = vld [vmem:[%s12294_s18 + $0x1380] sm:$0xff] }
 0x4e6   : > { %v2842_v48 = vpop.xlane.xlu1 %2841  ;;  %v2839_v45 = vpop.xlane.xlu0 %2838  ;;  %v3074_v27 = vsel %vm1198_vm0, %v799_v6, 0.0 }
 0x4e7   : > { %v9180_v2 = vsel %vm6465_vm1, %v9179_v41, %v9175_v25  ;;  %v4818_v20 = vmul.f32 0.015625, %v2842_v48  ;;  %v4817_v29 = vmul.f32 0.015625, %v2839_v45  ;;  %v3071_v41 = vsel %vm1198_vm0, %v798_v55, 0.0 }
 0x4e9   : > { %v9189_v62 = vrot.slane %v4818_v20, %v12460_v34  ;;  %v9184_v63 = vrot.slane %v4817_v29, %v12466_v36  ;;  %3057 = vadd.xlane.f32.xlu1 %v3056_v51  ;;  %3054 = vadd.xlane.f32.xlu0 %v3053_v54  ;;  %v801_v51 = vld [vmem:[%s12294_s18 + $0x1398] sm:$0xff]  ;;  %v800_v54 = vld [vmem:[%s12294_s18 + $0x1390] sm:$0xff] }
 0x4ea   : > { %v2848_v16 = vpop.xlane.xlu1 %2847  ;;  %v2845_v3 = vpop.xlane.xlu0 %2844 }
 0x4eb   : > { %v9185_v42 = vsel %vm6472_vm2, %v9184_v63, %v9180_v2  ;;  %v4820_v7 = vmul.f32 0.015625, %v2848_v16  ;;  %v4819_v50 = vmul.f32 0.015625, %v2845_v3  ;;  %v3077_v63 = vsel %vm1198_vm0, %v800_v54, 0.0 }
 0x4ec   : > { %v9190_v14 = vsel %vm6479_vm3, %v9189_v62, %v9185_v42  ;;  %v3080_v62 = vsel %vm1198_vm0, %v801_v51, 0.0  ;;  %v802_v42 = vld [vmem:[%s12294_s18 + $0x13a0] sm:$0xff] }
 0x4ed   : > { %v9199_v56 = vrot.slane %v4820_v7, %v12473_v46  ;;  %v9194_v15 = vrot.slane %v4819_v50, %v12476_v47  ;;  %3063 = vadd.xlane.f32.xlu1 %v3062_v5  ;;  %3060 = vadd.xlane.f32.xlu0 %v3059_v52  ;;  %v803_v52 = vld [vmem:[%s12294_s18 + $0x13a8] sm:$0xff] }
 0x4ee   : > { %v2854_v19 = vpop.xlane.xlu1 %2853  ;;  %v2851_v4 = vpop.xlane.xlu0 %2850 }
 0x4ef   : > { %v9195_v24 = vsel %vm6486_vm4, %v9194_v15, %v9190_v14  ;;  %v4822_v26 = vmul.f32 0.015625, %v2854_v19  ;;  %v4821_v28 = vmul.f32 0.015625, %v2851_v4  ;;  %v3083_v15 = vsel %vm1198_vm0, %v802_v42, 0.0 }
 0x4f0   : > { %v9200_v30 = vsel %vm6493_vm5, %v9199_v56, %v9195_v24  ;;  %v3086_v56 = vsel %vm1198_vm0, %v803_v52, 0.0  ;;  %v804_v24 = vld [vmem:[%s12294_s18 + $0x13b0] sm:$0xff] }
 0x4f1   : > { %v9209_v31 = vrot.slane %v4822_v26, %v12491_v0  ;;  %v9204_v33 = vrot.slane %v4821_v28, %v12494_v1  ;;  %3069 = vadd.xlane.f32.xlu1 %v3068_v21  ;;  %3066 = vadd.xlane.f32.xlu0 %v3065_v22  ;;  %v805_v22 = vld [vmem:[%s12294_s18 + $0x13b8] sm:$0xff] }
 0x4f2   : > { %v2860_v38 = vpop.xlane.xlu1 %2859  ;;  %v2857_v17 = vpop.xlane.xlu0 %2856 }
 0x4f3   : > { %v9205_v25 = vsel %vm6500_vm6, %v9204_v33, %v9200_v30  ;;  %v4824_v48 = vmul.f32 0.015625, %v2860_v38  ;;  %v4823_v45 = vmul.f32 0.015625, %v2857_v17  ;;  %v3089_v33 = vsel %vm1198_vm0, %v804_v24, 0.0 }
 0x4f4   : > { %v9210_v2 = vsel %vm17372_vm7, %v9209_v31, %v9205_v25  ;;  %v3092_v31 = vsel %vm1198_vm0, %v805_v22, 0.0  ;;  %v806_v25 = vld [vmem:[%s12294_s18 + $0x13c0] sm:$0xff] }
 0x4f5   : > { %v9219_v20 = vrot.slane %v4824_v48, %v12508_v18  ;;  %v9214_v29 = vrot.slane %v4823_v45, %v12514_v23  ;;  %3075 = vadd.xlane.f32.xlu1 %v3074_v27  ;;  %3072 = vadd.xlane.f32.xlu0 %v3071_v41  ;;  %v807_v41 = vld [vmem:[%s12294_s18 + $0x13c8] sm:$0xff] }
 0x4f6   : > { %v2866_v59 = vpop.xlane.xlu1 %2865  ;;  %v2863_v40 = vpop.xlane.xlu0 %2862 }
 0x4f7   : > { %v9215_v16 = vsel %vm17367_vm8, %v9214_v29, %v9210_v2  ;;  %v4826_v3 = vmul.f32 0.015625, %v2866_v59  ;;  %v4825_v5 = vmul.f32 0.015625, %v2863_v40  ;;  %v3095_v29 = vsel %vm1198_vm0, %v806_v25, 0.0 }
 0x4f8   : > { %v9220_v7 = vsel %vm17421_vm9, %v9219_v20, %v9215_v16  ;;  %vm17422_vm9 = vcmask 786112   ;;  %v3098_v20 = vsel %vm1198_vm0, %v807_v41, 0.0  ;;  %v808_v16 = vld [vmem:[%s12294_s18 + $0x13d0] sm:$0xff] }
 0x4f9   : > { %v9229_v50 = vrot.slane %v4826_v3, %v12530_v43  ;;  %v9224_v9 = vrot.slane %v4825_v5, %v12524_v39  ;;  %3081 = vadd.xlane.f32.xlu1 %v3080_v62  ;;  %3078 = vadd.xlane.f32.xlu0 %v3077_v63  ;;  %v809_v63 = vld [vmem:[%s12294_s18 + $0x13d8] sm:$0xff] }
 0x4fa   : > { %v2872_v12 = vpop.xlane.xlu1 %2871  ;;  %v2869_v14 = vpop.xlane.xlu0 %2868 }
 0x4fb   : > { %v9225_v19 = vsel %vm6528_vm10, %v9224_v9, %v9220_v7  ;;  %v4828_v4 = vmul.f32 0.015625, %v2872_v12  ;;  %v4827_v21 = vmul.f32 0.015625, %v2869_v14  ;;  %v3104_v9 = vsel %vm1198_vm0, %v809_v63, 0.0 }
 0x4fc   : > { %v9230_v26 = vsel %vm17422_vm9, %v9229_v50, %v9225_v19  ;;  %v3101_v12 = vsel %vm1198_vm0, %v808_v16, 0.0  ;;  %v811_v19 = vld [vmem:[%s12294_s18 + $0x13e8] sm:$0xff]  ;;  %vm17423_vm9 = vcmask 654912  }
 0x4fd   : > { %v9239_v28 = vrot.slane %v4828_v4, %v12546_v61  ;;  %v9234_v6 = vrot.slane %v4827_v21, %v12540_v57  ;;  %3087 = vadd.xlane.f32.xlu1 %v3086_v56  ;;  %3084 = vadd.xlane.f32.xlu0 %v3083_v15  ;;  %v810_v4 = vld [vmem:[%s12294_s18 + $0x13e0] sm:$0xff] }
 0x4fe   : > { %v2878_v55 = vpop.xlane.xlu1 %2877  ;;  %v2875_v30 = vpop.xlane.xlu0 %2874 }
 0x4ff   : > { %v9235_v38 = vsel %vm6542_vm12, %v9234_v6, %v9230_v26  ;;  %v4830_v17 = vmul.f32 0.015625, %v2878_v55  ;;  %v4829_v27 = vmul.f32 0.015625, %v2875_v30  ;;  %v3110_v26 = vsel %vm1198_vm0, %v811_v19, 0.0 }
 0x500   : > { %v9240_v48 = vsel %vm6549_vm13, %v9239_v28, %v9235_v38  ;;  %v3107_v28 = vsel %vm1198_vm0, %v810_v4, 0.0 }
 0x501   : > { %v9249_v45 = vrot.slane %v4830_v17, %v12561_v13  ;;  %v9244_v51 = vrot.slane %v4829_v27, %v12556_v11  ;;  %3093 = vadd.xlane.f32.xlu1 %v3092_v31  ;;  %3090 = vadd.xlane.f32.xlu0 %v3089_v33  ;;  %v813_v31 = vld [vmem:[%s12294_s18 + $0x13f8] sm:$0xff]  ;;  %v812_v33 = vld [vmem:[%s12294_s18 + $0x13f0] sm:$0xff] }
 0x502   : > { %v2884_v54 = vpop.xlane.xlu1 %2883  ;;  %v2881_v2 = vpop.xlane.xlu0 %2880 }
 0x503   : > { %v9245_v59 = vsel %vm6556_vm14, %v9244_v51, %v9240_v48  ;;  %v4832_v40 = vmul.f32 0.015625, %v2884_v54  ;;  %v4831_v62 = vmul.f32 0.015625, %v2881_v2  ;;  %v3116_v48 = vsel %vm1198_vm0, %v813_v31, 0.0 }
 0x504   : > { %v9250_v3 = vsel %vm6563_vm15, %v9249_v45, %v9245_v59  ;;  %v3113_v45 = vsel %vm1198_vm0, %v812_v33, 0.0 }
 0x505   : > { %v9258_v5 = vrot.slane %v4832_v40, %v12463_v35  ;;  %v9254_v52 = vrot.slane %v4831_v62, %v12457_v32  ;;  %3099 = vadd.xlane.f32.xlu1 %v3098_v20  ;;  %3096 = vadd.xlane.f32.xlu0 %v3095_v29  ;;  %v14843_v42 = vsel %vm11548_vm11, %v9250_v3, %v14307_v49  ;;  %v815_v20 = vld [vmem:[%s12294_s18 + $0x1408] sm:$0xff]  ;;  %v814_v29 = vld [vmem:[%s12294_s18 + $0x1400] sm:$0xff] }
 0x506   : > { %v2890_v7 = vpop.xlane.xlu1 %2889  ;;  %v2887_v50 = vpop.xlane.xlu0 %2886  ;;  %v3122_v3 = vsel %vm1198_vm0, %v815_v20, 0.0 }
 0x507   : > { %v9259_v14 = vsel %vm6465_vm1, %v9258_v5, %v9254_v52  ;;  %v4834_v56 = vmul.f32 0.015625, %v2890_v7  ;;  %v4833_v15 = vmul.f32 0.015625, %v2887_v50  ;;  %v3119_v5 = vsel %vm1198_vm0, %v814_v29, 0.0 }
 0x509   : > { %v9268_v21 = vrot.slane %v4834_v56, %v12460_v34  ;;  %v9263_v22 = vrot.slane %v4833_v15, %v12466_v36  ;;  %3105 = vadd.xlane.f32.xlu1 %v3104_v9  ;;  %3102 = vadd.xlane.f32.xlu0 %v3101_v12  ;;  %v817_v9 = vld [vmem:[%s12294_s18 + $0x1418] sm:$0xff]  ;;  %v816_v12 = vld [vmem:[%s12294_s18 + $0x1410] sm:$0xff] }
 0x50a   : > { %v2896_v49 = vpop.xlane.xlu1 %2895  ;;  %v2893_v24 = vpop.xlane.xlu0 %2892 }
 0x50b   : > { %v9264_v6 = vsel %vm6472_vm2, %v9263_v22, %v9259_v14  ;;  %v4836_v55 = vmul.f32 0.015625, %v2896_v49  ;;  %v4835_v30 = vmul.f32 0.015625, %v2893_v24  ;;  %v3125_v22 = vsel %vm1198_vm0, %v816_v12, 0.0 }
 0x50c   : > { %v9269_v38 = vsel %vm6479_vm3, %v9268_v21, %v9264_v6  ;;  %v3128_v21 = vsel %vm1198_vm0, %v817_v9, 0.0  ;;  %v818_v6 = vld [vmem:[%s12294_s18 + $0x1420] sm:$0xff] }
 0x50d   : > { %v9278_v17 = vrot.slane %v4836_v55, %v12473_v46  ;;  %v9273_v27 = vrot.slane %v4835_v30, %v12476_v47  ;;  %3111 = vadd.xlane.f32.xlu1 %v3110_v26  ;;  %3108 = vadd.xlane.f32.xlu0 %v3107_v28  ;;  %v819_v28 = vld [vmem:[%s12294_s18 + $0x1428] sm:$0xff] }
 0x50e   : > { %v2902_v41 = vpop.xlane.xlu1 %2901  ;;  %v2899_v25 = vpop.xlane.xlu0 %2898 }
 0x50f   : > { %v9274_v51 = vsel %vm6486_vm4, %v9273_v27, %v9269_v38  ;;  %v4838_v54 = vmul.f32 0.015625, %v2902_v41  ;;  %v4837_v2 = vmul.f32 0.015625, %v2899_v25  ;;  %v3131_v27 = vsel %vm1198_vm0, %v818_v6, 0.0 }
 0x510   : > { %v9279_v59 = vsel %vm6493_vm5, %v9278_v17, %v9274_v51  ;;  %v3134_v17 = vsel %vm1198_vm0, %v819_v28, 0.0  ;;  %v820_v51 = vld [vmem:[%s12294_s18 + $0x1430] sm:$0xff] }
 0x511   : > { %v9288_v40 = vrot.slane %v4838_v54, %v12491_v0  ;;  %v9283_v62 = vrot.slane %v4837_v2, %v12494_v1  ;;  %3117 = vadd.xlane.f32.xlu1 %v3116_v48  ;;  %3114 = vadd.xlane.f32.xlu0 %v3113_v45  ;;  %v821_v45 = vld [vmem:[%s12294_s18 + $0x1438] sm:$0xff] }
 0x512   : > { %v2908_v63 = vpop.xlane.xlu1 %2907  ;;  %v2905_v16 = vpop.xlane.xlu0 %2904 }
 0x513   : > { %v9284_v52 = vsel %vm6500_vm6, %v9283_v62, %v9279_v59  ;;  %v4840_v7 = vmul.f32 0.015625, %v2908_v63  ;;  %v4839_v50 = vmul.f32 0.015625, %v2905_v16  ;;  %v3137_v62 = vsel %vm1198_vm0, %v820_v51, 0.0 }
 0x514   : > { %v9289_v14 = vsel %vm17372_vm7, %v9288_v40, %v9284_v52  ;;  %v3140_v40 = vsel %vm1198_vm0, %v821_v45, 0.0  ;;  %v822_v52 = vld [vmem:[%s12294_s18 + $0x1440] sm:$0xff] }
 0x515   : > { %v9298_v56 = vrot.slane %v4840_v7, %v12508_v18  ;;  %v9293_v15 = vrot.slane %v4839_v50, %v12514_v23  ;;  %3123 = vadd.xlane.f32.xlu1 %v3122_v3  ;;  %3120 = vadd.xlane.f32.xlu0 %v3119_v5  ;;  %v823_v5 = vld [vmem:[%s12294_s18 + $0x1448] sm:$0xff] }
 0x516   : > { %v2914_v19 = vpop.xlane.xlu1 %2913  ;;  %v2911_v4 = vpop.xlane.xlu0 %2910 }
 0x517   : > { %v9294_v49 = vsel %vm17367_vm8, %v9293_v15, %v9289_v14  ;;  %v4842_v24 = vmul.f32 0.015625, %v2914_v19  ;;  %v4841_v26 = vmul.f32 0.015625, %v2911_v4  ;;  %v3143_v15 = vsel %vm1198_vm0, %v822_v52, 0.0 }
 0x518   : > { %v9299_v55 = vsel %vm17423_vm9, %v9298_v56, %v9294_v49  ;;  %vm17424_vm9 = vcmask 786112   ;;  %v3146_v56 = vsel %vm1198_vm0, %v823_v5, 0.0  ;;  %v824_v49 = vld [vmem:[%s12294_s18 + $0x1450] sm:$0xff] }
 0x519   : > { %v9308_v30 = vrot.slane %v4842_v24, %v12530_v43  ;;  %v9303_v31 = vrot.slane %v4841_v26, %v12524_v39  ;;  %3129 = vadd.xlane.f32.xlu1 %v3128_v21  ;;  %3126 = vadd.xlane.f32.xlu0 %v3125_v22  ;;  %v825_v22 = vld [vmem:[%s12294_s18 + $0x1458] sm:$0xff] }
 0x51a   : > { %v2920_v33 = vpop.xlane.xlu1 %2919  ;;  %v2917_v38 = vpop.xlane.xlu0 %2916 }
 0x51b   : > { %v9304_v41 = vsel %vm6528_vm10, %v9303_v31, %v9299_v55  ;;  %v4844_v25 = vmul.f32 0.015625, %v2920_v33  ;;  %v4843_v48 = vmul.f32 0.015625, %v2917_v38  ;;  %v3152_v31 = vsel %vm1198_vm0, %v825_v22, 0.0 }
 0x51c   : > { %v9309_v54 = vsel %vm17424_vm9, %v9308_v30, %v9304_v41  ;;  %v3149_v33 = vsel %vm1198_vm0, %v824_v49, 0.0  ;;  %v827_v41 = vld [vmem:[%s12294_s18 + $0x1468] sm:$0xff]  ;;  %vm17425_vm9 = vcmask 654912  }
 0x51d   : > { %v9318_v2 = vrot.slane %v4844_v25, %v12546_v61  ;;  %v9313_v20 = vrot.slane %v4843_v48, %v12540_v57  ;;  %3135 = vadd.xlane.f32.xlu1 %v3134_v17  ;;  %3132 = vadd.xlane.f32.xlu0 %v3131_v27  ;;  %v826_v25 = vld [vmem:[%s12294_s18 + $0x1460] sm:$0xff] }
 0x51e   : > { %v2926_v29 = vpop.xlane.xlu1 %2925  ;;  %v2923_v59 = vpop.xlane.xlu0 %2922 }
 0x51f   : > { %v9314_v63 = vsel %vm6542_vm12, %v9313_v20, %v9309_v54  ;;  %v4846_v16 = vmul.f32 0.015625, %v2926_v29  ;;  %v4845_v3 = vmul.f32 0.015625, %v2923_v59  ;;  %v3158_v54 = vsel %vm1198_vm0, %v827_v41, 0.0 }
 0x520   : > { %v9319_v7 = vsel %vm6549_vm13, %v9318_v2, %v9314_v63  ;;  %v3155_v2 = vsel %vm1198_vm0, %v826_v25, 0.0 }
 0x521   : > { %v9328_v50 = vrot.slane %v4846_v16, %v12561_v13  ;;  %v9323_v9 = vrot.slane %v4845_v3, %v12556_v11  ;;  %3141 = vadd.xlane.f32.xlu1 %v3140_v40  ;;  %3138 = vadd.xlane.f32.xlu0 %v3137_v62  ;;  %v829_v40 = vld [vmem:[%s12294_s18 + $0x1478] sm:$0xff]  ;;  %v828_v62 = vld [vmem:[%s12294_s18 + $0x1470] sm:$0xff] }
 0x522   : > { %v2932_v12 = vpop.xlane.xlu1 %2931  ;;  %v2929_v14 = vpop.xlane.xlu0 %2928 }
 0x523   : > { %v9324_v19 = vsel %vm6556_vm14, %v9323_v9, %v9319_v7  ;;  %v4848_v4 = vmul.f32 0.015625, %v2932_v12  ;;  %v4847_v21 = vmul.f32 0.015625, %v2929_v14  ;;  %v3164_v7 = vsel %vm1198_vm0, %v829_v40, 0.0 }
 0x524   : > { %v9329_v24 = vsel %vm6563_vm15, %v9328_v50, %v9324_v19  ;;  %v3161_v50 = vsel %vm1198_vm0, %v828_v62, 0.0 }
 0x525   : > { %v9337_v26 = vrot.slane %v4848_v4, %v12463_v35  ;;  %v9333_v28 = vrot.slane %v4847_v21, %v12457_v32  ;;  %3147 = vadd.xlane.f32.xlu1 %v3146_v56  ;;  %3144 = vadd.xlane.f32.xlu0 %v3143_v15  ;;  %v14910_v6 = vsel %vm11548_vm11, %v9329_v24, %v14374_v8  ;;  %v831_v56 = vld [vmem:[%s12294_s18 + $0x1488] sm:$0xff]  ;;  %v830_v15 = vld [vmem:[%s12294_s18 + $0x1480] sm:$0xff] }
 0x526   : > { %v2938_v55 = vpop.xlane.xlu1 %2937  ;;  %v2935_v30 = vpop.xlane.xlu0 %2934  ;;  %v3170_v24 = vsel %vm1198_vm0, %v831_v56, 0.0 }
 0x527   : > { %v9338_v38 = vsel %vm6465_vm1, %v9337_v26, %v9333_v28  ;;  %v4850_v17 = vmul.f32 0.015625, %v2938_v55  ;;  %v4849_v27 = vmul.f32 0.015625, %v2935_v30  ;;  %v3167_v26 = vsel %vm1198_vm0, %v830_v15, 0.0 }
 0x529   : > { %v9347_v48 = vrot.slane %v4850_v17, %v12460_v34  ;;  %v9342_v45 = vrot.slane %v4849_v27, %v12466_v36  ;;  %3153 = vadd.xlane.f32.xlu1 %v3152_v31  ;;  %3150 = vadd.xlane.f32.xlu0 %v3149_v33  ;;  %v833_v31 = vld [vmem:[%s12294_s18 + $0x1498] sm:$0xff]  ;;  %v832_v33 = vld [vmem:[%s12294_s18 + $0x1490] sm:$0xff] }
 0x52a   : > { %v2944_v8 = vpop.xlane.xlu1 %2943  ;;  %v2941_v51 = vpop.xlane.xlu0 %2940 }
 0x52b   : > { %v9343_v20 = vsel %vm6472_vm2, %v9342_v45, %v9338_v38  ;;  %v4852_v29 = vmul.f32 0.015625, %v2944_v8  ;;  %v4851_v59 = vmul.f32 0.015625, %v2941_v51  ;;  %v3173_v45 = vsel %vm1198_vm0, %v832_v33, 0.0 }
 0x52c   : > { %v9348_v63 = vsel %vm6479_vm3, %v9347_v48, %v9343_v20  ;;  %v3176_v48 = vsel %vm1198_vm0, %v833_v31, 0.0  ;;  %v834_v20 = vld [vmem:[%s12294_s18 + $0x14a0] sm:$0xff] }
 0x52d   : > { %v9357_v16 = vrot.slane %v4852_v29, %v12473_v46  ;;  %v9352_v3 = vrot.slane %v4851_v59, %v12476_v47  ;;  %3159 = vadd.xlane.f32.xlu1 %v3158_v54  ;;  %3156 = vadd.xlane.f32.xlu0 %v3155_v2  ;;  %v835_v2 = vld [vmem:[%s12294_s18 + $0x14a8] sm:$0xff] }
 0x52e   : > { %v2950_v5 = vpop.xlane.xlu1 %2949  ;;  %v2947_v52 = vpop.xlane.xlu0 %2946 }
 0x52f   : > { %v9353_v9 = vsel %vm6486_vm4, %v9352_v3, %v9348_v63  ;;  %v4854_v12 = vmul.f32 0.015625, %v2950_v5  ;;  %v4853_v14 = vmul.f32 0.015625, %v2947_v52  ;;  %v3179_v3 = vsel %vm1198_vm0, %v834_v20, 0.0 }
 0x530   : > { %v9358_v19 = vsel %vm6493_vm5, %v9357_v16, %v9353_v9  ;;  %v3182_v16 = vsel %vm1198_vm0, %v835_v2, 0.0  ;;  %v836_v9 = vld [vmem:[%s12294_s18 + $0x14b0] sm:$0xff] }
 0x531   : > { %v9367_v4 = vrot.slane %v4854_v12, %v12491_v0  ;;  %v9362_v21 = vrot.slane %v4853_v14, %v12494_v1  ;;  %3165 = vadd.xlane.f32.xlu1 %v3164_v7  ;;  %3162 = vadd.xlane.f32.xlu0 %v3161_v50  ;;  %v837_v50 = vld [vmem:[%s12294_s18 + $0x14b8] sm:$0xff] }
 0x532   : > { %v2956_v22 = vpop.xlane.xlu1 %2955  ;;  %v2953_v49 = vpop.xlane.xlu0 %2952 }
 0x533   : > { %v9363_v28 = vsel %vm6500_vm6, %v9362_v21, %v9358_v19  ;;  %v4856_v55 = vmul.f32 0.015625, %v2956_v22  ;;  %v4855_v30 = vmul.f32 0.015625, %v2953_v49  ;;  %v3185_v21 = vsel %vm1198_vm0, %v836_v9, 0.0 }
 0x534   : > { %v9368_v38 = vsel %vm17372_vm7, %v9367_v4, %v9363_v28  ;;  %v3188_v4 = vsel %vm1198_vm0, %v837_v50, 0.0  ;;  %v838_v28 = vld [vmem:[%s12294_s18 + $0x14c0] sm:$0xff] }
 0x535   : > { %v9377_v17 = vrot.slane %v4856_v55, %v12508_v18  ;;  %v9372_v27 = vrot.slane %v4855_v30, %v12514_v23  ;;  %3171 = vadd.xlane.f32.xlu1 %v3170_v24  ;;  %3168 = vadd.xlane.f32.xlu0 %v3167_v26  ;;  %v839_v26 = vld [vmem:[%s12294_s18 + $0x14c8] sm:$0xff] }
 0x536   : > { %v2962_v41 = vpop.xlane.xlu1 %2961  ;;  %v2959_v25 = vpop.xlane.xlu0 %2958 }
 0x537   : > { %v9373_v8 = vsel %vm17367_vm8, %v9372_v27, %v9368_v38  ;;  %v4858_v51 = vmul.f32 0.015625, %v2962_v41  ;;  %v4857_v54 = vmul.f32 0.015625, %v2959_v25  ;;  %v3191_v27 = vsel %vm1198_vm0, %v838_v28, 0.0 }
 0x538   : > { %v9378_v29 = vsel %vm17425_vm9, %v9377_v17, %v9373_v8  ;;  %vm17426_vm9 = vcmask 786112   ;;  %v3194_v17 = vsel %vm1198_vm0, %v839_v26, 0.0  ;;  %v840_v8 = vld [vmem:[%s12294_s18 + $0x14d0] sm:$0xff] }
 0x539   : > { %v9387_v59 = vrot.slane %v4858_v51, %v12530_v43  ;;  %v9382_v40 = vrot.slane %v4857_v54, %v12524_v39  ;;  %3177 = vadd.xlane.f32.xlu1 %v3176_v48  ;;  %3174 = vadd.xlane.f32.xlu0 %v3173_v45  ;;  %v841_v45 = vld [vmem:[%s12294_s18 + $0x14d8] sm:$0xff] }
 0x53a   : > { %v2968_v62 = vpop.xlane.xlu1 %2967  ;;  %v2965_v63 = vpop.xlane.xlu0 %2964 }
 0x53b   : > { %v9383_v5 = vsel %vm6528_vm10, %v9382_v40, %v9378_v29  ;;  %v4860_v52 = vmul.f32 0.015625, %v2968_v62  ;;  %v4859_v7 = vmul.f32 0.015625, %v2965_v63  ;;  %v3200_v40 = vsel %vm1198_vm0, %v841_v45, 0.0 }
 0x53c   : > { %v9388_v12 = vsel %vm17426_vm9, %v9387_v59, %v9383_v5  ;;  %v3197_v62 = vsel %vm1198_vm0, %v840_v8, 0.0  ;;  %v843_v5 = vld [vmem:[%s12294_s18 + $0x14e8] sm:$0xff]  ;;  %vm17427_vm9 = vcmask 654912  }
 0x53d   : > { %v9397_v14 = vrot.slane %v4860_v52, %v12546_v61  ;;  %v9392_v56 = vrot.slane %v4859_v7, %v12540_v57  ;;  %3183 = vadd.xlane.f32.xlu1 %v3182_v16  ;;  %3180 = vadd.xlane.f32.xlu0 %v3179_v3  ;;  %v842_v52 = vld [vmem:[%s12294_s18 + $0x14e0] sm:$0xff] }
 0x53e   : > { %v2974_v15 = vpop.xlane.xlu1 %2973  ;;  %v2971_v19 = vpop.xlane.xlu0 %2970 }
 0x53f   : > { %v9393_v22 = vsel %vm6542_vm12, %v9392_v56, %v9388_v12  ;;  %v4862_v49 = vmul.f32 0.015625, %v2974_v15  ;;  %v4861_v24 = vmul.f32 0.015625, %v2971_v19  ;;  %v3206_v12 = vsel %vm1198_vm0, %v843_v5, 0.0 }
 0x540   : > { %v9398_v55 = vsel %vm6549_vm13, %v9397_v14, %v9393_v22  ;;  %v3203_v14 = vsel %vm1198_vm0, %v842_v52, 0.0 }
 0x541   : > { %v9407_v30 = vrot.slane %v4862_v49, %v12561_v13  ;;  %v9402_v31 = vrot.slane %v4861_v24, %v12556_v11  ;;  %3189 = vadd.xlane.f32.xlu1 %v3188_v4  ;;  %3186 = vadd.xlane.f32.xlu0 %v3185_v21  ;;  %v845_v4 = vld [vmem:[%s12294_s18 + $0x14f8] sm:$0xff]  ;;  %v844_v21 = vld [vmem:[%s12294_s18 + $0x14f0] sm:$0xff] }
 0x542   : > { %v2980_v33 = vpop.xlane.xlu1 %2979  ;;  %v2977_v38 = vpop.xlane.xlu0 %2976 }
 0x543   : > { %v9403_v41 = vsel %vm6556_vm14, %v9402_v31, %v9398_v55  ;;  %v4864_v25 = vmul.f32 0.015625, %v2980_v33  ;;  %v4863_v48 = vmul.f32 0.015625, %v2977_v38  ;;  %v3212_v55 = vsel %vm1198_vm0, %v845_v4, 0.0 }
 0x544   : > { %v9408_v51 = vsel %vm6563_vm15, %v9407_v30, %v9403_v41  ;;  %v3209_v30 = vsel %vm1198_vm0, %v844_v21, 0.0 }
 0x545   : > { %v9416_v54 = vrot.slane %v4864_v25, %v12463_v35  ;;  %v9412_v2 = vrot.slane %v4863_v48, %v12457_v32  ;;  %3195 = vadd.xlane.f32.xlu1 %v3194_v17  ;;  %3192 = vadd.xlane.f32.xlu0 %v3191_v27  ;;  %v14977_v20 = vsel %vm11548_vm11, %v9408_v51, %v14441_v53  ;;  %v847_v17 = vld [vmem:[%s12294_s18 + $0x1508] sm:$0xff]  ;;  %v846_v27 = vld [vmem:[%s12294_s18 + $0x1500] sm:$0xff] }
 0x546   : > { %v2986_v29 = vpop.xlane.xlu1 %2985  ;;  %v2983_v59 = vpop.xlane.xlu0 %2982  ;;  %v3218_v51 = vsel %vm1198_vm0, %v847_v17, 0.0 }
 0x547   : > { %v9417_v63 = vsel %vm6465_vm1, %v9416_v54, %v9412_v2  ;;  %v4866_v16 = vmul.f32 0.015625, %v2986_v29  ;;  %v4865_v3 = vmul.f32 0.015625, %v2983_v59  ;;  %v3215_v54 = vsel %vm1198_vm0, %v846_v27, 0.0 }
 0x549   : > { %v9426_v7 = vrot.slane %v4866_v16, %v12460_v34  ;;  %v9421_v50 = vrot.slane %v4865_v3, %v12466_v36  ;;  %3201 = vadd.xlane.f32.xlu1 %v3200_v40  ;;  %3198 = vadd.xlane.f32.xlu0 %v3197_v62  ;;  %v849_v40 = vld [vmem:[%s12294_s18 + $0x1518] sm:$0xff]  ;;  %v848_v62 = vld [vmem:[%s12294_s18 + $0x1510] sm:$0xff] }
 0x54a   : > { %v2992_v53 = vpop.xlane.xlu1 %2991  ;;  %v2989_v9 = vpop.xlane.xlu0 %2988 }
 0x54b   : > { %v9422_v56 = vsel %vm6472_vm2, %v9421_v50, %v9417_v63  ;;  %v4868_v15 = vmul.f32 0.015625, %v2992_v53  ;;  %v4867_v19 = vmul.f32 0.015625, %v2989_v9  ;;  %v3221_v50 = vsel %vm1198_vm0, %v848_v62, 0.0 }
 0x54c   : > { %v9427_v22 = vsel %vm6479_vm3, %v9426_v7, %v9422_v56  ;;  %v3224_v7 = vsel %vm1198_vm0, %v849_v40, 0.0  ;;  %v850_v56 = vld [vmem:[%s12294_s18 + $0x1520] sm:$0xff] }
 0x54d   : > { %v9436_v49 = vrot.slane %v4868_v15, %v12473_v46  ;;  %v9431_v24 = vrot.slane %v4867_v19, %v12476_v47  ;;  %3207 = vadd.xlane.f32.xlu1 %v3206_v12  ;;  %3204 = vadd.xlane.f32.xlu0 %v3203_v14  ;;  %v851_v14 = vld [vmem:[%s12294_s18 + $0x1528] sm:$0xff] }
 0x54e   : > { %v2998_v26 = vpop.xlane.xlu1 %2997  ;;  %v2995_v28 = vpop.xlane.xlu0 %2994 }
 0x54f   : > { %v9432_v31 = vsel %vm6486_vm4, %v9431_v24, %v9427_v22  ;;  %v4870_v33 = vmul.f32 0.015625, %v2998_v26  ;;  %v4869_v38 = vmul.f32 0.015625, %v2995_v28  ;;  %v3227_v24 = vsel %vm1198_vm0, %v850_v56, 0.0 }
 0x550   : > { %v9437_v41 = vsel %vm6493_vm5, %v9436_v49, %v9432_v31  ;;  %v3230_v49 = vsel %vm1198_vm0, %v851_v14, 0.0  ;;  %v852_v31 = vld [vmem:[%s12294_s18 + $0x1530] sm:$0xff] }
 0x551   : > { %v9446_v25 = vrot.slane %v4870_v33, %v12491_v0  ;;  %v9441_v48 = vrot.slane %v4869_v38, %v12494_v1  ;;  %3213 = vadd.xlane.f32.xlu1 %v3212_v55  ;;  %3210 = vadd.xlane.f32.xlu0 %v3209_v30  ;;  %v853_v30 = vld [vmem:[%s12294_s18 + $0x1538] sm:$0xff] }
 0x552   : > { %v3004_v45 = vpop.xlane.xlu1 %3003  ;;  %v3001_v8 = vpop.xlane.xlu0 %3000 }
 0x553   : > { %v9442_v2 = vsel %vm6500_vm6, %v9441_v48, %v9437_v41  ;;  %v4872_v29 = vmul.f32 0.015625, %v3004_v45  ;;  %v4871_v59 = vmul.f32 0.015625, %v3001_v8  ;;  %v3233_v48 = vsel %vm1198_vm0, %v852_v31, 0.0 }
 0x554   : > { %v9447_v63 = vsel %vm17372_vm7, %v9446_v25, %v9442_v2  ;;  %v3236_v25 = vsel %vm1198_vm0, %v853_v30, 0.0  ;;  %v854_v2 = vld [vmem:[%s12294_s18 + $0x1540] sm:$0xff] }
 0x555   : > { %v9456_v16 = vrot.slane %v4872_v29, %v12508_v18  ;;  %v9451_v3 = vrot.slane %v4871_v59, %v12514_v23  ;;  %3219 = vadd.xlane.f32.xlu1 %v3218_v51  ;;  %3216 = vadd.xlane.f32.xlu0 %v3215_v54  ;;  %v855_v54 = vld [vmem:[%s12294_s18 + $0x1548] sm:$0xff] }
 0x556   : > { %v3010_v5 = vpop.xlane.xlu1 %3009  ;;  %v3007_v52 = vpop.xlane.xlu0 %3006 }
 0x557   : > { %v9452_v53 = vsel %vm17367_vm8, %v9451_v3, %v9447_v63  ;;  %v4874_v9 = vmul.f32 0.015625, %v3010_v5  ;;  %v4873_v12 = vmul.f32 0.015625, %v3007_v52  ;;  %v3239_v3 = vsel %vm1198_vm0, %v854_v2, 0.0 }
 0x558   : > { %v9457_v15 = vsel %vm17427_vm9, %v9456_v16, %v9452_v53  ;;  %vm17428_vm9 = vcmask 786112   ;;  %v3242_v16 = vsel %vm1198_vm0, %v855_v54, 0.0  ;;  %v856_v53 = vld [vmem:[%s12294_s18 + $0x1550] sm:$0xff] }
 0x559   : > { %v9466_v19 = vrot.slane %v4874_v9, %v12530_v43  ;;  %v9461_v4 = vrot.slane %v4873_v12, %v12524_v39  ;;  %3225 = vadd.xlane.f32.xlu1 %v3224_v7  ;;  %3222 = vadd.xlane.f32.xlu0 %v3221_v50  ;;  %v857_v50 = vld [vmem:[%s12294_s18 + $0x1558] sm:$0xff] }
 0x55a   : > { %v3016_v21 = vpop.xlane.xlu1 %3015  ;;  %v3013_v22 = vpop.xlane.xlu0 %3012 }
 0x55b   : > { %v9462_v26 = vsel %vm6528_vm10, %v9461_v4, %v9457_v15  ;;  %v4876_v28 = vmul.f32 0.015625, %v3016_v21  ;;  %v4875_v55 = vmul.f32 0.015625, %v3013_v22  ;;  %v3248_v4 = vsel %vm1198_vm0, %v857_v50, 0.0 }
 0x55c   : > { %v9467_v33 = vsel %vm17428_vm9, %v9466_v19, %v9462_v26  ;;  %v3245_v21 = vsel %vm1198_vm0, %v856_v53, 0.0  ;;  %v859_v26 = vld [vmem:[%s12294_s18 + $0x1568] sm:$0xff]  ;;  %vm17429_vm9 = vcmask 654912  }
 0x55d   : > { %v9476_v38 = vrot.slane %v4876_v28, %v12546_v61  ;;  %v9471_v17 = vrot.slane %v4875_v55, %v12540_v57  ;;  %3231 = vadd.xlane.f32.xlu1 %v3230_v49  ;;  %3228 = vadd.xlane.f32.xlu0 %v3227_v24  ;;  %v858_v28 = vld [vmem:[%s12294_s18 + $0x1560] sm:$0xff] }
 0x55e   : > { %v3022_v27 = vpop.xlane.xlu1 %3021  ;;  %v3019_v41 = vpop.xlane.xlu0 %3018 }
 0x55f   : > { %v9472_v45 = vsel %vm6542_vm12, %v9471_v17, %v9467_v33  ;;  %v4878_v8 = vmul.f32 0.015625, %v3022_v27  ;;  %v4877_v51 = vmul.f32 0.015625, %v3019_v41  ;;  %v3254_v33 = vsel %vm1198_vm0, %v859_v26, 0.0 }
 0x560   : > { %v9477_v29 = vsel %vm6549_vm13, %v9476_v38, %v9472_v45  ;;  %v3251_v38 = vsel %vm1198_vm0, %v858_v28, 0.0 }
 0x561   : > { %v9486_v59 = vrot.slane %v4878_v8, %v12561_v13  ;;  %v9481_v40 = vrot.slane %v4877_v51, %v12556_v11  ;;  %3237 = vadd.xlane.f32.xlu1 %v3236_v25  ;;  %3234 = vadd.xlane.f32.xlu0 %v3233_v48  ;;  %v861_v25 = vld [vmem:[%s12294_s18 + $0x1578] sm:$0xff]  ;;  %v860_v48 = vld [vmem:[%s12294_s18 + $0x1570] sm:$0xff] }
 0x562   : > { %v3028_v62 = vpop.xlane.xlu1 %3027  ;;  %v3025_v63 = vpop.xlane.xlu0 %3024 }
 0x563   : > { %v9482_v5 = vsel %vm6556_vm14, %v9481_v40, %v9477_v29  ;;  %v4880_v52 = vmul.f32 0.015625, %v3028_v62  ;;  %v4879_v7 = vmul.f32 0.015625, %v3025_v63  ;;  %v3260_v29 = vsel %vm1198_vm0, %v861_v25, 0.0 }
 0x564   : > { %v9487_v9 = vsel %vm6563_vm15, %v9486_v59, %v9482_v5  ;;  %v3257_v59 = vsel %vm1198_vm0, %v860_v48, 0.0 }
 0x565   : > { %v9495_v12 = vrot.slane %v4880_v52, %v12463_v35  ;;  %v9491_v14 = vrot.slane %v4879_v7, %v12457_v32  ;;  %3243 = vadd.xlane.f32.xlu1 %v3242_v16  ;;  %3240 = vadd.xlane.f32.xlu0 %v3239_v3  ;;  %v15044_v56 = vsel %vm11548_vm11, %v9487_v9, %v14508_v58  ;;  %v863_v16 = vld [vmem:[%s12294_s18 + $0x1588] sm:$0xff]  ;;  %v862_v3 = vld [vmem:[%s12294_s18 + $0x1580] sm:$0xff] }
 0x566   : > { %v3034_v15 = vpop.xlane.xlu1 %3033  ;;  %v3031_v19 = vpop.xlane.xlu0 %3030  ;;  %v3266_v9 = vsel %vm1198_vm0, %v863_v16, 0.0 }
 0x567   : > { %v9496_v22 = vsel %vm6465_vm1, %v9495_v12, %v9491_v14  ;;  %v4882_v49 = vmul.f32 0.015625, %v3034_v15  ;;  %v4881_v24 = vmul.f32 0.015625, %v3031_v19  ;;  %v3263_v12 = vsel %vm1198_vm0, %v862_v3, 0.0 }
 0x569   : > { %v9505_v55 = vrot.slane %v4882_v49, %v12460_v34  ;;  %v9500_v30 = vrot.slane %v4881_v24, %v12466_v36  ;;  %3249 = vadd.xlane.f32.xlu1 %v3248_v4  ;;  %3246 = vadd.xlane.f32.xlu0 %v3245_v21  ;;  %v865_v4 = vld [vmem:[%s12294_s18 + $0x1598] sm:$0xff]  ;;  %v864_v21 = vld [vmem:[%s12294_s18 + $0x1590] sm:$0xff] }
 0x56a   : > { %v3040_v58 = vpop.xlane.xlu1 %3039  ;;  %v3037_v31 = vpop.xlane.xlu0 %3036 }
 0x56b   : > { %v9501_v17 = vsel %vm6472_vm2, %v9500_v30, %v9496_v22  ;;  %v4884_v27 = vmul.f32 0.015625, %v3040_v58  ;;  %v4883_v41 = vmul.f32 0.015625, %v3037_v31  ;;  %v3269_v30 = vsel %vm1198_vm0, %v864_v21, 0.0 }
 0x56c   : > { %v9506_v45 = vsel %vm6479_vm3, %v9505_v55, %v9501_v17  ;;  %v3272_v55 = vsel %vm1198_vm0, %v865_v4, 0.0  ;;  %v866_v17 = vld [vmem:[%s12294_s18 + $0x15a0] sm:$0xff] }
 0x56d   : > { %v9515_v8 = vrot.slane %v4884_v27, %v12473_v46  ;;  %v9510_v51 = vrot.slane %v4883_v41, %v12476_v47  ;;  %3255 = vadd.xlane.f32.xlu1 %v3254_v33  ;;  %3252 = vadd.xlane.f32.xlu0 %v3251_v38  ;;  %v867_v38 = vld [vmem:[%s12294_s18 + $0x15a8] sm:$0xff] }
 0x56e   : > { %v3046_v54 = vpop.xlane.xlu1 %3045  ;;  %v3043_v2 = vpop.xlane.xlu0 %3042 }
 0x56f   : > { %v9511_v40 = vsel %vm6486_vm4, %v9510_v51, %v9506_v45  ;;  %v4886_v62 = vmul.f32 0.015625, %v3046_v54  ;;  %v4885_v63 = vmul.f32 0.015625, %v3043_v2  ;;  %v3275_v51 = vsel %vm1198_vm0, %v866_v17, 0.0 }
 0x570   : > { %v9516_v5 = vsel %vm6493_vm5, %v9515_v8, %v9511_v40  ;;  %v3278_v8 = vsel %vm1198_vm0, %v867_v38, 0.0  ;;  %v868_v40 = vld [vmem:[%s12294_s18 + $0x15b0] sm:$0xff] }
 0x571   : > { %v9525_v52 = vrot.slane %v4886_v62, %v12491_v0  ;;  %v9520_v7 = vrot.slane %v4885_v63, %v12494_v1  ;;  %3261 = vadd.xlane.f32.xlu1 %v3260_v29  ;;  %3258 = vadd.xlane.f32.xlu0 %v3257_v59  ;;  %v869_v59 = vld [vmem:[%s12294_s18 + $0x15b8] sm:$0xff] }
 0x572   : > { %v3052_v50 = vpop.xlane.xlu1 %3051  ;;  %v3049_v53 = vpop.xlane.xlu0 %3048 }
 0x573   : > { %v9521_v14 = vsel %vm6500_vm6, %v9520_v7, %v9516_v5  ;;  %v4888_v15 = vmul.f32 0.015625, %v3052_v50  ;;  %v4887_v19 = vmul.f32 0.015625, %v3049_v53  ;;  %v3281_v7 = vsel %vm1198_vm0, %v868_v40, 0.0 }
 0x574   : > { %v9526_v22 = vsel %vm17372_vm7, %v9525_v52, %v9521_v14  ;;  %v3284_v52 = vsel %vm1198_vm0, %v869_v59, 0.0  ;;  %v870_v14 = vld [vmem:[%s12294_s18 + $0x15c0] sm:$0xff] }
 0x575   : > { %v9535_v49 = vrot.slane %v4888_v15, %v12508_v18  ;;  %v9530_v24 = vrot.slane %v4887_v19, %v12514_v23  ;;  %3267 = vadd.xlane.f32.xlu1 %v3266_v9  ;;  %3264 = vadd.xlane.f32.xlu0 %v3263_v12  ;;  %v871_v12 = vld [vmem:[%s12294_s18 + $0x15c8] sm:$0xff] }
 0x576   : > { %v3058_v26 = vpop.xlane.xlu1 %3057  ;;  %v3055_v28 = vpop.xlane.xlu0 %3054 }
 0x577   : > { %v9531_v58 = vsel %vm17367_vm8, %v9530_v24, %v9526_v22  ;;  %v4890_v31 = vmul.f32 0.015625, %v3058_v26  ;;  %v4889_v33 = vmul.f32 0.015625, %v3055_v28  ;;  %v3287_v24 = vsel %vm1198_vm0, %v870_v14, 0.0 }
 0x578   : > { %v9536_v27 = vsel %vm17429_vm9, %v9535_v49, %v9531_v58  ;;  %vm17430_vm9 = vcmask 786112   ;;  %v3290_v49 = vsel %vm1198_vm0, %v871_v12, 0.0  ;;  %v872_v58 = vld [vmem:[%s12294_s18 + $0x15d0] sm:$0xff] }
 0x579   : > { %v9545_v41 = vrot.slane %v4890_v31, %v12530_v43  ;;  %v9540_v25 = vrot.slane %v4889_v33, %v12524_v39  ;;  %3273 = vadd.xlane.f32.xlu1 %v3272_v55  ;;  %3270 = vadd.xlane.f32.xlu0 %v3269_v30  ;;  %v873_v30 = vld [vmem:[%s12294_s18 + $0x15d8] sm:$0xff] }
 0x57a   : > { %v3064_v48 = vpop.xlane.xlu1 %3063  ;;  %v3061_v45 = vpop.xlane.xlu0 %3060 }
 0x57b   : > { %v9541_v54 = vsel %vm6528_vm10, %v9540_v25, %v9536_v27  ;;  %v4892_v2 = vmul.f32 0.015625, %v3064_v48  ;;  %v4891_v29 = vmul.f32 0.015625, %v3061_v45  ;;  %v3296_v25 = vsel %vm1198_vm0, %v873_v30, 0.0 }
 0x57c   : > { %v9546_v62 = vsel %vm17430_vm9, %v9545_v41, %v9541_v54  ;;  %v3293_v48 = vsel %vm1198_vm0, %v872_v58, 0.0  ;;  %v875_v54 = vld [vmem:[%s12294_s18 + $0x15e8] sm:$0xff]  ;;  %vm17431_vm9 = vcmask 654912  }
 0x57d   : > { %v9555_v63 = vrot.slane %v4892_v2, %v12546_v61  ;;  %v9550_v16 = vrot.slane %v4891_v29, %v12540_v57  ;;  %3279 = vadd.xlane.f32.xlu1 %v3278_v8  ;;  %3276 = vadd.xlane.f32.xlu0 %v3275_v51  ;;  %v874_v2 = vld [vmem:[%s12294_s18 + $0x15e0] sm:$0xff] }
 0x57e   : > { %v3070_v3 = vpop.xlane.xlu1 %3069  ;;  %v3067_v5 = vpop.xlane.xlu0 %3066 }
 0x57f   : > { %v9551_v50 = vsel %vm6542_vm12, %v9550_v16, %v9546_v62  ;;  %v4894_v53 = vmul.f32 0.015625, %v3070_v3  ;;  %v4893_v9 = vmul.f32 0.015625, %v3067_v5  ;;  %v3302_v62 = vsel %vm1198_vm0, %v875_v54, 0.0 }
 0x580   : > { %v9556_v15 = vsel %vm6549_vm13, %v9555_v63, %v9551_v50  ;;  %v3299_v63 = vsel %vm1198_vm0, %v874_v2, 0.0 }
 0x581   : > { %v9565_v19 = vrot.slane %v4894_v53, %v12561_v13  ;;  %v9560_v4 = vrot.slane %v4893_v9, %v12556_v11  ;;  %3285 = vadd.xlane.f32.xlu1 %v3284_v52  ;;  %3282 = vadd.xlane.f32.xlu0 %v3281_v7  ;;  %v877_v52 = vld [vmem:[%s12294_s18 + $0x15f8] sm:$0xff]  ;;  %v876_v7 = vld [vmem:[%s12294_s18 + $0x15f0] sm:$0xff] }
 0x582   : > { %v3076_v21 = vpop.xlane.xlu1 %3075  ;;  %v3073_v22 = vpop.xlane.xlu0 %3072 }
 0x583   : > { %v9561_v26 = vsel %vm6556_vm14, %v9560_v4, %v9556_v15  ;;  %v4896_v28 = vmul.f32 0.015625, %v3076_v21  ;;  %v4895_v55 = vmul.f32 0.015625, %v3073_v22  ;;  %v3308_v15 = vsel %vm1198_vm0, %v877_v52, 0.0 }
 0x584   : > { %v9566_v31 = vsel %vm6563_vm15, %v9565_v19, %v9561_v26  ;;  %v3305_v19 = vsel %vm1198_vm0, %v876_v7, 0.0 }
 0x585   : > { %v9574_v33 = vrot.slane %v4896_v28, %v12463_v35  ;;  %v9570_v38 = vrot.slane %v4895_v55, %v12457_v32  ;;  %3291 = vadd.xlane.f32.xlu1 %v3290_v49  ;;  %3288 = vadd.xlane.f32.xlu0 %v3287_v24  ;;  %v15111_v17 = vsel %vm11548_vm11, %v9566_v31, %v14575_v10  ;;  %v879_v49 = vld [vmem:[%s12294_s18 + $0x1608] sm:$0xff]  ;;  %v878_v24 = vld [vmem:[%s12294_s18 + $0x1600] sm:$0xff] }
 0x586   : > { %v3082_v27 = vpop.xlane.xlu1 %3081  ;;  %v3079_v41 = vpop.xlane.xlu0 %3078  ;;  %v3314_v31 = vsel %vm1198_vm0, %v879_v49, 0.0 }
 0x587   : > { %v9575_v45 = vsel %vm6465_vm1, %v9574_v33, %v9570_v38  ;;  %v4898_v8 = vmul.f32 0.015625, %v3082_v27  ;;  %v4897_v51 = vmul.f32 0.015625, %v3079_v41  ;;  %v3311_v33 = vsel %vm1198_vm0, %v878_v24, 0.0 }
 0x589   : > { %v9584_v29 = vrot.slane %v4898_v8, %v12460_v34  ;;  %v9579_v59 = vrot.slane %v4897_v51, %v12466_v36  ;;  %3297 = vadd.xlane.f32.xlu1 %v3296_v25  ;;  %3294 = vadd.xlane.f32.xlu0 %v3293_v48  ;;  %v881_v25 = vld [vmem:[%s12294_s18 + $0x1618] sm:$0xff]  ;;  %v880_v48 = vld [vmem:[%s12294_s18 + $0x1610] sm:$0xff] }
 0x58a   : > { %v3088_v10 = vpop.xlane.xlu1 %3087  ;;  %v3085_v40 = vpop.xlane.xlu0 %3084 }
 0x58b   : > { %v9580_v16 = vsel %vm6472_vm2, %v9579_v59, %v9575_v45  ;;  %v4900_v3 = vmul.f32 0.015625, %v3088_v10  ;;  %v4899_v5 = vmul.f32 0.015625, %v3085_v40  ;;  %v3317_v59 = vsel %vm1198_vm0, %v880_v48, 0.0 }
 0x58c   : > { %v9585_v50 = vsel %vm6479_vm3, %v9584_v29, %v9580_v16  ;;  %v3320_v29 = vsel %vm1198_vm0, %v881_v25, 0.0  ;;  %v882_v16 = vld [vmem:[%s12294_s18 + $0x1620] sm:$0xff] }
 0x58d   : > { %v9594_v53 = vrot.slane %v4900_v3, %v12473_v46  ;;  %v9589_v9 = vrot.slane %v4899_v5, %v12476_v47  ;;  %3303 = vadd.xlane.f32.xlu1 %v3302_v62  ;;  %3300 = vadd.xlane.f32.xlu0 %v3299_v63  ;;  %v883_v63 = vld [vmem:[%s12294_s18 + $0x1628] sm:$0xff] }
 0x58e   : > { %v3094_v12 = vpop.xlane.xlu1 %3093  ;;  %v3091_v14 = vpop.xlane.xlu0 %3090 }
 0x58f   : > { %v9590_v4 = vsel %vm6486_vm4, %v9589_v9, %v9585_v50  ;;  %v4902_v21 = vmul.f32 0.015625, %v3094_v12  ;;  %v4901_v22 = vmul.f32 0.015625, %v3091_v14  ;;  %v3323_v9 = vsel %vm1198_vm0, %v882_v16, 0.0 }
 0x590   : > { %v9595_v26 = vsel %vm6493_vm5, %v9594_v53, %v9590_v4  ;;  %v3326_v53 = vsel %vm1198_vm0, %v883_v63, 0.0  ;;  %v884_v4 = vld [vmem:[%s12294_s18 + $0x1630] sm:$0xff] }
 0x591   : > { %v9604_v28 = vrot.slane %v4902_v21, %v12491_v0  ;;  %v9599_v55 = vrot.slane %v4901_v22, %v12494_v1  ;;  %3309 = vadd.xlane.f32.xlu1 %v3308_v15  ;;  %3306 = vadd.xlane.f32.xlu0 %v3305_v19  ;;  %v885_v19 = vld [vmem:[%s12294_s18 + $0x1638] sm:$0xff] }
 0x592   : > { %v3100_v30 = vpop.xlane.xlu1 %3099  ;;  %v3097_v58 = vpop.xlane.xlu0 %3096 }
 0x593   : > { %v9600_v38 = vsel %vm6500_vm6, %v9599_v55, %v9595_v26  ;;  %v4904_v27 = vmul.f32 0.015625, %v3100_v30  ;;  %v4903_v41 = vmul.f32 0.015625, %v3097_v58  ;;  %v3329_v55 = vsel %vm1198_vm0, %v884_v4, 0.0 }
 0x594   : > { %v9605_v45 = vsel %vm17372_vm7, %v9604_v28, %v9600_v38  ;;  %v3332_v28 = vsel %vm1198_vm0, %v885_v19, 0.0  ;;  %v886_v38 = vld [vmem:[%s12294_s18 + $0x1640] sm:$0xff] }
 0x595   : > { %v9614_v8 = vrot.slane %v4904_v27, %v12508_v18  ;;  %v9609_v51 = vrot.slane %v4903_v41, %v12514_v23  ;;  %3315 = vadd.xlane.f32.xlu1 %v3314_v31  ;;  %3312 = vadd.xlane.f32.xlu0 %v3311_v33  ;;  %v887_v33 = vld [vmem:[%s12294_s18 + $0x1648] sm:$0xff] }
 0x596   : > { %v3106_v54 = vpop.xlane.xlu1 %3105  ;;  %v3103_v2 = vpop.xlane.xlu0 %3102 }
 0x597   : > { %v9610_v10 = vsel %vm17367_vm8, %v9609_v51, %v9605_v45  ;;  %v4906_v40 = vmul.f32 0.015625, %v3106_v54  ;;  %v4905_v62 = vmul.f32 0.015625, %v3103_v2  ;;  %v3335_v51 = vsel %vm1198_vm0, %v886_v38, 0.0 }
 0x598   : > { %v9615_v3 = vsel %vm17431_vm9, %v9614_v8, %v9610_v10  ;;  %vm17432_vm9 = vcmask 786112   ;;  %v3338_v8 = vsel %vm1198_vm0, %v887_v33, 0.0  ;;  %v888_v10 = vld [vmem:[%s12294_s18 + $0x1650] sm:$0xff] }
 0x599   : > { %v9624_v5 = vrot.slane %v4906_v40, %v12530_v43  ;;  %v9619_v52 = vrot.slane %v4905_v62, %v12524_v39  ;;  %3321 = vadd.xlane.f32.xlu1 %v3320_v29  ;;  %3318 = vadd.xlane.f32.xlu0 %v3317_v59  ;;  %v889_v59 = vld [vmem:[%s12294_s18 + $0x1658] sm:$0xff] }
 0x59a   : > { %v3112_v7 = vpop.xlane.xlu1 %3111  ;;  %v3109_v50 = vpop.xlane.xlu0 %3108 }
 0x59b   : > { %v9620_v12 = vsel %vm6528_vm10, %v9619_v52, %v9615_v3  ;;  %v4908_v14 = vmul.f32 0.015625, %v3112_v7  ;;  %v4907_v15 = vmul.f32 0.015625, %v3109_v50  ;;  %v3344_v52 = vsel %vm1198_vm0, %v889_v59, 0.0 }
 0x59c   : > { %v9625_v21 = vsel %vm17432_vm9, %v9624_v5, %v9620_v12  ;;  %v3341_v7 = vsel %vm1198_vm0, %v888_v10, 0.0  ;;  %v891_v12 = vld [vmem:[%s12294_s18 + $0x1668] sm:$0xff] }
 0x59d   : > { %v9634_v22 = vrot.slane %v4908_v14, %v12546_v61  ;;  %v9629_v49 = vrot.slane %v4907_v15, %v12540_v57  ;;  %3327 = vadd.xlane.f32.xlu1 %v3326_v53  ;;  %3324 = vadd.xlane.f32.xlu0 %v3323_v9  ;;  %v890_v14 = vld [vmem:[%s12294_s18 + $0x1660] sm:$0xff] }
 0x59e   : > { %v3118_v24 = vpop.xlane.xlu1 %3117  ;;  %v3115_v26 = vpop.xlane.xlu0 %3114 }
 0x59f   : > { %v9630_v30 = vsel %vm6542_vm12, %v9629_v49, %v9625_v21  ;;  %v4910_v58 = vmul.f32 0.015625, %v3118_v24  ;;  %v4909_v31 = vmul.f32 0.015625, %v3115_v26  ;;  %v3350_v21 = vsel %vm1198_vm0, %v891_v12, 0.0 }
 0x5a0   : > { %v9635_v27 = vsel %vm6549_vm13, %v9634_v22, %v9630_v30  ;;  %v3347_v22 = vsel %vm1198_vm0, %v890_v14, 0.0 }
 0x5a1   : > { %v9644_v41 = vrot.slane %v4910_v58, %v12561_v13  ;;  %v9639_v25 = vrot.slane %v4909_v31, %v12556_v11  ;;  %3333 = vadd.xlane.f32.xlu1 %v3332_v28  ;;  %3330 = vadd.xlane.f32.xlu0 %v3329_v55  ;;  %v893_v28 = vld [vmem:[%s12294_s18 + $0x1678] sm:$0xff]  ;;  %v892_v55 = vld [vmem:[%s12294_s18 + $0x1670] sm:$0xff] }
 0x5a2   : > { %v3124_v48 = vpop.xlane.xlu1 %3123  ;;  %v3121_v45 = vpop.xlane.xlu0 %3120 }
 0x5a3   : > { %v9640_v54 = vsel %vm6556_vm14, %v9639_v25, %v9635_v27  ;;  %v4912_v2 = vmul.f32 0.015625, %v3124_v48  ;;  %v4911_v29 = vmul.f32 0.015625, %v3121_v45  ;;  %v3356_v27 = vsel %vm1198_vm0, %v893_v28, 0.0 }
 0x5a4   : > { %v9645_v40 = vsel %vm6563_vm15, %v9644_v41, %v9640_v54  ;;  %v3353_v41 = vsel %vm1198_vm0, %v892_v55, 0.0 }
 0x5a5   : > { %v9653_v62 = vrot.slane %v4912_v2, %v12463_v35  ;;  %v9649_v63 = vrot.slane %v4911_v29, %v12457_v32  ;;  %3339 = vadd.xlane.f32.xlu1 %v3338_v8  ;;  %3336 = vadd.xlane.f32.xlu0 %v3335_v51  ;;  %v15178_v16 = vsel %vm11548_vm11, %v9645_v40, %v14642_v37  ;;  %v895_v8 = vld [vmem:[%s12294_s18 + $0x1688] sm:$0xff]  ;;  %v894_v51 = vld [vmem:[%s12294_s18 + $0x1680] sm:$0xff]  ;;  %vm17434_vm11 = vcmask 654912  }
 0x5a6   : > { %17433 = vst [vmem:[#allocation4_spill] sm:$0xff] %v15178_v16  ;;  %v3130_v3 = vpop.xlane.xlu1 %3129  ;;  %v3127_v5 = vpop.xlane.xlu0 %3126  ;;  %v3362_v40 = vsel %vm1198_vm0, %v895_v8, 0.0  ;;  %v1141_v16 = vld [vmem:[%s12294_s18 + $0x1e38] sm:$0xff] }
 0x5a7   : > { %v9654_v50 = vsel %vm6465_vm1, %v9653_v62, %v9649_v63  ;;  %v4914_v53 = vmul.f32 0.015625, %v3130_v3  ;;  %v4913_v9 = vmul.f32 0.015625, %v3127_v5  ;;  %v3359_v62 = vsel %vm1198_vm0, %v894_v51, 0.0 }
 0x5a9   : > { %v9663_v15 = vrot.slane %v4914_v53, %v12460_v34  ;;  %v9658_v19 = vrot.slane %v4913_v9, %v12466_v36  ;;  %3345 = vadd.xlane.f32.xlu1 %v3344_v52  ;;  %3342 = vadd.xlane.f32.xlu0 %v3341_v7  ;;  %v897_v52 = vld [vmem:[%s12294_s18 + $0x1698] sm:$0xff]  ;;  %v896_v7 = vld [vmem:[%s12294_s18 + $0x1690] sm:$0xff] }
 0x5aa   : > { %v3136_v37 = vpop.xlane.xlu1 %3135  ;;  %v3133_v4 = vpop.xlane.xlu0 %3132 }
 0x5ab   : > { %v9659_v49 = vsel %vm6472_vm2, %v9658_v19, %v9654_v50  ;;  %v4916_v24 = vmul.f32 0.015625, %v3136_v37  ;;  %v4915_v26 = vmul.f32 0.015625, %v3133_v4  ;;  %v3365_v19 = vsel %vm1198_vm0, %v896_v7, 0.0 }
 0x5ac   : > { %v9664_v30 = vsel %vm6479_vm3, %v9663_v15, %v9659_v49  ;;  %v3368_v15 = vsel %vm1198_vm0, %v897_v52, 0.0  ;;  %v898_v49 = vld [vmem:[%s12294_s18 + $0x16a0] sm:$0xff] }
 0x5ad   : > { %v9673_v58 = vrot.slane %v4916_v24, %v12473_v46  ;;  %v9668_v31 = vrot.slane %v4915_v26, %v12476_v47  ;;  %3351 = vadd.xlane.f32.xlu1 %v3350_v21  ;;  %3348 = vadd.xlane.f32.xlu0 %v3347_v22  ;;  %v899_v22 = vld [vmem:[%s12294_s18 + $0x16a8] sm:$0xff] }
 0x5ae   : > { %v3142_v33 = vpop.xlane.xlu1 %3141  ;;  %v3139_v38 = vpop.xlane.xlu0 %3138 }
 0x5af   : > { %v9669_v25 = vsel %vm6486_vm4, %v9668_v31, %v9664_v30  ;;  %v4918_v48 = vmul.f32 0.015625, %v3142_v33  ;;  %v4917_v45 = vmul.f32 0.015625, %v3139_v38  ;;  %v3371_v31 = vsel %vm1198_vm0, %v898_v49, 0.0 }
 0x5b0   : > { %v9674_v54 = vsel %vm6493_vm5, %v9673_v58, %v9669_v25  ;;  %v3374_v58 = vsel %vm1198_vm0, %v899_v22, 0.0  ;;  %v900_v25 = vld [vmem:[%s12294_s18 + $0x16b0] sm:$0xff] }
 0x5b1   : > { %v9683_v2 = vrot.slane %v4918_v48, %v12491_v0  ;;  %v9678_v29 = vrot.slane %v4917_v45, %v12494_v1  ;;  %3357 = vadd.xlane.f32.xlu1 %v3356_v27  ;;  %3354 = vadd.xlane.f32.xlu0 %v3353_v41  ;;  %v901_v41 = vld [vmem:[%s12294_s18 + $0x16b8] sm:$0xff] }
 0x5b2   : > { %v3148_v59 = vpop.xlane.xlu1 %3147  ;;  %v3145_v10 = vpop.xlane.xlu0 %3144 }
 0x5b3   : > { %v9679_v63 = vsel %vm6500_vm6, %v9678_v29, %v9674_v54  ;;  %v4920_v3 = vmul.f32 0.015625, %v3148_v59  ;;  %v4919_v5 = vmul.f32 0.015625, %v3145_v10  ;;  %v3377_v29 = vsel %vm1198_vm0, %v900_v25, 0.0 }
 0x5b4   : > { %v9684_v50 = vsel %vm17372_vm7, %v9683_v2, %v9679_v63  ;;  %v3380_v2 = vsel %vm1198_vm0, %v901_v41, 0.0  ;;  %v902_v63 = vld [vmem:[%s12294_s18 + $0x16c0] sm:$0xff] }
 0x5b5   : > { %v9693_v53 = vrot.slane %v4920_v3, %v12508_v18  ;;  %v9688_v9 = vrot.slane %v4919_v5, %v12514_v23  ;;  %3363 = vadd.xlane.f32.xlu1 %v3362_v40  ;;  %3360 = vadd.xlane.f32.xlu0 %v3359_v62  ;;  %v903_v62 = vld [vmem:[%s12294_s18 + $0x16c8] sm:$0xff] }
 0x5b6   : > { %v3154_v12 = vpop.xlane.xlu1 %3153  ;;  %v3151_v14 = vpop.xlane.xlu0 %3150 }
 0x5b7   : > { %v9689_v37 = vsel %vm17367_vm8, %v9688_v9, %v9684_v50  ;;  %v4922_v4 = vmul.f32 0.015625, %v3154_v12  ;;  %v4921_v21 = vmul.f32 0.015625, %v3151_v14  ;;  %v3383_v9 = vsel %vm1198_vm0, %v902_v63, 0.0 }
 0x5b8   : > { %v9694_v24 = vsel %vm17434_vm11, %v9693_v53, %v9689_v37  ;;  %v3386_v53 = vsel %vm1198_vm0, %v903_v62, 0.0  ;;  %vm17366_vm11 = vcmask 1045509   ;;  %v904_v37 = vld [vmem:[%s12294_s18 + $0x16d0] sm:$0xff] }
 0x5b9   : > { %v9703_v26 = vrot.slane %v4922_v4, %v12530_v43  ;;  %v9698_v28 = vrot.slane %v4921_v21, %v12524_v39  ;;  %3369 = vadd.xlane.f32.xlu1 %v3368_v15  ;;  %3366 = vadd.xlane.f32.xlu0 %v3365_v19  ;;  %v905_v19 = vld [vmem:[%s12294_s18 + $0x16d8] sm:$0xff] }
 0x5ba   : > { %v3160_v55 = vpop.xlane.xlu1 %3159  ;;  %v3157_v30 = vpop.xlane.xlu0 %3156 }
 0x5bb   : > { %v9699_v33 = vsel %vm6528_vm10, %v9698_v28, %v9694_v24  ;;  %v4924_v38 = vmul.f32 0.015625, %v3160_v55  ;;  %v4923_v27 = vmul.f32 0.015625, %v3157_v30  ;;  %v3392_v28 = vsel %vm1198_vm0, %v905_v19, 0.0 }
 0x5bc   : > { %v9704_v48 = vsel %vm17432_vm9, %v9703_v26, %v9699_v33  ;;  %v3389_v55 = vsel %vm1198_vm0, %v904_v37, 0.0  ;;  %v907_v33 = vld [vmem:[%s12294_s18 + $0x16e8] sm:$0xff]  ;;  %vm17435_vm9 = vcmask 654912  }
 0x5bd   : > { %v9713_v45 = vrot.slane %v4924_v38, %v12546_v61  ;;  %v9708_v8 = vrot.slane %v4923_v27, %v12540_v57  ;;  %3375 = vadd.xlane.f32.xlu1 %v3374_v58  ;;  %3372 = vadd.xlane.f32.xlu0 %v3371_v31  ;;  %v906_v38 = vld [vmem:[%s12294_s18 + $0x16e0] sm:$0xff] }
 0x5be   : > { %v3166_v51 = vpop.xlane.xlu1 %3165  ;;  %v3163_v54 = vpop.xlane.xlu0 %3162 }
 0x5bf   : > { %v9709_v59 = vsel %vm6542_vm12, %v9708_v8, %v9704_v48  ;;  %v4926_v10 = vmul.f32 0.015625, %v3166_v51  ;;  %v4925_v40 = vmul.f32 0.015625, %v3163_v54  ;;  %v3398_v48 = vsel %vm1198_vm0, %v907_v33, 0.0 }
 0x5c0   : > { %v9714_v3 = vsel %vm6549_vm13, %v9713_v45, %v9709_v59  ;;  %v3395_v45 = vsel %vm1198_vm0, %v906_v38, 0.0 }
 0x5c1   : > { %v9723_v5 = vrot.slane %v4926_v10, %v12561_v13  ;;  %v9718_v52 = vrot.slane %v4925_v40, %v12556_v11  ;;  %3381 = vadd.xlane.f32.xlu1 %v3380_v2  ;;  %3378 = vadd.xlane.f32.xlu0 %v3377_v29  ;;  %v909_v2 = vld [vmem:[%s12294_s18 + $0x16f8] sm:$0xff]  ;;  %v908_v29 = vld [vmem:[%s12294_s18 + $0x16f0] sm:$0xff] }
 0x5c2   : > { %v3172_v7 = vpop.xlane.xlu1 %3171  ;;  %v3169_v50 = vpop.xlane.xlu0 %3168 }
 0x5c3   : > { %v9719_v12 = vsel %vm6556_vm14, %v9718_v52, %v9714_v3  ;;  %v4928_v14 = vmul.f32 0.015625, %v3172_v7  ;;  %v4927_v15 = vmul.f32 0.015625, %v3169_v50  ;;  %v3404_v3 = vsel %vm1198_vm0, %v909_v2, 0.0 }
 0x5c4   : > { %v9724_v4 = vsel %vm6563_vm15, %v9723_v5, %v9719_v12  ;;  %v3401_v5 = vsel %vm1198_vm0, %v908_v29, 0.0 }
 0x5c5   : > { %v9732_v21 = vrot.slane %v4928_v14, %v12463_v35  ;;  %v9728_v22 = vrot.slane %v4927_v15, %v12457_v32  ;;  %3387 = vadd.xlane.f32.xlu1 %v3386_v53  ;;  %3384 = vadd.xlane.f32.xlu0 %v3383_v9  ;;  %v15245_v49 = vsel %vm17366_vm11, %v9724_v4, %v14709_v60  ;;  %v911_v53 = vld [vmem:[%s12294_s18 + $0x1708] sm:$0xff]  ;;  %v910_v9 = vld [vmem:[%s12294_s18 + $0x1700] sm:$0xff] }
 0x5c6   : > { %v3178_v24 = vpop.xlane.xlu1 %3177  ;;  %v3175_v26 = vpop.xlane.xlu0 %3174  ;;  %v3410_v4 = vsel %vm1198_vm0, %v911_v53, 0.0 }
 0x5c7   : > { %v9733_v30 = vsel %vm6465_vm1, %v9732_v21, %v9728_v22  ;;  %v4930_v58 = vmul.f32 0.015625, %v3178_v24  ;;  %v4929_v31 = vmul.f32 0.015625, %v3175_v26  ;;  %v3407_v21 = vsel %vm1198_vm0, %v910_v9, 0.0 }
 0x5c9   : > { %v9742_v27 = vrot.slane %v4930_v58, %v12460_v34  ;;  %v9737_v41 = vrot.slane %v4929_v31, %v12466_v36  ;;  %3393 = vadd.xlane.f32.xlu1 %v3392_v28  ;;  %3390 = vadd.xlane.f32.xlu0 %v3389_v55  ;;  %v913_v28 = vld [vmem:[%s12294_s18 + $0x1718] sm:$0xff]  ;;  %v912_v55 = vld [vmem:[%s12294_s18 + $0x1710] sm:$0xff] }
 0x5ca   : > { %v3184_v60 = vpop.xlane.xlu1 %3183  ;;  %v3181_v25 = vpop.xlane.xlu0 %3180 }
 0x5cb   : > { %v9738_v8 = vsel %vm6472_vm2, %v9737_v41, %v9733_v30  ;;  %v4932_v51 = vmul.f32 0.015625, %v3184_v60  ;;  %v4931_v54 = vmul.f32 0.015625, %v3181_v25  ;;  %v3413_v41 = vsel %vm1198_vm0, %v912_v55, 0.0 }
 0x5cc   : > { %v9743_v59 = vsel %vm6479_vm3, %v9742_v27, %v9738_v8  ;;  %v3416_v27 = vsel %vm1198_vm0, %v913_v28, 0.0  ;;  %v914_v8 = vld [vmem:[%s12294_s18 + $0x1720] sm:$0xff] }
 0x5cd   : > { %v9752_v10 = vrot.slane %v4932_v51, %v12473_v46  ;;  %v9747_v40 = vrot.slane %v4931_v54, %v12476_v47  ;;  %3399 = vadd.xlane.f32.xlu1 %v3398_v48  ;;  %3396 = vadd.xlane.f32.xlu0 %v3395_v45  ;;  %v915_v45 = vld [vmem:[%s12294_s18 + $0x1728] sm:$0xff] }
 0x5ce   : > { %v3190_v62 = vpop.xlane.xlu1 %3189  ;;  %v3187_v63 = vpop.xlane.xlu0 %3186 }
 0x5cf   : > { %v9748_v52 = vsel %vm6486_vm4, %v9747_v40, %v9743_v59  ;;  %v4934_v7 = vmul.f32 0.015625, %v3190_v62  ;;  %v4933_v50 = vmul.f32 0.015625, %v3187_v63  ;;  %v3419_v40 = vsel %vm1198_vm0, %v914_v8, 0.0 }
 0x5d0   : > { %v9753_v12 = vsel %vm6493_vm5, %v9752_v10, %v9748_v52  ;;  %v3422_v10 = vsel %vm1198_vm0, %v915_v45, 0.0  ;;  %v916_v52 = vld [vmem:[%s12294_s18 + $0x1730] sm:$0xff] }
 0x5d1   : > { %v9762_v14 = vrot.slane %v4934_v7, %v12491_v0  ;;  %v9757_v15 = vrot.slane %v4933_v50, %v12494_v1  ;;  %3405 = vadd.xlane.f32.xlu1 %v3404_v3  ;;  %3402 = vadd.xlane.f32.xlu0 %v3401_v5  ;;  %v917_v5 = vld [vmem:[%s12294_s18 + $0x1738] sm:$0xff] }
 0x5d2   : > { %v3196_v19 = vpop.xlane.xlu1 %3195  ;;  %v3193_v37 = vpop.xlane.xlu0 %3192 }
 0x5d3   : > { %v9758_v22 = vsel %vm6500_vm6, %v9757_v15, %v9753_v12  ;;  %v4936_v24 = vmul.f32 0.015625, %v3196_v19  ;;  %v4935_v26 = vmul.f32 0.015625, %v3193_v37  ;;  %v3425_v15 = vsel %vm1198_vm0, %v916_v52, 0.0 }
 0x5d4   : > { %v9763_v30 = vsel %vm17372_vm7, %v9762_v14, %v9758_v22  ;;  %v3428_v14 = vsel %vm1198_vm0, %v917_v5, 0.0  ;;  %v918_v22 = vld [vmem:[%s12294_s18 + $0x1740] sm:$0xff] }
 0x5d5   : > { %v9772_v58 = vrot.slane %v4936_v24, %v12508_v18  ;;  %v9767_v31 = vrot.slane %v4935_v26, %v12514_v23  ;;  %3411 = vadd.xlane.f32.xlu1 %v3410_v4  ;;  %3408 = vadd.xlane.f32.xlu0 %v3407_v21  ;;  %v919_v21 = vld [vmem:[%s12294_s18 + $0x1748] sm:$0xff] }
 0x5d6   : > { %v3202_v33 = vpop.xlane.xlu1 %3201  ;;  %v3199_v38 = vpop.xlane.xlu0 %3198 }
 0x5d7   : > { %v9768_v60 = vsel %vm17367_vm8, %v9767_v31, %v9763_v30  ;;  %v4938_v25 = vmul.f32 0.015625, %v3202_v33  ;;  %v4937_v48 = vmul.f32 0.015625, %v3199_v38  ;;  %v3431_v31 = vsel %vm1198_vm0, %v918_v22, 0.0 }
 0x5d8   : > { %v9773_v51 = vsel %vm17435_vm9, %v9772_v58, %v9768_v60  ;;  %vm17436_vm9 = vcmask 786112   ;;  %v3434_v58 = vsel %vm1198_vm0, %v919_v21, 0.0  ;;  %v920_v60 = vld [vmem:[%s12294_s18 + $0x1750] sm:$0xff] }
 0x5d9   : > { %v9782_v54 = vrot.slane %v4938_v25, %v12530_v43  ;;  %v9777_v2 = vrot.slane %v4937_v48, %v12524_v39  ;;  %3417 = vadd.xlane.f32.xlu1 %v3416_v27  ;;  %3414 = vadd.xlane.f32.xlu0 %v3413_v41  ;;  %v921_v41 = vld [vmem:[%s12294_s18 + $0x1758] sm:$0xff] }
 0x5da   : > { %v3208_v29 = vpop.xlane.xlu1 %3207  ;;  %v3205_v59 = vpop.xlane.xlu0 %3204 }
 0x5db   : > { %v9778_v62 = vsel %vm6528_vm10, %v9777_v2, %v9773_v51  ;;  %v4940_v63 = vmul.f32 0.015625, %v3208_v29  ;;  %v4939_v3 = vmul.f32 0.015625, %v3205_v59  ;;  %v3440_v2 = vsel %vm1198_vm0, %v921_v41, 0.0 }
 0x5dc   : > { %v9783_v7 = vsel %vm17436_vm9, %v9782_v54, %v9778_v62  ;;  %v3437_v29 = vsel %vm1198_vm0, %v920_v60, 0.0  ;;  %v923_v62 = vld [vmem:[%s12294_s18 + $0x1768] sm:$0xff]  ;;  %vm17437_vm9 = vcmask 654912  }
 0x5dd   : > { %v9792_v50 = vrot.slane %v4940_v63, %v12546_v61  ;;  %v9787_v53 = vrot.slane %v4939_v3, %v12540_v57  ;;  %3423 = vadd.xlane.f32.xlu1 %v3422_v10  ;;  %3420 = vadd.xlane.f32.xlu0 %v3419_v40  ;;  %v922_v63 = vld [vmem:[%s12294_s18 + $0x1760] sm:$0xff] }
 0x5de   : > { %v3214_v9 = vpop.xlane.xlu1 %3213  ;;  %v3211_v12 = vpop.xlane.xlu0 %3210 }
 0x5df   : > { %v9788_v19 = vsel %vm6542_vm12, %v9787_v53, %v9783_v7  ;;  %v4942_v37 = vmul.f32 0.015625, %v3214_v9  ;;  %v4941_v4 = vmul.f32 0.015625, %v3211_v12  ;;  %v3446_v7 = vsel %vm1198_vm0, %v923_v62, 0.0 }
 0x5e0   : > { %v9793_v24 = vsel %vm6549_vm13, %v9792_v50, %v9788_v19  ;;  %v3443_v50 = vsel %vm1198_vm0, %v922_v63, 0.0 }
 0x5e1   : > { %v9802_v26 = vrot.slane %v4942_v37, %v12561_v13  ;;  %v9797_v28 = vrot.slane %v4941_v4, %v12556_v11  ;;  %3429 = vadd.xlane.f32.xlu1 %v3428_v14  ;;  %3426 = vadd.xlane.f32.xlu0 %v3425_v15  ;;  %v925_v14 = vld [vmem:[%s12294_s18 + $0x1778] sm:$0xff]  ;;  %v924_v15 = vld [vmem:[%s12294_s18 + $0x1770] sm:$0xff] }
 0x5e2   : > { %v3220_v55 = vpop.xlane.xlu1 %3219  ;;  %v3217_v30 = vpop.xlane.xlu0 %3216 }
 0x5e3   : > { %v9798_v33 = vsel %vm6556_vm14, %v9797_v28, %v9793_v24  ;;  %v4944_v38 = vmul.f32 0.015625, %v3220_v55  ;;  %v4943_v27 = vmul.f32 0.015625, %v3217_v30  ;;  %v3452_v24 = vsel %vm1198_vm0, %v925_v14, 0.0 }
 0x5e4   : > { %v9803_v25 = vsel %vm6563_vm15, %v9802_v26, %v9798_v33  ;;  %v3449_v26 = vsel %vm1198_vm0, %v924_v15, 0.0 }
 0x5e5   : > { %v9811_v48 = vrot.slane %v4944_v38, %v12463_v35  ;;  %v9807_v45 = vrot.slane %v4943_v27, %v12457_v32  ;;  %3435 = vadd.xlane.f32.xlu1 %v3434_v58  ;;  %3432 = vadd.xlane.f32.xlu0 %v3431_v31  ;;  %v15312_v8 = vsel %vm17366_vm11, %v9803_v25, %v14776_v44  ;;  %v927_v58 = vld [vmem:[%s12294_s18 + $0x1788] sm:$0xff]  ;;  %v926_v31 = vld [vmem:[%s12294_s18 + $0x1780] sm:$0xff] }
 0x5e6   : > { %v3226_v51 = vpop.xlane.xlu1 %3225  ;;  %v3223_v54 = vpop.xlane.xlu0 %3222  ;;  %v3458_v25 = vsel %vm1198_vm0, %v927_v58, 0.0 }
 0x5e7   : > { %v9812_v59 = vsel %vm6465_vm1, %v9811_v48, %v9807_v45  ;;  %v4946_v10 = vmul.f32 0.015625, %v3226_v51  ;;  %v4945_v40 = vmul.f32 0.015625, %v3223_v54  ;;  %v3455_v48 = vsel %vm1198_vm0, %v926_v31, 0.0 }
 0x5e9   : > { %v9821_v3 = vrot.slane %v4946_v10, %v12460_v34  ;;  %v9816_v5 = vrot.slane %v4945_v40, %v12466_v36  ;;  %3441 = vadd.xlane.f32.xlu1 %v3440_v2  ;;  %3438 = vadd.xlane.f32.xlu0 %v3437_v29  ;;  %v929_v2 = vld [vmem:[%s12294_s18 + $0x1798] sm:$0xff]  ;;  %v928_v29 = vld [vmem:[%s12294_s18 + $0x1790] sm:$0xff] }
 0x5ea   : > { %v3232_v44 = vpop.xlane.xlu1 %3231  ;;  %v3229_v52 = vpop.xlane.xlu0 %3228 }
 0x5eb   : > { %v9817_v53 = vsel %vm6472_vm2, %v9816_v5, %v9812_v59  ;;  %v4948_v9 = vmul.f32 0.015625, %v3232_v44  ;;  %v4947_v12 = vmul.f32 0.015625, %v3229_v52  ;;  %v3461_v5 = vsel %vm1198_vm0, %v928_v29, 0.0 }
 0x5ec   : > { %v9822_v19 = vsel %vm6479_vm3, %v9821_v3, %v9817_v53  ;;  %v3464_v3 = vsel %vm1198_vm0, %v929_v2, 0.0  ;;  %v930_v53 = vld [vmem:[%s12294_s18 + $0x17a0] sm:$0xff] }
 0x5ed   : > { %v9831_v37 = vrot.slane %v4948_v9, %v12473_v46  ;;  %v9826_v4 = vrot.slane %v4947_v12, %v12476_v47  ;;  %3447 = vadd.xlane.f32.xlu1 %v3446_v7  ;;  %3444 = vadd.xlane.f32.xlu0 %v3443_v50  ;;  %v931_v50 = vld [vmem:[%s12294_s18 + $0x17a8] sm:$0xff] }
 0x5ee   : > { %v3238_v21 = vpop.xlane.xlu1 %3237  ;;  %v3235_v22 = vpop.xlane.xlu0 %3234 }
 0x5ef   : > { %v9827_v28 = vsel %vm6486_vm4, %v9826_v4, %v9822_v19  ;;  %v4950_v55 = vmul.f32 0.015625, %v3238_v21  ;;  %v4949_v30 = vmul.f32 0.015625, %v3235_v22  ;;  %v3467_v4 = vsel %vm1198_vm0, %v930_v53, 0.0 }
 0x5f0   : > { %v9832_v33 = vsel %vm6493_vm5, %v9831_v37, %v9827_v28  ;;  %v3470_v37 = vsel %vm1198_vm0, %v931_v50, 0.0  ;;  %v932_v28 = vld [vmem:[%s12294_s18 + $0x17b0] sm:$0xff] }
 0x5f1   : > { %v9841_v38 = vrot.slane %v4950_v55, %v12491_v0  ;;  %v9836_v27 = vrot.slane %v4949_v30, %v12494_v1  ;;  %3453 = vadd.xlane.f32.xlu1 %v3452_v24  ;;  %3450 = vadd.xlane.f32.xlu0 %v3449_v26  ;;  %v933_v26 = vld [vmem:[%s12294_s18 + $0x17b8] sm:$0xff] }
 0x5f2   : > { %v3244_v41 = vpop.xlane.xlu1 %3243  ;;  %v3241_v60 = vpop.xlane.xlu0 %3240 }
 0x5f3   : > { %v9837_v45 = vsel %vm6500_vm6, %v9836_v27, %v9832_v33  ;;  %v4952_v51 = vmul.f32 0.015625, %v3244_v41  ;;  %v4951_v54 = vmul.f32 0.015625, %v3241_v60  ;;  %v3473_v27 = vsel %vm1198_vm0, %v932_v28, 0.0 }
 0x5f4   : > { %v9842_v59 = vsel %vm17372_vm7, %v9841_v38, %v9837_v45  ;;  %v3476_v38 = vsel %vm1198_vm0, %v933_v26, 0.0  ;;  %v934_v45 = vld [vmem:[%s12294_s18 + $0x17c0] sm:$0xff] }
 0x5f5   : > { %v9851_v10 = vrot.slane %v4952_v51, %v12508_v18  ;;  %v9846_v40 = vrot.slane %v4951_v54, %v12514_v23  ;;  %3459 = vadd.xlane.f32.xlu1 %v3458_v25  ;;  %3456 = vadd.xlane.f32.xlu0 %v3455_v48  ;;  %v935_v48 = vld [vmem:[%s12294_s18 + $0x17c8] sm:$0xff] }
 0x5f6   : > { %v3250_v62 = vpop.xlane.xlu1 %3249  ;;  %v3247_v63 = vpop.xlane.xlu0 %3246 }
 0x5f7   : > { %v9847_v44 = vsel %vm17367_vm8, %v9846_v40, %v9842_v59  ;;  %v4954_v52 = vmul.f32 0.015625, %v3250_v62  ;;  %v4953_v7 = vmul.f32 0.015625, %v3247_v63  ;;  %v3479_v40 = vsel %vm1198_vm0, %v934_v45, 0.0 }
 0x5f8   : > { %v9852_v9 = vsel %vm17437_vm9, %v9851_v10, %v9847_v44  ;;  %vm17438_vm9 = vcmask 786112   ;;  %v3482_v10 = vsel %vm1198_vm0, %v935_v48, 0.0  ;;  %v936_v44 = vld [vmem:[%s12294_s18 + $0x17d0] sm:$0xff] }
 0x5f9   : > { %v9861_v12 = vrot.slane %v4954_v52, %v12530_v43  ;;  %v9856_v14 = vrot.slane %v4953_v7, %v12524_v39  ;;  %3465 = vadd.xlane.f32.xlu1 %v3464_v3  ;;  %3462 = vadd.xlane.f32.xlu0 %v3461_v5  ;;  %v937_v5 = vld [vmem:[%s12294_s18 + $0x17d8] sm:$0xff] }
 0x5fa   : > { %v3256_v15 = vpop.xlane.xlu1 %3255  ;;  %v3253_v19 = vpop.xlane.xlu0 %3252 }
 0x5fb   : > { %v9857_v21 = vsel %vm6528_vm10, %v9856_v14, %v9852_v9  ;;  %v4956_v22 = vmul.f32 0.015625, %v3256_v15  ;;  %v4955_v24 = vmul.f32 0.015625, %v3253_v19  ;;  %v3488_v14 = vsel %vm1198_vm0, %v937_v5, 0.0 }
 0x5fc   : > { %v9862_v55 = vsel %vm17438_vm9, %v9861_v12, %v9857_v21  ;;  %v3485_v15 = vsel %vm1198_vm0, %v936_v44, 0.0  ;;  %v939_v21 = vld [vmem:[%s12294_s18 + $0x17e8] sm:$0xff]  ;;  %vm17439_vm9 = vcmask 654912  }
 0x5fd   : > { %v9871_v30 = vrot.slane %v4956_v22, %v12546_v61  ;;  %v9866_v58 = vrot.slane %v4955_v24, %v12540_v57  ;;  %3471 = vadd.xlane.f32.xlu1 %v3470_v37  ;;  %3468 = vadd.xlane.f32.xlu0 %v3467_v4  ;;  %v938_v22 = vld [vmem:[%s12294_s18 + $0x17e0] sm:$0xff] }
 0x5fe   : > { %v3262_v31 = vpop.xlane.xlu1 %3261  ;;  %v3259_v33 = vpop.xlane.xlu0 %3258 }
 0x5ff   : > { %v9867_v41 = vsel %vm6542_vm12, %v9866_v58, %v9862_v55  ;;  %v4958_v60 = vmul.f32 0.015625, %v3262_v31  ;;  %v4957_v25 = vmul.f32 0.015625, %v3259_v33  ;;  %v3494_v55 = vsel %vm1198_vm0, %v939_v21, 0.0 }
 0x600   : > { %v9872_v51 = vsel %vm6549_vm13, %v9871_v30, %v9867_v41  ;;  %v3491_v30 = vsel %vm1198_vm0, %v938_v22, 0.0 }
 0x601   : > { %v9881_v54 = vrot.slane %v4958_v60, %v12561_v13  ;;  %v9876_v2 = vrot.slane %v4957_v25, %v12556_v11  ;;  %3477 = vadd.xlane.f32.xlu1 %v3476_v38  ;;  %3474 = vadd.xlane.f32.xlu0 %v3473_v27  ;;  %v958_v38 = vld [vmem:[%s12294_s18 + $0x1880] sm:$0xff]  ;;  %v940_v27 = vld [vmem:[%s12294_s18 + $0x17f0] sm:$0xff] }
 0x602   : > { %v3268_v29 = vpop.xlane.xlu1 %3267  ;;  %v3265_v59 = vpop.xlane.xlu0 %3264 }
 0x603   : > { %v9877_v62 = vsel %vm6556_vm14, %v9876_v2, %v9872_v51  ;;  %v4960_v63 = vmul.f32 0.015625, %v3268_v29  ;;  %v4959_v3 = vmul.f32 0.015625, %v3265_v59  ;;  %v3551_v51 = vsel %vm1198_vm0, %v958_v38, 0.0 }
 0x604   : > { %v9882_v52 = vsel %vm6563_vm15, %v9881_v54, %v9877_v62  ;;  %v3497_v54 = vsel %vm1198_vm0, %v940_v27, 0.0 }
 0x605   : > { %v9890_v7 = vrot.slane %v4960_v63, %v12463_v35  ;;  %v9886_v50 = vrot.slane %v4959_v3, %v12457_v32  ;;  %3483 = vadd.xlane.f32.xlu1 %v3482_v10  ;;  %3480 = vadd.xlane.f32.xlu0 %v3479_v40  ;;  %v15379_v53 = vsel %vm17366_vm11, %v9882_v52, %v14843_v42  ;;  %v942_v10 = vld [vmem:[%s12294_s18 + $0x1800] sm:$0xff]  ;;  %v959_v40 = vld [vmem:[%s12294_s18 + $0x1888] sm:$0xff] }
 0x606   : > { %v3274_v9 = vpop.xlane.xlu1 %3273  ;;  %v3271_v12 = vpop.xlane.xlu0 %3270  ;;  %v3503_v52 = vsel %vm1198_vm0, %v942_v10, 0.0 }
 0x607   : > { %v9891_v19 = vsel %vm6465_vm1, %v9890_v7, %v9886_v50  ;;  %v4962_v37 = vmul.f32 0.015625, %v3274_v9  ;;  %v4961_v4 = vmul.f32 0.015625, %v3271_v12  ;;  %v3554_v7 = vsel %vm1198_vm0, %v959_v40, 0.0 }
 0x609   : > { %v9900_v24 = vrot.slane %v4962_v37, %v12460_v34  ;;  %v9895_v26 = vrot.slane %v4961_v4, %v12466_v36  ;;  %3489 = vadd.xlane.f32.xlu1 %v3488_v14  ;;  %3486 = vadd.xlane.f32.xlu0 %v3485_v15  ;;  %v960_v14 = vld [vmem:[%s12294_s18 + $0x1890] sm:$0xff]  ;;  %v943_v15 = vld [vmem:[%s12294_s18 + $0x1808] sm:$0xff] }
 0x60a   : > { %v3280_v42 = vpop.xlane.xlu1 %3279  ;;  %v3277_v28 = vpop.xlane.xlu0 %3276 }
 0x60b   : > { %v9896_v58 = vsel %vm6472_vm2, %v9895_v26, %v9891_v19  ;;  %v4964_v31 = vmul.f32 0.015625, %v3280_v42  ;;  %v4963_v33 = vmul.f32 0.015625, %v3277_v28  ;;  %v3506_v26 = vsel %vm1198_vm0, %v943_v15, 0.0 }
 0x60c   : > { %v9901_v41 = vsel %vm6479_vm3, %v9900_v24, %v9896_v58  ;;  %v3557_v24 = vsel %vm1198_vm0, %v960_v14, 0.0  ;;  %v1086_v58 = vld [vmem:[%s12294_s18 + $0x1c80] sm:$0xff] }
 0x60d   : > { %v9910_v60 = vrot.slane %v4964_v31, %v12473_v46  ;;  %v9905_v25 = vrot.slane %v4963_v33, %v12476_v47  ;;  %3495 = vadd.xlane.f32.xlu1 %v3494_v55  ;;  %3492 = vadd.xlane.f32.xlu0 %v3491_v30  ;;  %v1087_v30 = vld [vmem:[%s12294_s18 + $0x1c88] sm:$0xff] }
 0x60e   : > { %v3286_v48 = vpop.xlane.xlu1 %3285  ;;  %v3283_v45 = vpop.xlane.xlu0 %3282 }
 0x60f   : > { %v9906_v2 = vsel %vm6486_vm4, %v9905_v25, %v9901_v41  ;;  %v4966_v29 = vmul.f32 0.015625, %v3286_v48  ;;  %v4965_v59 = vmul.f32 0.015625, %v3283_v45  ;;  %v3935_v25 = vsel %vm1198_vm0, %v1086_v58, 0.0 }
 0x610   : > { %v9911_v62 = vsel %vm6493_vm5, %v9910_v60, %v9906_v2  ;;  %v3938_v60 = vsel %vm1198_vm0, %v1087_v30, 0.0  ;;  %v944_v2 = vld [vmem:[%s12294_s18 + $0x1810] sm:$0xff] }
 0x611   : > { %v9920_v63 = vrot.slane %v4966_v29, %v12491_v0  ;;  %v9915_v3 = vrot.slane %v4965_v59, %v12494_v1  ;;  %3552 = vadd.xlane.f32.xlu1 %v3551_v51  ;;  %3498 = vadd.xlane.f32.xlu0 %v3497_v54  ;;  %v961_v54 = vld [vmem:[%s12294_s18 + $0x1898] sm:$0xff] }
 0x612   : > { %v3292_v5 = vpop.xlane.xlu1 %3291  ;;  %v3289_v44 = vpop.xlane.xlu0 %3288 }
 0x613   : > { %v9916_v50 = vsel %vm6500_vm6, %v9915_v3, %v9911_v62  ;;  %v4968_v9 = vmul.f32 0.015625, %v3292_v5  ;;  %v4967_v12 = vmul.f32 0.015625, %v3289_v44  ;;  %v3509_v3 = vsel %vm1198_vm0, %v944_v2, 0.0 }
 0x614   : > { %v9921_v19 = vsel %vm17372_vm7, %v9920_v63, %v9916_v50  ;;  %v3560_v63 = vsel %vm1198_vm0, %v961_v54, 0.0  ;;  %v990_v50 = vld [vmem:[%s12294_s18 + $0x1980] sm:$0xff] }
 0x615   : > { %v9930_v37 = vrot.slane %v4968_v9, %v12508_v18  ;;  %v9925_v4 = vrot.slane %v4967_v12, %v12514_v23  ;;  %3504 = vadd.xlane.f32.xlu1 %v3503_v52  ;;  %3555 = vadd.xlane.f32.xlu0 %v3554_v7  ;;  %v991_v7 = vld [vmem:[%s12294_s18 + $0x1988] sm:$0xff] }
 0x616   : > { %v3298_v21 = vpop.xlane.xlu1 %3297  ;;  %v3295_v22 = vpop.xlane.xlu0 %3294 }
 0x617   : > { %v9926_v42 = vsel %vm17367_vm8, %v9925_v4, %v9921_v19  ;;  %v4970_v28 = vmul.f32 0.015625, %v3298_v21  ;;  %v4969_v55 = vmul.f32 0.015625, %v3295_v22  ;;  %v3647_v4 = vsel %vm1198_vm0, %v990_v50, 0.0 }
 0x618   : > { %v9931_v31 = vsel %vm17439_vm9, %v9930_v37, %v9926_v42  ;;  %vm17440_vm9 = vcmask 786112   ;;  %v3650_v37 = vsel %vm1198_vm0, %v991_v7, 0.0  ;;  %v1070_v42 = vld [vmem:[%s12294_s18 + $0x1c00] sm:$0xff] }
 0x619   : > { %v9940_v33 = vrot.slane %v4970_v28, %v12530_v43  ;;  %v9935_v38 = vrot.slane %v4969_v55, %v12524_v39  ;;  %3558 = vadd.xlane.f32.xlu1 %v3557_v24  ;;  %3507 = vadd.xlane.f32.xlu0 %v3506_v26  ;;  %v1071_v26 = vld [vmem:[%s12294_s18 + $0x1c08] sm:$0xff] }
 0x61a   : > { %v3304_v27 = vpop.xlane.xlu1 %3303  ;;  %v3301_v41 = vpop.xlane.xlu0 %3300 }
 0x61b   : > { %v9936_v48 = vsel %vm6528_vm10, %v9935_v38, %v9931_v31  ;;  %v4972_v45 = vmul.f32 0.015625, %v3304_v27  ;;  %v4971_v51 = vmul.f32 0.015625, %v3301_v41  ;;  %v3890_v38 = vsel %vm1198_vm0, %v1071_v26, 0.0 }
 0x61c   : > { %v9941_v29 = vsel %vm17440_vm9, %v9940_v33, %v9936_v48  ;;  %v3887_v27 = vsel %vm1198_vm0, %v1070_v42, 0.0  ;;  %v945_v48 = vld [vmem:[%s12294_s18 + $0x1818] sm:$0xff]  ;;  %vm17441_vm9 = vcmask 654912  }
 0x61d   : > { %v9950_v59 = vrot.slane %v4972_v45, %v12546_v61  ;;  %v9945_v10 = vrot.slane %v4971_v51, %v12540_v57  ;;  %3939 = vadd.xlane.f32.xlu1 %v3938_v60  ;;  %3936 = vadd.xlane.f32.xlu0 %v3935_v25  ;;  %v1088_v45 = vld [vmem:[%s12294_s18 + $0x1c90] sm:$0xff] }
 0x61e   : > { %v3310_v40 = vpop.xlane.xlu1 %3309  ;;  %v3307_v62 = vpop.xlane.xlu0 %3306 }
 0x61f   : > { %v9946_v5 = vsel %vm6542_vm12, %v9945_v10, %v9941_v29  ;;  %v4974_v44 = vmul.f32 0.015625, %v3310_v40  ;;  %v4973_v52 = vmul.f32 0.015625, %v3307_v62  ;;  %v3512_v29 = vsel %vm1198_vm0, %v945_v48, 0.0 }
 0x620   : > { %v9951_v9 = vsel %vm6549_vm13, %v9950_v59, %v9946_v5  ;;  %v3941_v59 = vsel %vm1198_vm0, %v1088_v45, 0.0 }
 0x621   : > { %v9960_v12 = vrot.slane %v4974_v44, %v12561_v13  ;;  %v9955_v14 = vrot.slane %v4973_v52, %v12556_v11  ;;  %3561 = vadd.xlane.f32.xlu1 %v3560_v63  ;;  %3510 = vadd.xlane.f32.xlu0 %v3509_v3  ;;  %v974_v63 = vld [vmem:[%s12294_s18 + $0x1900] sm:$0xff] }
 0x622   : > { %v3316_v15 = vpop.xlane.xlu1 %3315  ;;  %v3313_v19 = vpop.xlane.xlu0 %3312  ;;  %v962_v3 = vld [vmem:[%s12294_s18 + $0x18a0] sm:$0xff] }
 0x623   : > { %v9956_v21 = vsel %vm6556_vm14, %v9955_v14, %v9951_v9  ;;  %v4976_v22 = vmul.f32 0.015625, %v3316_v15  ;;  %v4975_v24 = vmul.f32 0.015625, %v3313_v19  ;;  %v3599_v9 = vsel %vm1198_vm0, %v974_v63, 0.0 }
 0x624   : > { %v9961_v28 = vsel %vm6563_vm15, %v9960_v12, %v9956_v21  ;;  %v3563_v12 = vsel %vm1198_vm0, %v962_v3, 0.0 }
 0x625   : > { %v9969_v55 = vrot.slane %v4976_v22, %v12463_v35  ;;  %v9965_v30 = vrot.slane %v4975_v24, %v12457_v32  ;;  %3651 = vadd.xlane.f32.xlu1 %v3650_v37  ;;  %3648 = vadd.xlane.f32.xlu0 %v3647_v4  ;;  %v15446_v58 = vsel %vm17366_vm11, %v9961_v28, %v14910_v6  ;;  %v992_v37 = vld [vmem:[%s12294_s18 + $0x1990] sm:$0xff]  ;;  %v975_v4 = vld [vmem:[%s12294_s18 + $0x1908] sm:$0xff] }
 0x626   : > { %v3322_v31 = vpop.xlane.xlu1 %3321  ;;  %v3319_v33 = vpop.xlane.xlu0 %3318  ;;  %v3653_v28 = vsel %vm1198_vm0, %v992_v37, 0.0 }
 0x627   : > { %v9970_v41 = vsel %vm6465_vm1, %v9969_v55, %v9965_v30  ;;  %v4978_v60 = vmul.f32 0.015625, %v3322_v31  ;;  %v4977_v25 = vmul.f32 0.015625, %v3319_v33  ;;  %v3602_v55 = vsel %vm1198_vm0, %v975_v4, 0.0 }
 0x629   : > { %v9979_v51 = vrot.slane %v4978_v60, %v12460_v34  ;;  %v9974_v54 = vrot.slane %v4977_v25, %v12466_v36  ;;  %3891 = vadd.xlane.f32.xlu1 %v3890_v38  ;;  %3888 = vadd.xlane.f32.xlu0 %v3887_v27  ;;  %v1089_v38 = vld [vmem:[%s12294_s18 + $0x1c98] sm:$0xff]  ;;  %v1072_v27 = vld [vmem:[%s12294_s18 + $0x1c10] sm:$0xff] }
 0x62a   : > { %v3328_v6 = vpop.xlane.xlu1 %3327  ;;  %v3325_v2 = vpop.xlane.xlu0 %3324 }
 0x62b   : > { %v9975_v10 = vsel %vm6472_vm2, %v9974_v54, %v9970_v41  ;;  %v4980_v40 = vmul.f32 0.015625, %v3328_v6  ;;  %v4979_v62 = vmul.f32 0.015625, %v3325_v2  ;;  %v3893_v54 = vsel %vm1198_vm0, %v1072_v27, 0.0 }
 0x62c   : > { %v9980_v5 = vsel %vm6479_vm3, %v9979_v51, %v9975_v10  ;;  %v3944_v51 = vsel %vm1198_vm0, %v1089_v38, 0.0  ;;  %v1118_v10 = vld [vmem:[%s12294_s18 + $0x1d80] sm:$0xff] }
 0x62d   : > { %v9989_v44 = vrot.slane %v4980_v40, %v12473_v46  ;;  %v9984_v52 = vrot.slane %v4979_v62, %v12476_v47  ;;  %3513 = vadd.xlane.f32.xlu1 %v3512_v29  ;;  %3942 = vadd.xlane.f32.xlu0 %v3941_v59  ;;  %v1119_v59 = vld [vmem:[%s12294_s18 + $0x1d88] sm:$0xff] }
 0x62e   : > { %v3334_v7 = vpop.xlane.xlu1 %3333  ;;  %v3331_v50 = vpop.xlane.xlu0 %3330 }
 0x62f   : > { %v9985_v14 = vsel %vm6486_vm4, %v9984_v52, %v9980_v5  ;;  %v4982_v15 = vmul.f32 0.015625, %v3334_v7  ;;  %v4981_v19 = vmul.f32 0.015625, %v3331_v50  ;;  %v4031_v52 = vsel %vm1198_vm0, %v1118_v10, 0.0 }
 0x630   : > { %v9990_v21 = vsel %vm6493_vm5, %v9989_v44, %v9985_v14  ;;  %v4034_v44 = vsel %vm1198_vm0, %v1119_v59, 0.0  ;;  %v946_v14 = vld [vmem:[%s12294_s18 + $0x1820] sm:$0xff] }
 0x631   : > { %v9999_v22 = vrot.slane %v4982_v15, %v12491_v0  ;;  %v9994_v24 = vrot.slane %v4981_v19, %v12494_v1  ;;  %3600 = vadd.xlane.f32.xlu1 %v3599_v9  ;;  %3564 = vadd.xlane.f32.xlu0 %v3563_v12  ;;  %v963_v12 = vld [vmem:[%s12294_s18 + $0x18a8] sm:$0xff] }
 0x632   : > { %v3340_v26 = vpop.xlane.xlu1 %3339  ;;  %v3337_v42 = vpop.xlane.xlu0 %3336 }
 0x633   : > { %v9995_v30 = vsel %vm6500_vm6, %v9994_v24, %v9990_v21  ;;  %v4984_v31 = vmul.f32 0.015625, %v3340_v26  ;;  %v4983_v33 = vmul.f32 0.015625, %v3337_v42  ;;  %v3515_v24 = vsel %vm1198_vm0, %v946_v14, 0.0 }
 0x634   : > { %v10000_v41 = vsel %vm17372_vm7, %v9999_v22, %v9995_v30  ;;  %v3566_v22 = vsel %vm1198_vm0, %v963_v12, 0.0  ;;  %v976_v30 = vld [vmem:[%s12294_s18 + $0x1910] sm:$0xff] }
 0x635   : > { %v10009_v60 = vrot.slane %v4984_v31, %v12508_v18  ;;  %v10004_v25 = vrot.slane %v4983_v33, %v12514_v23  ;;  %3654 = vadd.xlane.f32.xlu1 %v3653_v28  ;;  %3603 = vadd.xlane.f32.xlu0 %v3602_v55  ;;  %v993_v55 = vld [vmem:[%s12294_s18 + $0x1998] sm:$0xff] }
 0x636   : > { %v3346_v48 = vpop.xlane.xlu1 %3345  ;;  %v3343_v45 = vpop.xlane.xlu0 %3342 }
 0x637   : > { %v10005_v6 = vsel %vm17367_vm8, %v10004_v25, %v10000_v41  ;;  %v4986_v2 = vmul.f32 0.015625, %v3346_v48  ;;  %v4985_v29 = vmul.f32 0.015625, %v3343_v45  ;;  %v3605_v25 = vsel %vm1198_vm0, %v976_v30, 0.0 }
 0x638   : > { %v10010_v40 = vsel %vm17441_vm9, %v10009_v60, %v10005_v6  ;;  %vm17442_vm9 = vcmask 786112   ;;  %v3656_v60 = vsel %vm1198_vm0, %v993_v55, 0.0  ;;  %v1073_v6 = vld [vmem:[%s12294_s18 + $0x1c18] sm:$0xff] }
 0x639   : > { %v10019_v62 = vrot.slane %v4986_v2, %v12530_v43  ;;  %v10014_v63 = vrot.slane %v4985_v29, %v12524_v39  ;;  %3945 = vadd.xlane.f32.xlu1 %v3944_v51  ;;  %3894 = vadd.xlane.f32.xlu0 %v3893_v54  ;;  %v1090_v54 = vld [vmem:[%s12294_s18 + $0x1ca0] sm:$0xff] }
 0x63a   : > { %v3352_v3 = vpop.xlane.xlu1 %3351  ;;  %v3349_v5 = vpop.xlane.xlu0 %3348 }
 0x63b   : > { %v10015_v7 = vsel %vm6528_vm10, %v10014_v63, %v10010_v40  ;;  %v4988_v50 = vmul.f32 0.015625, %v3352_v3  ;;  %v4987_v9 = vmul.f32 0.015625, %v3349_v5  ;;  %v3947_v63 = vsel %vm1198_vm0, %v1090_v54, 0.0 }
 0x63c   : > { %v10020_v15 = vsel %vm17442_vm9, %v10019_v62, %v10015_v7  ;;  %v3896_v3 = vsel %vm1198_vm0, %v1073_v6, 0.0  ;;  %v1103_v7 = vld [vmem:[%s12294_s18 + $0x1d08] sm:$0xff]  ;;  %vm17444_vm9 = vcmask 654912  }
 0x63d   : > { %v10029_v19 = vrot.slane %v4988_v50, %v12546_v61  ;;  %v10024_v37 = vrot.slane %v4987_v9, %v12540_v57  ;;  %4035 = vadd.xlane.f32.xlu1 %v4034_v44  ;;  %4032 = vadd.xlane.f32.xlu0 %v4031_v52  ;;  %v1102_v50 = vld [vmem:[%s12294_s18 + $0x1d00] sm:$0xff] }
 0x63e   : > { %v3358_v4 = vpop.xlane.xlu1 %3357  ;;  %v3355_v21 = vpop.xlane.xlu0 %3354 }
 0x63f   : > { %v10025_v26 = vsel %vm6542_vm12, %v10024_v37, %v10020_v15  ;;  %v4990_v42 = vmul.f32 0.015625, %v3358_v4  ;;  %v4989_v28 = vmul.f32 0.015625, %v3355_v21  ;;  %v3986_v15 = vsel %vm1198_vm0, %v1103_v7, 0.0 }
 0x640   : > { %v10030_v31 = vsel %vm6549_vm13, %v10029_v19, %v10025_v26  ;;  %v3983_v19 = vsel %vm1198_vm0, %v1102_v50, 0.0 }
 0x641   : > { %v10039_v33 = vrot.slane %v4990_v42, %v12561_v13  ;;  %v10034_v38 = vrot.slane %v4989_v28, %v12556_v11  ;;  %3567 = vadd.xlane.f32.xlu1 %v3566_v22  ;;  %3516 = vadd.xlane.f32.xlu0 %v3515_v24  ;;  %v947_v22 = vld [vmem:[%s12294_s18 + $0x1828] sm:$0xff]  ;;  %v1120_v24 = vld [vmem:[%s12294_s18 + $0x1d90] sm:$0xff] }
 0x642   : > { %v3364_v27 = vpop.xlane.xlu1 %3363  ;;  %v3361_v41 = vpop.xlane.xlu0 %3360 }
 0x643   : > { %v10035_v48 = vsel %vm6556_vm14, %v10034_v38, %v10030_v31  ;;  %v4992_v45 = vmul.f32 0.015625, %v3364_v27  ;;  %v4991_v51 = vmul.f32 0.015625, %v3361_v41  ;;  %v3518_v31 = vsel %vm1198_vm0, %v947_v22, 0.0 }
 0x644   : > { %v10040_v2 = vsel %vm6563_vm15, %v10039_v33, %v10035_v48  ;;  %v4037_v33 = vsel %vm1198_vm0, %v1120_v24, 0.0 }
 0x645   : > { %v10048_v29 = vrot.slane %v4992_v45, %v12463_v35  ;;  %v10044_v59 = vrot.slane %v4991_v51, %v12457_v32  ;;  %3657 = vadd.xlane.f32.xlu1 %v3656_v60  ;;  %3606 = vadd.xlane.f32.xlu0 %v3605_v25  ;;  %v15513_v10 = vsel %vm17366_vm11, %v10040_v2, %v14977_v20  ;;  %v977_v60 = vld [vmem:[%s12294_s18 + $0x1918] sm:$0xff]  ;;  %v964_v25 = vld [vmem:[%s12294_s18 + $0x18b0] sm:$0xff] }
 0x646   : > { %17443 = vst [vmem:[#allocation5_spill] sm:$0xff] %v15513_v10  ;;  %v3370_v40 = vpop.xlane.xlu1 %3369  ;;  %v3367_v62 = vpop.xlane.xlu0 %3366  ;;  %v3608_v2 = vsel %vm1198_vm0, %v977_v60, 0.0 }
 0x647   : > { %v10049_v5 = vsel %vm6465_vm1, %v10048_v29, %v10044_v59  ;;  %v4994_v44 = vmul.f32 0.015625, %v3370_v40  ;;  %v4993_v52 = vmul.f32 0.015625, %v3367_v62  ;;  %v3569_v29 = vsel %vm1198_vm0, %v964_v25, 0.0 }
 0x649   : > { %v10058_v9 = vrot.slane %v4994_v44, %v12460_v34  ;;  %v10053_v12 = vrot.slane %v4993_v52, %v12466_v36  ;;  %3948 = vadd.xlane.f32.xlu1 %v3947_v63  ;;  %3897 = vadd.xlane.f32.xlu0 %v3896_v3  ;;  %v1074_v63 = vld [vmem:[%s12294_s18 + $0x1c20] sm:$0xff] }
 0x64a   : > { %v3376_v20 = vpop.xlane.xlu1 %3375  ;;  %v3373_v14 = vpop.xlane.xlu0 %3372  ;;  %v994_v3 = vld [vmem:[%s12294_s18 + $0x19a0] sm:$0xff] }
 0x64b   : > { %v10054_v37 = vsel %vm6472_vm2, %v10053_v12, %v10049_v5  ;;  %v4996_v4 = vmul.f32 0.015625, %v3376_v20  ;;  %v4995_v21 = vmul.f32 0.015625, %v3373_v14  ;;  %v3659_v12 = vsel %vm1198_vm0, %v994_v3, 0.0 }
 0x64c   : > { %v10059_v26 = vsel %vm6479_vm3, %v10058_v9, %v10054_v37  ;;  %v3899_v9 = vsel %vm1198_vm0, %v1074_v63, 0.0  ;;  %v1091_v37 = vld [vmem:[%s12294_s18 + $0x1ca8] sm:$0xff] }
 0x64d   : > { %v10068_v42 = vrot.slane %v4996_v4, %v12473_v46  ;;  %v10063_v28 = vrot.slane %v4995_v21, %v12476_v47  ;;  %3987 = vadd.xlane.f32.xlu1 %v3986_v15  ;;  %3984 = vadd.xlane.f32.xlu0 %v3983_v19  ;;  %v1104_v19 = vld [vmem:[%s12294_s18 + $0x1d10] sm:$0xff] }
 0x64e   : > { %v3382_v55 = vpop.xlane.xlu1 %3381  ;;  %v3379_v30 = vpop.xlane.xlu0 %3378 }
 0x64f   : > { %v10064_v38 = vsel %vm6486_vm4, %v10063_v28, %v10059_v26  ;;  %v4998_v27 = vmul.f32 0.015625, %v3382_v55  ;;  %v4997_v41 = vmul.f32 0.015625, %v3379_v30  ;;  %v3950_v28 = vsel %vm1198_vm0, %v1091_v37, 0.0 }
 0x650   : > { %v10069_v48 = vsel %vm6493_vm5, %v10068_v42, %v10064_v38  ;;  %v3989_v42 = vsel %vm1198_vm0, %v1104_v19, 0.0  ;;  %v1121_v38 = vld [vmem:[%s12294_s18 + $0x1d98] sm:$0xff] }
 0x651   : > { %v10078_v45 = vrot.slane %v4998_v27, %v12491_v0  ;;  %v10073_v51 = vrot.slane %v4997_v41, %v12494_v1  ;;  %3519 = vadd.xlane.f32.xlu1 %v3518_v31  ;;  %4038 = vadd.xlane.f32.xlu0 %v4037_v33  ;;  %v948_v33 = vld [vmem:[%s12294_s18 + $0x1830] sm:$0xff] }
 0x652   : > { %v3388_v54 = vpop.xlane.xlu1 %3387  ;;  %v3385_v6 = vpop.xlane.xlu0 %3384 }
 0x653   : > { %v10074_v59 = vsel %vm6500_vm6, %v10073_v51, %v10069_v48  ;;  %v5000_v40 = vmul.f32 0.015625, %v3388_v54  ;;  %v4999_v62 = vmul.f32 0.015625, %v3385_v6  ;;  %v4040_v51 = vsel %vm1198_vm0, %v1121_v38, 0.0 }
 0x654   : > { %v10079_v5 = vsel %vm17372_vm7, %v10078_v45, %v10074_v59  ;;  %v3521_v45 = vsel %vm1198_vm0, %v948_v33, 0.0  ;;  %v965_v59 = vld [vmem:[%s12294_s18 + $0x18b8] sm:$0xff] }
 0x655   : > { %v10088_v44 = vrot.slane %v5000_v40, %v12508_v18  ;;  %v10083_v52 = vrot.slane %v4999_v62, %v12514_v23  ;;  %3609 = vadd.xlane.f32.xlu1 %v3608_v2  ;;  %3570 = vadd.xlane.f32.xlu0 %v3569_v29  ;;  %v978_v29 = vld [vmem:[%s12294_s18 + $0x1920] sm:$0xff] }
 0x656   : > { %v3394_v7 = vpop.xlane.xlu1 %3393  ;;  %v3391_v50 = vpop.xlane.xlu0 %3390 }
 0x657   : > { %v10084_v20 = vsel %vm17367_vm8, %v10083_v52, %v10079_v5  ;;  %v5002_v14 = vmul.f32 0.015625, %v3394_v7  ;;  %v5001_v15 = vmul.f32 0.015625, %v3391_v50  ;;  %v3572_v52 = vsel %vm1198_vm0, %v965_v59, 0.0 }
 0x658   : > { %v10089_v4 = vsel %vm17444_vm9, %v10088_v44, %v10084_v20  ;;  %vm17445_vm9 = vcmask 786112   ;;  %v3611_v44 = vsel %vm1198_vm0, %v978_v29, 0.0  ;;  %v995_v20 = vld [vmem:[%s12294_s18 + $0x19a8] sm:$0xff] }
 0x659   : > { %v10098_v21 = vrot.slane %v5002_v14, %v12530_v43  ;;  %v10093_v22 = vrot.slane %v5001_v15, %v12524_v39  ;;  %3900 = vadd.xlane.f32.xlu1 %v3899_v9  ;;  %3660 = vadd.xlane.f32.xlu0 %v3659_v12  ;;  %v1075_v12 = vld [vmem:[%s12294_s18 + $0x1c28] sm:$0xff] }
 0x65a   : > { %v3400_v24 = vpop.xlane.xlu1 %3399  ;;  %v3397_v26 = vpop.xlane.xlu0 %3396 }
 0x65b   : > { %v10094_v55 = vsel %vm6528_vm10, %v10093_v22, %v10089_v4  ;;  %v5004_v30 = vmul.f32 0.015625, %v3400_v24  ;;  %v5003_v31 = vmul.f32 0.015625, %v3397_v26  ;;  %v3902_v22 = vsel %vm1198_vm0, %v1075_v12, 0.0 }
 0x65c   : > { %v10099_v27 = vsel %vm17445_vm9, %v10098_v21, %v10094_v55  ;;  %v3662_v24 = vsel %vm1198_vm0, %v995_v20, 0.0  ;;  %v1105_v55 = vld [vmem:[%s12294_s18 + $0x1d18] sm:$0xff]  ;;  %vm17447_vm9 = vcmask 654912  }
 0x65d   : > { %v10108_v41 = vrot.slane %v5004_v30, %v12546_v61  ;;  %v10103_v60 = vrot.slane %v5003_v31, %v12540_v57  ;;  %3990 = vadd.xlane.f32.xlu1 %v3989_v42  ;;  %3951 = vadd.xlane.f32.xlu0 %v3950_v28  ;;  %v1092_v30 = vld [vmem:[%s12294_s18 + $0x1cb0] sm:$0xff] }
 0x65e   : > { %v3406_v25 = vpop.xlane.xlu1 %3405  ;;  %v3403_v48 = vpop.xlane.xlu0 %3402 }
 0x65f   : > { %v10104_v54 = vsel %vm6542_vm12, %v10103_v60, %v10099_v27  ;;  %v5006_v6 = vmul.f32 0.015625, %v3406_v25  ;;  %v5005_v2 = vmul.f32 0.015625, %v3403_v48  ;;  %v3992_v27 = vsel %vm1198_vm0, %v1105_v55, 0.0 }
 0x660   : > { %v10109_v40 = vsel %vm6549_vm13, %v10108_v41, %v10104_v54  ;;  %v3953_v41 = vsel %vm1198_vm0, %v1092_v30, 0.0 }
 0x661   : > { %v10118_v62 = vrot.slane %v5006_v6, %v12561_v13  ;;  %v10113_v63 = vrot.slane %v5005_v2, %v12556_v11  ;;  %3522 = vadd.xlane.f32.xlu1 %v3521_v45  ;;  %4041 = vadd.xlane.f32.xlu0 %v4040_v51  ;;  %v949_v45 = vld [vmem:[%s12294_s18 + $0x1838] sm:$0xff]  ;;  %v1122_v51 = vld [vmem:[%s12294_s18 + $0x1da0] sm:$0xff] }
 0x662   : > { %v3412_v3 = vpop.xlane.xlu1 %3411  ;;  %v3409_v5 = vpop.xlane.xlu0 %3408 }
 0x663   : > { %v10114_v7 = vsel %vm6556_vm14, %v10113_v63, %v10109_v40  ;;  %v5008_v50 = vmul.f32 0.015625, %v3412_v3  ;;  %v5007_v9 = vmul.f32 0.015625, %v3409_v5  ;;  %v3524_v40 = vsel %vm1198_vm0, %v949_v45, 0.0 }
 0x664   : > { %v10119_v14 = vsel %vm6563_vm15, %v10118_v62, %v10114_v7  ;;  %v4043_v62 = vsel %vm1198_vm0, %v1122_v51, 0.0 }
 0x665   : > { %v10127_v15 = vrot.slane %v5008_v50, %v12463_v35  ;;  %v10123_v19 = vrot.slane %v5007_v9, %v12457_v32  ;;  %3612 = vadd.xlane.f32.xlu1 %v3611_v44  ;;  %3573 = vadd.xlane.f32.xlu0 %v3572_v52  ;;  %v15580_v37 = vsel %vm17366_vm11, %v10119_v14, %v15044_v56  ;;  %v979_v44 = vld [vmem:[%s12294_s18 + $0x1928] sm:$0xff]  ;;  %v966_v52 = vld [vmem:[%s12294_s18 + $0x18c0] sm:$0xff] }
 0x666   : > { %17446 = vst [vmem:[#allocation6_spill] sm:$0xff] %v15580_v37  ;;  %v3418_v4 = vpop.xlane.xlu1 %3417  ;;  %v3415_v21 = vpop.xlane.xlu0 %3414  ;;  %v3614_v14 = vsel %vm1198_vm0, %v979_v44, 0.0 }
 0x667   : > { %v10128_v26 = vsel %vm6465_vm1, %v10127_v15, %v10123_v19  ;;  %v5010_v42 = vmul.f32 0.015625, %v3418_v4  ;;  %v5009_v28 = vmul.f32 0.015625, %v3415_v21  ;;  %v3575_v15 = vsel %vm1198_vm0, %v966_v52, 0.0 }
 0x669   : > { %v10137_v31 = vrot.slane %v5010_v42, %v12460_v34  ;;  %v10132_v33 = vrot.slane %v5009_v28, %v12466_v36  ;;  %3903 = vadd.xlane.f32.xlu1 %v3902_v22  ;;  %3663 = vadd.xlane.f32.xlu0 %v3662_v24  ;;  %v1076_v22 = vld [vmem:[%s12294_s18 + $0x1c30] sm:$0xff] }
 0x66a   : > { %v3424_v56 = vpop.xlane.xlu1 %3423  ;;  %v3421_v38 = vpop.xlane.xlu0 %3420  ;;  %v996_v24 = vld [vmem:[%s12294_s18 + $0x19b0] sm:$0xff] }
 0x66b   : > { %v10133_v60 = vsel %vm6472_vm2, %v10132_v33, %v10128_v26  ;;  %v5012_v25 = vmul.f32 0.015625, %v3424_v56  ;;  %v5011_v48 = vmul.f32 0.015625, %v3421_v38  ;;  %v3665_v33 = vsel %vm1198_vm0, %v996_v24, 0.0 }
 0x66c   : > { %v10138_v54 = vsel %vm6479_vm3, %v10137_v31, %v10133_v60  ;;  %v3905_v31 = vsel %vm1198_vm0, %v1076_v22, 0.0  ;;  %v1093_v60 = vld [vmem:[%s12294_s18 + $0x1cb8] sm:$0xff] }
 0x66d   : > { %v10147_v6 = vrot.slane %v5012_v25, %v12473_v46  ;;  %v10142_v2 = vrot.slane %v5011_v48, %v12476_v47  ;;  %3993 = vadd.xlane.f32.xlu1 %v3992_v27  ;;  %3954 = vadd.xlane.f32.xlu0 %v3953_v41  ;;  %v1106_v41 = vld [vmem:[%s12294_s18 + $0x1d20] sm:$0xff] }
 0x66e   : > { %v3430_v29 = vpop.xlane.xlu1 %3429  ;;  %v3427_v59 = vpop.xlane.xlu0 %3426 }
 0x66f   : > { %v10143_v63 = vsel %vm6486_vm4, %v10142_v2, %v10138_v54  ;;  %v5014_v3 = vmul.f32 0.015625, %v3430_v29  ;;  %v5013_v5 = vmul.f32 0.015625, %v3427_v59  ;;  %v3956_v2 = vsel %vm1198_vm0, %v1093_v60, 0.0 }
 0x670   : > { %v10148_v7 = vsel %vm6493_vm5, %v10147_v6, %v10143_v63  ;;  %v3995_v6 = vsel %vm1198_vm0, %v1106_v41, 0.0  ;;  %v1123_v63 = vld [vmem:[%s12294_s18 + $0x1da8] sm:$0xff] }
 0x671   : > { %v10157_v50 = vrot.slane %v5014_v3, %v12491_v0  ;;  %v10152_v9 = vrot.slane %v5013_v5, %v12494_v1  ;;  %3525 = vadd.xlane.f32.xlu1 %v3524_v40  ;;  %4044 = vadd.xlane.f32.xlu0 %v4043_v62  ;;  %v950_v62 = vld [vmem:[%s12294_s18 + $0x1840] sm:$0xff] }
 0x672   : > { %v3436_v12 = vpop.xlane.xlu1 %3435  ;;  %v3433_v20 = vpop.xlane.xlu0 %3432 }
 0x673   : > { %v10153_v19 = vsel %vm6500_vm6, %v10152_v9, %v10148_v7  ;;  %v5016_v4 = vmul.f32 0.015625, %v3436_v12  ;;  %v5015_v21 = vmul.f32 0.015625, %v3433_v20  ;;  %v4046_v9 = vsel %vm1198_vm0, %v1123_v63, 0.0 }
 0x674   : > { %v10158_v26 = vsel %vm17372_vm7, %v10157_v50, %v10153_v19  ;;  %v3527_v50 = vsel %vm1198_vm0, %v950_v62, 0.0  ;;  %v967_v19 = vld [vmem:[%s12294_s18 + $0x18c8] sm:$0xff] }
 0x675   : > { %v10167_v42 = vrot.slane %v5016_v4, %v12508_v18  ;;  %v10162_v28 = vrot.slane %v5015_v21, %v12514_v23  ;;  %3615 = vadd.xlane.f32.xlu1 %v3614_v14  ;;  %3576 = vadd.xlane.f32.xlu0 %v3575_v15  ;;  %v980_v15 = vld [vmem:[%s12294_s18 + $0x1930] sm:$0xff] }
 0x676   : > { %v3442_v55 = vpop.xlane.xlu1 %3441  ;;  %v3439_v30 = vpop.xlane.xlu0 %3438 }
 0x677   : > { %v10163_v56 = vsel %vm17367_vm8, %v10162_v28, %v10158_v26  ;;  %v5018_v38 = vmul.f32 0.015625, %v3442_v55  ;;  %v5017_v27 = vmul.f32 0.015625, %v3439_v30  ;;  %v3578_v28 = vsel %vm1198_vm0, %v967_v19, 0.0 }
 0x678   : > { %v10168_v25 = vsel %vm17447_vm9, %v10167_v42, %v10163_v56  ;;  %vm17448_vm9 = vcmask 786112   ;;  %v3617_v42 = vsel %vm1198_vm0, %v980_v15, 0.0  ;;  %v997_v56 = vld [vmem:[%s12294_s18 + $0x19b8] sm:$0xff] }
 0x679   : > { %v10177_v48 = vrot.slane %v5018_v38, %v12530_v43  ;;  %v10172_v45 = vrot.slane %v5017_v27, %v12524_v39  ;;  %3906 = vadd.xlane.f32.xlu1 %v3905_v31  ;;  %3666 = vadd.xlane.f32.xlu0 %v3665_v33  ;;  %v1077_v33 = vld [vmem:[%s12294_s18 + $0x1c38] sm:$0xff] }
 0x67a   : > { %v3448_v51 = vpop.xlane.xlu1 %3447  ;;  %v3445_v54 = vpop.xlane.xlu0 %3444 }
 0x67b   : > { %v10173_v29 = vsel %vm6528_vm10, %v10172_v45, %v10168_v25  ;;  %v5020_v59 = vmul.f32 0.015625, %v3448_v51  ;;  %v5019_v40 = vmul.f32 0.015625, %v3445_v54  ;;  %v3908_v45 = vsel %vm1198_vm0, %v1077_v33, 0.0 }
 0x67c   : > { %v10178_v3 = vsel %vm17448_vm9, %v10177_v48, %v10173_v29  ;;  %v3668_v51 = vsel %vm1198_vm0, %v997_v56, 0.0  ;;  %v1107_v29 = vld [vmem:[%s12294_s18 + $0x1d28] sm:$0xff]  ;;  %vm17450_vm9 = vcmask 654912  }
 0x67d   : > { %v10187_v5 = vrot.slane %v5020_v59, %v12546_v61  ;;  %v10182_v44 = vrot.slane %v5019_v40, %v12540_v57  ;;  %3996 = vadd.xlane.f32.xlu1 %v3995_v6  ;;  %3957 = vadd.xlane.f32.xlu0 %v3956_v2  ;;  %v1094_v59 = vld [vmem:[%s12294_s18 + $0x1cc0] sm:$0xff] }
 0x67e   : > { %v3454_v52 = vpop.xlane.xlu1 %3453  ;;  %v3451_v7 = vpop.xlane.xlu0 %3450 }
 0x67f   : > { %v10183_v12 = vsel %vm6542_vm12, %v10182_v44, %v10178_v3  ;;  %v5022_v20 = vmul.f32 0.015625, %v3454_v52  ;;  %v5021_v14 = vmul.f32 0.015625, %v3451_v7  ;;  %v3998_v3 = vsel %vm1198_vm0, %v1107_v29, 0.0 }
 0x680   : > { %v10188_v4 = vsel %vm6549_vm13, %v10187_v5, %v10183_v12  ;;  %v3959_v5 = vsel %vm1198_vm0, %v1094_v59, 0.0 }
 0x681   : > { %v10197_v21 = vrot.slane %v5022_v20, %v12561_v13  ;;  %v10192_v22 = vrot.slane %v5021_v14, %v12556_v11  ;;  %3528 = vadd.xlane.f32.xlu1 %v3527_v50  ;;  %4047 = vadd.xlane.f32.xlu0 %v4046_v9  ;;  %v951_v50 = vld [vmem:[%s12294_s18 + $0x1848] sm:$0xff]  ;;  %v1124_v9 = vld [vmem:[%s12294_s18 + $0x1db0] sm:$0xff] }
 0x682   : > { %v3460_v24 = vpop.xlane.xlu1 %3459  ;;  %v3457_v26 = vpop.xlane.xlu0 %3456 }
 0x683   : > { %v10193_v55 = vsel %vm6556_vm14, %v10192_v22, %v10188_v4  ;;  %v5024_v30 = vmul.f32 0.015625, %v3460_v24  ;;  %v5023_v31 = vmul.f32 0.015625, %v3457_v26  ;;  %v3530_v4 = vsel %vm1198_vm0, %v951_v50, 0.0 }
 0x684   : > { %v10198_v38 = vsel %vm6563_vm15, %v10197_v21, %v10193_v55  ;;  %v4049_v21 = vsel %vm1198_vm0, %v1124_v9, 0.0 }
 0x685   : > { %v10206_v27 = vrot.slane %v5024_v30, %v12463_v35  ;;  %v10202_v41 = vrot.slane %v5023_v31, %v12457_v32  ;;  %3618 = vadd.xlane.f32.xlu1 %v3617_v42  ;;  %3579 = vadd.xlane.f32.xlu0 %v3578_v28  ;;  %v15647_v60 = vsel %vm17366_vm11, %v10198_v38, %v15111_v17  ;;  %v981_v42 = vld [vmem:[%s12294_s18 + $0x1938] sm:$0xff]  ;;  %v968_v28 = vld [vmem:[%s12294_s18 + $0x18d0] sm:$0xff]  ;;  %vm17455_vm11 = vcmask 654912  }
 0x686   : > { %17449 = vst [vmem:[#allocation7_spill] sm:$0xff] %v15647_v60  ;;  %v3466_v25 = vpop.xlane.xlu1 %3465  ;;  %v3463_v48 = vpop.xlane.xlu0 %3462  ;;  %v3620_v38 = vsel %vm1198_vm0, %v981_v42, 0.0  ;;  %v1031_v60 = vld [vmem:[%s12294_s18 + $0x1ac8] sm:$0xff] }
 0x687   : > { %v10207_v54 = vsel %vm6465_vm1, %v10206_v27, %v10202_v41  ;;  %v5026_v6 = vmul.f32 0.015625, %v3466_v25  ;;  %v5025_v2 = vmul.f32 0.015625, %v3463_v48  ;;  %v3581_v27 = vsel %vm1198_vm0, %v968_v28, 0.0 }
 0x689   : > { %v10216_v40 = vrot.slane %v5026_v6, %v12460_v34  ;;  %v10211_v62 = vrot.slane %v5025_v2, %v12466_v36  ;;  %3909 = vadd.xlane.f32.xlu1 %v3908_v45  ;;  %3669 = vadd.xlane.f32.xlu0 %v3668_v51  ;;  %v1078_v45 = vld [vmem:[%s12294_s18 + $0x1c40] sm:$0xff] }
 0x68a   : > { %v3472_v17 = vpop.xlane.xlu1 %3471  ;;  %v3469_v63 = vpop.xlane.xlu0 %3468  ;;  %v998_v51 = vld [vmem:[%s12294_s18 + $0x19c0] sm:$0xff] }
 0x68b   : > { %v10212_v44 = vsel %vm6472_vm2, %v10211_v62, %v10207_v54  ;;  %v5028_v52 = vmul.f32 0.015625, %v3472_v17  ;;  %v5027_v7 = vmul.f32 0.015625, %v3469_v63  ;;  %v3671_v62 = vsel %vm1198_vm0, %v998_v51, 0.0 }
 0x68c   : > { %v10217_v12 = vsel %vm6479_vm3, %v10216_v40, %v10212_v44  ;;  %v3911_v40 = vsel %vm1198_vm0, %v1078_v45, 0.0  ;;  %v1095_v44 = vld [vmem:[%s12294_s18 + $0x1cc8] sm:$0xff] }
 0x68d   : > { %v10226_v20 = vrot.slane %v5028_v52, %v12473_v46  ;;  %v10221_v14 = vrot.slane %v5027_v7, %v12476_v47  ;;  %3999 = vadd.xlane.f32.xlu1 %v3998_v3  ;;  %3960 = vadd.xlane.f32.xlu0 %v3959_v5  ;;  %v1108_v5 = vld [vmem:[%s12294_s18 + $0x1d30] sm:$0xff] }
 0x68e   : > { %v3478_v15 = vpop.xlane.xlu1 %3477  ;;  %v3475_v19 = vpop.xlane.xlu0 %3474 }
 0x68f   : > { %v10222_v22 = vsel %vm6486_vm4, %v10221_v14, %v10217_v12  ;;  %v5030_v24 = vmul.f32 0.015625, %v3478_v15  ;;  %v5029_v26 = vmul.f32 0.015625, %v3475_v19  ;;  %v3962_v14 = vsel %vm1198_vm0, %v1095_v44, 0.0 }
 0x690   : > { %v10227_v55 = vsel %vm6493_vm5, %v10226_v20, %v10222_v22  ;;  %v4001_v20 = vsel %vm1198_vm0, %v1108_v5, 0.0  ;;  %v1125_v22 = vld [vmem:[%s12294_s18 + $0x1db8] sm:$0xff] }
 0x691   : > { %v10236_v30 = vrot.slane %v5030_v24, %v12491_v0  ;;  %v10231_v31 = vrot.slane %v5029_v26, %v12494_v1  ;;  %3531 = vadd.xlane.f32.xlu1 %v3530_v4  ;;  %4050 = vadd.xlane.f32.xlu0 %v4049_v21  ;;  %v952_v21 = vld [vmem:[%s12294_s18 + $0x1850] sm:$0xff] }
 0x692   : > { %v3484_v33 = vpop.xlane.xlu1 %3483  ;;  %v3481_v56 = vpop.xlane.xlu0 %3480 }
 0x693   : > { %v10232_v41 = vsel %vm6500_vm6, %v10231_v31, %v10227_v55  ;;  %v5032_v25 = vmul.f32 0.015625, %v3484_v33  ;;  %v5031_v48 = vmul.f32 0.015625, %v3481_v56  ;;  %v4052_v31 = vsel %vm1198_vm0, %v1125_v22, 0.0 }
 0x694   : > { %v10237_v54 = vsel %vm17372_vm7, %v10236_v30, %v10232_v41  ;;  %v3533_v30 = vsel %vm1198_vm0, %v952_v21, 0.0 }
 0x695   : > { %v10246_v6 = vrot.slane %v5032_v25, %v12508_v18  ;;  %v10241_v2 = vrot.slane %v5031_v48, %v12514_v23  ;;  %3621 = vadd.xlane.f32.xlu1 %v3620_v38  ;;  %3582 = vadd.xlane.f32.xlu0 %v3581_v27  ;;  %v982_v38 = vld [vmem:[%s12294_s18 + $0x1940] sm:$0xff]  ;;  %v969_v27 = vld [vmem:[%s12294_s18 + $0x18d8] sm:$0xff] }
 0x696   : > { %v3490_v29 = vpop.xlane.xlu1 %3489  ;;  %v3487_v59 = vpop.xlane.xlu0 %3486 }
 0x697   : > { %v10242_v17 = vsel %vm17367_vm8, %v10241_v2, %v10237_v54  ;;  %v5034_v63 = vmul.f32 0.015625, %v3490_v29  ;;  %v5033_v3 = vmul.f32 0.015625, %v3487_v59  ;;  %v3623_v54 = vsel %vm1198_vm0, %v982_v38, 0.0  ;;  %v1079_v59 = vld [vmem:[%s12294_s18 + $0x1c48] sm:$0xff] }
 0x698   : > { %v10247_v52 = vsel %vm17450_vm9, %v10246_v6, %v10242_v17  ;;  %vm17451_vm9 = vcmask 786112   ;;  %v3584_v6 = vsel %vm1198_vm0, %v969_v27, 0.0  ;;  %v3914_v44 = vsel %vm1198_vm0, %v1079_v59, 0.0 }
 0x699   : > { %v10256_v7 = vrot.slane %v5034_v63, %v12530_v43  ;;  %v10251_v50 = vrot.slane %v5033_v3, %v12524_v39  ;;  %3912 = vadd.xlane.f32.xlu1 %v3911_v40  ;;  %3672 = vadd.xlane.f32.xlu0 %v3671_v62  ;;  %v999_v40 = vld [vmem:[%s12294_s18 + $0x19c8] sm:$0xff] }
 0x69a   : > { %v3496_v9 = vpop.xlane.xlu1 %3495  ;;  %v3493_v12 = vpop.xlane.xlu0 %3492 }
 0x69b   : > { %v10252_v15 = vsel %vm6528_vm10, %v10251_v50, %v10247_v52  ;;  %v5036_v19 = vmul.f32 0.015625, %v3496_v9  ;;  %v5035_v4 = vmul.f32 0.015625, %v3493_v12  ;;  %v3674_v52 = vsel %vm1198_vm0, %v999_v40, 0.0  ;;  %v1109_v12 = vld [vmem:[%s12294_s18 + $0x1d38] sm:$0xff] }
 0x69c   : > { %v10257_v24 = vsel %vm17451_vm9, %v10256_v7, %v10252_v15  ;;  %v4004_v22 = vsel %vm1198_vm0, %v1109_v12, 0.0  ;;  %vm17453_vm9 = vcmask 654912  }
 0x69d   : > { %v10266_v26 = vrot.slane %v5036_v19, %v12546_v61  ;;  %v10261_v42 = vrot.slane %v5035_v4, %v12540_v57  ;;  %4002 = vadd.xlane.f32.xlu1 %v4001_v20  ;;  %3963 = vadd.xlane.f32.xlu0 %v3962_v14  ;;  %v1096_v20 = vld [vmem:[%s12294_s18 + $0x1cd0] sm:$0xff] }
 0x69e   : > { %v3553_v28 = vpop.xlane.xlu1 %3552  ;;  %v3499_v55 = vpop.xlane.xlu0 %3498 }
 0x69f   : > { %v10262_v33 = vsel %vm6542_vm12, %v10261_v42, %v10257_v24  ;;  %v5037_v56 = vmul.f32 0.015625, %v3499_v55  ;;  %v5055_v25 = vmul.f32 0.015625, %v3553_v28  ;;  %v3965_v24 = vsel %vm1198_vm0, %v1096_v20, 0.0 }
 0x6a0   : > { %v10267_v41 = vsel %vm6549_vm13, %v10266_v26, %v10262_v33 }
 0x6a1   : > { %v10271_v48 = vrot.slane %v5037_v56, %v12556_v11  ;;  %3534 = vadd.xlane.f32.xlu1 %v3533_v30  ;;  %4053 = vadd.xlane.f32.xlu0 %v4052_v31  ;;  %v10360_v62 = vrot.slane %v5055_v25, %v12457_v32  ;;  %v953_v30 = vld [vmem:[%s12294_s18 + $0x1858] sm:$0xff]  ;;  %v1126_v31 = vld [vmem:[%s12294_s18 + $0x1dc0] sm:$0xff] }
 0x6a2   : > { %v3505_v45 = vpop.xlane.xlu1 %3504  ;;  %v3556_v51 = vpop.xlane.xlu0 %3555  ;;  %v4055_v25 = vsel %vm1198_vm0, %v1126_v31, 0.0 }
 0x6a3   : > { %v15706_v2 = vsel %vm6556_vm14, %v10271_v48, %v10267_v41  ;;  %v5056_v29 = vmul.f32 0.015625, %v3556_v51  ;;  %v5039_v17 = vmul.f32 0.015625, %v3505_v45  ;;  %v3536_v41 = vsel %vm1198_vm0, %v953_v30, 0.0 }
 0x6a4   : > { %17452 = vst [vmem:[#allocation8_spill] sm:$0xff] %v15706_v2 }
 0x6a5   : > { %v10364_v63 = vrot.slane %v5056_v29, %v12463_v35  ;;  %3624 = vadd.xlane.f32.xlu1 %v3623_v54  ;;  %3585 = vadd.xlane.f32.xlu0 %v3584_v6  ;;  %v10281_v14 = vrot.slane %v5039_v17, %v12457_v32  ;;  %v983_v54 = vld [vmem:[%s12294_s18 + $0x1948] sm:$0xff]  ;;  %v970_v6 = vld [vmem:[%s12294_s18 + $0x18e0] sm:$0xff] }
 0x6a6   : > { %v3559_v3 = vpop.xlane.xlu1 %3558  ;;  %v3508_v5 = vpop.xlane.xlu0 %3507  ;;  %v3626_v17 = vsel %vm1198_vm0, %v983_v54, 0.0 }
 0x6a7   : > { %v10365_v7 = vsel %vm6465_vm1, %v10364_v63, %v10360_v62  ;;  %v5057_v50 = vmul.f32 0.015625, %v3559_v3  ;;  %v5040_v9 = vmul.f32 0.015625, %v3508_v5  ;;  %v3587_v63 = vsel %vm1198_vm0, %v970_v6, 0.0 }
 0x6a9   : > { %v10369_v15 = vrot.slane %v5057_v50, %v12466_v36  ;;  %v10285_v19 = vrot.slane %v5040_v9, %v12463_v35  ;;  %3915 = vadd.xlane.f32.xlu1 %v3914_v44  ;;  %3675 = vadd.xlane.f32.xlu0 %v3674_v52  ;;  %v1000_v50 = vld [vmem:[%s12294_s18 + $0x19d0] sm:$0xff] }
 0x6aa   : > { %v3940_v4 = vpop.xlane.xlu1 %3939  ;;  %v3937_v21 = vpop.xlane.xlu0 %3936 }
 0x6ab   : > { %v10370_v26 = vsel %vm6472_vm2, %v10369_v15, %v10365_v7  ;;  %v10286_v42 = vsel %vm6465_vm1, %v10285_v19, %v10281_v14  ;;  %v5184_v28 = vmul.f32 0.015625, %v3940_v4  ;;  %v5183_v55 = vmul.f32 0.015625, %v3937_v21  ;;  %v1080_v7 = vld [vmem:[%s12294_s18 + $0x1c50] sm:$0xff] }
 0x6ac   : > { %v3917_v15 = vsel %vm1198_vm0, %v1080_v7, 0.0  ;;  %v3677_v19 = vsel %vm1198_vm0, %v1000_v50, 0.0 }
 0x6ad   : > { %v10996_v33 = vrot.slane %v5184_v28, %v12463_v35  ;;  %v10992_v56 = vrot.slane %v5183_v55, %v12457_v32  ;;  %4005 = vadd.xlane.f32.xlu1 %v4004_v22  ;;  %3966 = vadd.xlane.f32.xlu0 %v3965_v24  ;;  %v1110_v24 = vld [vmem:[%s12294_s18 + $0x1d40] sm:$0xff] }
 0x6ae   : > { %v3562_v38 = vpop.xlane.xlu1 %3561  ;;  %v3511_v27 = vpop.xlane.xlu0 %3510  ;;  %v4007_v31 = vsel %vm1198_vm0, %v1110_v24, 0.0 }
 0x6af   : > { %v10997_v48 = vsel %vm6465_vm1, %v10996_v33, %v10992_v56  ;;  %v5058_v45 = vmul.f32 0.015625, %v3562_v38  ;;  %v5041_v51 = vmul.f32 0.015625, %v3511_v27 }
 0x6b1   : > { %v10374_v29 = vrot.slane %v5058_v45, %v12460_v34  ;;  %v10290_v59 = vrot.slane %v5041_v51, %v12466_v36  ;;  %3537 = vadd.xlane.f32.xlu1 %v3536_v41  ;;  %4056 = vadd.xlane.f32.xlu0 %v4055_v25  ;;  %v954_v41 = vld [vmem:[%s12294_s18 + $0x1860] sm:$0xff]  ;;  %v1127_v25 = vld [vmem:[%s12294_s18 + $0x1dc8] sm:$0xff] }
 0x6b2   : > { %v3652_v40 = vpop.xlane.xlu1 %3651  ;;  %v3649_v62 = vpop.xlane.xlu0 %3648 }
 0x6b3   : > { %v10375_v3 = vsel %vm6479_vm3, %v10374_v29, %v10370_v26  ;;  %v10291_v5 = vsel %vm6472_vm2, %v10290_v59, %v10286_v42  ;;  %v5088_v44 = vmul.f32 0.015625, %v3652_v40  ;;  %v5087_v52 = vmul.f32 0.015625, %v3649_v62  ;;  %v1097_v26 = vld [vmem:[%s12294_s18 + $0x1cd8] sm:$0xff] }
 0x6b4   : > { %v3968_v33 = vsel %vm1198_vm0, %v1097_v26, 0.0  ;;  %v3539_v29 = vsel %vm1198_vm0, %v954_v41, 0.0  ;;  %v4058_v59 = vsel %vm1198_vm0, %v1127_v25, 0.0 }
 0x6b5   : > { %v10522_v9 = vrot.slane %v5088_v44, %v12463_v35  ;;  %v10518_v12 = vrot.slane %v5087_v52, %v12457_v32  ;;  %3627 = vadd.xlane.f32.xlu1 %v3626_v17  ;;  %3588 = vadd.xlane.f32.xlu0 %v3587_v63  ;;  %v984_v63 = vld [vmem:[%s12294_s18 + $0x1950] sm:$0xff]  ;;  %v971_v44 = vld [vmem:[%s12294_s18 + $0x18e8] sm:$0xff] }
 0x6b6   : > { %v3892_v20 = vpop.xlane.xlu1 %3891  ;;  %v3889_v14 = vpop.xlane.xlu0 %3888 }
 0x6b7   : > { %v10523_v4 = vsel %vm6465_vm1, %v10522_v9, %v10518_v12  ;;  %v5168_v21 = vmul.f32 0.015625, %v3892_v20  ;;  %v5167_v22 = vmul.f32 0.015625, %v3889_v14  ;;  %v3629_v12 = vsel %vm1198_vm0, %v984_v63, 0.0  ;;  %v955_v63 = vld [vmem:[%s12294_s18 + $0x1868] sm:$0xff] }
 0x6b8   : > { %v3590_v20 = vsel %vm1198_vm0, %v971_v44, 0.0  ;;  %v1128_v44 = vld [vmem:[%s12294_s18 + $0x1dd0] sm:$0xff] }
 0x6b9   : > { %v10917_v42 = vrot.slane %v5168_v21, %v12463_v35  ;;  %v10913_v28 = vrot.slane %v5167_v22, %v12457_v32  ;;  %3918 = vadd.xlane.f32.xlu1 %v3917_v15  ;;  %3678 = vadd.xlane.f32.xlu0 %v3677_v19  ;;  %v1001_v19 = vld [vmem:[%s12294_s18 + $0x19d8] sm:$0xff] }
 0x6ba   : > { %v3514_v55 = vpop.xlane.xlu1 %3513  ;;  %v3943_v30 = vpop.xlane.xlu0 %3942 }
 0x6bb   : > { %v10918_v56 = vsel %vm6465_vm1, %v10917_v42, %v10913_v28  ;;  %v5042_v38 = vmul.f32 0.015625, %v3514_v55  ;;  %v5185_v27 = vmul.f32 0.015625, %v3943_v30 }
 0x6bd   : > { %v10295_v45 = vrot.slane %v5042_v38, %v12460_v34  ;;  %v11001_v51 = vrot.slane %v5185_v27, %v12466_v36  ;;  %4008 = vadd.xlane.f32.xlu1 %v4007_v31  ;;  %3969 = vadd.xlane.f32.xlu0 %v3968_v33  ;;  %v1111_v38 = vld [vmem:[%s12294_s18 + $0x1d48] sm:$0xff]  ;;  %v1098_v27 = vld [vmem:[%s12294_s18 + $0x1ce0] sm:$0xff] }
 0x6be   : > { %v3601_v54 = vpop.xlane.xlu1 %3600  ;;  %v3565_v6 = vpop.xlane.xlu0 %3564 }
 0x6bf   : > { %v15760_v40 = vsel %vm6479_vm3, %v10295_v45, %v10291_v5  ;;  %v11002_v62 = vsel %vm6472_vm2, %v11001_v51, %v10997_v48  ;;  %v5059_v17 = vmul.f32 0.015625, %v3565_v6  ;;  %v5071_v52 = vmul.f32 0.015625, %v3601_v54  ;;  %v1081_v48 = vld [vmem:[%s12294_s18 + $0x1c58] sm:$0xff] }
 0x6c0   : > { %v3920_v28 = vsel %vm1198_vm0, %v1081_v48, 0.0  ;;  %v4010_v54 = vsel %vm1198_vm0, %v1111_v38, 0.0  ;;  %v972_v48 = vld [vmem:[%s12294_s18 + $0x18f0] sm:$0xff]  ;;  %v1082_v38 = vld [vmem:[%s12294_s18 + $0x1c60] sm:$0xff] }
 0x6c1   : > { %v10379_v7 = vrot.slane %v5059_v17, %v12476_v47  ;;  %3540 = vadd.xlane.f32.xlu1 %v3539_v29  ;;  %4059 = vadd.xlane.f32.xlu0 %v4058_v59  ;;  %v10439_v21 = vrot.slane %v5071_v52, %v12457_v32 }
 0x6c2   : > { %v3655_v50 = vpop.xlane.xlu1 %3654  ;;  %v3604_v9 = vpop.xlane.xlu0 %3603 }
 0x6c3   : > { %v10380_v5 = vsel %vm6486_vm4, %v10379_v7, %v10375_v3  ;;  %v5089_v14 = vmul.f32 0.015625, %v3655_v50  ;;  %v5072_v15 = vmul.f32 0.015625, %v3604_v9  ;;  %v3680_v3 = vsel %vm1198_vm0, %v1001_v19, 0.0 }
 0x6c5   : > { %v10527_v22 = vrot.slane %v5089_v14, %v12466_v36  ;;  %v10443_v24 = vrot.slane %v5072_v15, %v12463_v35  ;;  %3630 = vadd.xlane.f32.xlu1 %v3629_v12  ;;  %3591 = vadd.xlane.f32.xlu0 %v3590_v20  ;;  %v3542_v12 = vsel %vm1198_vm0, %v955_v63, 0.0  ;;  %v985_v15 = vld [vmem:[%s12294_s18 + $0x1958] sm:$0xff]  ;;  %v1112_v63 = vld [vmem:[%s12294_s18 + $0x1d50] sm:$0xff] }
 0x6c6   : > { %v3946_v26 = vpop.xlane.xlu1 %3945  ;;  %v3895_v42 = vpop.xlane.xlu0 %3894 }
 0x6c7   : > { %v10528_v55 = vsel %vm6472_vm2, %v10527_v22, %v10523_v4  ;;  %v10444_v30 = vsel %vm6465_vm1, %v10443_v24, %v10439_v21  ;;  %v5186_v31 = vmul.f32 0.015625, %v3946_v26  ;;  %v5169_v33 = vmul.f32 0.015625, %v3895_v42 }
 0x6c8   : > { %v3971_v4 = vsel %vm1198_vm0, %v1098_v27, 0.0  ;;  %v3632_v26 = vsel %vm1198_vm0, %v985_v15, 0.0  ;;  %v3593_v42 = vsel %vm1198_vm0, %v972_v48, 0.0  ;;  %v1002_v27 = vld [vmem:[%s12294_s18 + $0x19e0] sm:$0xff]  ;;  %v956_v15 = vld [vmem:[%s12294_s18 + $0x1870] sm:$0xff]  ;;  %v1129_v48 = vld [vmem:[%s12294_s18 + $0x1dd8] sm:$0xff] }
 0x6c9   : > { %v11006_v41 = vrot.slane %v5186_v31, %v12460_v34  ;;  %v10922_v25 = vrot.slane %v5169_v33, %v12466_v36  ;;  %3921 = vadd.xlane.f32.xlu1 %v3920_v28  ;;  %3681 = vadd.xlane.f32.xlu0 %v3680_v3 }
 0x6ca   : > { %v4036_v45 = vpop.xlane.xlu1 %4035  ;;  %v4033_v51 = vpop.xlane.xlu0 %4032 }
 0x6cb   : > { %v11007_v6 = vsel %vm6479_vm3, %v11006_v41, %v11002_v62  ;;  %v10923_v29 = vsel %vm6472_vm2, %v10922_v25, %v10918_v56  ;;  %v5216_v59 = vmul.f32 0.015625, %v4036_v45  ;;  %v5215_v17 = vmul.f32 0.015625, %v4033_v51 }
 0x6cc   : > { %v4061_v62 = vsel %vm1198_vm0, %v1128_v44, 0.0  ;;  %v1099_v44 = vld [vmem:[%s12294_s18 + $0x1ce8] sm:$0xff] }
 0x6cd   : > { %v11154_v52 = vrot.slane %v5216_v59, %v12463_v35  ;;  %v11150_v7 = vrot.slane %v5215_v17, %v12457_v32  ;;  %4011 = vadd.xlane.f32.xlu1 %v4010_v54  ;;  %3972 = vadd.xlane.f32.xlu0 %v3971_v4  ;;  %v3683_v54 = vsel %vm1198_vm0, %v1002_v27, 0.0 }
 0x6ce   : > { %v3568_v50 = vpop.xlane.xlu1 %3567  ;;  %v3517_v9 = vpop.xlane.xlu0 %3516 }
 0x6cf   : > { %v15793_v56 = vsel %vm6465_vm1, %v11154_v52, %v11150_v7  ;;  %v5060_v20 = vmul.f32 0.015625, %v3568_v50  ;;  %v5043_v14 = vmul.f32 0.015625, %v3517_v9 }
 0x6d1   : > { %v10384_v19 = vrot.slane %v5060_v20, %v12473_v46  ;;  %v10300_v21 = vrot.slane %v5043_v14, %v12476_v47  ;;  %3543 = vadd.xlane.f32.xlu1 %v3542_v12  ;;  %4062 = vadd.xlane.f32.xlu0 %v4061_v62  ;;  %v4013_v12 = vsel %vm1198_vm0, %v1112_v63, 0.0 }
 0x6d2   : > { %v3658_v22 = vpop.xlane.xlu1 %3657  ;;  %v3607_v24 = vpop.xlane.xlu0 %3606 }
 0x6d3   : > { %v15802_v28 = vsel %vm6493_vm5, %v10384_v19, %v10380_v5  ;;  %v10301_v3 = vsel %vm6486_vm4, %v10300_v21, %v15760_v40  ;;  %v5090_v31 = vmul.f32 0.015625, %v3658_v22  ;;  %v5073_v33 = vmul.f32 0.015625, %v3607_v24 }
 0x6d4   : > { %v3923_v5 = vsel %vm1198_vm0, %v1082_v38, 0.0  ;;  %v973_v38 = vld [vmem:[%s12294_s18 + $0x18f8] sm:$0xff] }
 0x6d5   : > { %v10532_v41 = vrot.slane %v5090_v31, %v12460_v34  ;;  %v10448_v25 = vrot.slane %v5073_v33, %v12466_v36  ;;  %3633 = vadd.xlane.f32.xlu1 %v3632_v26  ;;  %3594 = vadd.xlane.f32.xlu0 %v3593_v42  ;;  %v3545_v26 = vsel %vm1198_vm0, %v956_v15, 0.0  ;;  %v986_v33 = vld [vmem:[%s12294_s18 + $0x1960] sm:$0xff] }
 0x6d6   : > { %v3949_v45 = vpop.xlane.xlu1 %3948  ;;  %v3898_v51 = vpop.xlane.xlu0 %3897 }
 0x6d7   : > { %v15813_v40 = vsel %vm6479_vm3, %v10532_v41, %v10528_v55  ;;  %v10449_v4 = vsel %vm6472_vm2, %v10448_v25, %v10444_v30  ;;  %v5187_v59 = vmul.f32 0.015625, %v3949_v45  ;;  %v5170_v17 = vmul.f32 0.015625, %v3898_v51 }
 0x6d8   : > { %v3974_v55 = vsel %vm1198_vm0, %v1099_v44, 0.0  ;;  %v3635_v51 = vsel %vm1198_vm0, %v986_v33, 0.0  ;;  %v1083_v44 = vld [vmem:[%s12294_s18 + $0x1c68] sm:$0xff] }
 0x6d9   : > { %v11011_v52 = vrot.slane %v5187_v59, %v12476_v47  ;;  %v10927_v7 = vrot.slane %v5170_v17, %v12460_v34  ;;  %3924 = vadd.xlane.f32.xlu1 %v3923_v5  ;;  %3684 = vadd.xlane.f32.xlu0 %v3683_v54  ;;  %v3596_v5 = vsel %vm1198_vm0, %v973_v38, 0.0  ;;  %v957_v38 = vld [vmem:[%s12294_s18 + $0x1878] sm:$0xff] }
 0x6da   : > { %v3988_v50 = vpop.xlane.xlu1 %3987  ;;  %v3985_v9 = vpop.xlane.xlu0 %3984 }
 0x6db   : > { %v15823_v30 = vsel %vm6486_vm4, %v11011_v52, %v11007_v6  ;;  %v10928_v62 = vsel %vm6479_vm3, %v10927_v7, %v10923_v29  ;;  %v5200_v20 = vmul.f32 0.015625, %v3988_v50  ;;  %v5199_v14 = vmul.f32 0.015625, %v3985_v9  ;;  %v1003_v52 = vld [vmem:[%s12294_s18 + $0x19e8] sm:$0xff] }
 0x6dc   : > { %v4064_v6 = vsel %vm1198_vm0, %v1129_v48, 0.0  ;;  %v1113_v48 = vld [vmem:[%s12294_s18 + $0x1d58] sm:$0xff] }
 0x6dd   : > { %v11075_v19 = vrot.slane %v5200_v20, %v12463_v35  ;;  %v11071_v21 = vrot.slane %v5199_v14, %v12457_v32  ;;  %4014 = vadd.xlane.f32.xlu1 %v4013_v12  ;;  %3975 = vadd.xlane.f32.xlu0 %v3974_v55  ;;  %v3926_v55 = vsel %vm1198_vm0, %v1083_v44, 0.0 }
 0x6de   : > { %v3520_v22 = vpop.xlane.xlu1 %3519  ;;  %v4039_v24 = vpop.xlane.xlu0 %4038 }
 0x6df   : > { %v11076_v29 = vsel %vm6465_vm1, %v11075_v19, %v11071_v21  ;;  %v5044_v42 = vmul.f32 0.015625, %v3520_v22  ;;  %v5217_v31 = vmul.f32 0.015625, %v4039_v24  ;;  %v1100_v19 = vld [vmem:[%s12294_s18 + $0x1cf0] sm:$0xff] }
 0x6e1   : > { %v10305_v27 = vrot.slane %v5044_v42, %v12473_v46  ;;  %v11159_v41 = vrot.slane %v5217_v31, %v12466_v36  ;;  %3546 = vadd.xlane.f32.xlu1 %v3545_v26  ;;  %4065 = vadd.xlane.f32.xlu0 %v4064_v6  ;;  %v4016_v6 = vsel %vm1198_vm0, %v1113_v48, 0.0 }
 0x6e2   : > { %v3610_v25 = vpop.xlane.xlu1 %3609  ;;  %v3571_v45 = vpop.xlane.xlu0 %3570 }
 0x6e3   : > { %v10306_v54 = vsel %vm6493_vm5, %v10305_v27, %v10301_v3  ;;  %v11160_v59 = vsel %vm6472_vm2, %v11159_v41, %v15793_v56  ;;  %v5074_v17 = vmul.f32 0.015625, %v3610_v25  ;;  %v5061_v63 = vmul.f32 0.015625, %v3571_v45  ;;  %v1130_v27 = vld [vmem:[%s12294_s18 + $0x1de0] sm:$0xff] }
 0x6e4   : > { %v3686_v3 = vsel %vm1198_vm0, %v1003_v52, 0.0  ;;  %v1004_v52 = vld [vmem:[%s12294_s18 + $0x19f0] sm:$0xff] }
 0x6e5   : > { %v10453_v7 = vrot.slane %v5074_v17, %v12460_v34  ;;  %v10389_v50 = vrot.slane %v5061_v63, %v12494_v1  ;;  %3636 = vadd.xlane.f32.xlu1 %v3635_v51  ;;  %3597 = vadd.xlane.f32.xlu0 %v3596_v5  ;;  %v4067_v5 = vsel %vm1198_vm0, %v1130_v27, 0.0 }
 0x6e6   : > { %v3901_v9 = vpop.xlane.xlu1 %3900  ;;  %v3661_v12 = vpop.xlane.xlu0 %3660 }
 0x6e7   : > { %v10454_v56 = vsel %vm6479_vm3, %v10453_v7, %v10449_v4  ;;  %v10390_v20 = vsel %vm6500_vm6, %v10389_v50, %v15802_v28  ;;  %v5171_v14 = vmul.f32 0.015625, %v3901_v9  ;;  %v5091_v15 = vmul.f32 0.015625, %v3661_v12  ;;  %v987_v7 = vld [vmem:[%s12294_s18 + $0x1968] sm:$0xff] }
 0x6e8   : > { %v3977_v4 = vsel %vm1198_vm0, %v1100_v19, 0.0  ;;  %v1101_v19 = vld [vmem:[%s12294_s18 + $0x1cf8] sm:$0xff] }
 0x6e9   : > { %v10932_v21 = vrot.slane %v5171_v14, %v12476_v47  ;;  %v10537_v22 = vrot.slane %v5091_v15, %v12476_v47  ;;  %3927 = vadd.xlane.f32.xlu1 %v3926_v55  ;;  %3687 = vadd.xlane.f32.xlu0 %v3686_v3  ;;  %v3638_v3 = vsel %vm1198_vm0, %v987_v7, 0.0 }
 0x6ea   : > { %v3991_v24 = vpop.xlane.xlu1 %3990  ;;  %v3952_v26 = vpop.xlane.xlu0 %3951 }
 0x6eb   : > { %v15858_v28 = vsel %vm6486_vm4, %v10932_v21, %v10928_v62  ;;  %v15862_v42 = vsel %vm6486_vm4, %v10537_v22, %v15813_v40  ;;  %v5201_v31 = vmul.f32 0.015625, %v3991_v24  ;;  %v5188_v33 = vmul.f32 0.015625, %v3952_v26  ;;  %v1084_v21 = vld [vmem:[%s12294_s18 + $0x1c70] sm:$0xff] }
 0x6ec   : > { %v3548_v62 = vsel %vm1198_vm0, %v957_v38, 0.0 }
 0x6ed   : > { %v11080_v41 = vrot.slane %v5201_v31, %v12466_v36  ;;  %v11016_v25 = vrot.slane %v5188_v33, %v12473_v46  ;;  %4017 = vadd.xlane.f32.xlu1 %v4016_v6  ;;  %3978 = vadd.xlane.f32.xlu0 %v3977_v4  ;;  %v3929_v4 = vsel %vm1198_vm0, %v1084_v21, 0.0  ;;  %v5312_v31 = vld [vmem:[%s17361_s1 + $0x88] sm:$0xff]  ;;  %v5297_v21 = vld [vmem:[%s17361_s1 + $0x10] sm:$0xff] }
 0x6ee   : > { %v3523_v45 = vpop.xlane.xlu1 %3522  ;;  %v4042_v51 = vpop.xlane.xlu0 %4041 }
 0x6ef   : > { %v15871_v40 = vsel %vm6472_vm2, %v11080_v41, %v11076_v29  ;;  %v15875_v17 = vsel %vm6493_vm5, %v11016_v25, %v15823_v30  ;;  %v5045_v63 = vmul.f32 0.015625, %v3523_v45  ;;  %v5218_v44 = vmul.f32 0.015625, %v4042_v51  ;;  %v1131_v25 = vld [vmem:[%s12294_s18 + $0x1de8] sm:$0xff]  ;;  %v1114_v45 = vld [vmem:[%s12294_s18 + $0x1d60] sm:$0xff] }
 0x6f0   : > { %v3689_v29 = vsel %vm1198_vm0, %v1004_v52, 0.0  ;;  %v5295_v51 = vld [vmem:[%s17361_s1] sm:$0xff]  ;;  %v4070_v7 = vsel %vm1198_vm0, %v1131_v25, 0.0 }
 0x6f1   : > { %v10310_v50 = vrot.slane %v5045_v63, %v12494_v1  ;;  %v11164_v9 = vrot.slane %v5218_v44, %v12460_v34  ;;  %3549 = vadd.xlane.f32.xlu1 %v3548_v62  ;;  %4068 = vadd.xlane.f32.xlu0 %v4067_v5  ;;  %v5296_v5 = vld [vmem:[%s17361_s1 + $0x8] sm:$0xff] }
 0x6f2   : > { %v3613_v12 = vpop.xlane.xlu1 %3612  ;;  %v3574_v55 = vpop.xlane.xlu0 %3573 }
 0x6f3   : > { %v15884_v30 = vsel %vm6500_vm6, %v10310_v50, %v10306_v54  ;;  %v15887_v14 = vsel %vm6479_vm3, %v11164_v9, %v11160_v59  ;;  %v5075_v15 = vmul.f32 0.015625, %v3613_v12  ;;  %v5062_v48 = vmul.f32 0.015625, %v3574_v55  ;;  %v5311_v59 = vld [vmem:[%s17361_s1 + $0x80] sm:$0xff]  ;;  %v5313_v9 = vld [vmem:[%s17361_s1 + $0x90] sm:$0xff]  ;;  %v5314_v12 = vld [vmem:[%s17361_s1 + $0x98] sm:$0xff] }
 0x6f4   : > { %v3980_v54 = vsel %vm1198_vm0, %v1101_v19, 0.0  ;;  %v12112_v62 = vpack.c.bf16 %v5312_v31, %v5311_v59  ;;  %v4019_v50 = vsel %vm1198_vm0, %v1114_v45, 0.0  ;;  %v988_v19 = vld [vmem:[%s12294_s18 + $0x1970] sm:$0xff]  ;;  %v5315_v31 = vld [vmem:[%s17361_s1 + $0xa0] sm:$0xff] }
 0x6f5   : > { %v10458_v22 = vrot.slane %v5075_v15, %v12476_v47  ;;  %v10394_v24 = vrot.slane %v5062_v48, %v12491_v0  ;;  %3690 = vadd.xlane.f32.xlu1 %v3689_v29  ;;  %3639 = vadd.xlane.f32.xlu0 %v3638_v3  ;;  %v1005_v48 = vld [vmem:[%s12294_s18 + $0x19f8] sm:$0xff]  ;;  %v3641_v59 = vsel %vm1198_vm0, %v988_v19, 0.0 }
 0x6f6   : > { %v3904_v26 = vpop.xlane.xlu1 %3903  ;;  %v3664_v6 = vpop.xlane.xlu0 %3663  ;;  %12113 = vmatprep.subr.bf16.mxu0 %v12112_v62  ;;  %v1115_v62 = vld [vmem:[%s12294_s18 + $0x1d68] sm:$0xff] }
 0x6f7   : > { %v15902_v33 = vsel %vm6486_vm4, %v10458_v22, %v10454_v56  ;;  %v15905_v38 = vsel %vm17372_vm7, %v10394_v24, %v10390_v20  ;;  %v5172_v27 = vmul.f32 0.015625, %v3904_v26  ;;  %v5092_v41 = vmul.f32 0.015625, %v3664_v6  ;;  %v5298_v24 = vld [vmem:[%s17361_s1 + $0x18] sm:$0xff] }
 0x6f8   : > { %v12114_v20 = vpack.c.bf16 %v5296_v5, %v5295_v51  ;;  %v12116_v22 = vpack.c.bf16 %v5314_v12, %v5313_v9  ;;  %v12118_v26 = vpack.c.bf16 %v5298_v24, %v5297_v21  ;;  %v1085_v5 = vld [vmem:[%s12294_s18 + $0x1c78] sm:$0xff]  ;;  %v5317_v12 = vld [vmem:[%s17361_s1 + $0xb0] sm:$0xff] }
 0x6f9   : > { %v10937_v63 = vrot.slane %v5172_v27, %v12473_v46  ;;  %v10542_v56 = vrot.slane %v5092_v41, %v12473_v46  ;;  %3981 = vadd.xlane.f32.xlu1 %v3980_v54  ;;  %3930 = vadd.xlane.f32.xlu0 %v3929_v4  ;;  %v3692_v4 = vsel %vm1198_vm0, %v1005_v48, 0.0  ;;  %v5316_v27 = vld [vmem:[%s17361_s1 + $0xa8] sm:$0xff]  ;;  %v3932_v9 = vsel %vm1198_vm0, %v1085_v5, 0.0  ;;  %v989_v24 = vld [vmem:[%s12294_s18 + $0x1978] sm:$0xff] }
 0x6fa   : > { %v3994_v44 = vpop.xlane.xlu1 %3993  ;;  %v3955_v52 = vpop.xlane.xlu0 %3954  ;;  %12115 = vmatpush3.bf16.msra.mxu0 %v12114_v20  ;;  %v5300_v20 = vld [vmem:[%s17361_s1 + $0x28] sm:$0xff] }
 0x6fb   : > { %v15927_v55 = vsel %vm6493_vm5, %v10937_v63, %v15858_v28  ;;  %v15931_v29 = vsel %vm6493_vm5, %v10542_v56, %v15862_v42  ;;  %v5202_v3 = vmul.f32 0.015625, %v3994_v44  ;;  %v5189_v15 = vmul.f32 0.015625, %v3955_v52  ;;  %12117 = vmatprep.subr.bf16.mxu0 %v12116_v22  ;;  %v5299_v63 = vld [vmem:[%s17361_s1 + $0x20] sm:$0xff] }
 0x6fc   : > { %v12120_v56 = vpack.c.bf16 %v5316_v27, %v5315_v31  ;;  %v5328_v27 = vld [vmem:[%s17361_s1 + $0x108] sm:$0xff] }
 0x6fd   : > { %v11085_v28 = vrot.slane %v5202_v3, %v12460_v34  ;;  %v11021_v42 = vrot.slane %v5189_v15, %v12494_v1  ;;  %4071 = vadd.xlane.f32.xlu1 %v4070_v7  ;;  %4020 = vadd.xlane.f32.xlu0 %v4019_v50  ;;  %v4022_v50 = vsel %vm1198_vm0, %v1115_v62, 0.0  ;;  %v5318_v3 = vld [vmem:[%s17361_s1 + $0xb8] sm:$0xff]  ;;  %v5343_v15 = vld [vmem:[%s17361_s1 + $0x180] sm:$0xff]  ;;  %v3644_v62 = vsel %vm1198_vm0, %v989_v24, 0.0 }
 0x6fe   : > { %v3526_v6 = vpop.xlane.xlu1 %3525  ;;  %v4045_v54 = vpop.xlane.xlu0 %4044  ;;  %12119 = vmatpush3.bf16.msra.mxu0 %v12118_v26  ;;  %v12124_v26 = vpack.c.bf16 %v5318_v3, %v5317_v12  ;;  %v5346_v12 = vld [vmem:[%s17361_s1 + $0x198] sm:$0xff] }
 0x6ff   : > { %v15953_v41 = vsel %vm6479_vm3, %v11085_v28, %v15871_v40  ;;  %v15957_v25 = vsel %vm6500_vm6, %v11021_v42, %v15875_v17  ;;  %v5046_v45 = vmul.f32 0.015625, %v3526_v6  ;;  %v5219_v51 = vmul.f32 0.015625, %v4045_v54  ;;  %12121 = vmatprep.subr.bf16.mxu0 %v12120_v56  ;;  %v1132_v28 = vld [vmem:[%s12294_s18 + $0x1df0] sm:$0xff]  ;;  %v5344_v42 = vld [vmem:[%s17361_s1 + $0x188] sm:$0xff]  ;;  %v5327_v54 = vld [vmem:[%s17361_s1 + $0x100] sm:$0xff] }
 0x700   : > { %v12122_v17 = vpack.c.bf16 %v5300_v20, %v5299_v63  ;;  %v12144_v6 = vpack.c.bf16 %v5344_v42, %v5343_v15  ;;  %v4073_v5 = vsel %vm1198_vm0, %v1132_v28, 0.0  ;;  %v12146_v63 = vpack.c.bf16 %v5328_v27, %v5327_v54  ;;  %v5319_v56 = vld [vmem:[%s17361_s1 + $0xc0] sm:$0xff]  ;;  %v5320_v20 = vld [vmem:[%s17361_s1 + $0xc8] sm:$0xff]  ;;  %v5330_v42 = vld [vmem:[%s17361_s1 + $0x118] sm:$0xff] }
 0x701   : > { %v10315_v40 = vrot.slane %v5046_v45, %v12491_v0  ;;  %v11169_v44 = vrot.slane %v5219_v51, %v12476_v47  ;;  %3693 = vadd.xlane.f32.xlu1 %v3692_v4  ;;  %3642 = vadd.xlane.f32.xlu0 %v3641_v59  ;;  %v12128_v3 = vpack.c.bf16 %v5320_v20, %v5319_v56  ;;  %v5348_v56 = vld [vmem:[%s17361_s1 + $0x1a8] sm:$0xff] }
 0x702   : > { %v3616_v52 = vpop.xlane.xlu1 %3615  ;;  %v3577_v7 = vpop.xlane.xlu0 %3576  ;;  %12123 = vmatpush3.bf16.msra.mxu0 %v12122_v17  ;;  %12145 = vmatprep.subr.bf16.mxu1 %v12144_v6 }
 0x703   : > { %v15982_v48 = vsel %vm17372_vm7, %v10315_v40, %v15884_v30  ;;  %v15986_v19 = vsel %vm6486_vm4, %v11169_v44, %v15887_v14  ;;  %v5076_v21 = vmul.f32 0.015625, %v3616_v52  ;;  %v5063_v22 = vmul.f32 0.015625, %v3577_v7  ;;  %v5301_v30 = vld [vmem:[%s17361_s1 + $0x30] sm:$0xff]  ;;  %v5302_v14 = vld [vmem:[%s17361_s1 + $0x38] sm:$0xff]  ;;  %12125 = vmatprep.subr.bf16.mxu0 %v12124_v26  ;;  %12147 = vmatpush3.bf16.msra.mxu1 %v12146_v63 }
 0x704   : > { %v12126_v31 = vpack.c.bf16 %v5302_v14, %v5301_v30  ;;  %v5345_v40 = vld [vmem:[%s17361_s1 + $0x190] sm:$0xff]  ;;  %v1117_v63 = vld [vmem:[%s12294_s18 + $0x1d78] sm:$0xff] }
 0x705   : > { %v10463_v4 = vrot.slane %v5076_v21, %v12473_v46  ;;  %v10399_v59 = vrot.slane %v5063_v22, %v12514_v23  ;;  %4023 = vadd.xlane.f32.xlu1 %v4022_v50  ;;  %3933 = vadd.xlane.f32.xlu0 %v3932_v9  ;;  %v1133_v50 = vld [vmem:[%s12294_s18 + $0x1df8] sm:$0xff]  ;;  %v1116_v9 = vld [vmem:[%s12294_s18 + $0x1d70] sm:$0xff]  ;;  %v12148_v15 = vpack.c.bf16 %v5346_v12, %v5345_v40  ;;  %v5332_v12 = vld [vmem:[%s17361_s1 + $0x128] sm:$0xff] }
 0x706   : > { %v3907_v45 = vpop.xlane.xlu1 %3906  ;;  %v3667_v51 = vpop.xlane.xlu0 %3666  ;;  %12127 = vmatpush3.bf16.msra.mxu0 %v12126_v31  ;;  %v5329_v21 = vld [vmem:[%s17361_s1 + $0x110] sm:$0xff]  ;;  %v4076_v30 = vsel %vm1198_vm0, %v1133_v50, 0.0  ;;  %v4025_v14 = vsel %vm1198_vm0, %v1116_v9, 0.0  ;;  %v5347_v31 = vld [vmem:[%s17361_s1 + $0x1a0] sm:$0xff] }
 0x707   : > { %v16020_v44 = vsel %vm6493_vm5, %v10463_v4, %v15902_v33  ;;  %v16024_v17 = vsel %vm17367_vm8, %v10399_v59, %v15905_v38  ;;  %v5173_v52 = vmul.f32 0.015625, %v3907_v45  ;;  %v5093_v7 = vmul.f32 0.015625, %v3667_v51  ;;  %v5303_v33 = vld [vmem:[%s17361_s1 + $0x40] sm:$0xff]  ;;  %v5304_v38 = vld [vmem:[%s17361_s1 + $0x48] sm:$0xff]  ;;  %12129 = vmatprep.subr.bf16.mxu0 %v12128_v3  ;;  %12149 = vmatprep.subr.bf16.mxu1 %v12148_v15  ;;  %v5321_v4 = vld [vmem:[%s17361_s1 + $0xd0] sm:$0xff] }
 0x708   : > { %v12130_v28 = vpack.c.bf16 %v5304_v38, %v5303_v33  ;;  %v12150_v54 = vpack.c.bf16 %v5330_v42, %v5329_v21  ;;  %v5322_v59 = vld [vmem:[%s17361_s1 + $0xd8] sm:$0xff]  ;;  %v12152_v40 = vpack.c.bf16 %v5348_v56, %v5347_v31  ;;  %v4028_v38 = vsel %vm1198_vm0, %v1117_v63, 0.0  ;;  %v1006_v21 = vld [vmem:[%s12294_s18 + $0x1a00] sm:$0xff] }
 0x709   : > { %v10942_v22 = vrot.slane %v5173_v52, %v12494_v1  ;;  %v10547_v24 = vrot.slane %v5093_v7, %v12494_v1  ;;  %3645 = vadd.xlane.f32.xlu1 %v3644_v62  ;;  %4074 = vadd.xlane.f32.xlu0 %v4073_v5  ;;  %v1022_v5 = vld [vmem:[%s12294_s18 + $0x1a80] sm:$0xff]  ;;  %v12132_v20 = vpack.c.bf16 %v5322_v59, %v5321_v4 }
 0x70a   : > { %v3997_v26 = vpop.xlane.xlu1 %3996  ;;  %v3958_v6 = vpop.xlane.xlu0 %3957  ;;  %12131 = vmatpush3.bf16.msra.mxu0 %v12130_v28  ;;  %12151 = vmatpush3.bf16.msra.mxu1 %v12150_v54  ;;  %v5331_v52 = vld [vmem:[%s17361_s1 + $0x120] sm:$0xff]  ;;  %v3743_v33 = vsel %vm1198_vm0, %v1022_v5, 0.0  ;;  %v5350_v54 = vld [vmem:[%s17361_s1 + $0x1b8] sm:$0xff]  ;;  %v5333_v5 = vld [vmem:[%s17361_s1 + $0x130] sm:$0xff] }
 0x70b   : > { %v16058_v27 = vsel %vm6500_vm6, %v10942_v22, %v15927_v55  ;;  %v16062_v45 = vsel %vm6500_vm6, %v10547_v24, %v15931_v29  ;;  %v5203_v51 = vmul.f32 0.015625, %v3997_v26  ;;  %v5190_v62 = vmul.f32 0.015625, %v3958_v6  ;;  %v5305_v55 = vld [vmem:[%s17361_s1 + $0x50] sm:$0xff]  ;;  %v5306_v29 = vld [vmem:[%s17361_s1 + $0x58] sm:$0xff]  ;;  %v1023_v22 = vld [vmem:[%s12294_s18 + $0x1a88] sm:$0xff]  ;;  %12133 = vmatprep.subr.bf16.mxu0 %v12132_v20  ;;  %12153 = vmatprep.subr.bf16.mxu1 %v12152_v40 }
 0x70c   : > { %v12134_v9 = vpack.c.bf16 %v5306_v29, %v5305_v55  ;;  %v12154_v24 = vpack.c.bf16 %v5332_v12, %v5331_v52  ;;  %v3695_v20 = vsel %vm1198_vm0, %v1006_v21, 0.0  ;;  %v3746_v40 = vsel %vm1198_vm0, %v1023_v22, 0.0  ;;  %v1024_v55 = vld [vmem:[%s12294_s18 + $0x1a90] sm:$0xff]  ;;  %v1007_v29 = vld [vmem:[%s12294_s18 + $0x1a08] sm:$0xff] }
 0x70d   : > { %v11090_v7 = vrot.slane %v5203_v51, %v12476_v47  ;;  %v11026_v50 = vrot.slane %v5190_v62, %v12491_v0  ;;  %4077 = vadd.xlane.f32.xlu1 %v4076_v30  ;;  %4026 = vadd.xlane.f32.xlu0 %v4025_v14  ;;  %v5323_v30 = vld [vmem:[%s17361_s1 + $0xe0] sm:$0xff]  ;;  %v5324_v14 = vld [vmem:[%s17361_s1 + $0xe8] sm:$0xff] }
 0x70e   : > { %v3529_v3 = vpop.xlane.xlu1 %3528  ;;  %v4048_v15 = vpop.xlane.xlu0 %4047  ;;  %12135 = vmatpush3.bf16.msra.mxu0 %v12134_v9  ;;  %12155 = vmatpush3.bf16.msra.mxu1 %v12154_v24  ;;  %v5307_v51 = vld [vmem:[%s17361_s1 + $0x60] sm:$0xff]  ;;  %v5308_v62 = vld [vmem:[%s17361_s1 + $0x68] sm:$0xff] }
 0x70f   : > { %v16089_v28 = vsel %vm6486_vm4, %v11090_v7, %v15953_v41  ;;  %v16093_v42 = vsel %vm17372_vm7, %v11026_v50, %v15957_v25  ;;  %v5047_v26 = vmul.f32 0.015625, %v3529_v3  ;;  %v5220_v6 = vmul.f32 0.015625, %v4048_v15  ;;  %v5349_v41 = vld [vmem:[%s17361_s1 + $0x1b0] sm:$0xff]  ;;  %v5334_v7 = vld [vmem:[%s17361_s1 + $0x138] sm:$0xff]  ;;  %v5352_v21 = vld [vmem:[%s17361_s1 + $0x1c8] sm:$0xff] }
 0x710   : > { %v12136_v25 = vpack.c.bf16 %v5324_v14, %v5323_v30  ;;  %v12156_v31 = vpack.c.bf16 %v5350_v54, %v5349_v41  ;;  %v12138_v52 = vpack.c.bf16 %v5308_v62, %v5307_v51  ;;  %v5325_v15 = vld [vmem:[%s17361_s1 + $0xf0] sm:$0xff]  ;;  %v5310_v30 = vld [vmem:[%s17361_s1 + $0x78] sm:$0xff]  ;;  %v5335_v14 = vld [vmem:[%s17361_s1 + $0x140] sm:$0xff]  ;;  %v3749_v54 = vsel %vm1198_vm0, %v1024_v55, 0.0 }
 0x711   : > { %v10320_v4 = vrot.slane %v5047_v26, %v12514_v23  ;;  %v11174_v59 = vrot.slane %v5220_v6, %v12473_v46  ;;  %3744 = vadd.xlane.f32.xlu1 %v3743_v33  ;;  %4029 = vadd.xlane.f32.xlu0 %v4028_v38  ;;  %v5326_v33 = vld [vmem:[%s17361_s1 + $0xf8] sm:$0xff]  ;;  %v12158_v38 = vpack.c.bf16 %v5334_v7, %v5333_v5  ;;  %v5309_v6 = vld [vmem:[%s17361_s1 + $0x70] sm:$0xff]  ;;  %v5336_v51 = vld [vmem:[%s17361_s1 + $0x148] sm:$0xff] }
 0x712   : > { %v3619_v63 = vpop.xlane.xlu1 %3618  ;;  %v3580_v56 = vpop.xlane.xlu0 %3579  ;;  %12137 = vmatprep.subr.bf16.mxu0 %v12136_v25  ;;  %12157 = vmatprep.subr.bf16.mxu1 %v12156_v31  ;;  %v12142_v31 = vpack.c.bf16 %v5310_v30, %v5309_v6  ;;  %v5354_v55 = vld [vmem:[%s17361_s1 + $0x1d8] sm:$0xff]  ;;  %v1008_v6 = vld [vmem:[%s12294_s18 + $0x1a10] sm:$0xff]  ;;  %v5355_v30 = vld [vmem:[%s17361_s1 + $0x1e0] sm:$0xff] }
 0x713   : > { %v16127_v50 = vsel %vm17367_vm8, %v10320_v4, %v15982_v48  ;;  %v16131_v9 = vsel %vm6493_vm5, %v11174_v59, %v15986_v19  ;;  %v5077_v12 = vmul.f32 0.015625, %v3619_v63  ;;  %v5064_v3 = vmul.f32 0.015625, %v3580_v56  ;;  %v5351_v48 = vld [vmem:[%s17361_s1 + $0x1c0] sm:$0xff]  ;;  %12139 = vmatpush3.bf16.msra.mxu0 %v12138_v52  ;;  %v1151_v59 = vld [vmem:[%s12294_s18 + $0x1e88] sm:$0xff]  ;;  %12159 = vmatpush3.bf16.msra.mxu1 %v12158_v38  ;;  %v1025_v38 = vld [vmem:[%s12294_s18 + $0x1a98] sm:$0xff] }
 0x714   : > { %v12140_v19 = vpack.c.bf16 %v5326_v33, %v5325_v15  ;;  %v12160_v26 = vpack.c.bf16 %v5352_v21, %v5351_v48  ;;  %v3698_v4 = vsel %vm1198_vm0, %v1007_v29, 0.0  ;;  %v4130_v33 = vsel %vm1198_vm0, %v1151_v59, 0.0 }
 0x715   : > { %v10468_v22 = vrot.slane %v5077_v12, %v12494_v1  ;;  %v10404_v24 = vrot.slane %v5064_v3, %v12508_v18  ;;  %3696 = vadd.xlane.f32.xlu1 %v3695_v20  ;;  %3747 = vadd.xlane.f32.xlu0 %v3746_v40  ;;  %v1150_v20 = vld [vmem:[%s12294_s18 + $0x1e80] sm:$0xff]  ;;  %v5353_v40 = vld [vmem:[%s17361_s1 + $0x1d0] sm:$0xff]  ;;  %v5338_v12 = vld [vmem:[%s17361_s1 + $0x158] sm:$0xff] }
 0x716   : > { %v3910_v41 = vpop.xlane.xlu1 %3909  ;;  %v3670_v25 = vpop.xlane.xlu0 %3669  ;;  %12141 = vmatprep.subr.bf16.mxu0 %v12140_v19  ;;  %12161 = vmatprep.subr.bf16.mxu1 %v12160_v26  ;;  %v12164_v29 = vpack.c.bf16 %v5354_v55, %v5353_v40  ;;  %v4127_v48 = vsel %vm1198_vm0, %v1150_v20, 0.0 }
 0x717   : > { %v16164_v62 = vsel %vm6500_vm6, %v10468_v22, %v16020_v44  ;;  %v16168_v5 = vsel %vm17453_vm9, %v10404_v24, %v16024_v17  ;;  %v5174_v63 = vmul.f32 0.015625, %v3910_v41  ;;  %v5094_v56 = vmul.f32 0.015625, %v3670_v25  ;;  %12143 = vmatpush3.bf16.msra.mxu0 %v12142_v31  ;;  %v5337_v17 = vld [vmem:[%s17361_s1 + $0x150] sm:$0xff] }
 0x718   : > { %v12162_v44 = vpack.c.bf16 %v5336_v51, %v5335_v14  ;;  %v12166_v19 = vpack.c.bf16 %v5338_v12, %v5337_v17  ;;  %v5356_v14 = vld [vmem:[%s17361_s1 + $0x1e8] sm:$0xff]  ;;  %v3752_v31 = vsel %vm1198_vm0, %v1025_v38, 0.0  ;;  %v3701_v51 = vsel %vm1198_vm0, %v1008_v6, 0.0  ;;  %v5357_v17 = vld [vmem:[%s17361_s1 + $0x1f0] sm:$0xff] }
 0x719   : > { %v10947_v52 = vrot.slane %v5174_v63, %v12491_v0  ;;  %v10552_v7 = vrot.slane %v5094_v56, %v12491_v0  ;;  %3750 = vadd.xlane.f32.xlu1 %v3749_v54  ;;  %3699 = vadd.xlane.f32.xlu0 %v3698_v4  ;;  %v12168_v41 = vpack.c.bf16 %v5356_v14, %v5355_v30  ;;  %v5340_v54 = vld [vmem:[%s17361_s1 + $0x168] sm:$0xff] }
 0x71a   : > { %v4000_v3 = vpop.xlane.xlu1 %3999  ;;  %v3961_v15 = vpop.xlane.xlu0 %3960  ;;  %12163 = vmatpush3.bf16.msra.mxu1 %v12162_v44  ;;  %v1055_v63 = vld [vmem:[%s12294_s18 + $0x1b88] sm:$0xff] }
 0x71b   : > { %v16190_v21 = vsel %vm17372_vm7, %v10947_v52, %v16058_v27  ;;  %v16194_v22 = vsel %vm17372_vm7, %v10552_v7, %v16062_v45  ;;  %v5204_v24 = vmul.f32 0.015625, %v4000_v3  ;;  %v5191_v26 = vmul.f32 0.015625, %v3961_v15  ;;  %12165 = vmatprep.subr.bf16.mxu1 %v12164_v29  ;;  %v5339_v27 = vld [vmem:[%s17361_s1 + $0x160] sm:$0xff]  ;;  %v5358_v52 = vld [vmem:[%s17361_s1 + $0x1f8] sm:$0xff]  ;;  %v1135_v14 = vld [vmem:[%s12294_s18 + $0x1e08] sm:$0xff] }
 0x71c   : > { %v12170_v56 = vpack.c.bf16 %v5340_v54, %v5339_v27  ;;  %v1054_v29 = vld [vmem:[%s12294_s18 + $0x1b80] sm:$0xff]  ;;  %v12172_v7 = vpack.c.bf16 %v5358_v52, %v5357_v17  ;;  %v5342_v3 = vld [vmem:[%s17361_s1 + $0x178] sm:$0xff] }
 0x71d   : > { %v11095_v45 = vrot.slane %v5204_v24, %v12473_v46  ;;  %v11031_v25 = vrot.slane %v5191_v26, %v12514_v23  ;;  %4131 = vadd.xlane.f32.xlu1 %v4130_v33  ;;  %4128 = vadd.xlane.f32.xlu0 %v4127_v48  ;;  %v3842_v48 = vsel %vm1198_vm0, %v1055_v63, 0.0  ;;  %v3839_v38 = vsel %vm1198_vm0, %v1054_v29, 0.0  ;;  %v1009_v63 = vld [vmem:[%s12294_s18 + $0x1a18] sm:$0xff] }
 0x71e   : > { %v3532_v4 = vpop.xlane.xlu1 %3531  ;;  %v4051_v59 = vpop.xlane.xlu0 %4050  ;;  %12167 = vmatpush3.bf16.msra.mxu1 %v12166_v19  ;;  %v3704_v52 = vsel %vm1198_vm0, %v1009_v63, 0.0 }
 0x71f   : > { %v16216_v20 = vsel %vm6493_vm5, %v11095_v45, %v16089_v28  ;;  %v16220_v40 = vsel %vm17367_vm8, %v11031_v25, %v16093_v42  ;;  %v5048_v55 = vmul.f32 0.015625, %v3532_v4  ;;  %v5221_v44 = vmul.f32 0.015625, %v4051_v59  ;;  %12169 = vmatprep.subr.bf16.mxu1 %v12168_v41  ;;  %v5341_v28 = vld [vmem:[%s17361_s1 + $0x170] sm:$0xff]  ;;  %v1134_v41 = vld [vmem:[%s12294_s18 + $0x1e00] sm:$0xff] }
 0x720   : > { %v12174_v19 = vpack.c.bf16 %v5342_v3, %v5341_v28  ;;  %v4079_v4 = vsel %vm1198_vm0, %v1134_v41, 0.0  ;;  %v1026_v3 = vld [vmem:[%s12294_s18 + $0x1aa0] sm:$0xff]  ;;  %v1056_v41 = vld [vmem:[%s12294_s18 + $0x1b90] sm:$0xff] }
 0x721   : > { %v10325_v42 = vrot.slane %v5048_v55, %v12508_v18  ;;  %v11179_v12 = vrot.slane %v5221_v44, %v12494_v1  ;;  %3753 = vadd.xlane.f32.xlu1 %v3752_v31  ;;  %3702 = vadd.xlane.f32.xlu0 %v3701_v51 }
 0x722   : > { %v3622_v15 = vpop.xlane.xlu1 %3621  ;;  %v3583_v33 = vpop.xlane.xlu0 %3582  ;;  %12171 = vmatpush3.bf16.msra.mxu1 %v12170_v56  ;;  %v1152_v56 = vld [vmem:[%s12294_s18 + $0x1e90] sm:$0xff] }
 0x723   : > { %v10326_v24 = vsel %vm17453_vm9, %v10325_v42, %v16127_v50  ;;  %v11180_v26 = vsel %vm6500_vm6, %v11179_v12, %v16131_v9  ;;  %v5078_v6 = vmul.f32 0.015625, %v3622_v15  ;;  %v5065_v30 = vmul.f32 0.015625, %v3583_v33  ;;  %12173 = vmatprep.subr.bf16.mxu1 %v12172_v7  ;;  %v1038_v12 = vld [vmem:[%s12294_s18 + $0x1b00] sm:$0xff] }
 0x724   : > { %v4082_v50 = vsel %vm1198_vm0, %v1135_v14, 0.0 }
 0x725   : > { %v10473_v27 = vrot.slane %v5078_v6, %v12491_v0  ;;  %v10409_v45 = vrot.slane %v5065_v30, %v12524_v39  ;;  %3843 = vadd.xlane.f32.xlu1 %v3842_v48  ;;  %3840 = vadd.xlane.f32.xlu0 %v3839_v38 }
 0x726   : > { %v3913_v25 = vpop.xlane.xlu1 %3912  ;;  %v3673_v54 = vpop.xlane.xlu0 %3672  ;;  %12175 = vmatpush3.bf16.msra.mxu1 %v12174_v19  ;;  %v3791_v19 = vsel %vm1198_vm0, %v1038_v12, 0.0 }
 0x727   : > { %v10474_v9 = vsel %vm17372_vm7, %v10473_v27, %v16164_v62  ;;  %v10410_v59 = vsel %vm6528_vm10, %v10409_v45, %v16168_v5  ;;  %v5175_v31 = vmul.f32 0.015625, %v3913_v25  ;;  %v5095_v51 = vmul.f32 0.015625, %v3673_v54  ;;  %v1039_v27 = vld [vmem:[%s12294_s18 + $0x1b08] sm:$0xff] }
 0x728   : > { %v4133_v62 = vsel %vm1198_vm0, %v1152_v56, 0.0  ;;  %v1153_v56 = vld [vmem:[%s12294_s18 + $0x1e98] sm:$0xff] }
 0x729   : > { %v10952_v55 = vrot.slane %v5175_v31, %v12514_v23  ;;  %v10557_v44 = vrot.slane %v5095_v51, %v12514_v23  ;;  %4083 = vadd.xlane.f32.xlu1 %v4082_v50  ;;  %4080 = vadd.xlane.f32.xlu0 %v4079_v4  ;;  %v3845_v4 = vsel %vm1198_vm0, %v1056_v41, 0.0 }
 0x72a   : > { %v4003_v29 = vpop.xlane.xlu1 %4002  ;;  %v3964_v17 = vpop.xlane.xlu0 %3963 }
 0x72b   : > { %v10953_v5 = vsel %vm17367_vm8, %v10952_v55, %v16190_v21  ;;  %v10558_v7 = vsel %vm17367_vm8, %v10557_v44, %v16194_v22  ;;  %v5205_v28 = vmul.f32 0.015625, %v4003_v29  ;;  %v5192_v42 = vmul.f32 0.015625, %v3964_v17  ;;  %v1136_v55 = vld [vmem:[%s12294_s18 + $0x1e10] sm:$0xff] }
 0x72c   : > { %v3755_v21 = vsel %vm1198_vm0, %v1026_v3, 0.0  ;;  %v1183_v3 = vld [vmem:[%s12294_s18 + $0x1f88] sm:$0xff] }
 0x72d   : > { %v11100_v15 = vrot.slane %v5205_v28, %v12494_v1  ;;  %v11036_v33 = vrot.slane %v5192_v42, %v12508_v18  ;;  %3705 = vadd.xlane.f32.xlu1 %v3704_v52  ;;  %4134 = vadd.xlane.f32.xlu0 %v4133_v62  ;;  %v4136_v62 = vsel %vm1198_vm0, %v1153_v56, 0.0 }
 0x72e   : > { %v3535_v48 = vpop.xlane.xlu1 %3534  ;;  %v4054_v38 = vpop.xlane.xlu0 %4053 }
 0x72f   : > { %v11101_v22 = vsel %vm6500_vm6, %v11100_v15, %v16216_v20  ;;  %v11037_v6 = vsel %vm17453_vm9, %v11036_v33, %v16220_v40  ;;  %v5049_v30 = vmul.f32 0.015625, %v3535_v48  ;;  %v5222_v14 = vmul.f32 0.015625, %v4054_v38  ;;  %v1182_v15 = vld [vmem:[%s12294_s18 + $0x1f80] sm:$0xff] }
 0x730   : > { %v3794_v20 = vsel %vm1198_vm0, %v1039_v27, 0.0  ;;  %vm17454_vm9 = vcmask 786112   ;;  %v1027_v27 = vld [vmem:[%s12294_s18 + $0x1aa8] sm:$0xff] }
 0x731   : > { %v10330_v45 = vrot.slane %v5049_v30, %v12524_v39  ;;  %v11184_v25 = vrot.slane %v5222_v14, %v12491_v0  ;;  %3792 = vadd.xlane.f32.xlu1 %v3791_v19  ;;  %3756 = vadd.xlane.f32.xlu0 %v3755_v21  ;;  %v4226_v21 = vsel %vm1198_vm0, %v1183_v3, 0.0 }
 0x732   : > { %v3625_v54 = vpop.xlane.xlu1 %3624  ;;  %v3586_v50 = vpop.xlane.xlu0 %3585 }
 0x733   : > { %v10331_v40 = vsel %vm6528_vm10, %v10330_v45, %v10326_v24  ;;  %v11185_v31 = vsel %vm17372_vm7, %v11184_v25, %v11180_v26  ;;  %v5079_v51 = vmul.f32 0.015625, %v3625_v54  ;;  %v5066_v63 = vmul.f32 0.015625, %v3586_v50  ;;  %v1010_v45 = vld [vmem:[%s12294_s18 + $0x1a20] sm:$0xff] }
 0x734   : > { %v4085_v24 = vsel %vm1198_vm0, %v1136_v55, 0.0  ;;  %v1057_v55 = vld [vmem:[%s12294_s18 + $0x1b98] sm:$0xff] }
 0x735   : > { %v10478_v44 = vrot.slane %v5079_v51, %v12514_v23  ;;  %v10414_v29 = vrot.slane %v5066_v63, %v12530_v43  ;;  %3846 = vadd.xlane.f32.xlu1 %v3845_v4  ;;  %3795 = vadd.xlane.f32.xlu0 %v3794_v20  ;;  %v3758_v20 = vsel %vm1198_vm0, %v1027_v27, 0.0 }
 0x736   : > { %v3916_v17 = vpop.xlane.xlu1 %3915  ;;  %v3676_v52 = vpop.xlane.xlu0 %3675 }
 0x737   : > { %v10479_v26 = vsel %vm17367_vm8, %v10478_v44, %v10474_v9  ;;  %v10415_v28 = vsel %vm17454_vm9, %v10414_v29, %v10410_v59  ;;  %v5176_v42 = vmul.f32 0.015625, %v3916_v17  ;;  %v5096_v12 = vmul.f32 0.015625, %v3676_v52  ;;  %vm17456_vm9 = vmmov %vm17455_vm11  ;;  %v1040_v44 = vld [vmem:[%s12294_s18 + $0x1b10] sm:$0xff] }
 0x738   : > { %v4223_v9 = vsel %vm1198_vm0, %v1182_v15, 0.0  ;;  %v1154_v15 = vld [vmem:[%s12294_s18 + $0x1ea0] sm:$0xff] }
 0x739   : > { %v10957_v33 = vrot.slane %v5176_v42, %v12508_v18  ;;  %v10562_v48 = vrot.slane %v5096_v12, %v12508_v18  ;;  %4137 = vadd.xlane.f32.xlu1 %v4136_v62  ;;  %4086 = vadd.xlane.f32.xlu0 %v4085_v24  ;;  %v3848_v24 = vsel %vm1198_vm0, %v1057_v55, 0.0  ;;  %v1011_v55 = vld [vmem:[%s12294_s18 + $0x1a28] sm:$0xff] }
 0x73a   : > { %v4006_v38 = vpop.xlane.xlu1 %4005  ;;  %v3967_v19 = vpop.xlane.xlu0 %3966 }
 0x73b   : > { %v10958_v59 = vsel %vm17455_vm11, %v10957_v33, %v10953_v5  ;;  %v10563_v30 = vsel %vm17456_vm9, %v10562_v48, %v10558_v7  ;;  %v5206_v14 = vmul.f32 0.015625, %v4006_v38  ;;  %v5193_v41 = vmul.f32 0.015625, %v3967_v19  ;;  %v1137_v33 = vld [vmem:[%s12294_s18 + $0x1e18] sm:$0xff] }
 0x73c   : > { %v3707_v5 = vsel %vm1198_vm0, %v1010_v45, 0.0  ;;  %vm17457_vm11 = vcmask 786112   ;;  %v1167_v45 = vld [vmem:[%s12294_s18 + $0x1f08] sm:$0xff] }
 0x73d   : > { %v11105_v25 = vrot.slane %v5206_v14, %v12491_v0  ;;  %v11041_v54 = vrot.slane %v5193_v41, %v12524_v39  ;;  %4227 = vadd.xlane.f32.xlu1 %v4226_v21  ;;  %4224 = vadd.xlane.f32.xlu0 %v4223_v9  ;;  %v4139_v9 = vsel %vm1198_vm0, %v1154_v15, 0.0 }
 0x73e   : > { %v3538_v50 = vpop.xlane.xlu1 %3537  ;;  %v4057_v4 = vpop.xlane.xlu0 %4056 }
 0x73f   : > { %v11106_v7 = vsel %vm17372_vm7, %v11105_v25, %v11101_v22  ;;  %v16305_v51 = vsel %vm6528_vm10, %v11041_v54, %v11037_v6  ;;  %v5050_v63 = vmul.f32 0.015625, %v3538_v50  ;;  %v5223_v56 = vmul.f32 0.015625, %v4057_v4  ;;  %v1166_v25 = vld [vmem:[%s12294_s18 + $0x1f00] sm:$0xff] }
 0x740   : > { %v3797_v22 = vsel %vm1198_vm0, %v1040_v44, 0.0  ;;  %v1184_v44 = vld [vmem:[%s12294_s18 + $0x1f90] sm:$0xff] }
 0x741   : > { %v10335_v29 = vrot.slane %v5050_v63, %v12530_v43  ;;  %v11189_v17 = vrot.slane %v5223_v56, %v12514_v23  ;;  %3759 = vadd.xlane.f32.xlu1 %v3758_v20  ;;  %3708 = vadd.xlane.f32.xlu0 %v3707_v5 }
 0x742   : > { %v3628_v52 = vpop.xlane.xlu1 %3627  ;;  %v3589_v62 = vpop.xlane.xlu0 %3588 }
 0x743   : > { %v10336_v6 = vsel %vm17457_vm11, %v10335_v29, %v10331_v40  ;;  %v11190_v42 = vsel %vm17367_vm8, %v11189_v17, %v11185_v31  ;;  %v5080_v12 = vmul.f32 0.015625, %v3628_v52  ;;  %v5067_v3 = vmul.f32 0.015625, %v3589_v62  ;;  %vm17458_vm11 = vmmov %vm17456_vm9 }
 0x744   : > { %v4088_v40 = vsel %vm1198_vm0, %v1137_v33, 0.0  ;;  %v3710_v62 = vsel %vm1198_vm0, %v1011_v55, 0.0 }
 0x745   : > { %v10483_v48 = vrot.slane %v5080_v12, %v12508_v18  ;;  %v10419_v38 = vrot.slane %v5067_v3, %v12540_v57  ;;  %3849 = vadd.xlane.f32.xlu1 %v3848_v24  ;;  %3798 = vadd.xlane.f32.xlu0 %v3797_v22  ;;  %v4229_v24 = vsel %vm1198_vm0, %v1184_v44, 0.0  ;;  %v1041_v12 = vld [vmem:[%s12294_s18 + $0x1b18] sm:$0xff]  ;;  %v1028_v3 = vld [vmem:[%s12294_s18 + $0x1ab0] sm:$0xff] }
 0x746   : > { %v3919_v19 = vpop.xlane.xlu1 %3918  ;;  %v3679_v21 = vpop.xlane.xlu0 %3678 }
 0x747   : > { %v10484_v31 = vsel %vm17456_vm9, %v10483_v48, %v10479_v26  ;;  %v16323_v14 = vsel %vm6542_vm12, %v10419_v38, %v10415_v28  ;;  %v5177_v41 = vmul.f32 0.015625, %v3919_v19  ;;  %v5097_v27 = vmul.f32 0.015625, %v3679_v21 }
 0x748   : > { %v4178_v26 = vsel %vm1198_vm0, %v1167_v45, 0.0  ;;  %v4175_v28 = vsel %vm1198_vm0, %v1166_v25, 0.0  ;;  %v3800_v19 = vsel %vm1198_vm0, %v1041_v12, 0.0  ;;  %vm11552_vm9 = vcmask 1046534  }
 0x749   : > { %v10962_v54 = vrot.slane %v5177_v41, %v12524_v39  ;;  %v10567_v50 = vrot.slane %v5097_v27, %v12524_v39  ;;  %4140 = vadd.xlane.f32.xlu1 %v4139_v9  ;;  %4089 = vadd.xlane.f32.xlu0 %v4088_v40  ;;  %v1138_v41 = vld [vmem:[%s12294_s18 + $0x1e20] sm:$0xff] }
 0x74a   : > { %v4009_v4 = vpop.xlane.xlu1 %4008  ;;  %v16329_v20 = vpop.xlane.xlu0 %3969  ;;  %v1058_v27 = vld [vmem:[%s12294_s18 + $0x1ba0] sm:$0xff] }
 0x74b   : > { %v16334_v5 = vsel %vm6528_vm10, %v10962_v54, %v10958_v59  ;;  %v16337_v63 = vsel %vm6528_vm10, %v10567_v50, %v10563_v30  ;;  %v5207_v56 = vmul.f32 0.015625, %v4009_v4  ;;  %v4091_v50 = vsel %vm1198_vm0, %v1138_v41, 0.0  ;;  %v1168_v4 = vld [vmem:[%s12294_s18 + $0x1f10] sm:$0xff] }
 0x74c   : > { %v4181_v55 = vsel %vm1198_vm0, %v1168_v4, 0.0 }
 0x74d   : > { %v11110_v29 = vrot.slane %v5207_v56, %v12514_v23  ;;  %4179 = vadd.xlane.f32.xlu1 %v4178_v26  ;;  %4176 = vadd.xlane.f32.xlu0 %v4175_v28  ;;  %v1155_v26 = vld [vmem:[%s12294_s18 + $0x1ea8] sm:$0xff] }
 0x74e   : > { %v3541_v17 = vpop.xlane.xlu1 %3540  ;;  %v4060_v52 = vpop.xlane.xlu0 %4059  ;;  %v4142_v44 = vsel %vm1198_vm0, %v1155_v26, 0.0 }
 0x74f   : > { %v16345_v59 = vsel %vm17367_vm8, %v11110_v29, %v11106_v7  ;;  %v5051_v22 = vmul.f32 0.015625, %v3541_v17  ;;  %v5224_v30 = vmul.f32 0.015625, %v4060_v52  ;;  %v3761_v7 = vsel %vm1198_vm0, %v1028_v3, 0.0  ;;  %v1012_v29 = vld [vmem:[%s12294_s18 + $0x1a30] sm:$0xff]  ;;  %v1185_v17 = vld [vmem:[%s12294_s18 + $0x1f98] sm:$0xff] }
 0x750   : > { %vm17459_vm8 = vcmask 786112  }
 0x751   : > { %v10340_v15 = vrot.slane %v5051_v22, %v12540_v57  ;;  %v11194_v33 = vrot.slane %v5224_v30, %v12508_v18  ;;  %3711 = vadd.xlane.f32.xlu1 %v3710_v62  ;;  %4230 = vadd.xlane.f32.xlu0 %v4229_v24  ;;  %v3713_v62 = vsel %vm1198_vm0, %v1012_v29, 0.0  ;;  %v4232_v24 = vsel %vm1198_vm0, %v1185_v17, 0.0  ;;  %v1042_v22 = vld [vmem:[%s12294_s18 + $0x1b20] sm:$0xff]  ;;  %v1029_v30 = vld [vmem:[%s12294_s18 + $0x1ab8] sm:$0xff]  ;;  %vm17460_vm7 = vmmov %vm17459_vm8 }
 0x752   : > { %v3631_v48 = vpop.xlane.xlu1 %3630  ;;  %v3592_v38 = vpop.xlane.xlu0 %3591  ;;  %v1186_v29 = vld [vmem:[%s12294_s18 + $0x1fa0] sm:$0xff] }
 0x753   : > { %v16354_v21 = vsel %vm6542_vm12, %v10340_v15, %v10336_v6  ;;  %v16357_v9 = vsel %vm17458_vm11, %v11194_v33, %v11190_v42  ;;  %v5081_v40 = vmul.f32 0.015625, %v3631_v48  ;;  %v3851_v6 = vsel %vm1198_vm0, %v1058_v27, 0.0  ;;  %v1139_v48 = vld [vmem:[%s12294_s18 + $0x1e28] sm:$0xff] }
 0x754   : > { %v3803_v15 = vsel %vm1198_vm0, %v1042_v22, 0.0  ;;  %v3764_v33 = vsel %vm1198_vm0, %v1029_v30, 0.0  ;;  %v4094_v41 = vsel %vm1198_vm0, %v1139_v48, 0.0  ;;  %v5068_v17 = vmul.f32 0.015625, %v3592_v38  ;;  %v1030_v48 = vld [vmem:[%s12294_s18 + $0x1ac0] sm:$0xff] }
 0x755   : > { %v10488_v45 = vrot.slane %v5081_v40, %v12524_v39  ;;  %3801 = vadd.xlane.f32.xlu1 %v3800_v19  ;;  %3762 = vadd.xlane.f32.xlu0 %v3761_v7  ;;  %v1059_v19 = vld [vmem:[%s12294_s18 + $0x1ba8] sm:$0xff]  ;;  %vm11554_vm11 = vcmask 1047559  }
 0x756   : > { %v16362_v25 = vpop.xlane.xlu1 %3921  ;;  %v16364_v54 = vpop.xlane.xlu0 %3681  ;;  %v3854_v27 = vsel %vm1198_vm0, %v1059_v19, 0.0  ;;  %v10424_v19 = vrot.slane %v5068_v17, %v12546_v61 }
 0x757   : > { %v16369_v42 = vsel %vm6528_vm10, %v10488_v45, %v10484_v31  ;;  %v1169_v45 = vld [vmem:[%s12294_s18 + $0x1f18] sm:$0xff] }
 0x758   : > { %v4184_v26 = vsel %vm1198_vm0, %v1169_v45, 0.0  ;;  %v3767_v45 = vsel %vm1198_vm0, %v1030_v48, 0.0  ;;  %v1170_v48 = vld [vmem:[%s12294_s18 + $0x1f20] sm:$0xff] }
 0x759   : > { %4092 = vadd.xlane.f32.xlu1 %v4091_v50  ;;  %3852 = vadd.xlane.f32.xlu0 %v3851_v6  ;;  %v1156_v50 = vld [vmem:[%s12294_s18 + $0x1eb0] sm:$0xff] }
 0x75a   : > { %v16373_v28 = vpop.xlane.xlu1 %4011  ;;  %v16375_v56 = vpop.xlane.xlu0 %3972 }
 0x75d   : > { %4182 = vadd.xlane.f32.xlu1 %v4181_v55  ;;  %4143 = vadd.xlane.f32.xlu0 %v4142_v44  ;;  %v4145_v55 = vsel %vm1198_vm0, %v1156_v50, 0.0  ;;  %v1013_v44 = vld [vmem:[%s12294_s18 + $0x1a38] sm:$0xff] }
 0x75e   : > { %v16381_v31 = vpop.xlane.xlu1 %3543  ;;  %v16383_v52 = vpop.xlane.xlu0 %4062  ;;  %v3716_v30 = vsel %vm1198_vm0, %v1013_v44, 0.0  ;;  %v10425_v44 = vsel %vm6549_vm13, %v10424_v19, %v16323_v14 }
 0x761   : > { %3714 = vadd.xlane.f32.xlu1 %v3713_v62  ;;  %4233 = vadd.xlane.f32.xlu0 %v4232_v24 }
 0x762   : > { %v16389_v12 = vpop.xlane.xlu1 %3633  ;;  %v3595_v3 = vpop.xlane.xlu0 %3594 }
 0x763   : > { %v5069_v62 = vmul.f32 0.015625, %v3595_v3 }
 0x765   : > { %3804 = vadd.xlane.f32.xlu1 %v3803_v15  ;;  %3765 = vadd.xlane.f32.xlu0 %v3764_v33  ;;  %v4235_v15 = vsel %vm1198_vm0, %v1186_v29, 0.0  ;;  %v1043_v33 = vld [vmem:[%s12294_s18 + $0x1b28] sm:$0xff]  ;;  %v10429_v38 = vrot.slane %v5069_v62, %v12556_v11 }
 0x766   : > { %v16395_v7 = vpop.xlane.xlu1 %3924  ;;  %v16397_v40 = vpop.xlane.xlu0 %3684 }
 0x769   : > { %4095 = vadd.xlane.f32.xlu1 %v4094_v41  ;;  %3855 = vadd.xlane.f32.xlu0 %v3854_v27  ;;  %v3806_v27 = vsel %vm1198_vm0, %v1043_v33, 0.0  ;;  %v10430_v33 = vsel %vm6556_vm14, %v10429_v38, %v10425_v44  ;;  %v4187_v38 = vsel %vm1198_vm0, %v1170_v48, 0.0  ;;  %v1014_v44 = vld [vmem:[%s12294_s18 + $0x1a40] sm:$0xff] }
 0x76a   : > { %v16403_v6 = vpop.xlane.xlu1 %4014  ;;  %v16405_v4 = vpop.xlane.xlu0 %3975 }
 0x76d   : > { %4185 = vadd.xlane.f32.xlu1 %v4184_v26  ;;  %4146 = vadd.xlane.f32.xlu0 %v4145_v55  ;;  %v1140_v26 = vld [vmem:[%s12294_s18 + $0x1e30] sm:$0xff] }
 0x76e   : > { %v3547_v24 = vpop.xlane.xlu1 %3546  ;;  %v16411_v22 = vpop.xlane.xlu0 %4065  ;;  %v1060_v55 = vld [vmem:[%s12294_s18 + $0x1bb0] sm:$0xff] }
 0x771   : > { %3717 = vadd.xlane.f32.xlu1 %v3716_v30  ;;  %4236 = vadd.xlane.f32.xlu0 %v4235_v15  ;;  %v4097_v30 = vsel %vm1198_vm0, %v1140_v26, 0.0  ;;  %v3857_v15 = vsel %vm1198_vm0, %v1060_v55, 0.0 }
 0x772   : > { %v16419_v41 = vpop.xlane.xlu1 %3636  ;;  %v3598_v3 = vpop.xlane.xlu0 %3597 }
 0x773   : > { %v5070_v50 = vmul.f32 0.015625, %v3598_v3  ;;  %v1157_v3 = vld [vmem:[%s12294_s18 + $0x1eb8] sm:$0xff] }
 0x774   : > { %v4148_v55 = vsel %vm1198_vm0, %v1157_v3, 0.0  ;;  %v1044_v3 = vld [vmem:[%s12294_s18 + $0x1b30] sm:$0xff] }
 0x775   : > { %v10434_v29 = vrot.slane %v5070_v50, %v12561_v13  ;;  %3807 = vadd.xlane.f32.xlu1 %v3806_v27  ;;  %3768 = vadd.xlane.f32.xlu0 %v3767_v45  ;;  %v5052_v27 = vmul.f32 0.015625, %v16381_v31  ;;  %v5053_v45 = vmul.f32 0.015625, %v3547_v24  ;;  %v3719_v24 = vsel %vm1198_vm0, %v1014_v44, 0.0 }
 0x776   : > { %v16428_v17 = vpop.xlane.xlu1 %3927  ;;  %v16430_v62 = vpop.xlane.xlu0 %3687  ;;  %v3809_v10 = vsel %vm1198_vm0, %v1044_v3, 0.0  ;;  %v4100_v3 = vsel %vm1198_vm0, %v1141_v16, 0.0 }
 0x777   : > { %v10435_v14 = vsel %vm6563_vm15, %v10434_v29, %v10430_v33  ;;  %v1187_v29 = vld [vmem:[%s12294_s18 + $0x1fa8] sm:$0xff]  ;;  %v10345_v33 = vrot.slane %v5052_v27, %v12546_v61  ;;  %v5195_v27 = vmul.f32 0.015625, %v16375_v56  ;;  %v3770_v56 = vsel %vm1198_vm0, %v1031_v60, 0.0 }
 0x778   : > { %v16440_v19 = vsel %vm11552_vm9, %v10435_v14, %v15312_v8  ;;  %v10350_v8 = vrot.slane %v5053_v45, %v12556_v11  ;;  %v5194_v14 = vmul.f32 0.015625, %v16329_v20  ;;  %v5100_v0 = vmul.f32 0.015625, %v16430_v62 }
 0x779   : > { %4098 = vadd.xlane.f32.xlu1 %v4097_v30  ;;  %3858 = vadd.xlane.f32.xlu0 %v3857_v15  ;;  %v4238_v15 = vsel %vm1198_vm0, %v1187_v29, 0.0  ;;  %v10346_v45 = vsel %vm6549_vm13, %v10345_v33, %v16354_v21  ;;  %v1061_v21 = vld [vmem:[%s12294_s18 + $0x1bb8] sm:$0xff] }
 0x77a   : > { %v16443_v50 = vpop.xlane.xlu1 %4017  ;;  %v3979_v26 = vpop.xlane.xlu0 %3978  ;;  %v10351_v20 = vsel %vm6556_vm14, %v10350_v8, %v10346_v45  ;;  %v11046_v33 = vrot.slane %v5194_v14, %v12530_v43  ;;  %v11051_v8 = vrot.slane %v5195_v27, %v12540_v57  ;;  %v3860_v14 = vsel %vm1198_vm0, %v1061_v21, 0.0 }
 0x77b   : > { %v5197_v44 = vmul.f32 0.015625, %v3979_v26  ;;  %v1015_v26 = vld [vmem:[%s12294_s18 + $0x1a48] sm:$0xff]  ;;  %v5178_v27 = vmul.f32 0.015625, %v16362_v25  ;;  %v5099_v25 = vmul.f32 0.015625, %v16397_v40 }
 0x77c   : > { %v11047_v16 = vsel %vm17459_vm8, %v11046_v33, %v16305_v51  ;;  %v3722_v21 = vsel %vm1198_vm0, %v1015_v26, 0.0 }
 0x77d   : > { %4188 = vadd.xlane.f32.xlu1 %v4187_v38  ;;  %4149 = vadd.xlane.f32.xlu0 %v4148_v55  ;;  %v5196_v38 = vmul.f32 0.015625, %v16405_v4  ;;  %v1171_v4 = vld [vmem:[%s12294_s18 + $0x1f28] sm:$0xff]  ;;  %v11061_v2 = vrot.slane %v5197_v44, %v12556_v11  ;;  %v11052_v23 = vsel %vm6542_vm12, %v11051_v8, %v11047_v16  ;;  %v10967_v40 = vrot.slane %v5178_v27, %v12530_v43 }
 0x77e   : > { %v3550_v31 = vpop.xlane.xlu1 %3549  ;;  %v16451_v30 = vpop.xlane.xlu0 %4068  ;;  %v4190_v45 = vsel %vm1198_vm0, %v1171_v4, 0.0  ;;  %v1142_v4 = vld [vmem:[%s12294_s18 + $0x1e40] sm:$0xff]  ;;  %v1159_v27 = vld [vmem:[%s12294_s18 + $0x1ec8] sm:$0xff]  ;;  %v5179_v16 = vmul.f32 0.015625, %v16395_v7 }
 0x77f   : > { %v5054_v48 = vmul.f32 0.015625, %v3550_v31  ;;  %v11056_v60 = vrot.slane %v5196_v38, %v12546_v61  ;;  %v5098_v38 = vmul.f32 0.015625, %v16364_v54  ;;  %v16512_v62 = vsel %vm1198_vm0, %v1142_v4, 0.0 }
 0x780   : > { %v5180_v4 = vmul.f32 0.015625, %v16428_v17  ;;  %v16538_v17 = vsel %vm1198_vm0, %v1159_v27, 0.0 }
 0x781   : > { %v10355_v55 = vrot.slane %v5054_v48, %v12561_v13  ;;  %3720 = vadd.xlane.f32.xlu1 %v3719_v24  ;;  %4239 = vadd.xlane.f32.xlu0 %v4238_v15  ;;  %v1158_v48 = vld [vmem:[%s12294_s18 + $0x1ec0] sm:$0xff] }
 0x782   : > { %v3691_v29 = vpop.xlane.xlu1 %3690  ;;  %v16464_v31 = vpop.xlane.xlu0 %3639 }
 0x783   : > { %v10356_v24 = vsel %vm6563_vm15, %v10355_v55, %v10351_v20  ;;  %v1188_v55 = vld [vmem:[%s12294_s18 + $0x1fb0] sm:$0xff]  ;;  %v1045_v20 = vld [vmem:[%s12294_s18 + $0x1b38] sm:$0xff]  ;;  %v5101_v33 = vmul.f32 0.015625, %v3691_v29  ;;  %v16522_v29 = vmul.f32 0.015625, %v16373_v28  ;;  %v10968_v28 = vsel %vm17459_vm8, %v10967_v40, %v16334_v5  ;;  %vm17461_vm8 = vmmov %vm17460_vm7 }
 0x784   : > { %v16478_v15 = vsel %vm11552_vm9, %v10356_v24, %v15245_v49  ;;  %v4151_v24 = vsel %vm1198_vm0, %v1158_v48, 0.0  ;;  %v4241_v44 = vsel %vm1198_vm0, %v1188_v55, 0.0  ;;  %v16499_v48 = vsel %vm1198_vm0, %v1045_v20, 0.0  ;;  %v1062_v20 = vld [vmem:[%s12294_s18 + $0x1bc0] sm:$0xff] }
 0x785   : > { %3810 = vadd.xlane.f32.xlu1 %v3809_v10  ;;  %3771 = vadd.xlane.f32.xlu0 %v3770_v56  ;;  %v1032_v10 = vld [vmem:[%s12294_s18 + $0x1ad0] sm:$0xff]  ;;  %v10587_v7 = vrot.slane %v5101_v33, %v12556_v11  ;;  %v11115_v5 = vrot.slane %v16522_v29, %v12508_v18  ;;  %v10972_v40 = vrot.slane %v5179_v16, %v12540_v57  ;;  %v5083_v33 = vmul.f32 0.015625, %v16419_v41 }
 0x786   : > { %v3982_v37 = vpop.xlane.xlu1 %3981  ;;  %v3931_v49 = vpop.xlane.xlu0 %3930  ;;  %v16505_v54 = vsel %vm1198_vm0, %v1032_v10, 0.0 }
 0x787   : > { %v5198_v56 = vmul.f32 0.015625, %v3982_v37  ;;  %v11057_v37 = vsel %vm6549_vm13, %v11056_v60, %v11052_v23  ;;  %v5225_v23 = vmul.f32 0.015625, %v16383_v52  ;;  %v5082_v60 = vmul.f32 0.015625, %v16389_v12 }
 0x788   : > { %v11062_v55 = vsel %vm6556_vm14, %v11061_v2, %v11057_v37  ;;  %v10577_v2 = vrot.slane %v5099_v25, %v12540_v57  ;;  %v3863_v52 = vsel %vm1198_vm0, %v1062_v20, 0.0  ;;  %v5181_v25 = vmul.f32 0.015625, %v3931_v49 }
 0x789   : > { %v11066_v51 = vrot.slane %v5198_v56, %v12561_v13  ;;  %4101 = vadd.xlane.f32.xlu1 %v4100_v3  ;;  %3861 = vadd.xlane.f32.xlu0 %v3860_v14  ;;  %v1172_v3 = vld [vmem:[%s12294_s18 + $0x1f30] sm:$0xff]  ;;  %v10572_v14 = vrot.slane %v5098_v38, %v12530_v43  ;;  %v10582_v38 = vrot.slane %v5100_v0, %v12546_v61 }
 0x78a   : > { %v4072_v8 = vpop.xlane.xlu1 %4071  ;;  %v16508_v26 = vpop.xlane.xlu0 %4020  ;;  %v16532_v12 = vsel %vm1198_vm0, %v1172_v3, 0.0 }
 0x78b   : > { %v11067_v10 = vsel %vm6563_vm15, %v11066_v51, %v11062_v55  ;;  %v10573_v0 = vsel %vm17460_vm7, %v10572_v14, %v16337_v63  ;;  %v10977_v55 = vrot.slane %v5180_v4, %v12546_v61  ;;  %v5084_v63 = vmul.f32 0.015625, %v16464_v31 }
 0x78c   : > { %v11562_v56 = vsel %vm11554_vm11, %v11067_v10, %v16440_v19  ;;  %v10578_v49 = vsel %vm6542_vm12, %v10577_v2, %v10573_v0  ;;  %v5226_v14 = vmul.f32 0.015625, %v16411_v22  ;;  %v10498_v22 = vrot.slane %v5083_v33, %v12540_v57 }
 0x78d   : > { %4191 = vadd.xlane.f32.xlu1 %v4190_v45  ;;  %4152 = vadd.xlane.f32.xlu0 %v4151_v24  ;;  %v11199_v45 = vrot.slane %v5225_v23, %v12524_v39  ;;  %v10493_v24 = vrot.slane %v5082_v60, %v12530_v43  ;;  %v10583_v20 = vsel %vm6549_vm13, %v10582_v38, %v10578_v49  ;;  %v5210_v0 = vmul.f32 0.015625, %v16443_v50 }
 0x78e   : > { %11677 = vmatprep.mubr.f32.mxu0 %v11562_v56  ;;  %v3694_v51 = vpop.xlane.xlu1 %3693  ;;  %v3643_v19 = vpop.xlane.xlu0 %3642  ;;  %v10982_v23 = vrot.slane %v5181_v25, %v12556_v11  ;;  %v10588_v16 = vsel %vm6556_vm14, %v10587_v7, %v10583_v20  ;;  %v5228_v7 = vmul.f32 0.015625, %v4072_v8  ;;  %v11204_v25 = vrot.slane %v5226_v14, %v12530_v43  ;;  %v1016_v14 = vld [vmem:[%s12294_s18 + $0x1a50] sm:$0xff] }
 0x78f   : > { %v5102_v37 = vmul.f32 0.015625, %v3694_v51  ;;  %v5085_v60 = vmul.f32 0.015625, %v3643_v19  ;;  %v11200_v41 = vsel %vm6528_vm10, %v11199_v45, %v16357_v9  ;;  %v10494_v2 = vsel %vm17460_vm7, %v10493_v24, %v16369_v42 }
 0x790   : > { %v10503_v9 = vrot.slane %v5084_v63, %v12546_v61  ;;  %v11214_v49 = vrot.slane %v5228_v7, %v12546_v61  ;;  %v11205_v20 = vsel %vm17461_vm8, %v11204_v25, %v11200_v41  ;;  %vm17462_vm7 = vcmask 654912  }
 0x791   : > { %v10592_v3 = vrot.slane %v5102_v37, %v12561_v13  ;;  %3723 = vadd.xlane.f32.xlu1 %v3722_v21  ;;  %4242 = vadd.xlane.f32.xlu0 %v4241_v44  ;;  %v10973_v21 = vsel %vm6542_vm12, %v10972_v40, %v10968_v28  ;;  %v5227_v44 = vmul.f32 0.015625, %v16451_v30  ;;  %v5209_v28 = vmul.f32 0.015625, %v16403_v6 }
 0x792   : > { %v4024_v10 = vpop.xlane.xlu1 %4023  ;;  %v3934_v27 = vpop.xlane.xlu0 %3933  ;;  %v10978_v38 = vsel %vm6549_vm13, %v10977_v55, %v10973_v21  ;;  %v10508_v30 = vrot.slane %v5085_v60, %v12556_v11  ;;  %v5211_v6 = vmul.f32 0.015625, %v16508_v26  ;;  %v3725_v29 = vsel %vm1198_vm0, %v1016_v14, 0.0  ;;  %v1173_v14 = vld [vmem:[%s12294_s18 + $0x1f38] sm:$0xff] }
 0x793   : > { %v5182_v31 = vmul.f32 0.015625, %v3934_v27  ;;  %v10593_v56 = vsel %vm6563_vm15, %v10592_v3, %v10588_v16  ;;  %v10983_v19 = vsel %vm6556_vm14, %v10982_v23, %v10978_v38  ;;  %v5212_v50 = vmul.f32 0.015625, %v4024_v10  ;;  %v1189_v27 = vld [vmem:[%s12294_s18 + $0x1fb8] sm:$0xff] }
 0x794   : > { %v16566_v4 = vsel %vm11552_vm9, %v10593_v56, %v15446_v58  ;;  %v11120_v55 = vrot.slane %v5209_v28, %v12524_v39  ;;  %v11125_v23 = vrot.slane %v5210_v0, %v12530_v43  ;;  %v11130_v41 = vrot.slane %v5211_v6, %v12540_v57  ;;  %v1063_v6 = vld [vmem:[%s12294_s18 + $0x1bc8] sm:$0xff] }
 0x795   : > { %v10987_v42 = vrot.slane %v5182_v31, %v12561_v13  ;;  %3813 = vadd.xlane.f32.xlu1 %v16499_v48  ;;  %3774 = vadd.xlane.f32.xlu0 %v16505_v54  ;;  %v10499_v48 = vsel %vm6542_vm12, %v10498_v22, %v10494_v2  ;;  %v11209_v54 = vrot.slane %v5227_v44, %v12540_v57  ;;  %v4244_v44 = vsel %vm1198_vm0, %v1189_v27, 0.0 }
 0x796   : > { %v3646_v51 = vpop.xlane.xlu1 %3645  ;;  %v4075_v58 = vpop.xlane.xlu0 %4074  ;;  %v10504_v40 = vsel %vm6549_vm13, %v10503_v9, %v10499_v48  ;;  %v11135_v31 = vrot.slane %v5212_v50, %v12546_v61 }
 0x797   : > { %v5086_v45 = vmul.f32 0.015625, %v3646_v51  ;;  %v5229_v8 = vmul.f32 0.015625, %v4075_v58  ;;  %v10988_v24 = vsel %vm6563_vm15, %v10987_v42, %v10983_v19  ;;  %v10509_v26 = vsel %vm6556_vm14, %v10508_v30, %v10504_v40  ;;  %v1033_v42 = vld [vmem:[%s12294_s18 + $0x1ad8] sm:$0xff] }
 0x798   : > { %v11555_v37 = vsel %vm11554_vm11, %v10988_v24, %v16478_v15  ;;  %v11210_v16 = vsel %vm6542_vm12, %v11209_v54, %v11205_v20 }
 0x799   : > { %v10513_v33 = vrot.slane %v5086_v45, %v12561_v13  ;;  %4104 = vadd.xlane.f32.xlu1 %v16512_v62  ;;  %3864 = vadd.xlane.f32.xlu0 %v3863_v52  ;;  %v11219_v63 = vrot.slane %v5229_v8, %v12556_v11  ;;  %v11116_v52 = vsel %vm17462_vm7, %v11115_v5, %v16345_v59  ;;  %v3776_v8 = vsel %vm1198_vm0, %v1033_v42, 0.0  ;;  %v1047_v42 = vld [vmem:[%s12294_s18 + $0x1b48] sm:$0xff] }
 0x79a   : > { %11678 = vmatmul.mubr.f32.vlgmr.msra.gmra.mrb[0].mxu0 %v11555_v37  ;;  %v4078_v15 = vpop.xlane.xlu1 %4077  ;;  %v4027_v3 = vpop.xlane.xlu0 %4026  ;;  %v11215_v59 = vsel %vm6549_vm13, %v11214_v49, %v11210_v16  ;;  %v11121_v5 = vsel %vm6528_vm10, %v11120_v55, %v11116_v52  ;;  %v4196_v16 = vsel %vm1198_vm0, %v1173_v14, 0.0 }
 0x79b   : > { %v5230_v60 = vmul.f32 0.015625, %v4078_v15  ;;  %v5213_v10 = vmul.f32 0.015625, %v4027_v3  ;;  %v10514_v62 = vsel %vm6563_vm15, %v10513_v33, %v10509_v26  ;;  %v11220_v38 = vsel %vm6556_vm14, %v11219_v63, %v11215_v59  ;;  %v1017_v59 = vld [vmem:[%s12294_s18 + $0x1a58] sm:$0xff] }
 0x79c   : > { %v11568_v2 = vsel %vm11552_vm9, %v10514_v62, %v15379_v53  ;;  %v11126_v9 = vsel %vm17461_vm8, %v11125_v23, %v11121_v5  ;;  %v3866_v26 = vsel %vm1198_vm0, %v1063_v6, 0.0  ;;  %v1160_v23 = vld [vmem:[%s12294_s18 + $0x1ed0] sm:$0xff]  ;;  %v1190_v5 = vld [vmem:[%s12294_s18 + $0x1fc0] sm:$0xff] }
 0x79d   : > { %v11224_v56 = vrot.slane %v5230_v60, %v12561_v13  ;;  %4194 = vadd.xlane.f32.xlu1 %v16532_v12  ;;  %4155 = vadd.xlane.f32.xlu0 %v16538_v17  ;;  %v11140_v21 = vrot.slane %v5213_v10, %v12556_v11  ;;  %v1046_v17 = vld [vmem:[%s12294_s18 + $0x1b40] sm:$0xff]  ;;  %v11131_v28 = vsel %vm6542_vm12, %v11130_v41, %v11126_v9  ;;  %v4157_v41 = vsel %vm1198_vm0, %v1160_v23, 0.0 }
 0x79e   : > { %v3745_v22 = vpop.xlane.xlu1 %3744  ;;  %v4030_v53 = vpop.xlane.xlu0 %4029  ;;  %v11136_v30 = vsel %vm6549_vm13, %v11135_v31, %v11131_v28  ;;  %v3815_v45 = vsel %vm1198_vm0, %v1046_v17, 0.0  ;;  %v4247_v9 = vsel %vm1198_vm0, %v1190_v5, 0.0  ;;  %v1034_v28 = vld [vmem:[%s12294_s18 + $0x1ae0] sm:$0xff] }
 0x79f   : > { %v5214_v7 = vmul.f32 0.015625, %v4030_v53  ;;  %v11225_v12 = vsel %vm6563_vm15, %v11224_v56, %v11220_v38  ;;  %v5119_v51 = vmul.f32 0.015625, %v3745_v22  ;;  %v11141_v24 = vsel %vm6556_vm14, %v11140_v21, %v11136_v30 }
 0x7a0   : > { %v11576_v25 = vsel %vm11554_vm11, %v11225_v12, %v16566_v4  ;;  %v1143_v4 = vld [vmem:[%s12294_s18 + $0x1e48] sm:$0xff]  ;;  %v3728_v38 = vsel %vm1198_vm0, %v1017_v59, 0.0 }
 0x7a1   : > { %v11145_v58 = vrot.slane %v5214_v7, %v12561_v13  ;;  %3726 = vadd.xlane.f32.xlu1 %v3725_v29  ;;  %4245 = vadd.xlane.f32.xlu0 %v4244_v44  ;;  %v10676_v40 = vrot.slane %v5119_v51, %v12457_v32  ;;  %v4106_v20 = vsel %vm1198_vm0, %v1143_v4, 0.0  ;;  %v1064_v4 = vld [vmem:[%s12294_s18 + $0x1bd0] sm:$0xff] }
 0x7a2   : > { %11747 = vmatprep.mubr.f32.mxu1 %v11576_v25  ;;  %v3697_v19 = vpop.xlane.xlu1 %3696  ;;  %v3748_v0 = vpop.xlane.xlu0 %3747 }
 0x7a3   : > { %v5120_v48 = vmul.f32 0.015625, %v3748_v0  ;;  %v11146_v54 = vsel %vm6563_vm15, %v11145_v58, %v11141_v24  ;;  %v5103_v49 = vmul.f32 0.015625, %v3697_v19  ;;  %v3818_v19 = vsel %vm1198_vm0, %v1047_v42, 0.0 }
 0x7a4   : > { %v11569_v37 = vsel %vm11554_vm11, %v11146_v54, %v11568_v2  ;;  %v3779_v0 = vsel %vm1198_vm0, %v1034_v28, 0.0  ;;  %v1144_v54 = vld [vmem:[%s12294_s18 + $0x1e50] sm:$0xff] }
 0x7a5   : > { %v10680_v50 = vrot.slane %v5120_v48, %v12463_v35  ;;  %3816 = vadd.xlane.f32.xlu1 %v3815_v45  ;;  %3777 = vadd.xlane.f32.xlu0 %v3776_v8  ;;  %v10597_v60 = vrot.slane %v5103_v49, %v12457_v32 }
 0x7a6   : > { %11748 = vmatmul.mubr.f32.vlgmr.msra.gmra.mrb[0].mxu1 %v11569_v37  ;;  %v3751_v33 = vpop.xlane.xlu1 %3750  ;;  %v3700_v55 = vpop.xlane.xlu0 %3699 }
 0x7a7   : > { %v10681_v63 = vsel %vm6465_vm1, %v10680_v50, %v10676_v40  ;;  %v5121_v15 = vmul.f32 0.015625, %v3751_v33  ;;  %v5104_v3 = vmul.f32 0.015625, %v3700_v55  ;;  %v4109_v50 = vsel %vm1198_vm0, %v1144_v54, 0.0 }
 0x7a8   : > { %v3869_v33 = vsel %vm1198_vm0, %v1064_v4, 0.0 }
 0x7a9   : > { %v10685_v10 = vrot.slane %v5121_v15, %v12466_v36  ;;  %v10601_v27 = vrot.slane %v5104_v3, %v12463_v35  ;;  %4107 = vadd.xlane.f32.xlu1 %v4106_v20  ;;  %3867 = vadd.xlane.f32.xlu0 %v3866_v26  ;;  %v1161_v15 = vld [vmem:[%s12294_s18 + $0x1ed8] sm:$0xff] }
 0x7aa   : > { %v4132_v62 = vpop.xlane.xlu1 %4131  ;;  %v4129_v52 = vpop.xlane.xlu0 %4128 }
 0x7ab   : > { %v10686_v2 = vsel %vm6472_vm2, %v10685_v10, %v10681_v63  ;;  %v10602_v31 = vsel %vm6465_vm1, %v10601_v27, %v10597_v60  ;;  %v5248_v56 = vmul.f32 0.015625, %v4132_v62  ;;  %v5247_v29 = vmul.f32 0.015625, %v4129_v52  ;;  %v1174_v63 = vld [vmem:[%s12294_s18 + $0x1f40] sm:$0xff] }
 0x7ac   : > { %v4199_v10 = vsel %vm1198_vm0, %v1174_v63, 0.0  ;;  %v4160_v27 = vsel %vm1198_vm0, %v1161_v15, 0.0 }
 0x7ad   : > { %v11312_v21 = vrot.slane %v5248_v56, %v12463_v35  ;;  %v11308_v22 = vrot.slane %v5247_v29, %v12457_v32  ;;  %4197 = vadd.xlane.f32.xlu1 %v4196_v16  ;;  %4158 = vadd.xlane.f32.xlu0 %v4157_v41  ;;  %v1018_v41 = vld [vmem:[%s12294_s18 + $0x1a60] sm:$0xff] }
 0x7ae   : > { %v3754_v53 = vpop.xlane.xlu1 %3753  ;;  %v3703_v44 = vpop.xlane.xlu0 %3702  ;;  %v3731_v5 = vsel %vm1198_vm0, %v1018_v41, 0.0 }
 0x7af   : > { %v11313_v7 = vsel %vm6465_vm1, %v11312_v21, %v11308_v22  ;;  %v5122_v12 = vmul.f32 0.015625, %v3754_v53  ;;  %v5105_v17 = vmul.f32 0.015625, %v3703_v44 }
 0x7b1   : > { %v10690_v25 = vrot.slane %v5122_v12, %v12460_v34  ;;  %v10606_v30 = vrot.slane %v5105_v17, %v12466_v36  ;;  %3729 = vadd.xlane.f32.xlu1 %v3728_v38  ;;  %4248 = vadd.xlane.f32.xlu0 %v4247_v9  ;;  %v1048_v38 = vld [vmem:[%s12294_s18 + $0x1b50] sm:$0xff]  ;;  %v1035_v9 = vld [vmem:[%s12294_s18 + $0x1ae8] sm:$0xff] }
 0x7b2   : > { %v3844_v51 = vpop.xlane.xlu1 %3843  ;;  %v3841_v58 = vpop.xlane.xlu0 %3840 }
 0x7b3   : > { %v10691_v45 = vsel %vm6479_vm3, %v10690_v25, %v10686_v2  ;;  %v10607_v8 = vsel %vm6472_vm2, %v10606_v30, %v10602_v31  ;;  %v5152_v24 = vmul.f32 0.015625, %v3844_v51  ;;  %v5151_v48 = vmul.f32 0.015625, %v3841_v58  ;;  %v1191_v2 = vld [vmem:[%s12294_s18 + $0x1fc8] sm:$0xff] }
 0x7b4   : > { %v4250_v21 = vsel %vm1198_vm0, %v1191_v2, 0.0  ;;  %v3821_v25 = vsel %vm1198_vm0, %v1048_v38, 0.0  ;;  %v3782_v30 = vsel %vm1198_vm0, %v1035_v9, 0.0 }
 0x7b5   : > { %v10838_v6 = vrot.slane %v5152_v24, %v12463_v35  ;;  %v10834_v37 = vrot.slane %v5151_v48, %v12457_v32  ;;  %3819 = vadd.xlane.f32.xlu1 %v3818_v19  ;;  %3780 = vadd.xlane.f32.xlu0 %v3779_v0  ;;  %v1065_v0 = vld [vmem:[%s12294_s18 + $0x1bd8] sm:$0xff] }
 0x7b6   : > { %v4084_v40 = vpop.xlane.xlu1 %4083  ;;  %v4081_v49 = vpop.xlane.xlu0 %4080 }
 0x7b7   : > { %v10839_v55 = vsel %vm6465_vm1, %v10838_v6, %v10834_v37  ;;  %v5232_v20 = vmul.f32 0.015625, %v4084_v40  ;;  %v5231_v26 = vmul.f32 0.015625, %v4081_v49 }
 0x7b9   : > { %v11233_v3 = vrot.slane %v5232_v20, %v12463_v35  ;;  %v11229_v14 = vrot.slane %v5231_v26, %v12457_v32  ;;  %4110 = vadd.xlane.f32.xlu1 %v4109_v50  ;;  %3870 = vadd.xlane.f32.xlu0 %v3869_v33  ;;  %v1175_v33 = vld [vmem:[%s12294_s18 + $0x1f48] sm:$0xff]  ;;  %v1162_v20 = vld [vmem:[%s12294_s18 + $0x1ee0] sm:$0xff] }
 0x7ba   : > { %v3706_v23 = vpop.xlane.xlu1 %3705  ;;  %v4135_v60 = vpop.xlane.xlu0 %4134 }
 0x7bb   : > { %v11234_v62 = vsel %vm6465_vm1, %v11233_v3, %v11229_v14  ;;  %v5106_v52 = vmul.f32 0.015625, %v3706_v23  ;;  %v5249_v16 = vmul.f32 0.015625, %v4135_v60  ;;  %v4202_v14 = vsel %vm1198_vm0, %v1175_v33, 0.0  ;;  %v1163_v33 = vld [vmem:[%s12294_s18 + $0x1ee8] sm:$0xff] }
 0x7bd   : > { %v10611_v31 = vrot.slane %v5106_v52, %v12460_v34  ;;  %v11317_v56 = vrot.slane %v5249_v16, %v12466_v36  ;;  %4200 = vadd.xlane.f32.xlu1 %v4199_v10  ;;  %4161 = vadd.xlane.f32.xlu0 %v4160_v27  ;;  %v1019_v52 = vld [vmem:[%s12294_s18 + $0x1a68] sm:$0xff]  ;;  %v1192_v16 = vld [vmem:[%s12294_s18 + $0x1fd0] sm:$0xff] }
 0x7be   : > { %v3793_v29 = vpop.xlane.xlu1 %3792  ;;  %v3757_v59 = vpop.xlane.xlu0 %3756 }
 0x7bf   : > { %v16681_v22 = vsel %vm6479_vm3, %v10611_v31, %v10607_v8  ;;  %v11318_v53 = vsel %vm6472_vm2, %v11317_v56, %v11313_v7  ;;  %v5123_v44 = vmul.f32 0.015625, %v3757_v59  ;;  %v5135_v12 = vmul.f32 0.015625, %v3793_v29  ;;  %v1145_v7 = vld [vmem:[%s12294_s18 + $0x1e58] sm:$0xff] }
 0x7c0   : > { %v4112_v6 = vsel %vm1198_vm0, %v1145_v7, 0.0  ;;  %v3734_v29 = vsel %vm1198_vm0, %v1019_v52, 0.0  ;;  %v4253_v59 = vsel %vm1198_vm0, %v1192_v16, 0.0  ;;  %v1146_v7 = vld [vmem:[%s12294_s18 + $0x1e60] sm:$0xff]  ;;  %v1193_v52 = vld [vmem:[%s12294_s18 + $0x1fd8] sm:$0xff] }
 0x7c1   : > { %v10695_v17 = vrot.slane %v5123_v44, %v12476_v47  ;;  %3732 = vadd.xlane.f32.xlu1 %v3731_v5  ;;  %4251 = vadd.xlane.f32.xlu0 %v4250_v21  ;;  %v10755_v8 = vrot.slane %v5135_v12, %v12457_v32  ;;  %v1036_v44 = vld [vmem:[%s12294_s18 + $0x1af0] sm:$0xff] }
 0x7c2   : > { %v3847_v42 = vpop.xlane.xlu1 %3846  ;;  %v3796_v28 = vpop.xlane.xlu0 %3795 }
 0x7c3   : > { %v10696_v51 = vsel %vm6486_vm4, %v10695_v17, %v10691_v45  ;;  %v5153_v58 = vmul.f32 0.015625, %v3847_v42  ;;  %v5136_v19 = vmul.f32 0.015625, %v3796_v28  ;;  %v3872_v45 = vsel %vm1198_vm0, %v1065_v0, 0.0  ;;  %v1066_v0 = vld [vmem:[%s12294_s18 + $0x1be0] sm:$0xff] }
 0x7c4   : > { %v3785_v28 = vsel %vm1198_vm0, %v1036_v44, 0.0 }
 0x7c5   : > { %v10843_v24 = vrot.slane %v5153_v58, %v12466_v36  ;;  %v10759_v48 = vrot.slane %v5136_v19, %v12463_v35  ;;  %3822 = vadd.xlane.f32.xlu1 %v3821_v25  ;;  %3783 = vadd.xlane.f32.xlu0 %v3782_v30 }
 0x7c6   : > { %v4138_v54 = vpop.xlane.xlu1 %4137  ;;  %v4087_v4 = vpop.xlane.xlu0 %4086 }
 0x7c7   : > { %v10844_v37 = vsel %vm6472_vm2, %v10843_v24, %v10839_v55  ;;  %v10760_v40 = vsel %vm6465_vm1, %v10759_v48, %v10755_v8  ;;  %v5250_v49 = vmul.f32 0.015625, %v4138_v54  ;;  %v5233_v50 = vmul.f32 0.015625, %v4087_v4 }
 0x7c8   : > { %v4163_v55 = vsel %vm1198_vm0, %v1162_v20, 0.0  ;;  %v3875_v4 = vsel %vm1198_vm0, %v1066_v0, 0.0 }
 0x7c9   : > { %v11322_v26 = vrot.slane %v5250_v49, %v12460_v34  ;;  %v11238_v63 = vrot.slane %v5233_v50, %v12466_v36  ;;  %4113 = vadd.xlane.f32.xlu1 %v4112_v6  ;;  %3873 = vadd.xlane.f32.xlu0 %v3872_v45  ;;  %v1176_v50 = vld [vmem:[%s12294_s18 + $0x1f50] sm:$0xff] }
 0x7ca   : > { %v4228_v15 = vpop.xlane.xlu1 %4227  ;;  %v4225_v3 = vpop.xlane.xlu0 %4224 }
 0x7cb   : > { %v11323_v23 = vsel %vm6479_vm3, %v11322_v26, %v11318_v53  ;;  %v11239_v60 = vsel %vm6472_vm2, %v11238_v63, %v11234_v62  ;;  %v5280_v10 = vmul.f32 0.015625, %v4228_v15  ;;  %v5279_v27 = vmul.f32 0.015625, %v4225_v3  ;;  %v1049_v53 = vld [vmem:[%s12294_s18 + $0x1b58] sm:$0xff] }
 0x7cc   : > { %v3824_v42 = vsel %vm1198_vm0, %v1049_v53, 0.0  ;;  %v4205_v3 = vsel %vm1198_vm0, %v1176_v50, 0.0 }
 0x7cd   : > { %v11470_v41 = vrot.slane %v5280_v10, %v12463_v35  ;;  %v11466_v2 = vrot.slane %v5279_v27, %v12457_v32  ;;  %4203 = vadd.xlane.f32.xlu1 %v4202_v14  ;;  %4164 = vadd.xlane.f32.xlu0 %v4163_v55  ;;  %v1020_v27 = vld [vmem:[%s12294_s18 + $0x1a70] sm:$0xff] }
 0x7ce   : > { %v3760_v31 = vpop.xlane.xlu1 %3759  ;;  %v3709_v56 = vpop.xlane.xlu0 %3708 }
 0x7cf   : > { %v16714_v62 = vsel %vm6465_vm1, %v11470_v41, %v11466_v2  ;;  %v5124_v5 = vmul.f32 0.015625, %v3760_v31  ;;  %v5107_v21 = vmul.f32 0.015625, %v3709_v56  ;;  %v4256_v56 = vsel %vm1198_vm0, %v1193_v52, 0.0 }
 0x7d1   : > { %v10700_v38 = vrot.slane %v5124_v5, %v12473_v46  ;;  %v10616_v9 = vrot.slane %v5107_v21, %v12476_v47  ;;  %3735 = vadd.xlane.f32.xlu1 %v3734_v29  ;;  %4254 = vadd.xlane.f32.xlu0 %v4253_v59  ;;  %v1050_v29 = vld [vmem:[%s12294_s18 + $0x1b60] sm:$0xff]  ;;  %v1037_v59 = vld [vmem:[%s12294_s18 + $0x1af8] sm:$0xff] }
 0x7d2   : > { %v3850_v12 = vpop.xlane.xlu1 %3849  ;;  %v3799_v17 = vpop.xlane.xlu0 %3798  ;;  %v3788_v21 = vsel %vm1198_vm0, %v1037_v59, 0.0  ;;  %v1021_v59 = vld [vmem:[%s12294_s18 + $0x1a78] sm:$0xff] }
 0x7d3   : > { %v16723_v25 = vsel %vm6493_vm5, %v10700_v38, %v10696_v51  ;;  %v16727_v30 = vsel %vm6486_vm4, %v10616_v9, %v16681_v22  ;;  %v5154_v58 = vmul.f32 0.015625, %v3850_v12  ;;  %v5137_v19 = vmul.f32 0.015625, %v3799_v17  ;;  %v1147_v38 = vld [vmem:[%s12294_s18 + $0x1e68] sm:$0xff] }
 0x7d4   : > { %v4115_v51 = vsel %vm1198_vm0, %v1146_v7, 0.0  ;;  %v1067_v9 = vld [vmem:[%s12294_s18 + $0x1be8] sm:$0xff] }
 0x7d5   : > { %v10848_v8 = vrot.slane %v5154_v58, %v12460_v34  ;;  %v10764_v24 = vrot.slane %v5137_v19, %v12466_v36  ;;  %3825 = vadd.xlane.f32.xlu1 %v3824_v42  ;;  %3786 = vadd.xlane.f32.xlu0 %v3785_v28  ;;  %v4118_v58 = vsel %vm1198_vm0, %v1147_v38, 0.0  ;;  %v3878_v19 = vsel %vm1198_vm0, %v1067_v9, 0.0 }
 0x7d6   : > { %v4141_v48 = vpop.xlane.xlu1 %4140  ;;  %v4090_v54 = vpop.xlane.xlu0 %4089 }
 0x7d7   : > { %v16736_v22 = vsel %vm6479_vm3, %v10848_v8, %v10844_v37  ;;  %v10765_v6 = vsel %vm6472_vm2, %v10764_v24, %v10760_v40  ;;  %v5251_v45 = vmul.f32 0.015625, %v4141_v48  ;;  %v5234_v49 = vmul.f32 0.015625, %v4090_v54  ;;  %v1177_v48 = vld [vmem:[%s12294_s18 + $0x1f58] sm:$0xff]  ;;  %v1164_v54 = vld [vmem:[%s12294_s18 + $0x1ef0] sm:$0xff] }
 0x7d8   : > { %v4166_v37 = vsel %vm1198_vm0, %v1163_v33, 0.0  ;;  %v4208_v33 = vsel %vm1198_vm0, %v1177_v48, 0.0  ;;  %v1178_v48 = vld [vmem:[%s12294_s18 + $0x1f60] sm:$0xff] }
 0x7d9   : > { %v11327_v20 = vrot.slane %v5251_v45, %v12476_v47  ;;  %v11243_v26 = vrot.slane %v5234_v49, %v12460_v34  ;;  %4116 = vadd.xlane.f32.xlu1 %v4115_v51  ;;  %3876 = vadd.xlane.f32.xlu0 %v3875_v4 }
 0x7da   : > { %v4180_v63 = vpop.xlane.xlu1 %4179  ;;  %v4177_v15 = vpop.xlane.xlu0 %4176 }
 0x7db   : > { %v16746_v40 = vsel %vm6486_vm4, %v11327_v20, %v11323_v23  ;;  %v11244_v14 = vsel %vm6479_vm3, %v11243_v26, %v11239_v60  ;;  %v5264_v55 = vmul.f32 0.015625, %v4180_v63  ;;  %v5263_v10 = vmul.f32 0.015625, %v4177_v15 }
 0x7dc   : > { %v3737_v23 = vsel %vm1198_vm0, %v1020_v27, 0.0 }
 0x7dd   : > { %v11391_v16 = vrot.slane %v5264_v55, %v12463_v35  ;;  %v11387_v41 = vrot.slane %v5263_v10, %v12457_v32  ;;  %4206 = vadd.xlane.f32.xlu1 %v4205_v3  ;;  %4167 = vadd.xlane.f32.xlu0 %v4166_v37  ;;  %v3827_v32 = vsel %vm1198_vm0, %v1050_v29, 0.0  ;;  %v941_v3 = vld [vmem:[%s12294_s18 + $0x17f8] sm:$0xff]  ;;  %v1194_v37 = vld [vmem:[%s12294_s18 + $0x1fe0] sm:$0xff]  ;;  %v1051_v29 = vld [vmem:[%s12294_s18 + $0x1b68] sm:$0xff] }
 0x7de   : > { %v3712_v2 = vpop.xlane.xlu1 %3711  ;;  %v4231_v31 = vpop.xlane.xlu0 %4230 }
 0x7df   : > { %v11392_v60 = vsel %vm6465_vm1, %v11391_v16, %v11387_v41  ;;  %v5108_v45 = vmul.f32 0.015625, %v3712_v2  ;;  %v5281_v49 = vmul.f32 0.015625, %v4231_v31  ;;  %v4259_v41 = vsel %vm1198_vm0, %v1194_v37, 0.0 }
 0x7e0   : > { %vm17464_vm1 = vcmask 523712  }
 0x7e1   : > { %3738 = vadd.xlane.f32.xlu1 %v3737_v23  ;;  %4257 = vadd.xlane.f32.xlu0 %v4256_v56  ;;  %v10621_v27 = vrot.slane %v5108_v45, %v12473_v46  ;;  %vm17468_vm7 = vmmov %vm17464_vm1 }
 0x7e2   : > { %v3802_v5 = vpop.xlane.xlu1 %3801  ;;  %v3763_v35 = vpop.xlane.xlu0 %3762  ;;  %vm17471_vm8 = vmmov %vm17464_vm1 }
 0x7e3   : > { %v5138_v53 = vmul.f32 0.015625, %v3802_v5  ;;  %v5125_v44 = vmul.f32 0.015625, %v3763_v35 }
 0x7e5   : > { %v10769_v12 = vrot.slane %v5138_v53, %v12460_v34  ;;  %v10705_v17 = vrot.slane %v5125_v44, %v12494_v1  ;;  %3828 = vadd.xlane.f32.xlu1 %v3827_v32  ;;  %3789 = vadd.xlane.f32.xlu0 %v3788_v21  ;;  %v3830_v21 = vsel %vm1198_vm0, %v1051_v29, 0.0  ;;  %v3740_v53 = vsel %vm1198_vm0, %v1021_v59, 0.0 }
 0x7e6   : > { %v4093_v42 = vpop.xlane.xlu1 %4092  ;;  %v3853_v28 = vpop.xlane.xlu0 %3852 }
 0x7e7   : > { %v16767_v7 = vsel %vm6479_vm3, %v10769_v12, %v10765_v6  ;;  %v16771_v0 = vsel %vm6500_vm6, %v10705_v17, %v16723_v25  ;;  %v5235_v8 = vmul.f32 0.015625, %v4093_v42  ;;  %v5155_v24 = vmul.f32 0.015625, %v3853_v28  ;;  %v1068_v17 = vld [vmem:[%s12294_s18 + $0x1bf0] sm:$0xff]  ;;  %v17463_v42 = vld [vmem:[#allocation2_spill] sm:$0xff] }
 0x7e8   : > { %v4169_v25 = vsel %vm1198_vm0, %v1164_v54, 0.0 }
 0x7e9   : > { %v11248_v51 = vrot.slane %v5235_v8, %v12476_v47  ;;  %v10853_v4 = vrot.slane %v5155_v24, %v12476_v47  ;;  %4119 = vadd.xlane.f32.xlu1 %v4118_v58  ;;  %3879 = vadd.xlane.f32.xlu0 %v3878_v19  ;;  %v3881_v24 = vsel %vm1198_vm0, %v1068_v17, 0.0  ;;  %v5379_v17 = vld [vmem:[%s17361_s1 + $0x2a0] sm:$0xff] }
 0x7ea   : > { %v4183_v6 = vpop.xlane.xlu1 %4182  ;;  %v4144_v50 = vpop.xlane.xlu0 %4143 }
 0x7eb   : > { %v16780_v20 = vsel %vm6486_vm4, %v11248_v51, %v11244_v14  ;;  %v16784_v26 = vsel %vm6486_vm4, %v10853_v4, %v16736_v22  ;;  %v5265_v63 = vmul.f32 0.015625, %v4183_v6  ;;  %v5252_v15 = vmul.f32 0.015625, %v4144_v50  ;;  %v5375_v6 = vld [vmem:[%s17361_s1 + $0x280] sm:$0xff]  ;;  %v5376_v50 = vld [vmem:[%s17361_s1 + $0x288] sm:$0xff] }
 0x7ec   : > { %v11475_v14 = vrot.slane %v5281_v49, %v12466_v36  ;;  %v3500_v22 = vsel %vm1198_vm0, %v941_v3, 0.0  ;;  %v1165_v49 = vld [vmem:[%s12294_s18 + $0x1ef8] sm:$0xff] }
 0x7ed   : > { %v11396_v55 = vrot.slane %v5265_v63, %v12466_v36  ;;  %v11332_v10 = vrot.slane %v5252_v15, %v12473_v46  ;;  %4209 = vadd.xlane.f32.xlu1 %v4208_v33  ;;  %4170 = vadd.xlane.f32.xlu0 %v4169_v25  ;;  %v12176_v33 = vpack.c.bf16 %v5376_v50, %v5375_v6 }
 0x7ee   : > { %v3715_v52 = vpop.xlane.xlu1 %3714  ;;  %v4234_v16 = vpop.xlane.xlu0 %4233  ;;  %v11476_v35 = vsel %vm6472_vm2, %v11475_v14, %v16714_v62 }
 0x7ef   : > { %v16795_v2 = vsel %vm6472_vm2, %v11396_v55, %v11392_v60  ;;  %v16799_v31 = vsel %vm6493_vm5, %v11332_v10, %v16746_v40  ;;  %v5109_v23 = vmul.f32 0.015625, %v3715_v52  ;;  %v5282_v56 = vmul.f32 0.015625, %v4234_v16  ;;  %12177 = vmatprep.subr.bf16.mxu0 %v12176_v33  ;;  %vm17465_vm2 = vmmov %vm17464_vm1 }
 0x7f0   : > { %v10622_v60 = vsel %vm6493_vm5, %v10621_v27, %v16727_v30  ;;  %v1148_v30 = vld [vmem:[%s12294_s18 + $0x1e70] sm:$0xff]  ;;  %v4211_v55 = vsel %vm1198_vm0, %v1178_v48, 0.0  ;;  %v4172_v10 = vsel %vm1198_vm0, %v1165_v49, 0.0 }
 0x7f1   : > { %v10626_v36 = vrot.slane %v5109_v23, %v12494_v1  ;;  %v11480_v5 = vrot.slane %v5282_v56, %v12460_v34  ;;  %3501 = vadd.xlane.f32.xlu1 %v3500_v22  ;;  %4260 = vadd.xlane.f32.xlu0 %v4259_v41  ;;  %v4121_v8 = vsel %vm1198_vm0, %v1148_v30, 0.0  ;;  %v1052_v27 = vld [vmem:[%s12294_s18 + $0x1b70] sm:$0xff]  ;;  %v1195_v41 = vld [vmem:[%s12294_s18 + $0x1fe8] sm:$0xff]  ;;  %v5378_v56 = vld [vmem:[%s17361_s1 + $0x298] sm:$0xff] }
 0x7f2   : > { %v3805_v40 = vpop.xlane.xlu1 %3804  ;;  %v3766_v32 = vpop.xlane.xlu0 %3765  ;;  %v5377_v23 = vld [vmem:[%s17361_s1 + $0x290] sm:$0xff]  ;;  %v1069_v30 = vld [vmem:[%s12294_s18 + $0x1bf8] sm:$0xff] }
 0x7f3   : > { %v16812_v44 = vsel %vm6500_vm6, %v10626_v36, %v10622_v60  ;;  %v16815_v38 = vsel %vm6479_vm3, %v11480_v5, %v11476_v35  ;;  %v5139_v9 = vmul.f32 0.015625, %v3805_v40  ;;  %v5126_v12 = vmul.f32 0.015625, %v3766_v32  ;;  %v1196_v49 = vld [vmem:[%s12294_s18 + $0x1ff0] sm:$0xff] }
 0x7f4   : > { %v12180_v29 = vpack.c.bf16 %v5378_v56, %v5377_v23  ;;  %v3833_v40 = vsel %vm1198_vm0, %v1052_v27, 0.0  ;;  %v4262_v32 = vsel %vm1198_vm0, %v1195_v41, 0.0  ;;  %v5392_v41 = vld [vmem:[%s17361_s1 + $0x308] sm:$0xff] }
 0x7f5   : > { %v10774_v62 = vrot.slane %v5139_v9, %v12476_v47  ;;  %v10710_v28 = vrot.slane %v5126_v12, %v17463_v42  ;;  %3831 = vadd.xlane.f32.xlu1 %v3830_v21  ;;  %3741 = vadd.xlane.f32.xlu0 %v3740_v53  ;;  %v1149_v21 = vld [vmem:[%s12294_s18 + $0x1e78] sm:$0xff] }
 0x7f6   : > { %v4096_v58 = vpop.xlane.xlu1 %4095  ;;  %v3856_v19 = vpop.xlane.xlu0 %3855 }
 0x7f7   : > { %v16826_v54 = vsel %vm6486_vm4, %v10774_v62, %v16767_v7  ;;  %v16830_v51 = vsel %vm17464_vm1, %v10710_v28, %v16771_v0  ;;  %v5236_v4 = vmul.f32 0.015625, %v4096_v58  ;;  %v5156_v45 = vmul.f32 0.015625, %v3856_v19  ;;  %v5359_v7 = vld [vmem:[%s17361_s1 + $0x200] sm:$0xff]  ;;  %v5360_v0 = vld [vmem:[%s17361_s1 + $0x208] sm:$0xff] }
 0x7f8   : > { %v12178_v15 = vpack.c.bf16 %v5360_v0, %v5359_v7  ;;  %v5380_v62 = vld [vmem:[%s17361_s1 + $0x2a8] sm:$0xff] }
 0x7f9   : > { %v11253_v25 = vrot.slane %v5236_v4, %v12473_v46  ;;  %v10858_v63 = vrot.slane %v5156_v45, %v12473_v46  ;;  %4122 = vadd.xlane.f32.xlu1 %v4121_v8  ;;  %3882 = vadd.xlane.f32.xlu0 %v3881_v24  ;;  %v12184_v28 = vpack.c.bf16 %v5380_v62, %v5379_v17  ;;  %v4124_v4 = vsel %vm1198_vm0, %v1149_v21, 0.0  ;;  %v1179_v0 = vld [vmem:[%s12294_s18 + $0x1f68] sm:$0xff]  ;;  %v5383_v21 = vld [vmem:[%s17361_s1 + $0x2c0] sm:$0xff] }
 0x7fa   : > { %v4186_v3 = vpop.xlane.xlu1 %4185  ;;  %v4147_v37 = vpop.xlane.xlu0 %4146  ;;  %12179 = vmatpush3.bf16.msra.mxu0 %v12178_v15  ;;  %v3884_v45 = vsel %vm1198_vm0, %v1069_v30, 0.0  ;;  %v5409_v30 = vld [vmem:[%s17361_s1 + $0x390] sm:$0xff] }
 0x7fb   : > { %v16852_v14 = vsel %vm6493_vm5, %v11253_v25, %v16780_v20  ;;  %v16856_v52 = vsel %vm6493_vm5, %v10858_v63, %v16784_v26  ;;  %v5266_v16 = vmul.f32 0.015625, %v4186_v3  ;;  %v5253_v22 = vmul.f32 0.015625, %v4147_v37  ;;  %v5361_v20 = vld [vmem:[%s17361_s1 + $0x210] sm:$0xff]  ;;  %v5362_v26 = vld [vmem:[%s17361_s1 + $0x218] sm:$0xff]  ;;  %12181 = vmatprep.subr.bf16.mxu0 %v12180_v29 }
 0x7fc   : > { %v12182_v5 = vpack.c.bf16 %v5362_v26, %v5361_v20  ;;  %v5381_v25 = vld [vmem:[%s17361_s1 + $0x2b0] sm:$0xff]  ;;  %v5382_v63 = vld [vmem:[%s17361_s1 + $0x2b8] sm:$0xff]  ;;  %v4265_v29 = vsel %vm1198_vm0, %v1196_v49, 0.0  ;;  %v4214_v20 = vsel %vm1198_vm0, %v1179_v0, 0.0 }
 0x7fd   : > { %v11401_v59 = vrot.slane %v5266_v16, %v12460_v34  ;;  %v11337_v36 = vrot.slane %v5253_v22, %v12494_v1  ;;  %4212 = vadd.xlane.f32.xlu1 %v4211_v55  ;;  %4173 = vadd.xlane.f32.xlu0 %v4172_v10  ;;  %v12188_v15 = vpack.c.bf16 %v5382_v63, %v5381_v25  ;;  %v5365_v3 = vld [vmem:[%s17361_s1 + $0x230] sm:$0xff]  ;;  %v17466_v55 = vld [vmem:[#allocation3_spill] sm:$0xff]  ;;  %v5366_v16 = vld [vmem:[%s17361_s1 + $0x238] sm:$0xff] }
 0x7fe   : > { %v3718_v60 = vpop.xlane.xlu1 %3717  ;;  %v4237_v35 = vpop.xlane.xlu0 %4236  ;;  %12183 = vmatpush3.bf16.msra.mxu0 %v12182_v5  ;;  %v5391_v22 = vld [vmem:[%s17361_s1 + $0x300] sm:$0xff]  ;;  %v1180_v26 = vld [vmem:[%s12294_s18 + $0x1f70] sm:$0xff]  ;;  %v1197_v63 = vld [vmem:[%s12294_s18 + $0x1ff8] sm:$0xff] }
 0x7ff   : > { %v16878_v53 = vsel %vm6479_vm3, %v11401_v59, %v16795_v2  ;;  %v16882_v34 = vsel %vm6500_vm6, %v11337_v36, %v16799_v31  ;;  %v5110_v9 = vmul.f32 0.015625, %v3718_v60  ;;  %v5283_v12 = vmul.f32 0.015625, %v4237_v35  ;;  %v5363_v2 = vld [vmem:[%s17361_s1 + $0x220] sm:$0xff]  ;;  %v5364_v31 = vld [vmem:[%s17361_s1 + $0x228] sm:$0xff]  ;;  %12185 = vmatprep.subr.bf16.mxu0 %v12184_v28 }
 0x800   : > { %v12186_v8 = vpack.c.bf16 %v5364_v31, %v5363_v2  ;;  %v12190_v59 = vpack.c.bf16 %v5366_v16, %v5365_v3  ;;  %v12210_v36 = vpack.c.bf16 %v5392_v41, %v5391_v22  ;;  %vm17467_vm3 = vcmask 589312   ;;  %v5410_v2 = vld [vmem:[%s17361_s1 + $0x398] sm:$0xff]  ;;  %v5393_v31 = vld [vmem:[%s17361_s1 + $0x310] sm:$0xff]  ;;  %v5411_v3 = vld [vmem:[%s17361_s1 + $0x3a0] sm:$0xff] }
 0x801   : > { %v10631_v58 = vrot.slane %v5110_v9, %v17463_v42  ;;  %v11485_v19 = vrot.slane %v5283_v12, %v12476_v47  ;;  %3834 = vadd.xlane.f32.xlu1 %v3833_v40  ;;  %4263 = vadd.xlane.f32.xlu0 %v4262_v32  ;;  %v1053_v32 = vld [vmem:[%s12294_s18 + $0x1b78] sm:$0xff]  ;;  %v5384_v9 = vld [vmem:[%s17361_s1 + $0x2c8] sm:$0xff]  ;;  %v5395_v22 = vld [vmem:[%s17361_s1 + $0x320] sm:$0xff] }
 0x802   : > { %v3808_v24 = vpop.xlane.xlu1 %3807  ;;  %v3769_v48 = vpop.xlane.xlu0 %3768  ;;  %12187 = vmatpush3.bf16.msra.mxu0 %v12186_v8  ;;  %v5368_v12 = vld [vmem:[%s17361_s1 + $0x248] sm:$0xff] }
 0x803   : > { %v16904_v6 = vsel %vm17465_vm2, %v10631_v58, %v16812_v44  ;;  %v16908_v50 = vsel %vm6486_vm4, %v11485_v19, %v16815_v38  ;;  %v5140_v33 = vmul.f32 0.015625, %v3808_v24  ;;  %v5127_v7 = vmul.f32 0.015625, %v3769_v48  ;;  %v5407_v44 = vld [vmem:[%s17361_s1 + $0x380] sm:$0xff]  ;;  %v5408_v38 = vld [vmem:[%s17361_s1 + $0x388] sm:$0xff]  ;;  %12189 = vmatprep.subr.bf16.mxu0 %v12188_v15  ;;  %v5394_v58 = vld [vmem:[%s17361_s1 + $0x318] sm:$0xff] }
 0x804   : > { %v12208_v27 = vpack.c.bf16 %v5408_v38, %v5407_v44  ;;  %v4217_v24 = vsel %vm1198_vm0, %v1180_v26, 0.0  ;;  %v3836_v48 = vsel %vm1198_vm0, %v1053_v32, 0.0  ;;  %v12214_v49 = vpack.c.bf16 %v5394_v58, %v5393_v31  ;;  %v5385_v15 = vld [vmem:[%s17361_s1 + $0x2d0] sm:$0xff]  ;;  %v5386_v44 = vld [vmem:[%s17361_s1 + $0x2d8] sm:$0xff]  ;;  %v5412_v16 = vld [vmem:[%s17361_s1 + $0x3a8] sm:$0xff] }
 0x805   : > { %v10779_v37 = vrot.slane %v5140_v33, %v12473_v46  ;;  %v10715_v10 = vrot.slane %v5127_v7, %v17466_v55  ;;  %4125 = vadd.xlane.f32.xlu1 %v4124_v4  ;;  %3885 = vadd.xlane.f32.xlu0 %v3884_v45  ;;  %v1181_v4 = vld [vmem:[%s12294_s18 + $0x1f78] sm:$0xff]  ;;  %v12212_v45 = vpack.c.bf16 %v5410_v2, %v5409_v30  ;;  %v5396_v41 = vld [vmem:[%s17361_s1 + $0x328] sm:$0xff]  ;;  %v5387_v32 = vld [vmem:[%s17361_s1 + $0x2e0] sm:$0xff] }
 0x806   : > { %v4099_v23 = vpop.xlane.xlu1 %4098  ;;  %v3859_v56 = vpop.xlane.xlu0 %3858  ;;  %12209 = vmatprep.subr.bf16.mxu1 %v12208_v27  ;;  %12191 = vmatpush3.bf16.msra.mxu0 %v12190_v59  ;;  %v12196_v38 = vpack.c.bf16 %v5386_v44, %v5385_v15  ;;  %v12218_v26 = vpack.c.bf16 %v5396_v41, %v5395_v22 }
 0x807   : > { %v16942_v5 = vsel %vm6493_vm5, %v10779_v37, %v16826_v54  ;;  %v16946_v60 = vsel %vm17467_vm3, %v10715_v10, %v16830_v51  ;;  %v5237_v35 = vmul.f32 0.015625, %v4099_v23  ;;  %v5157_v40 = vmul.f32 0.015625, %v3859_v56  ;;  %12211 = vmatpush3.bf16.msra.mxu1 %v12210_v36  ;;  %v5367_v51 = vld [vmem:[%s17361_s1 + $0x240] sm:$0xff] }
 0x808   : > { %v12192_v54 = vpack.c.bf16 %v5384_v9, %v5383_v21  ;;  %v12194_v28 = vpack.c.bf16 %v5368_v12, %v5367_v51  ;;  %12213 = vmatprep.subr.bf16.mxu1 %v12212_v45  ;;  %v5388_v21 = vld [vmem:[%s17361_s1 + $0x2e8] sm:$0xff]  ;;  %v5389_v45 = vld [vmem:[%s17361_s1 + $0x2f0] sm:$0xff] }
 0x809   : > { %v11258_v17 = vrot.slane %v5237_v35, %v12494_v1  ;;  %v10863_v62 = vrot.slane %v5157_v40, %v12494_v1  ;;  %4266 = vadd.xlane.f32.xlu1 %v4265_v29  ;;  %4215 = vadd.xlane.f32.xlu0 %v4214_v20  ;;  %v4268_v29 = vsel %vm1198_vm0, %v1197_v63, 0.0  ;;  %v12216_v20 = vpack.c.bf16 %v5412_v16, %v5411_v3 }
 0x80a   : > { %v4189_v19 = vpop.xlane.xlu1 %4188  ;;  %v4150_v8 = vpop.xlane.xlu0 %4149  ;;  %12193 = vmatprep.subr.bf16.mxu0 %v12192_v54  ;;  %v12200_v9 = vpack.c.bf16 %v5388_v21, %v5387_v32  ;;  %v5413_v54 = vld [vmem:[%s17361_s1 + $0x3b0] sm:$0xff] }
 0x80b   : > { %v16980_v33 = vsel %vm6500_vm6, %v11258_v17, %v16852_v14  ;;  %v16984_v7 = vsel %vm6500_vm6, %v10863_v62, %v16856_v52  ;;  %v5267_v0 = vmul.f32 0.015625, %v4189_v19  ;;  %v5254_v25 = vmul.f32 0.015625, %v4150_v8  ;;  %12195 = vmatpush3.bf16.msra.mxu0 %v12194_v28  ;;  %v5369_v14 = vld [vmem:[%s17361_s1 + $0x250] sm:$0xff]  ;;  %v5370_v52 = vld [vmem:[%s17361_s1 + $0x258] sm:$0xff]  ;;  %12215 = vmatpush3.bf16.msra.mxu1 %v12214_v49 }
 0x80c   : > { %v12198_v27 = vpack.c.bf16 %v5370_v52, %v5369_v14  ;;  %12197 = vmatprep.subr.bf16.mxu0 %v12196_v38  ;;  %12217 = vmatprep.subr.bf16.mxu1 %v12216_v20  ;;  %v5414_v17 = vld [vmem:[%s17361_s1 + $0x3b8] sm:$0xff]  ;;  %v5397_v62 = vld [vmem:[%s17361_s1 + $0x330] sm:$0xff]  ;;  %v5416_v38 = vld [vmem:[%s17361_s1 + $0x3c8] sm:$0xff] }
 0x80d   : > { %v11406_v37 = vrot.slane %v5267_v0, %v12476_v47  ;;  %v11342_v10 = vrot.slane %v5254_v25, %v17463_v42  ;;  %4218 = vadd.xlane.f32.xlu1 %v4217_v24  ;;  %3837 = vadd.xlane.f32.xlu0 %v3836_v48  ;;  %v4220_v47 = vsel %vm1198_vm0, %v1181_v4, 0.0  ;;  %v5398_v28 = vld [vmem:[%s17361_s1 + $0x338] sm:$0xff]  ;;  %v12220_v58 = vpack.c.bf16 %v5414_v17, %v5413_v54  ;;  %vm17469_vm0 = vmmov %vm17467_vm3  ;;  %v5415_v25 = vld [vmem:[%s17361_s1 + $0x3c0] sm:$0xff] }
 0x80e   : > { %v3721_v23 = vpop.xlane.xlu1 %3720  ;;  %v4240_v56 = vpop.xlane.xlu0 %4239  ;;  %v12222_v19 = vpack.c.bf16 %v5398_v28, %v5397_v62  ;;  %v5390_v49 = vld [vmem:[%s17361_s1 + $0x2f8] sm:$0xff]  ;;  %v5399_v14 = vld [vmem:[%s17361_s1 + $0x340] sm:$0xff]  ;;  %v5400_v52 = vld [vmem:[%s17361_s1 + $0x348] sm:$0xff] }
 0x80f   : > { %v17017_v59 = vsel %vm6486_vm4, %v11406_v37, %v16878_v53  ;;  %v17021_v36 = vsel %vm17468_vm7, %v11342_v10, %v16882_v34  ;;  %v5111_v35 = vmul.f32 0.015625, %v3721_v23  ;;  %v5284_v40 = vmul.f32 0.015625, %v4240_v56  ;;  %12199 = vmatpush3.bf16.msra.mxu0 %v12198_v27  ;;  %v5371_v53 = vld [vmem:[%s17361_s1 + $0x260] sm:$0xff]  ;;  %v5372_v34 = vld [vmem:[%s17361_s1 + $0x268] sm:$0xff]  ;;  %12219 = vmatpush3.bf16.msra.mxu1 %v12218_v26  ;;  %v5417_v56 = vld [vmem:[%s17361_s1 + $0x3d0] sm:$0xff] }
 0x810   : > { %v12202_v30 = vpack.c.bf16 %v5372_v34, %v5371_v53  ;;  %12201 = vmatprep.subr.bf16.mxu0 %v12200_v9  ;;  %12221 = vmatprep.subr.bf16.mxu1 %v12220_v58  ;;  %v12204_v0 = vpack.c.bf16 %v5390_v49, %v5389_v45  ;;  %v12224_v10 = vpack.c.bf16 %v5416_v38, %v5415_v25  ;;  %vm17470_vm4 = vcmask 654912   ;;  %v5402_v26 = vld [vmem:[%s17361_s1 + $0x358] sm:$0xff]  ;;  %v5419_v54 = vld [vmem:[%s17361_s1 + $0x3e0] sm:$0xff]  ;;  %vm17472_vm2 = vmmov %vm17469_vm0 }
 0x811   : > { %v10636_v51 = vrot.slane %v5111_v35, %v17466_v55  ;;  %v11490_v12 = vrot.slane %v5284_v40, %v12473_v46  ;;  %4221 = vadd.xlane.f32.xlu1 %v4220_v47  ;;  %4269 = vadd.xlane.f32.xlu0 %v4268_v29  ;;  %v12226_v27 = vpack.c.bf16 %v5400_v52, %v5399_v14  ;;  %v5418_v47 = vld [vmem:[%s17361_s1 + $0x3d8] sm:$0xff]  ;;  %vm17474_vm3 = vmmov %vm17464_vm1 }
 0x812   : > { %v3811_v2 = vpop.xlane.xlu1 %3810  ;;  %v3772_v31 = vpop.xlane.xlu0 %3771  ;;  %vm17475_vm7 = vmmov %vm17469_vm0 }
 0x813   : > { %v17051_v8 = vsel %vm17469_vm0, %v10636_v51, %v16904_v6  ;;  %v17055_v24 = vsel %vm6493_vm5, %v11490_v12, %v16908_v50  ;;  %v5141_v48 = vmul.f32 0.015625, %v3811_v2  ;;  %v5128_v4 = vmul.f32 0.015625, %v3772_v31  ;;  %12203 = vmatpush3.bf16.msra.mxu0 %v12202_v30  ;;  %v5373_v6 = vld [vmem:[%s17361_s1 + $0x270] sm:$0xff]  ;;  %v5374_v50 = vld [vmem:[%s17361_s1 + $0x278] sm:$0xff]  ;;  %12223 = vmatpush3.bf16.msra.mxu1 %v12222_v19  ;;  %v5420_v51 = vld [vmem:[%s17361_s1 + $0x3e8] sm:$0xff] }
 0x814   : > { %v12206_v44 = vpack.c.bf16 %v5374_v50, %v5373_v6  ;;  %12205 = vmatprep.subr.bf16.mxu0 %v12204_v0  ;;  %12225 = vmatprep.subr.bf16.mxu1 %v12224_v10  ;;  %v12232_v17 = vpack.c.bf16 %v5420_v51, %v5419_v54 }
 0x815   : > { %v10784_v63 = vrot.slane %v5141_v48, %v12494_v1  ;;  %v10720_v15 = vrot.slane %v5128_v4, %v12508_v18  ;;  %v5421_v48 = vld [vmem:[%s17361_s1 + $0x3f0] sm:$0xff]  ;;  %v5422_v4 = vld [vmem:[%s17361_s1 + $0x3f8] sm:$0xff] }
 0x816   : > { %v4102_v3 = vpop.xlane.xlu1 %4101  ;;  %v3862_v37 = vpop.xlane.xlu0 %3861  ;;  %v12236_v0 = vpack.c.bf16 %v5422_v4, %v5421_v48 }
 0x817   : > { %v10785_v16 = vsel %vm6500_vm6, %v10784_v63, %v16942_v5  ;;  %v10721_v22 = vsel %vm17470_vm4, %v10720_v15, %v16946_v60  ;;  %v5238_v41 = vmul.f32 0.015625, %v4102_v3  ;;  %v5158_v23 = vmul.f32 0.015625, %v3862_v37  ;;  %12207 = vmatpush3.bf16.msra.mxu0 %v12206_v44  ;;  %v5401_v60 = vld [vmem:[%s17361_s1 + $0x350] sm:$0xff]  ;;  %12227 = vmatpush3.bf16.msra.mxu1 %v12226_v27 }
 0x818   : > { %v12228_v5 = vpack.c.bf16 %v5418_v47, %v5417_v56  ;;  %v12230_v32 = vpack.c.bf16 %v5402_v26, %v5401_v60 }
 0x819   : > { %v11263_v29 = vrot.slane %v5238_v41, %v17463_v42  ;;  %v10868_v20 = vrot.slane %v5158_v23, %v17463_v42 }
 0x81a   : > { %v4192_v35 = vpop.xlane.xlu1 %4191  ;;  %v4153_v40 = vpop.xlane.xlu0 %4152  ;;  %12229 = vmatprep.subr.bf16.mxu1 %v12228_v5 }
 0x81b   : > { %v11264_v21 = vsel %vm17471_vm8, %v11263_v29, %v16980_v33  ;;  %v10869_v9 = vsel %vm17464_vm1, %v10868_v20, %v16984_v7  ;;  %v5268_v53 = vmul.f32 0.015625, %v4192_v35  ;;  %v5255_v34 = vmul.f32 0.015625, %v4153_v40  ;;  %v5403_v33 = vld [vmem:[%s17361_s1 + $0x360] sm:$0xff]  ;;  %v5404_v7 = vld [vmem:[%s17361_s1 + $0x368] sm:$0xff]  ;;  %12231 = vmatpush3.bf16.msra.mxu1 %v12230_v32  ;;  %vm17476_vm8 = vmmov %vm17464_vm1 }
 0x81c   : > { %v12234_v2 = vpack.c.bf16 %v5404_v7, %v5403_v33  ;;  %12233 = vmatprep.subr.bf16.mxu1 %v12232_v17  ;;  %vm17478_vm1 = vcmask 786112  }
 0x81d   : > { %v11411_v12 = vrot.slane %v5268_v53, %v12473_v46  ;;  %v11347_v30 = vrot.slane %v5255_v34, %v17466_v55 }
 0x81e   : > { %v3724_v62 = vpop.xlane.xlu1 %3723  ;;  %v4243_v28 = vpop.xlane.xlu0 %4242 }
 0x81f   : > { %v11412_v31 = vsel %vm6493_vm5, %v11411_v12, %v17017_v59  ;;  %v11348_v46 = vsel %vm17472_vm2, %v11347_v30, %v17021_v36  ;;  %v5112_v58 = vmul.f32 0.015625, %v3724_v62  ;;  %v5285_v19 = vmul.f32 0.015625, %v4243_v28  ;;  %v5405_v59 = vld [vmem:[%s17361_s1 + $0x370] sm:$0xff]  ;;  %v5406_v36 = vld [vmem:[%s17361_s1 + $0x378] sm:$0xff]  ;;  %12235 = vmatpush3.bf16.msra.mxu1 %v12234_v2  ;;  %vm17473_vm5 = vmmov %vm17470_vm4 }
 0x820   : > { %v12238_v25 = vpack.c.bf16 %v5406_v36, %v5405_v59  ;;  %12237 = vmatprep.subr.bf16.mxu1 %v12236_v0  ;;  %vm17479_vm2 = vmmov %vm17470_vm4 }
 0x821   : > { %v10641_v45 = vrot.slane %v5112_v58, %v12508_v18  ;;  %v11495_v49 = vrot.slane %v5285_v19, %v12494_v1 }
 0x822   : > { %v3814_v6 = vpop.xlane.xlu1 %3813  ;;  %v3775_v50 = vpop.xlane.xlu0 %3774 }
 0x823   : > { %v10642_v63 = vsel %vm17473_vm5, %v10641_v45, %v17051_v8  ;;  %v11496_v15 = vsel %vm6500_vm6, %v11495_v49, %v17055_v24  ;;  %v5142_v44 = vmul.f32 0.015625, %v3814_v6  ;;  %v5129_v38 = vmul.f32 0.015625, %v3775_v50  ;;  %12239 = vmatpush3.bf16.msra.mxu1 %v12238_v25  ;;  %vm17480_vm5 = vmmov %vm17479_vm2 }
 0x825   : > { %v10789_v14 = vrot.slane %v5142_v44, %v17463_v42  ;;  %v10725_v52 = vrot.slane %v5129_v38, %v12524_v39 }
 0x826   : > { %v4105_v3 = vpop.xlane.xlu1 %4104  ;;  %v3865_v37 = vpop.xlane.xlu0 %3864 }
 0x827   : > { %v10790_v10 = vsel %vm17474_vm3, %v10789_v14, %v10785_v16  ;;  %v10726_v27 = vsel %vm6528_vm10, %v10725_v52, %v10721_v22  ;;  %v5239_v41 = vmul.f32 0.015625, %v4105_v3  ;;  %v5159_v23 = vmul.f32 0.015625, %v3865_v37 }
 0x829   : > { %v11268_v8 = vrot.slane %v5239_v41, %v17466_v55  ;;  %v10873_v24 = vrot.slane %v5159_v23, %v17466_v55 }
 0x82a   : > { %v4195_v56 = vpop.xlane.xlu1 %4194  ;;  %v4156_v47 = vpop.xlane.xlu0 %4155 }
 0x82b   : > { %v11269_v29 = vsel %vm17475_vm7, %v11268_v8, %v11264_v21  ;;  %v10874_v20 = vsel %vm17469_vm0, %v10873_v24, %v10869_v9  ;;  %v5269_v5 = vmul.f32 0.015625, %v4195_v56  ;;  %v5256_v60 = vmul.f32 0.015625, %v4156_v47  ;;  %vm17481_vm7 = vmmov %vm17478_vm1 }
 0x82d   : > { %v11416_v26 = vrot.slane %v5269_v5, %v12494_v1  ;;  %v11352_v16 = vrot.slane %v5256_v60, %v12508_v18 }
 0x82e   : > { %v3727_v35 = vpop.xlane.xlu1 %3726  ;;  %v4246_v22 = vpop.xlane.xlu0 %4245 }
 0x82f   : > { %v11417_v40 = vsel %vm6500_vm6, %v11416_v26, %v11412_v31  ;;  %v11353_v32 = vsel %vm17470_vm4, %v11352_v16, %v11348_v46  ;;  %v5113_v53 = vmul.f32 0.015625, %v3727_v35  ;;  %v5286_v34 = vmul.f32 0.015625, %v4246_v22  ;;  %vm17477_vm6 = vmmov %vm17469_vm0 }
 0x830   : > { %vm17482_vm4 = vmmov %vm17479_vm2 }
 0x831   : > { %v10646_v54 = vrot.slane %v5113_v53, %v12524_v39  ;;  %v11500_v21 = vrot.slane %v5286_v34, %v17463_v42 }
 0x832   : > { %v3817_v51 = vpop.xlane.xlu1 %3816  ;;  %v3778_v9 = vpop.xlane.xlu0 %3777 }
 0x833   : > { %v10647_v12 = vsel %vm6528_vm10, %v10646_v54, %v10642_v63  ;;  %v11501_v1 = vsel %vm17476_vm8, %v11500_v21, %v11496_v15  ;;  %v5143_v30 = vmul.f32 0.015625, %v3817_v51  ;;  %v5130_v17 = vmul.f32 0.015625, %v3778_v9  ;;  %vm17483_vm8 = vmmov %vm17469_vm0 }
 0x835   : > { %v10794_v33 = vrot.slane %v5143_v30, %v17466_v55  ;;  %v10730_v7 = vrot.slane %v5130_v17, %v12530_v43 }
 0x836   : > { %v4108_v62 = vpop.xlane.xlu1 %4107  ;;  %v3868_v28 = vpop.xlane.xlu0 %3867 }
 0x837   : > { %v10795_v2 = vsel %vm17477_vm6, %v10794_v33, %v10790_v10  ;;  %v10731_v31 = vsel %vm17478_vm1, %v10730_v7, %v10726_v27  ;;  %v5240_v46 = vmul.f32 0.015625, %v4108_v62  ;;  %v5160_v58 = vmul.f32 0.015625, %v3868_v28  ;;  %vm17484_vm6 = vmmov %vm17479_vm2 }
 0x839   : > { %v11273_v19 = vrot.slane %v5240_v46, %v12508_v18  ;;  %v10878_v48 = vrot.slane %v5160_v58, %v12508_v18 }
 0x83a   : > { %v4198_v4 = vpop.xlane.xlu1 %4197  ;;  %v4159_v45 = vpop.xlane.xlu0 %4158 }
 0x83b   : > { %v11274_v49 = vsel %vm17479_vm2, %v11273_v19, %v11269_v29  ;;  %v10879_v0 = vsel %vm17480_vm5, %v10878_v48, %v10874_v20  ;;  %v5270_v59 = vmul.f32 0.015625, %v4198_v4  ;;  %v5257_v36 = vmul.f32 0.015625, %v4159_v45 }
 0x83c   : > { %vm17488_vm5 = vcmask 1045509  }
 0x83d   : > { %v11421_v6 = vrot.slane %v5270_v59, %v17463_v42  ;;  %v11357_v50 = vrot.slane %v5257_v36, %v12524_v39 }
 0x83e   : > { %v3730_v25 = vpop.xlane.xlu1 %3729  ;;  %v4249_v63 = vpop.xlane.xlu0 %4248 }
 0x83f   : > { %v11422_v15 = vsel %vm17474_vm3, %v11421_v6, %v11417_v40  ;;  %v17169_v44 = vsel %vm6528_vm10, %v11357_v50, %v11353_v32  ;;  %v5114_v38 = vmul.f32 0.015625, %v3730_v25  ;;  %v5287_v14 = vmul.f32 0.015625, %v4249_v63  ;;  %vm17490_vm3 = vmmov %vm17478_vm1 }
 0x841   : > { %v10651_v52 = vrot.slane %v5114_v38, %v12530_v43  ;;  %v11505_v3 = vrot.slane %v5287_v14, %v17466_v55 }
 0x842   : > { %v3820_v37 = vpop.xlane.xlu1 %3819  ;;  %v3781_v10 = vpop.xlane.xlu0 %3780 }
 0x843   : > { %v10652_v27 = vsel %vm17481_vm7, %v10651_v52, %v10647_v12  ;;  %v11506_v42 = vsel %vm17469_vm0, %v11505_v3, %v11501_v1  ;;  %v5144_v41 = vmul.f32 0.015625, %v3820_v37  ;;  %v5131_v23 = vmul.f32 0.015625, %v3781_v10  ;;  %vm17491_vm7 = vmmov %vm17478_vm1 }
 0x844   : > { %vm17492_vm0 = vmmov %vm17478_vm1 }
 0x845   : > { %v10799_v8 = vrot.slane %v5144_v41, %v12508_v18  ;;  %v10735_v24 = vrot.slane %v5131_v23, %v12540_v57 }
 0x846   : > { %v4111_v56 = vpop.xlane.xlu1 %4110  ;;  %v3871_v47 = vpop.xlane.xlu0 %3870 }
 0x847   : > { %v10800_v29 = vsel %vm17482_vm4, %v10799_v8, %v10795_v2  ;;  %v10736_v20 = vsel %vm6542_vm12, %v10735_v24, %v10731_v31  ;;  %v5241_v5 = vmul.f32 0.015625, %v4111_v56  ;;  %v5161_v60 = vmul.f32 0.015625, %v3871_v47  ;;  %vm17493_vm4 = vmmov %vm17492_vm0 }
 0x849   : > { %v11278_v26 = vrot.slane %v5241_v5, %v12524_v39  ;;  %v10883_v16 = vrot.slane %v5161_v60, %v12524_v39 }
 0x84a   : > { %v4201_v35 = vpop.xlane.xlu1 %4200  ;;  %v17181_v22 = vpop.xlane.xlu0 %4161 }
 0x84b   : > { %v17184_v40 = vsel %vm6528_vm10, %v11278_v26, %v11274_v49  ;;  %v10884_v32 = vsel %vm6528_vm10, %v10883_v16, %v10879_v0  ;;  %v5271_v53 = vmul.f32 0.015625, %v4201_v35  ;;  %v11968_v16 = vld [vmem:[%s17362_s2] ss:$0 sm:$0xff] }
 0x84d   : > { %v11426_v34 = vrot.slane %v5271_v53, %v17466_v55  ;;  %v17485_v53 = vld [vmem:[#allocation6_spill] sm:$0xff] }
 0x84e   : > { %v3733_v54 = vpop.xlane.xlu1 %3732  ;;  %v4252_v21 = vpop.xlane.xlu0 %4251 }
 0x84f   : > { %v11427_v51 = vsel %vm17483_vm8, %v11426_v34, %v11422_v15  ;;  %v5115_v9 = vmul.f32 0.015625, %v3733_v54  ;;  %v5288_v12 = vmul.f32 0.015625, %v4252_v21 }
 0x851   : > { %v10656_v1 = vrot.slane %v5115_v9, %v12540_v57  ;;  %v11510_v30 = vrot.slane %v5288_v12, %v12508_v18 }
 0x852   : > { %v3823_v17 = vpop.xlane.xlu1 %3822  ;;  %v3784_v33 = vpop.xlane.xlu0 %3783 }
 0x853   : > { %v17192_v7 = vsel %vm6542_vm12, %v10656_v1, %v10652_v27  ;;  %v17195_v62 = vsel %vm17484_vm6, %v11510_v30, %v11506_v42  ;;  %v5145_v28 = vmul.f32 0.015625, %v3823_v17  ;;  %v5132_v3 = vmul.f32 0.015625, %v3784_v33 }
 0x855   : > { %v10804_v55 = vrot.slane %v5145_v28, %v12524_v39  ;;  %v10740_v41 = vrot.slane %v5132_v3, %v12546_v61 }
 0x856   : > { %v17198_v2 = vpop.xlane.xlu1 %4113  ;;  %v3874_v31 = vpop.xlane.xlu0 %3873 }
 0x857   : > { %v17201_v46 = vsel %vm6528_vm10, %v10804_v55, %v10800_v29  ;;  %v5162_v58 = vmul.f32 0.015625, %v3874_v31  ;;  %v10741_v47 = vsel %vm6549_vm13, %v10740_v41, %v10736_v20 }
 0x859   : > { %v10888_v19 = vrot.slane %v5162_v58, %v12530_v43 }
 0x85a   : > { %v4204_v48 = vpop.xlane.xlu1 %4203  ;;  %v4165_v4 = vpop.xlane.xlu0 %4164 }
 0x85b   : > { %v17205_v45 = vsel %vm17478_vm1, %v10888_v19, %v10884_v32  ;;  %v5272_v49 = vmul.f32 0.015625, %v4204_v48  ;;  %v17486_v48 = vld [vmem:[#allocation8_spill] sm:$0xff] }
 0x85d   : > { %v11431_v0 = vrot.slane %v5272_v49, %v12508_v18 }
 0x85e   : > { %v3736_v59 = vpop.xlane.xlu1 %3735  ;;  %v17208_v36 = vpop.xlane.xlu0 %4254 }
 0x85f   : > { %v17211_v6 = vsel %vm17479_vm2, %v11431_v0, %v11427_v51  ;;  %v5116_v1 = vmul.f32 0.015625, %v3736_v59 }
 0x861   : > { %v10661_v31 = vrot.slane %v5116_v1, %v12546_v61 }
 0x862   : > { %v17213_v50 = vpop.xlane.xlu1 %3825  ;;  %v3787_v25 = vpop.xlane.xlu0 %3786 }
 0x863   : > { %v5133_v10 = vmul.f32 0.015625, %v3787_v25  ;;  %v5258_v25 = vmul.f32 0.015625, %v17181_v22 }
 0x865   : > { %v10745_v8 = vrot.slane %v5133_v10, %v12556_v11 }
 0x866   : > { %v17215_v63 = vpop.xlane.xlu1 %4116  ;;  %v17217_v15 = vpop.xlane.xlu0 %3876 }
 0x867   : > { %v10746_v60 = vsel %vm6556_vm14, %v10745_v8, %v10741_v47  ;;  %v11362_v47 = vrot.slane %v5258_v25, %v12530_v43 }
 0x86a   : > { %v17219_v38 = vpop.xlane.xlu1 %4206  ;;  %v4168_v14 = vpop.xlane.xlu0 %4167 }
 0x86b   : > { %v5260_v10 = vmul.f32 0.015625, %v4168_v14  ;;  %v5242_v14 = vmul.f32 0.015625, %v17198_v2 }
 0x86d   : > { %v12004_v52 = vpop.f32.mrb[0].mxu0 }
 0x86e   : > { %v12005_v37 = vpop.f32.mrb[1].mxu0  ;;  %v3739_v18 = vpop.xlane.xlu1 %3738 }
 0x86f   : > { %v12006_v27 = vadd.f32 %v12005_v37, %v12004_v52  ;;  %v17221_v42 = vpop.xlane.xlu0 %4257  ;;  %v5117_v17 = vmul.f32 0.015625, %v3739_v18  ;;  %v17487_v52 = vld [vmem:[#allocation4_spill] sm:$0xff]  ;;  %v5259_v37 = vmul.f32 0.015625, %v4165_v4  ;;  %v10662_v18 = vsel %vm6549_vm13, %v10661_v31, %v17192_v7 }
 0x870   : > { %v11283_v31 = vrot.slane %v5242_v14, %v12530_v43 }
 0x871   : > { %v11680_v20 = vadd.f32 %v12006_v27, %v11968_v16  ;;  %v10666_v19 = vrot.slane %v5117_v17, %v12556_v11  ;;  %v11372_v16 = vrot.slane %v5260_v10, %v12546_v61 }
 0x872   : > { %v17224_v23 = vpop.xlane.xlu1 %3828 }
 0x873   : > { %v3790_v24 = vpop.xlane.xlu0 %3789  ;;  %v10667_v8 = vsel %vm6556_vm14, %v10666_v19, %v10662_v18  ;;  %v5289_v19 = vmul.f32 0.015625, %v17208_v36 }
 0x874   : > { %v5134_v56 = vmul.f32 0.015625, %v3790_v24 }
 0x875   : > { %v11515_v18 = vrot.slane %v5289_v19, %v12524_v39 }
 0x876   : > { %v10750_v29 = vrot.slane %v5134_v56, %v12561_v13  ;;  %v4120_v5 = vpop.xlane.xlu1 %4119 }
 0x877   : > { %v3880_v26 = vpop.xlane.xlu0 %3879  ;;  %v5244_v1 = vmul.f32 0.015625, %v4120_v5 }
 0x878   : > { %v10751_v35 = vsel %vm6563_vm15, %v10750_v29, %v10746_v60  ;;  %v11367_v29 = vrot.slane %v5259_v37, %v12540_v57  ;;  %v17489_v60 = vld [vmem:[#allocation5_spill] sm:$0xff]  ;;  %v5164_v17 = vmul.f32 0.015625, %v3880_v26 }
 0x879   : > { %v12039_v32 = vpop.f32.mrb[0].mxu1  ;;  %v11589_v34 = vsel %vm11552_vm9, %v10751_v35, %v17485_v53  ;;  %v11363_v53 = vsel %vm17490_vm3, %v11362_v47, %v17169_v44  ;;  %v11293_v25 = vrot.slane %v5244_v1, %v12546_v61  ;;  %v5147_v47 = vmul.f32 0.015625, %v17224_v23 }
 0x87a   : > { %v12040_v54 = vpop.f32.mrb[1].mxu1  ;;  %v17236_v21 = vpop.xlane.xlu1 %4209  ;;  %v10898_v36 = vrot.slane %v5164_v17, %v12546_v61  ;;  %v11516_v17 = vsel %vm6528_vm10, %v11515_v18, %v17195_v62 }
 0x87b   : > { %v12041_v51 = vadd.f32 %v12040_v54, %v12039_v32  ;;  %v4171_v9 = vpop.xlane.xlu0 %4170  ;;  %v5243_v54 = vmul.f32 0.015625, %v17215_v63 }
 0x87c   : > { %v5261_v24 = vmul.f32 0.015625, %v4171_v9  ;;  %v11368_v9 = vsel %vm6542_vm12, %v11367_v29, %v11363_v53 }
 0x87d   : > { %v17238_v12 = vadd.f32 %v12041_v51, %v11680_v20  ;;  %v5163_v20 = vmul.f32 0.015625, %v17217_v15  ;;  %v5146_v15 = vmul.f32 0.015625, %v17213_v50  ;;  %v11284_v50 = vsel %vm17491_vm7, %v11283_v31, %v17184_v40 }
 0x87e   : > { %v3502_v30 = vpop.xlane.xlu1 %3501  ;;  %v11377_v35 = vrot.slane %v5261_v24, %v12556_v11 }
 0x87f   : > { %v5038_v33 = vmul.f32 0.015625, %v3502_v30  ;;  %v17240_v28 = vpop.xlane.xlu0 %4260  ;;  %v11373_v30 = vsel %vm6549_vm13, %v11372_v16, %v11368_v9  ;;  %v10893_v5 = vrot.slane %v5163_v20, %v12540_v57  ;;  %v10814_v9 = vrot.slane %v5147_v47, %v12540_v57 }
 0x880   : > { %v11378_v63 = vsel %vm6556_vm14, %v11377_v35, %v11373_v30  ;;  %v5291_v1 = vmul.f32 0.015625, %v17240_v28 }
 0x881   : > { %v10276_v55 = vrot.slane %v5038_v33, %v12561_v13 }
 0x882   : > { %v17244_v58 = vpop.xlane.xlu1 %3831 }
 0x883   : > { %v10277_v49 = vsel %vm6563_vm15, %v10276_v55, %v17486_v48  ;;  %v3742_v0 = vpop.xlane.xlu0 %3741 }
 0x884   : > { %v5118_v59 = vmul.f32 0.015625, %v3742_v0  ;;  %v17252_v3 = vsel %vm17488_vm5, %v10277_v49, %v17487_v52  ;;  %v11288_v49 = vrot.slane %v5243_v54, %v12540_v57  ;;  %v5273_v0 = vmul.f32 0.015625, %v17219_v38 }
 0x885   : > { %v10809_v38 = vrot.slane %v5146_v15, %v12530_v43  ;;  %v5290_v54 = vmul.f32 0.015625, %v17221_v42  ;;  %v11525_v15 = vrot.slane %v5291_v1, %v12540_v57 }
 0x886   : > { %v10671_v27 = vrot.slane %v5118_v59, %v12561_v13  ;;  %v4123_v41 = vpop.xlane.xlu1 %4122 }
 0x887   : > { %v3883_v56 = vpop.xlane.xlu0 %3882  ;;  %v5245_v33 = vmul.f32 0.015625, %v4123_v41  ;;  %v10810_v28 = vsel %vm17492_vm0, %v10809_v38, %v17201_v46 }
 0x888   : > { %v10672_v22 = vsel %vm6563_vm15, %v10671_v27, %v10667_v8  ;;  %v5165_v44 = vmul.f32 0.015625, %v3883_v56  ;;  %v11289_v8 = vsel %vm6542_vm12, %v11288_v49, %v11284_v50  ;;  %v11436_v56 = vrot.slane %v5273_v0, %v12524_v39 }
 0x889   : > { %v11582_v4 = vsel %vm11552_vm9, %v10672_v22, %v17489_v60  ;;  %v11298_v52 = vrot.slane %v5245_v33, %v12556_v11  ;;  %v11294_v40 = vsel %vm6549_vm13, %v11293_v25, %v11289_v8  ;;  %v5148_v60 = vmul.f32 0.015625, %v17244_v58 }
 0x88a   : > { %v4213_v7 = vpop.xlane.xlu1 %4212  ;;  %v10903_v10 = vrot.slane %v5165_v44, %v12556_v11  ;;  %v11520_v44 = vrot.slane %v5290_v54, %v12530_v43  ;;  %v11437_v62 = vsel %vm6528_vm10, %v11436_v56, %v17211_v6  ;;  %vm17494_vm10 = vmmov %vm17492_vm0 }
 0x88b   : > { %v4174_v32 = vpop.xlane.xlu0 %4173  ;;  %v11299_v16 = vsel %vm6556_vm14, %v11298_v52, %v11294_v40  ;;  %v5275_v20 = vmul.f32 0.015625, %v4213_v7  ;;  %v10819_v33 = vrot.slane %v5148_v60, %v12546_v61 }
 0x88c   : > { %v5262_v51 = vmul.f32 0.015625, %v4174_v32 }
 0x88e   : > { %v11382_v2 = vrot.slane %v5262_v51, %v12561_v13  ;;  %v3835_v55 = vpop.xlane.xlu1 %3834 }
 0x88f   : > { %v4264_v48 = vpop.xlane.xlu0 %4263  ;;  %v5149_v39 = vmul.f32 0.015625, %v3835_v55 }
 0x890   : > { %v11383_v26 = vsel %vm6563_vm15, %v11382_v2, %v11378_v63  ;;  %v5292_v42 = vmul.f32 0.015625, %v4264_v48  ;;  %v10815_v48 = vsel %vm6542_vm12, %v10814_v9, %v10810_v28 }
 0x891   : > { %v11590_v59 = vsel %vm11554_vm11, %v11383_v26, %v11589_v34  ;;  %v10894_v34 = vsel %vm6542_vm12, %v10893_v5, %v17205_v45  ;;  %v5274_v45 = vmul.f32 0.015625, %v17236_v21  ;;  %v10824_v2 = vrot.slane %v5149_v39, %v12556_v11 }
 0x892   : > { %11817 = vmatprep.mubr.f32.mxu0 %v11590_v59  ;;  %v4126_v37 = vpop.xlane.xlu1 %4125  ;;  %v10899_v29 = vsel %vm6549_vm13, %v10898_v36, %v10894_v34  ;;  %v10820_v5 = vsel %vm6549_vm13, %v10819_v33, %v10815_v48  ;;  %v11530_v26 = vrot.slane %v5292_v42, %v12546_v61 }
 0x893   : > { %v5246_v27 = vmul.f32 0.015625, %v4126_v37  ;;  %v3886_v41 = vpop.xlane.xlu0 %3885  ;;  %v10904_v32 = vsel %vm6556_vm14, %v10903_v10, %v10899_v29  ;;  %v10825_v59 = vsel %vm6556_vm14, %v10824_v2, %v10820_v5 }
 0x894   : > { %v5166_v24 = vmul.f32 0.015625, %v3886_v41  ;;  %v17495_v41 = vld [vmem:[#allocation7_spill] sm:$0xff] }
 0x895   : > { %v11303_v22 = vrot.slane %v5246_v27, %v12561_v13 }
 0x896   : > { %v10908_v14 = vrot.slane %v5166_v24, %v12561_v13  ;;  %v4267_v35 = vpop.xlane.xlu1 %4266 }
 0x897   : > { %v4216_v53 = vpop.xlane.xlu0 %4215  ;;  %v11304_v23 = vsel %vm6563_vm15, %v11303_v22, %v11299_v16  ;;  %v5293_v55 = vmul.f32 0.015625, %v4267_v35 }
 0x898   : > { %v11583_v51 = vsel %vm11554_vm11, %v11304_v23, %v11582_v4  ;;  %v10909_v58 = vsel %vm6563_vm15, %v10908_v14, %v10904_v32  ;;  %v5276_v30 = vmul.f32 0.015625, %v4216_v53  ;;  %v11441_v4 = vrot.slane %v5274_v45, %v12530_v43 }
 0x899   : > { %11818 = vmatmul.mubr.f32.vlgmr.msra.gmra.mrb[2].mxu0 %v11583_v51  ;;  %v11603_v21 = vsel %vm11552_vm9, %v10909_v58, %v17252_v3  ;;  %v11446_v3 = vrot.slane %v5275_v20, %v12540_v57  ;;  %v11535_v6 = vrot.slane %v5293_v55, %v12556_v11  ;;  %v11521_v57 = vsel %vm17494_vm10, %v11520_v44, %v11516_v17 }
 0x89a   : > { %v4219_v7 = vpop.xlane.xlu1 %4218  ;;  %v11451_v49 = vrot.slane %v5276_v30, %v12546_v61  ;;  %v11442_v25 = vsel %vm17493_vm4, %v11441_v4, %v11437_v62  ;;  %v11526_v18 = vsel %vm6542_vm12, %v11525_v15, %v11521_v57 }
 0x89b   : > { %v5277_v31 = vmul.f32 0.015625, %v4219_v7  ;;  %v3838_v19 = vpop.xlane.xlu0 %3837  ;;  %v11447_v37 = vsel %vm6542_vm12, %v11446_v3, %v11442_v25  ;;  %vm11893_vm12 = vcmask 23552  }
 0x89c   : > { %v5150_v63 = vmul.f32 0.015625, %v3838_v19  ;;  %v11452_v10 = vsel %vm6549_vm13, %v11451_v49, %v11447_v37 }
 0x89d   : > { %v11456_v46 = vrot.slane %v5277_v31, %v12556_v11  ;;  %v11531_v11 = vsel %vm6549_vm13, %v11530_v26, %v11526_v18 }
 0x89e   : > { %v10829_v43 = vrot.slane %v5150_v63, %v12561_v13  ;;  %v4222_v0 = vpop.xlane.xlu1 %4221  ;;  %v11536_v24 = vsel %vm6556_vm14, %v11535_v6, %v11531_v11 }
 0x89f   : > { %v5278_v36 = vmul.f32 0.015625, %v4222_v0  ;;  %v4270_v52 = vpop.xlane.xlu0 %4269  ;;  %v11457_v8 = vsel %vm6556_vm14, %v11456_v46, %v11452_v10 }
 0x8a0   : > { %v10830_v50 = vsel %vm6563_vm15, %v10829_v43, %v10825_v59  ;;  %v5294_v61 = vmul.f32 0.015625, %v4270_v52 }
 0x8a1   : > { %v11461_v27 = vrot.slane %v5278_v36, %v12561_v13  ;;  %v11596_v38 = vsel %vm11552_vm9, %v10830_v50, %v17495_v41 }
 0x8a2   : > { %v11540_v34 = vrot.slane %v5294_v61, %v12561_v13 }
 0x8a3   : > { %v11462_v56 = vsel %vm6563_vm15, %v11461_v27, %v11457_v8 }
 0x8a4   : > { %v11541_v47 = vsel %vm6563_vm15, %v11540_v34, %v11536_v24  ;;  %v11597_v40 = vsel %vm11554_vm11, %v11462_v56, %v11596_v38 }
 0x8a5   : > { %v11604_v22 = vsel %vm11554_vm11, %v11541_v47, %v11603_v21 }
 0x8a6   : > { %11887 = vmatprep.mubr.f32.mxu1 %v11604_v22 }
 0x8a7   : > { %11888 = vmatmul.mubr.f32.vlgmr.msra.gmra.mrb[2].mxu1 %v11597_v40 }
 0x96c   : > { %v12074_v29 = vpop.f32.mrb[2].mxu0 }
 0x96d   : > { %v12075_v60 = vpop.f32.mrb[3].mxu0 }
 0x96e   : > { %v12076_v16 = vadd.f32 %v12075_v60, %v12074_v29 }
 0x970   : > { %v11820_v14 = vadd.f32 %v12076_v16, %v17238_v12 }
 0x97a   : > { %v12109_v35 = vpop.f32.mrb[2].mxu1 }
 0x97b   : > { %v12110_v13 = vpop.f32.mrb[3].mxu1 }
 0x97c   : > { %v12111_v45 = vadd.f32 %v12110_v13, %v12109_v35 }
 0x97e   : > { %v11890_v32 = vadd.f32 %v12111_v45, %v11820_v14 }
 0x980   : > { %v11894_v39 = vsel %vm11893_vm12, %v11890_v32, -inf }
 0x981   : > { %11895 = vmax.xlane.f32.xlu0 %v11894_v39 }
 0xa0e   : > { %v11896_v53 = vpop.xlane.xlu0 %11895 }
 0xa0f   : > { %v11897_v23 = vsub.f32 %v11890_v32, %v11896_v53 }
 0xa11   : > { %v11898_v54 = vmul.f32 1.442695, %v11897_v23 }
 0xa13   : > { %12248 = vpow2.f32 %v11898_v54 }
 0xa1d   : > { %v12249_v20 = vpop.eup %12248 }
 0xa1e   : > { %v11900_v51 = vsel %vm11893_vm12, %v12249_v20, 0.0 }
 0xa1f   : > { %11901 = vadd.xlane.f32.xlu1 %v11900_v51 }
 0xaac   : > { %v11902_v58 = vpop.xlane.xlu1 %11901 }
 0xaad   : > { %12250 = vrcp.f32 %v11902_v58 }
 0xab7   : > { %v12251_v12 = vpop.eup %12250 }
 0xab8   : > { %v11904_v9 = vmul.f32 %v12251_v12, %v12249_v20 }
 0xaba   : > { %11905 = vst.msk [vmem:[%s173_s10] sm:$0xff] %vm11893_vm12, %v11904_v9 }
 0xabb PF: > { %s13_s12 = sadd.s32 1, %s12258_s12  }
 0xabc   : > { %p10_p5 = scmp.ge.s32.totalorder %s13_s12, 4  }
 0xabe   :  { %12 = sbr.rel (!%p10_p5) target bundleno = 1 (0x1), region = 62 }

</bundles_post_ra>
